<compile_context>
chip_gen: v7x
topology: tpu7x:2x2x1
jax: 0.10.0
libtpu: 0.0.40
codegen_flags: <defaults>
</compile_context>

<pallas_src>
import math

import jax
import jax.numpy as jnp
from jax.experimental import pallas as pl
from jax.experimental.pallas import tpu as pltpu

_SQRT2PI = math.sqrt(2.0 * math.pi)
_INV_SQRT2 = 1.0 / math.sqrt(2.0)


# ---------------------------------------------------------------------------
# Fused Pallas kernel: one grid step == one (graph, row-tile) pair.
# ---------------------------------------------------------------------------
def _fused_bias_kernel(
    pos_m_ref, pos_i_ref,              # (1, tn, 3)  masked in-cell positions (main / init)
    fpos_m_ref, fpos_i_ref,            # (1, 3, ENp) masked full expanded positions, coord-major
    pad_ref,                           # (1, tn, 1)  1.0 where in-cell atom is padding
    fm_ref,                            # (1, 1, ENp) 1.0 where (in-cell | expanded | EN-pad)
    mul_m_ref, bias_m_ref,             # (1, tn, ENp) gaussian per-edge-type affine (main)
    mul_i_ref, bias_i_ref,             # (1, tn, ENp) (init)
    mean_m_ref, istd_m_ref, coef_m_ref,  # (1, 1, Kp)
    mean_i_ref, istd_i_ref, coef_i_ref,  # (1, 1, Kp)
    w1_ref, b1_ref,                    # (Kp, Kp) bf16, (1, Kp) f32
    w2t_ref, b2t_ref,                  # (H, Kp)  bf16, (H, 1) f32
    we_ref, be_ref,                    # (Kp, D)  bf16, (1, D) f32
    dist_ref,                          # out: (1, tn, ENp)
    delta_ref,                         # out: (1, 3, tn, ENp)   coordinate-major
    biasf_ref,                         # out: (1, H, tn*ENp)    head-major, lane-dense
    merge_ref,                         # out: (1, tn, D)
):
    tn = pos_m_ref.shape[1]
    ENp = fpos_m_ref.shape[2]
    Kp = w1_ref.shape[0]
    M = tn * ENp

    pad = pad_ref[0]                             # (tn, 1)
    fm = fm_ref[0]                               # (1, ENp)
    masked = jnp.logical_or(fm > 0.5, pad > 0.5)  # (tn, ENp)

    def deltas_and_dist(pos_ref, fpos_ref):
        pos = pos_ref[0]                         # (tn, 3)
        fpos = fpos_ref[0]                       # (3, ENp)
        dx = pos[:, 0:1] - fpos[0:1, :]
        dy = pos[:, 1:2] - fpos[1:2, :]
        dz = pos[:, 2:3] - fpos[2:3, :]
        d = jnp.sqrt(dx * dx + dy * dy + dz * dz)
        d = jnp.where(masked, jnp.float32(1.0), d)   # masked_fill(..., 1.0)
        return dx, dy, dz, d

    dx, dy, dz, dist_m = deltas_and_dist(pos_m_ref, fpos_m_ref)
    _, _, _, dist_i = deltas_and_dist(pos_i_ref, fpos_i_ref)

    dist_ref[0, :, :] = dist_m
    inv_d = pl.reciprocal(dist_m + 1e-5, approx=True)       # EUP, not a divide
    delta_ref[0, 0, :, :] = dx * inv_d
    delta_ref[0, 1, :, :] = dy * inv_d
    delta_ref[0, 2, :, :] = dz * inv_d

    def gaussian(dist, mul, bias, mean_ref, istd_ref, coef_ref):
        y = mul * dist + bias                    # (tn, ENp)
        mean = mean_ref[0][None]                 # (1, 1, Kp)
        istd = istd_ref[0][None]
        coef = coef_ref[0][None]
        z = (y[:, :, None] - mean) * istd        # (tn, ENp, Kp), multiplies only
        return jnp.exp(-0.5 * z * z) * coef      # zero on padded K channels

    g_m = gaussian(dist_m, mul_m_ref[0], bias_m_ref[0],
                   mean_m_ref, istd_m_ref, coef_m_ref)
    g_i = gaussian(dist_i, mul_i_ref[0], bias_i_ref[0],
                   mean_i_ref, istd_i_ref, coef_i_ref)

    # edge_proj(sum over EN of the full-mask-zeroed gaussians), both passes summed.
    keep = (1.0 - fm)[:, :, None]                # (1, ENp, 1)
    summed = jnp.sum((g_m + g_i) * keep, axis=1)  # (tn, Kp) f32
    merge_ref[0, :, :] = (
        jnp.dot(summed.astype(jnp.bfloat16), we_ref[...],
                preferred_element_type=jnp.float32)
        + 2.0 * be_ref[...])

    # feature_proj (NonLinear): Linear -> exact GELU -> Linear.
    # Both passes stacked as (2M, Kp) rows so layer-1 runs once over both.
    g2 = jnp.concatenate(
        [g_m.reshape(M, Kp).astype(jnp.bfloat16),
         g_i.reshape(M, Kp).astype(jnp.bfloat16)], axis=0)          # (2M, Kp)
    h = jnp.dot(g2, w1_ref[...], preferred_element_type=jnp.float32) + b1_ref[...]
    h = 0.5 * h * (1.0 + jax.lax.erf(h * _INV_SQRT2))               # exact GELU
    hs = h[:M, :] + h[M:, :]                     # sum passes before the (linear) layer 2
    hsT = hs.astype(jnp.bfloat16).T              # (Kp, M)
    b3t = (jnp.dot(w2t_ref[...], hsT, preferred_element_type=jnp.float32)
           + 2.0 * b2t_ref[...])                 # (H, M) head-major, lane-dense
    key_mask = jnp.tile(fm, (1, tn))             # (1, M): fm repeated per query row
    b3t = jnp.where(key_mask > 0.5, jnp.float32(-jnp.inf), b3t)
    biasf_ref[0, :, :] = b3t


def _fused_attn_bias(pos_m, pos_i, fpos_m, fpos_i, pad_col, fmask,
                     mul_m, bias_m, mul_i, bias_i,
                     mean_m, istd_m, coef_m, mean_i, istd_i, coef_i,
                     w1, b1, w2t, b2t, we, be):
    B, N, _ = pos_m.shape
    ENp = fpos_m.shape[2]
    Kp = w1.shape[0]
    H = w2t.shape[0]
    D = we.shape[1]
    tn = 8 if N % 8 == 0 else N                  # row tile (sublane aligned)
    grid = (B, N // tn)

    row3 = lambda b, i: (b, i, 0)                # row-tiled rank-3 arrays
    per_graph3 = lambda b, i: (b, 0, 0)          # per-graph rank-3 arrays
    wmap = lambda b, i: (0, 0)                   # shared weights

    in_specs = [
        pl.BlockSpec((1, tn, 3), row3),          # pos_m
        pl.BlockSpec((1, tn, 3), row3),          # pos_i
        pl.BlockSpec((1, 3, ENp), per_graph3),   # fpos_m
        pl.BlockSpec((1, 3, ENp), per_graph3),   # fpos_i
        pl.BlockSpec((1, tn, 1), row3),          # padding mask (float)
        pl.BlockSpec((1, 1, ENp), per_graph3),   # full mask (float)
        pl.BlockSpec((1, tn, ENp), row3),        # mul (main)
        pl.BlockSpec((1, tn, ENp), row3),        # bias (main)
        pl.BlockSpec((1, tn, ENp), row3),        # mul (init)
        pl.BlockSpec((1, tn, ENp), row3),        # bias (init)
        pl.BlockSpec((1, 1, Kp), per_graph3),    # mean (main)
        pl.BlockSpec((1, 1, Kp), per_graph3),    # inv_std (main)
        pl.BlockSpec((1, 1, Kp), per_graph3),    # coef (main)
        pl.BlockSpec((1, 1, Kp), per_graph3),    # mean (init)
        pl.BlockSpec((1, 1, Kp), per_graph3),    # inv_std (init)
        pl.BlockSpec((1, 1, Kp), per_graph3),    # coef (init)
        pl.BlockSpec((Kp, Kp), wmap),            # NonLinear layer1 weight (bf16)
        pl.BlockSpec((1, Kp), wmap),             # NonLinear layer1 bias
        pl.BlockSpec((H, Kp), wmap),             # NonLinear layer2 weight^T (bf16)
        pl.BlockSpec((H, 1), wmap),              # NonLinear layer2 bias^T
        pl.BlockSpec((Kp, D), wmap),             # edge_proj weight (bf16)
        pl.BlockSpec((1, D), wmap),              # edge_proj bias
    ]
    out_specs = [
        pl.BlockSpec((1, tn, ENp), row3),                           # dist (main pass)
        pl.BlockSpec((1, 3, tn, ENp), lambda b, i: (b, 0, i, 0)),   # delta_pos coord-major
        pl.BlockSpec((1, H, tn * ENp), lambda b, i: (b, 0, i)),     # attn bias head-major flat
        pl.BlockSpec((1, tn, D), row3),                             # merged edge features
    ]
    out_shape = [
        jax.ShapeDtypeStruct((B, N, ENp), jnp.float32),
        jax.ShapeDtypeStruct((B, 3, N, ENp), jnp.float32),
        jax.ShapeDtypeStruct((B, H, N * ENp), jnp.float32),
        jax.ShapeDtypeStruct((B, N, D), jnp.float32),
    ]
    return pl.pallas_call(
        _fused_bias_kernel,
        grid=grid,
        in_specs=in_specs,
        out_specs=out_specs,
        out_shape=out_shape,
        compiler_params=pltpu.CompilerParams(
            dimension_semantics=("parallel", "parallel"),
            vmem_limit_bytes=48 * 1024 * 1024),
    )(pos_m, pos_i, fpos_m, fpos_i, pad_col, fmask,
      mul_m, bias_m, mul_i, bias_i,
      mean_m, istd_m, coef_m, mean_i, istd_i, coef_i,
      w1, b1, w2t, b2t, we, be)


# ---------------------------------------------------------------------------
# Parameter construction (deterministic, synthetic).
# ---------------------------------------------------------------------------
def init_params(key, num_atom_types, num_kernel, num_heads, embed_dim,
                num_timesteps=50):
    num_edge_types = num_atom_types * num_atom_types
    ks = jax.random.split(key, 8)

    def unif(k, shape, lo, hi):
        return jax.random.uniform(k, shape, jnp.float32, lo, hi)

    def nrm(k, shape, scale=0.1):
        return (scale * jax.random.normal(k, shape)).astype(jnp.float32)

    def extractor(k):
        sub = jax.random.split(k, 4)
        return {
            "means": unif(sub[0], (num_timesteps, num_kernel), 0.0, 3.0),
            "stds": unif(sub[1], (num_timesteps, num_kernel), 0.1, 3.0),
            "mul": 1.0 + nrm(sub[2], (num_edge_types,), 0.1),
            "bias": nrm(sub[3], (num_edge_types,), 0.1),
        }

    return {
        "main": extractor(ks[0]),          # dist_feature_extractor
        "init": extractor(ks[1]),          # dist_feature_extractor_init
        "w1": nrm(ks[2], (num_kernel, num_kernel)),
        "b1": jnp.zeros((1, num_kernel), jnp.float32),
        "w2": nrm(ks[3], (num_kernel, num_heads)),
        "b2": jnp.zeros((1, num_heads), jnp.float32),
        "we": nrm(ks[4], (num_kernel, embed_dim)),
        "be": jnp.zeros((1, embed_dim), jnp.float32),
    }


# ---------------------------------------------------------------------------
# Forward (glue in plain JAX; the hot path is one fused Pallas kernel).
# ---------------------------------------------------------------------------
def graph3d_bias_pbc_cutoff(batched_data, params, num_atom_types):
    pos = batched_data["pos"]
    init_pos = batched_data["init_cell_pos"]
    x = batched_data["x"]
    t = batched_data["ts"]
    expand_pos = batched_data["expand_pos"]
    init_expand_pos = batched_data["init_expand_pos"]
    expand_mask = batched_data["expand_mask"]
    outcell_index = batched_data["outcell_index"]

    B, N, _ = pos.shape
    atoms = x[:, :, 0]
    expand_atoms = jnp.take_along_axis(atoms, outcell_index, axis=1)
    expand_atoms_full = jnp.concatenate([atoms, expand_atoms], axis=1)
    EN = expand_atoms_full.shape[1]
    edge_types = atoms[:, :, None] * num_atom_types + expand_atoms_full[:, None, :]
    padding_mask = atoms == 0
    full_mask = jnp.concatenate([padding_mask, expand_mask], axis=1)   # (B, EN)

    # Pad the expanded-neighbour axis to a multiple of 128 so all in-kernel
    # slabs are lane-dense (padded columns are flagged masked & sliced off).
    ENp = max(128, ((EN + 127) // 128) * 128)
    pad_e = ENp - EN

    K = params["w1"].shape[0]
    Kp = max(128, ((K + 127) // 128) * 128)
    H = params["w2"].shape[1]

    pad_col = padding_mask.astype(jnp.float32)[:, :, None]             # (B, N, 1)
    fmask = jnp.pad(full_mask, ((0, 0), (0, pad_e)),
                    constant_values=True).astype(jnp.float32)[:, None, :]  # (B, 1, ENp)

    def prep_pos(pos_in, epos_in):
        pos_zero = jnp.where(padding_mask[:, :, None], 0.0, pos_in)
        epos_zero = jnp.where(expand_mask[:, :, None], 0.0, epos_in)
        full_pos = jnp.concatenate([pos_zero, epos_zero], axis=1)      # (B, EN, 3)
        full_pos = jnp.pad(full_pos, ((0, 0), (0, pad_e), (0, 0)))
        return pos_zero, jnp.transpose(full_pos, (0, 2, 1))            # (B, 3, ENp)

    def prep_gaussian(ext):
        mul_g = jnp.pad(ext["mul"][edge_types], ((0, 0), (0, 0), (0, pad_e)))
        bias_g = jnp.pad(ext["bias"][edge_types], ((0, 0), (0, 0), (0, pad_e)))
        mean_t = ext["means"][t]                                       # (B, K)
        istd_t = 1.0 / (jnp.abs(ext["stds"][t]) + 1e-5)                # hoisted reciprocal
        coef_t = istd_t / _SQRT2PI
        padk = ((0, 0), (0, Kp - K))                                   # padded K channels -> g == 0
        return (mul_g, bias_g,
                jnp.pad(mean_t, padk)[:, None, :],
                jnp.pad(istd_t, padk)[:, None, :],
                jnp.pad(coef_t, padk)[:, None, :])

    pos_m, fpos_m = prep_pos(pos, expand_pos)
    pos_i, fpos_i = prep_pos(init_pos, init_expand_pos)
    mul_m, bias_m, mean_m, istd_m, coef_m = prep_gaussian(params["main"])
    mul_i, bias_i, mean_i, istd_i, coef_i = prep_gaussian(params["init"])

    # Shared NonLinear / edge_proj weights: zero-pad K -> Kp, bf16 MXU operands.
    padk_rows = ((0, Kp - K), (0, 0))
    w1 = jnp.pad(params["w1"], ((0, Kp - K), (0, Kp - K))).astype(jnp.bfloat16)
    b1 = jnp.pad(params["b1"], ((0, 0), (0, Kp - K)))
    w2t = jnp.transpose(jnp.pad(params["w2"], padk_rows)).astype(jnp.bfloat16)  # (H, Kp)
    b2t = jnp.transpose(params["b2"])                                           # (H, 1)
    we = jnp.pad(params["we"], padk_rows).astype(jnp.bfloat16)
    be = params["be"]

    dist_p, delta_p, bias_flat, edge_features = _fused_attn_bias(
        pos_m, pos_i, fpos_m, fpos_i, pad_col, fmask,
        mul_m, bias_m, mul_i, bias_i,
        mean_m, istd_m, coef_m, mean_i, istd_i, coef_i,
        w1, b1, w2t, b2t, we, be)

    attn_bias_3d = bias_flat.reshape(B, H, N, ENp)   # free: row-major metadata reshape
    if pad_e:
        dist_p = dist_p[:, :, :EN]
        delta_p = delta_p[:, :, :, :EN]
        attn_bias_3d = attn_bias_3d[:, :, :, :EN]

    return {
        "dist": dist_p,                  # (B, N, EN)     main pass, as in the reference
        # delta_pos is coordinate-major (B, 3, N, EN): lane-dense layout of the
        # reference (B, N, EN, 3) tensor; transpose(0, 2, 3, 1) recovers it.
        "delta_pos": delta_p,
        "attn_bias_3d": attn_bias_3d,    # (B, H, N, EN)  main + init, -inf on masked keys
        "edge_features": edge_features,  # (B, N, D)      main + init merged edge features
    }


if __name__ == "__main__":
    key = jax.random.PRNGKey(0)
    B, N, E = 2, 8, 120          # EN = N + E = 128 -> lane-dense, no EN padding needed
    num_heads = 8
    num_atom_types = 16
    num_kernel = 32              # padded to 128 inside the wrapper
    embed_dim = 64               # != num_kernel so edge_proj exists
    num_timesteps = 50

    ks = jax.random.split(key, 10)
    atoms = jax.random.randint(ks[0], (B, N), 1, num_atom_types)
    atoms = atoms.at[:, -2:].set(0)                 # pad last two atoms per graph
    x = atoms[:, :, None].astype(jnp.int32)         # (B, N, 1) atom types at [...,0]

    pos = jax.random.normal(ks[1], (B, N, 3), jnp.float32)
    init_pos = jax.random.normal(ks[2], (B, N, 3), jnp.float32)
    expand_pos = jax.random.normal(ks[3], (B, E, 3), jnp.float32)
    init_expand_pos = jax.random.normal(ks[4], (B, E, 3), jnp.float32)
    outcell_index = jax.random.randint(ks[5], (B, E), 0, N - 2)
    expand_mask = jax.random.bernoulli(ks[6], 0.25, (B, E))
    ts = jax.random.randint(ks[7], (B,), 0, num_timesteps)

    batched_data = {
        "pos": pos,
        "init_cell_pos": init_pos,
        "x": x,
        "ts": ts,
        "expand_pos": expand_pos,
        "init_expand_pos": init_expand_pos,
        "expand_mask": expand_mask,
        "outcell_index": outcell_index,
    }

    params = init_params(ks[8], num_atom_types, num_kernel, num_heads,
                         embed_dim, num_timesteps)

    out = graph3d_bias_pbc_cutoff(batched_data, params, num_atom_types)
    jax.tree_util.tree_map(jax.block_until_ready, out)

    EN = N + E
    assert out["dist"].shape == (B, N, EN)
    assert out["delta_pos"].shape == (B, 3, N, EN)
    assert out["attn_bias_3d"].shape == (B, num_heads, N, EN)
    assert out["edge_features"].shape == (B, N, embed_dim)

    # Structural sanity: -inf exactly on masked key columns, finite elsewhere.
    full_mask = jnp.concatenate([atoms == 0, expand_mask], axis=1)      # (B, EN)
    bias = out["attn_bias_3d"]
    mask_b = jnp.broadcast_to(full_mask[:, None, None, :], bias.shape)
    assert bool(jnp.all(jnp.isneginf(jnp.where(mask_b, bias, -jnp.inf))))
    assert bool(jnp.all(jnp.isfinite(jnp.where(mask_b, 0.0, bias))))
    assert bool(jnp.all(jnp.isfinite(out["edge_features"])))

    print("KERNEL_OK")
</pallas_src>

<mosaic_0001>
module attributes {stable_mosaic.version = 11 : i64} {
  func.func @_fused_bias_kernel(%arg0: i32, %arg1: i32, %arg2: memref<1x8x3xf32, #tpu.memory_space<vmem>>, %arg3: memref<1x8x3xf32, #tpu.memory_space<vmem>>, %arg4: memref<1x3x128xf32, #tpu.memory_space<vmem>>, %arg5: memref<1x3x128xf32, #tpu.memory_space<vmem>>, %arg6: memref<1x8x1xf32, #tpu.memory_space<vmem>>, %arg7: memref<1x1x128xf32, #tpu.memory_space<vmem>>, %arg8: memref<1x8x128xf32, #tpu.memory_space<vmem>>, %arg9: memref<1x8x128xf32, #tpu.memory_space<vmem>>, %arg10: memref<1x8x128xf32, #tpu.memory_space<vmem>>, %arg11: memref<1x8x128xf32, #tpu.memory_space<vmem>>, %arg12: memref<1x1x128xf32, #tpu.memory_space<vmem>>, %arg13: memref<1x1x128xf32, #tpu.memory_space<vmem>>, %arg14: memref<1x1x128xf32, #tpu.memory_space<vmem>>, %arg15: memref<1x1x128xf32, #tpu.memory_space<vmem>>, %arg16: memref<1x1x128xf32, #tpu.memory_space<vmem>>, %arg17: memref<1x1x128xf32, #tpu.memory_space<vmem>>, %arg18: memref<128x128xbf16, #tpu.memory_space<vmem>>, %arg19: memref<1x128xf32, #tpu.memory_space<vmem>>, %arg20: memref<8x128xbf16, #tpu.memory_space<vmem>>, %arg21: memref<8x1xf32, #tpu.memory_space<vmem>>, %arg22: memref<128x64xbf16, #tpu.memory_space<vmem>>, %arg23: memref<1x64xf32, #tpu.memory_space<vmem>>, %arg24: memref<1x8x128xf32, #tpu.memory_space<vmem>>, %arg25: memref<1x3x8x128xf32, #tpu.memory_space<vmem>>, %arg26: memref<1x8x1024xf32, #tpu.memory_space<vmem>>, %arg27: memref<1x8x64xf32, #tpu.memory_space<vmem>>) attributes {dimension_semantics = [#tpu.dimension_semantics<parallel>, #tpu.dimension_semantics<parallel>], iteration_bounds = array<i64: 2, 1>, scalar_prefetch = 0 : i64, scratch_operands = 0 : i64, tpu.core_type = #tpu.core_type<tc>, window_params = [{transform_indices = @transform_0, window_bounds = array<i64: 1, 8, 3>}, {transform_indices = @transform_1, window_bounds = array<i64: 1, 8, 3>}, {transform_indices = @transform_2, window_bounds = array<i64: 1, 3, 128>}, {transform_indices = @transform_3, window_bounds = array<i64: 1, 3, 128>}, {transform_indices = @transform_4, window_bounds = array<i64: 1, 8, 1>}, {transform_indices = @transform_5, window_bounds = array<i64: 1, 1, 128>}, {transform_indices = @transform_6, window_bounds = array<i64: 1, 8, 128>}, {transform_indices = @transform_7, window_bounds = array<i64: 1, 8, 128>}, {transform_indices = @transform_8, window_bounds = array<i64: 1, 8, 128>}, {transform_indices = @transform_9, window_bounds = array<i64: 1, 8, 128>}, {transform_indices = @transform_10, window_bounds = array<i64: 1, 1, 128>}, {transform_indices = @transform_11, window_bounds = array<i64: 1, 1, 128>}, {transform_indices = @transform_12, window_bounds = array<i64: 1, 1, 128>}, {transform_indices = @transform_13, window_bounds = array<i64: 1, 1, 128>}, {transform_indices = @transform_14, window_bounds = array<i64: 1, 1, 128>}, {transform_indices = @transform_15, window_bounds = array<i64: 1, 1, 128>}, {pipeline_mode = #tpu.pipeline_mode<synchronous>, transform_indices = @transform_16, window_bounds = array<i64: 128, 128>}, {pipeline_mode = #tpu.pipeline_mode<synchronous>, transform_indices = @transform_17, window_bounds = array<i64: 1, 128>}, {pipeline_mode = #tpu.pipeline_mode<synchronous>, transform_indices = @transform_18, window_bounds = array<i64: 8, 128>}, {pipeline_mode = #tpu.pipeline_mode<synchronous>, transform_indices = @transform_19, window_bounds = array<i64: 8, 1>}, {pipeline_mode = #tpu.pipeline_mode<synchronous>, transform_indices = @transform_20, window_bounds = array<i64: 128, 64>}, {pipeline_mode = #tpu.pipeline_mode<synchronous>, transform_indices = @transform_21, window_bounds = array<i64: 1, 64>}, {transform_indices = @transform_22, window_bounds = array<i64: 1, 8, 128>}, {transform_indices = @transform_23, window_bounds = array<i64: 1, 3, 8, 128>}, {transform_indices = @transform_24, window_bounds = array<i64: 1, 8, 1024>}, {transform_indices = @transform_25, window_bounds = array<i64: 1, 8, 64>}]} {
    %c0 = arith.constant 0 : index
    %c0_0 = arith.constant 0 : index
    %c0_1 = arith.constant 0 : index
    %0 = vector.load %arg6[%c0, %c0_0, %c0_1] : memref<1x8x1xf32, #tpu.memory_space<vmem>>, vector<1x8x1xf32>
    %1 = vector.shape_cast %0 : vector<1x8x1xf32> to vector<8x1xf32>
    %c0_2 = arith.constant 0 : index
    %c0_3 = arith.constant 0 : index
    %c0_4 = arith.constant 0 : index
    %2 = vector.load %arg7[%c0_2, %c0_3, %c0_4] : memref<1x1x128xf32, #tpu.memory_space<vmem>>, vector<1x1x128xf32>
    %3 = vector.shape_cast %2 : vector<1x1x128xf32> to vector<1x128xf32>
    %cst = arith.constant 5.000000e-01 : f32
    %4 = vector.broadcast %cst : f32 to vector<1x128xf32>
    %5 = arith.cmpf ogt, %3, %4 : vector<1x128xf32>
    %cst_5 = arith.constant 5.000000e-01 : f32
    %6 = vector.broadcast %cst_5 : f32 to vector<8x1xf32>
    %7 = arith.cmpf ogt, %1, %6 : vector<8x1xf32>
    %8 = vector.broadcast %5 : vector<1x128xi1> to vector<8x128xi1>
    %9 = vector.broadcast %7 : vector<8x1xi1> to vector<8x128xi1>
    %10 = arith.ori %8, %9 : vector<8x128xi1>
    %c0_6 = arith.constant 0 : index
    %c0_7 = arith.constant 0 : index
    %c0_8 = arith.constant 0 : index
    %11 = vector.load %arg2[%c0_6, %c0_7, %c0_8] : memref<1x8x3xf32, #tpu.memory_space<vmem>>, vector<1x8x3xf32>
    %12 = vector.shape_cast %11 : vector<1x8x3xf32> to vector<8x3xf32>
    %c0_9 = arith.constant 0 : index
    %c0_10 = arith.constant 0 : index
    %c0_11 = arith.constant 0 : index
    %13 = vector.load %arg4[%c0_9, %c0_10, %c0_11] : memref<1x3x128xf32, #tpu.memory_space<vmem>>, vector<1x3x128xf32>
    %14 = vector.shape_cast %13 : vector<1x3x128xf32> to vector<3x128xf32>
    %15 = vector.extract_strided_slice %12 {offsets = [0, 0], sizes = [8, 1], strides = [1, 1]} : vector<8x3xf32> to vector<8x1xf32>
    %16 = vector.extract_strided_slice %14 {offsets = [0, 0], sizes = [1, 128], strides = [1, 1]} : vector<3x128xf32> to vector<1x128xf32>
    %17 = vector.broadcast %15 : vector<8x1xf32> to vector<8x128xf32>
    %18 = vector.broadcast %16 : vector<1x128xf32> to vector<8x128xf32>
    %19 = arith.subf %17, %18 : vector<8x128xf32>
    %20 = vector.extract_strided_slice %12 {offsets = [0, 1], sizes = [8, 1], strides = [1, 1]} : vector<8x3xf32> to vector<8x1xf32>
    %21 = vector.extract_strided_slice %14 {offsets = [1, 0], sizes = [1, 128], strides = [1, 1]} : vector<3x128xf32> to vector<1x128xf32>
    %22 = vector.broadcast %20 : vector<8x1xf32> to vector<8x128xf32>
    %23 = vector.broadcast %21 : vector<1x128xf32> to vector<8x128xf32>
    %24 = arith.subf %22, %23 : vector<8x128xf32>
    %25 = vector.extract_strided_slice %12 {offsets = [0, 2], sizes = [8, 1], strides = [1, 1]} : vector<8x3xf32> to vector<8x1xf32>
    %26 = vector.extract_strided_slice %14 {offsets = [2, 0], sizes = [1, 128], strides = [1, 1]} : vector<3x128xf32> to vector<1x128xf32>
    %27 = vector.broadcast %25 : vector<8x1xf32> to vector<8x128xf32>
    %28 = vector.broadcast %26 : vector<1x128xf32> to vector<8x128xf32>
    %29 = arith.subf %27, %28 : vector<8x128xf32>
    %30 = arith.mulf %19, %19 : vector<8x128xf32>
    %31 = arith.mulf %24, %24 : vector<8x128xf32>
    %32 = arith.addf %30, %31 : vector<8x128xf32>
    %33 = arith.mulf %29, %29 : vector<8x128xf32>
    %34 = arith.addf %32, %33 : vector<8x128xf32>
    %35 = math.sqrt %34 : vector<8x128xf32>
    %cst_12 = arith.constant 1.000000e+00 : f32
    %36 = vector.broadcast %cst_12 : f32 to vector<8x128xf32>
    %37 = arith.select %10, %36, %35 : vector<8x128xi1>, vector<8x128xf32>
    %c0_13 = arith.constant 0 : index
    %c0_14 = arith.constant 0 : index
    %c0_15 = arith.constant 0 : index
    %38 = vector.load %arg3[%c0_13, %c0_14, %c0_15] : memref<1x8x3xf32, #tpu.memory_space<vmem>>, vector<1x8x3xf32>
    %39 = vector.shape_cast %38 : vector<1x8x3xf32> to vector<8x3xf32>
    %c0_16 = arith.constant 0 : index
    %c0_17 = arith.constant 0 : index
    %c0_18 = arith.constant 0 : index
    %40 = vector.load %arg5[%c0_16, %c0_17, %c0_18] : memref<1x3x128xf32, #tpu.memory_space<vmem>>, vector<1x3x128xf32>
    %41 = vector.shape_cast %40 : vector<1x3x128xf32> to vector<3x128xf32>
    %42 = vector.extract_strided_slice %39 {offsets = [0, 0], sizes = [8, 1], strides = [1, 1]} : vector<8x3xf32> to vector<8x1xf32>
    %43 = vector.extract_strided_slice %41 {offsets = [0, 0], sizes = [1, 128], strides = [1, 1]} : vector<3x128xf32> to vector<1x128xf32>
    %44 = vector.broadcast %42 : vector<8x1xf32> to vector<8x128xf32>
    %45 = vector.broadcast %43 : vector<1x128xf32> to vector<8x128xf32>
    %46 = arith.subf %44, %45 : vector<8x128xf32>
    %47 = vector.extract_strided_slice %39 {offsets = [0, 1], sizes = [8, 1], strides = [1, 1]} : vector<8x3xf32> to vector<8x1xf32>
    %48 = vector.extract_strided_slice %41 {offsets = [1, 0], sizes = [1, 128], strides = [1, 1]} : vector<3x128xf32> to vector<1x128xf32>
    %49 = vector.broadcast %47 : vector<8x1xf32> to vector<8x128xf32>
    %50 = vector.broadcast %48 : vector<1x128xf32> to vector<8x128xf32>
    %51 = arith.subf %49, %50 : vector<8x128xf32>
    %52 = vector.extract_strided_slice %39 {offsets = [0, 2], sizes = [8, 1], strides = [1, 1]} : vector<8x3xf32> to vector<8x1xf32>
    %53 = vector.extract_strided_slice %41 {offsets = [2, 0], sizes = [1, 128], strides = [1, 1]} : vector<3x128xf32> to vector<1x128xf32>
    %54 = vector.broadcast %52 : vector<8x1xf32> to vector<8x128xf32>
    %55 = vector.broadcast %53 : vector<1x128xf32> to vector<8x128xf32>
    %56 = arith.subf %54, %55 : vector<8x128xf32>
    %57 = arith.mulf %46, %46 : vector<8x128xf32>
    %58 = arith.mulf %51, %51 : vector<8x128xf32>
    %59 = arith.addf %57, %58 : vector<8x128xf32>
    %60 = arith.mulf %56, %56 : vector<8x128xf32>
    %61 = arith.addf %59, %60 : vector<8x128xf32>
    %62 = math.sqrt %61 : vector<8x128xf32>
    %cst_19 = arith.constant 1.000000e+00 : f32
    %63 = vector.broadcast %cst_19 : f32 to vector<8x128xf32>
    %64 = arith.select %10, %63, %62 : vector<8x128xi1>, vector<8x128xf32>
    %c0_20 = arith.constant 0 : index
    %c0_21 = arith.constant 0 : index
    %c0_22 = arith.constant 0 : index
    %65 = vector.load %arg24[%c0_20, %c0_21, %c0_22] : memref<1x8x128xf32, #tpu.memory_space<vmem>>, vector<1x8x128xf32>
    %66 = vector.shape_cast %65 : vector<1x8x128xf32> to vector<8x128xf32>
    %67 = vector.shape_cast %37 : vector<8x128xf32> to vector<1x8x128xf32>
    tpu.vector_store %arg24[%c0_20, %c0_21, %c0_22], %67 {strides = array<i32>} : memref<1x8x128xf32, #tpu.memory_space<vmem>>, vector<1x8x128xf32>,
    %cst_23 = arith.constant 9.99999974E-6 : f32
    %68 = vector.broadcast %cst_23 : f32 to vector<8x128xf32>
    %69 = arith.addf %37, %68 : vector<8x128xf32>
    %70 = tpu.reciprocal %69 {approx = true} : vector<8x128xf32> -> vector<8x128xf32>
    %71 = arith.mulf %19, %70 : vector<8x128xf32>
    %c0_24 = arith.constant 0 : index
    %c0_25 = arith.constant 0 : index
    %c0_26 = arith.constant 0 : index
    %c0_27 = arith.constant 0 : index
    %72 = vector.load %arg25[%c0_24, %c0_25, %c0_26, %c0_27] : memref<1x3x8x128xf32, #tpu.memory_space<vmem>>, vector<1x1x8x128xf32>
    %73 = vector.shape_cast %72 : vector<1x1x8x128xf32> to vector<8x128xf32>
    %74 = vector.shape_cast %71 : vector<8x128xf32> to vector<1x1x8x128xf32>
    tpu.vector_store %arg25[%c0_24, %c0_25, %c0_26, %c0_27], %74 {strides = array<i32>} : memref<1x3x8x128xf32, #tpu.memory_space<vmem>>, vector<1x1x8x128xf32>,
    %75 = arith.mulf %24, %70 : vector<8x128xf32>
    %c0_28 = arith.constant 0 : index
    %c1 = arith.constant 1 : index
    %c0_29 = arith.constant 0 : index
    %c0_30 = arith.constant 0 : index
    %76 = vector.load %arg25[%c0_28, %c1, %c0_29, %c0_30] : memref<1x3x8x128xf32, #tpu.memory_space<vmem>>, vector<1x1x8x128xf32>
    %77 = vector.shape_cast %76 : vector<1x1x8x128xf32> to vector<8x128xf32>
    %78 = vector.shape_cast %75 : vector<8x128xf32> to vector<1x1x8x128xf32>
    tpu.vector_store %arg25[%c0_28, %c1, %c0_29, %c0_30], %78 {strides = array<i32>} : memref<1x3x8x128xf32, #tpu.memory_space<vmem>>, vector<1x1x8x128xf32>,
    %79 = arith.mulf %29, %70 : vector<8x128xf32>
    %c0_31 = arith.constant 0 : index
    %c2 = arith.constant 2 : index
    %c0_32 = arith.constant 0 : index
    %c0_33 = arith.constant 0 : index
    %80 = vector.load %arg25[%c0_31, %c2, %c0_32, %c0_33] : memref<1x3x8x128xf32, #tpu.memory_space<vmem>>, vector<1x1x8x128xf32>
    %81 = vector.shape_cast %80 : vector<1x1x8x128xf32> to vector<8x128xf32>
    %82 = vector.shape_cast %79 : vector<8x128xf32> to vector<1x1x8x128xf32>
    tpu.vector_store %arg25[%c0_31, %c2, %c0_32, %c0_33], %82 {strides = array<i32>} : memref<1x3x8x128xf32, #tpu.memory_space<vmem>>, vector<1x1x8x128xf32>,
    %c0_34 = arith.constant 0 : index
    %c0_35 = arith.constant 0 : index
    %c0_36 = arith.constant 0 : index
    %83 = vector.load %arg8[%c0_34, %c0_35, %c0_36] : memref<1x8x128xf32, #tpu.memory_space<vmem>>, vector<1x8x128xf32>
    %84 = vector.shape_cast %83 : vector<1x8x128xf32> to vector<8x128xf32>
    %c0_37 = arith.constant 0 : index
    %c0_38 = arith.constant 0 : index
    %c0_39 = arith.constant 0 : index
    %85 = vector.load %arg9[%c0_37, %c0_38, %c0_39] : memref<1x8x128xf32, #tpu.memory_space<vmem>>, vector<1x8x128xf32>
    %86 = vector.shape_cast %85 : vector<1x8x128xf32> to vector<8x128xf32>
    %87 = arith.mulf %84, %37 : vector<8x128xf32>
    %88 = arith.addf %87, %86 : vector<8x128xf32>
    %c0_40 = arith.constant 0 : index
    %c0_41 = arith.constant 0 : index
    %c0_42 = arith.constant 0 : index
    %89 = vector.load %arg12[%c0_40, %c0_41, %c0_42] : memref<1x1x128xf32, #tpu.memory_space<vmem>>, vector<1x1x128xf32>
    %90 = vector.shape_cast %89 : vector<1x1x128xf32> to vector<1x128xf32>
    %91 = vector.shape_cast %90 : vector<1x128xf32> to vector<1x1x128xf32>
    %c0_43 = arith.constant 0 : index
    %c0_44 = arith.constant 0 : index
    %c0_45 = arith.constant 0 : index
    %92 = vector.load %arg13[%c0_43, %c0_44, %c0_45] : memref<1x1x128xf32, #tpu.memory_space<vmem>>, vector<1x1x128xf32>
    %93 = vector.shape_cast %92 : vector<1x1x128xf32> to vector<1x128xf32>
    %94 = vector.shape_cast %93 : vector<1x128xf32> to vector<1x1x128xf32>
    %c0_46 = arith.constant 0 : index
    %c0_47 = arith.constant 0 : index
    %c0_48 = arith.constant 0 : index
    %95 = vector.load %arg14[%c0_46, %c0_47, %c0_48] : memref<1x1x128xf32, #tpu.memory_space<vmem>>, vector<1x1x128xf32>
    %96 = vector.shape_cast %95 : vector<1x1x128xf32> to vector<1x128xf32>
    %97 = vector.shape_cast %96 : vector<1x128xf32> to vector<1x1x128xf32>
    %98 = vector.shape_cast %88 : vector<8x128xf32> to vector<8x128x1xf32>
    %99 = vector.broadcast %98 : vector<8x128x1xf32> to vector<8x128x128xf32>
    %100 = vector.broadcast %91 : vector<1x1x128xf32> to vector<8x128x128xf32>
    %101 = arith.subf %99, %100 : vector<8x128x128xf32>
    %102 = vector.broadcast %94 : vector<1x1x128xf32> to vector<8x128x128xf32>
    %103 = arith.mulf %101, %102 : vector<8x128x128xf32>
    %cst_49 = arith.constant -5.000000e-01 : f32
    %104 = vector.broadcast %cst_49 : f32 to vector<8x128x128xf32>
    %105 = arith.mulf %104, %103 : vector<8x128x128xf32>
    %106 = arith.mulf %105, %103 : vector<8x128x128xf32>
    %107 = math.exp %106 : vector<8x128x128xf32>
    %108 = vector.broadcast %97 : vector<1x1x128xf32> to vector<8x128x128xf32>
    %109 = arith.mulf %107, %108 : vector<8x128x128xf32>
    %c0_50 = arith.constant 0 : index
    %c0_51 = arith.constant 0 : index
    %c0_52 = arith.constant 0 : index
    %110 = vector.load %arg10[%c0_50, %c0_51, %c0_52] : memref<1x8x128xf32, #tpu.memory_space<vmem>>, vector<1x8x128xf32>
    %111 = vector.shape_cast %110 : vector<1x8x128xf32> to vector<8x128xf32>
    %c0_53 = arith.constant 0 : index
    %c0_54 = arith.constant 0 : index
    %c0_55 = arith.constant 0 : index
    %112 = vector.load %arg11[%c0_53, %c0_54, %c0_55] : memref<1x8x128xf32, #tpu.memory_space<vmem>>, vector<1x8x128xf32>
    %113 = vector.shape_cast %112 : vector<1x8x128xf32> to vector<8x128xf32>
    %114 = arith.mulf %111, %64 : vector<8x128xf32>
    %115 = arith.addf %114, %113 : vector<8x128xf32>
    %c0_56 = arith.constant 0 : index
    %c0_57 = arith.constant 0 : index
    %c0_58 = arith.constant 0 : index
    %116 = vector.load %arg15[%c0_56, %c0_57, %c0_58] : memref<1x1x128xf32, #tpu.memory_space<vmem>>, vector<1x1x128xf32>
    %117 = vector.shape_cast %116 : vector<1x1x128xf32> to vector<1x128xf32>
    %118 = vector.shape_cast %117 : vector<1x128xf32> to vector<1x1x128xf32>
    %c0_59 = arith.constant 0 : index
    %c0_60 = arith.constant 0 : index
    %c0_61 = arith.constant 0 : index
    %119 = vector.load %arg16[%c0_59, %c0_60, %c0_61] : memref<1x1x128xf32, #tpu.memory_space<vmem>>, vector<1x1x128xf32>
    %120 = vector.shape_cast %119 : vector<1x1x128xf32> to vector<1x128xf32>
    %121 = vector.shape_cast %120 : vector<1x128xf32> to vector<1x1x128xf32>
    %c0_62 = arith.constant 0 : index
    %c0_63 = arith.constant 0 : index
    %c0_64 = arith.constant 0 : index
    %122 = vector.load %arg17[%c0_62, %c0_63, %c0_64] : memref<1x1x128xf32, #tpu.memory_space<vmem>>, vector<1x1x128xf32>
    %123 = vector.shape_cast %122 : vector<1x1x128xf32> to vector<1x128xf32>
    %124 = vector.shape_cast %123 : vector<1x128xf32> to vector<1x1x128xf32>
    %125 = vector.shape_cast %115 : vector<8x128xf32> to vector<8x128x1xf32>
    %126 = vector.broadcast %125 : vector<8x128x1xf32> to vector<8x128x128xf32>
    %127 = vector.broadcast %118 : vector<1x1x128xf32> to vector<8x128x128xf32>
    %128 = arith.subf %126, %127 : vector<8x128x128xf32>
    %129 = vector.broadcast %121 : vector<1x1x128xf32> to vector<8x128x128xf32>
    %130 = arith.mulf %128, %129 : vector<8x128x128xf32>
    %cst_65 = arith.constant -5.000000e-01 : f32
    %131 = vector.broadcast %cst_65 : f32 to vector<8x128x128xf32>
    %132 = arith.mulf %131, %130 : vector<8x128x128xf32>
    %133 = arith.mulf %132, %130 : vector<8x128x128xf32>
    %134 = math.exp %133 : vector<8x128x128xf32>
    %135 = vector.broadcast %124 : vector<1x1x128xf32> to vector<8x128x128xf32>
    %136 = arith.mulf %134, %135 : vector<8x128x128xf32>
    %cst_66 = arith.constant 1.000000e+00 : f32
    %137 = vector.broadcast %cst_66 : f32 to vector<1x128xf32>
    %138 = arith.subf %137, %3 : vector<1x128xf32>
    %139 = vector.shape_cast %138 : vector<1x128xf32> to vector<1x128x1xf32>
    %140 = arith.addf %109, %136 : vector<8x128x128xf32>
    %141 = vector.broadcast %139 : vector<1x128x1xf32> to vector<8x128x128xf32>
    %142 = arith.mulf %140, %141 : vector<8x128x128xf32>
    %cst_67 = arith.constant dense<0.000000e+00> : vector<8x128xf32>
    %143 = vector.multi_reduction <add>, %142, %cst_67 [1] : vector<8x128x128xf32> to vector<8x128xf32>
    %144 = arith.truncf %143 : vector<8x128xf32> to vector<8x128xbf16>
    %c0_68 = arith.constant 0 : index
    %c0_69 = arith.constant 0 : index
    %145 = vector.load %arg22[%c0_68, %c0_69] : memref<128x64xbf16, #tpu.memory_space<vmem>>, vector<128x64xbf16>
    %cst_70 = arith.constant dense<0.000000e+00> : vector<8x64xf32>
    %146 = tpu.matmul %144, %145, %cst_70 {dimension_numbers = #tpu.dot_dimension_numbers<[1], [0], [0], [1], [0, 0, 1, 1], [], []>} : vector<8x128xbf16>, vector<128x64xbf16>, vector<8x64xf32> -> vector<8x64xf32>
    %c0_71 = arith.constant 0 : index
    %c0_72 = arith.constant 0 : index
    %147 = vector.load %arg23[%c0_71, %c0_72] : memref<1x64xf32, #tpu.memory_space<vmem>>, vector<1x64xf32>
    %cst_73 = arith.constant 2.000000e+00 : f32
    %148 = vector.broadcast %cst_73 : f32 to vector<1x64xf32>
    %149 = arith.mulf %148, %147 : vector<1x64xf32>
    %150 = vector.broadcast %149 : vector<1x64xf32> to vector<8x64xf32>
    %151 = arith.addf %146, %150 : vector<8x64xf32>
    %c0_74 = arith.constant 0 : index
    %c0_75 = arith.constant 0 : index
    %c0_76 = arith.constant 0 : index
    %152 = vector.load %arg27[%c0_74, %c0_75, %c0_76] : memref<1x8x64xf32, #tpu.memory_space<vmem>>, vector<1x8x64xf32>
    %153 = vector.shape_cast %152 : vector<1x8x64xf32> to vector<8x64xf32>
    %154 = vector.shape_cast %151 : vector<8x64xf32> to vector<1x8x64xf32>
    tpu.vector_store %arg27[%c0_74, %c0_75, %c0_76], %154 {strides = array<i32>} : memref<1x8x64xf32, #tpu.memory_space<vmem>>, vector<1x8x64xf32>,
    %155 = vector.shape_cast %109 : vector<8x128x128xf32> to vector<1024x128xf32>
    %156 = arith.truncf %155 : vector<1024x128xf32> to vector<1024x128xbf16>
    %157 = vector.shape_cast %136 : vector<8x128x128xf32> to vector<1024x128xf32>
    %158 = arith.truncf %157 : vector<1024x128xf32> to vector<1024x128xbf16>
    %159 = tpu.concatenate %156, %158 in 0 : vector<1024x128xbf16>, vector<1024x128xbf16> -> vector<2048x128xbf16>
    %c0_77 = arith.constant 0 : index
    %c0_78 = arith.constant 0 : index
    %160 = vector.load %arg18[%c0_77, %c0_78] : memref<128x128xbf16, #tpu.memory_space<vmem>>, vector<128x128xbf16>
    %cst_79 = arith.constant dense<0.000000e+00> : vector<2048x128xf32>
    %161 = tpu.matmul %159, %160, %cst_79 {dimension_numbers = #tpu.dot_dimension_numbers<[1], [0], [0], [1], [0, 0, 1, 1], [], []>} : vector<2048x128xbf16>, vector<128x128xbf16>, vector<2048x128xf32> -> vector<2048x128xf32>
    %c0_80 = arith.constant 0 : index
    %c0_81 = arith.constant 0 : index
    %162 = vector.load %arg19[%c0_80, %c0_81] : memref<1x128xf32, #tpu.memory_space<vmem>>, vector<1x128xf32>
    %163 = vector.broadcast %162 : vector<1x128xf32> to vector<2048x128xf32>
    %164 = arith.addf %161, %163 : vector<2048x128xf32>
    %cst_82 = arith.constant 5.000000e-01 : f32
    %165 = vector.broadcast %cst_82 : f32 to vector<2048x128xf32>
    %166 = arith.mulf %165, %164 : vector<2048x128xf32>
    %cst_83 = arith.constant 0.707106769 : f32
    %167 = vector.broadcast %cst_83 : f32 to vector<2048x128xf32>
    %168 = arith.mulf %164, %167 : vector<2048x128xf32>
    %169 = math.erf %168 : vector<2048x128xf32>
    %cst_84 = arith.constant 1.000000e+00 : f32
    %170 = vector.broadcast %cst_84 : f32 to vector<2048x128xf32>
    %171 = arith.addf %170, %169 : vector<2048x128xf32>
    %172 = arith.mulf %166, %171 : vector<2048x128xf32>
    %173 = vector.extract_strided_slice %172 {offsets = [0, 0], sizes = [1024, 128], strides = [1, 1]} : vector<2048x128xf32> to vector<1024x128xf32>
    %174 = vector.extract_strided_slice %172 {offsets = [1024, 0], sizes = [1024, 128], strides = [1, 1]} : vector<2048x128xf32> to vector<1024x128xf32>
    %175 = arith.addf %173, %174 : vector<1024x128xf32>
    %176 = arith.truncf %175 : vector<1024x128xf32> to vector<1024x128xbf16>
    %177 = tpu.transpose %176, [1, 0] : vector<1024x128xbf16> -> vector<128x1024xbf16>
    %c0_85 = arith.constant 0 : index
    %c0_86 = arith.constant 0 : index
    %178 = vector.load %arg20[%c0_85, %c0_86] : memref<8x128xbf16, #tpu.memory_space<vmem>>, vector<8x128xbf16>
    %cst_87 = arith.constant dense<0.000000e+00> : vector<8x1024xf32>
    %179 = tpu.matmul %178, %177, %cst_87 {dimension_numbers = #tpu.dot_dimension_numbers<[1], [0], [0], [1], [0, 0, 1, 1], [], []>} : vector<8x128xbf16>, vector<128x1024xbf16>, vector<8x1024xf32> -> vector<8x1024xf32>
    %c0_88 = arith.constant 0 : index
    %c0_89 = arith.constant 0 : index
    %180 = vector.load %arg21[%c0_88, %c0_89] : memref<8x1xf32, #tpu.memory_space<vmem>>, vector<8x1xf32>
    %cst_90 = arith.constant 2.000000e+00 : f32
    %181 = vector.broadcast %cst_90 : f32 to vector<8x1xf32>
    %182 = arith.mulf %181, %180 : vector<8x1xf32>
    %183 = vector.broadcast %182 : vector<8x1xf32> to vector<8x1024xf32>
    %184 = arith.addf %179, %183 : vector<8x1024xf32>
    %185 = tpu.concatenate %3, %3, %3, %3, %3, %3, %3, %3 in 1 : vector<1x128xf32>, vector<1x128xf32>, vector<1x128xf32>, vector<1x128xf32>, vector<1x128xf32>, vector<1x128xf32>, vector<1x128xf32>, vector<1x128xf32> -> vector<1x1024xf32>
    %cst_91 = arith.constant 5.000000e-01 : f32
    %186 = vector.broadcast %cst_91 : f32 to vector<1x1024xf32>
    %187 = arith.cmpf ogt, %185, %186 : vector<1x1024xf32>
    %cst_92 = arith.constant 0xFF800000 : f32
    %188 = vector.shape_cast %187 : vector<1x1024xi1> to vector<1x1024xi1>
    %189 = vector.broadcast %188 : vector<1x1024xi1> to vector<8x1024xi1>
    %190 = vector.broadcast %cst_92 : f32 to vector<8x1024xf32>
    %191 = arith.select %189, %190, %184 : vector<8x1024xi1>, vector<8x1024xf32>
    %c0_93 = arith.constant 0 : index
    %c0_94 = arith.constant 0 : index
    %c0_95 = arith.constant 0 : index
    %192 = vector.load %arg26[%c0_93, %c0_94, %c0_95] : memref<1x8x1024xf32, #tpu.memory_space<vmem>>, vector<1x8x1024xf32>
    %193 = vector.shape_cast %192 : vector<1x8x1024xf32> to vector<8x1024xf32>
    %194 = vector.shape_cast %191 : vector<8x1024xf32> to vector<1x8x1024xf32>
    tpu.vector_store %arg26[%c0_93, %c0_94, %c0_95], %194 {strides = array<i32>} : memref<1x8x1024xf32, #tpu.memory_space<vmem>>, vector<1x8x1024xf32>,
    return
  }
  func.func @transform_0(%arg0: i32, %arg1: i32) -> (i32, i32, i32) {
    %c0_i32 = arith.constant 0 : i32
    %c0_i32_0 = arith.constant 0 : i32
    return %arg0, %arg1, %c0_i32 : i32, i32, i32
  }
  func.func @transform_1(%arg0: i32, %arg1: i32) -> (i32, i32, i32) {
    %c0_i32 = arith.constant 0 : i32
    %c0_i32_0 = arith.constant 0 : i32
    return %arg0, %arg1, %c0_i32 : i32, i32, i32
  }
  func.func @transform_2(%arg0: i32, %arg1: i32) -> (i32, i32, i32) {
    %c0_i32 = arith.constant 0 : i32
    %c0_i32_0 = arith.constant 0 : i32
    %c0_i32_1 = arith.constant 0 : i32
    return %arg0, %c0_i32, %c0_i32_0 : i32, i32, i32
  }
  func.func @transform_3(%arg0: i32, %arg1: i32) -> (i32, i32, i32) {
    %c0_i32 = arith.constant 0 : i32
    %c0_i32_0 = arith.constant 0 : i32
    %c0_i32_1 = arith.constant 0 : i32
    return %arg0, %c0_i32, %c0_i32_0 : i32, i32, i32
  }
  func.func @transform_4(%arg0: i32, %arg1: i32) -> (i32, i32, i32) {
    %c0_i32 = arith.constant 0 : i32
    %c0_i32_0 = arith.constant 0 : i32
    return %arg0, %arg1, %c0_i32 : i32, i32, i32
  }
  func.func @transform_5(%arg0: i32, %arg1: i32) -> (i32, i32, i32) {
    %c0_i32 = arith.constant 0 : i32
    %c0_i32_0 = arith.constant 0 : i32
    %c0_i32_1 = arith.constant 0 : i32
    return %arg0, %c0_i32, %c0_i32_0 : i32, i32, i32
  }
  func.func @transform_6(%arg0: i32, %arg1: i32) -> (i32, i32, i32) {
    %c0_i32 = arith.constant 0 : i32
    %c0_i32_0 = arith.constant 0 : i32
    return %arg0, %arg1, %c0_i32 : i32, i32, i32
  }
  func.func @transform_7(%arg0: i32, %arg1: i32) -> (i32, i32, i32) {
    %c0_i32 = arith.constant 0 : i32
    %c0_i32_0 = arith.constant 0 : i32
    return %arg0, %arg1, %c0_i32 : i32, i32, i32
  }
  func.func @transform_8(%arg0: i32, %arg1: i32) -> (i32, i32, i32) {
    %c0_i32 = arith.constant 0 : i32
    %c0_i32_0 = arith.constant 0 : i32
    return %arg0, %arg1, %c0_i32 : i32, i32, i32
  }
  func.func @transform_9(%arg0: i32, %arg1: i32) -> (i32, i32, i32) {
    %c0_i32 = arith.constant 0 : i32
    %c0_i32_0 = arith.constant 0 : i32
    return %arg0, %arg1, %c0_i32 : i32, i32, i32
  }
  func.func @transform_10(%arg0: i32, %arg1: i32) -> (i32, i32, i32) {
    %c0_i32 = arith.constant 0 : i32
    %c0_i32_0 = arith.constant 0 : i32
    %c0_i32_1 = arith.constant 0 : i32
    return %arg0, %c0_i32, %c0_i32_0 : i32, i32, i32
  }
  func.func @transform_11(%arg0: i32, %arg1: i32) -> (i32, i32, i32) {
    %c0_i32 = arith.constant 0 : i32
    %c0_i32_0 = arith.constant 0 : i32
    %c0_i32_1 = arith.constant 0 : i32
    return %arg0, %c0_i32, %c0_i32_0 : i32, i32, i32
  }
  func.func @transform_12(%arg0: i32, %arg1: i32) -> (i32, i32, i32) {
    %c0_i32 = arith.constant 0 : i32
    %c0_i32_0 = arith.constant 0 : i32
    %c0_i32_1 = arith.constant 0 : i32
    return %arg0, %c0_i32, %c0_i32_0 : i32, i32, i32
  }
  func.func @transform_13(%arg0: i32, %arg1: i32) -> (i32, i32, i32) {
    %c0_i32 = arith.constant 0 : i32
    %c0_i32_0 = arith.constant 0 : i32
    %c0_i32_1 = arith.constant 0 : i32
    return %arg0, %c0_i32, %c0_i32_0 : i32, i32, i32
  }
  func.func @transform_14(%arg0: i32, %arg1: i32) -> (i32, i32, i32) {
    %c0_i32 = arith.constant 0 : i32
    %c0_i32_0 = arith.constant 0 : i32
    %c0_i32_1 = arith.constant 0 : i32
    return %arg0, %c0_i32, %c0_i32_0 : i32, i32, i32
  }
  func.func @transform_15(%arg0: i32, %arg1: i32) -> (i32, i32, i32) {
    %c0_i32 = arith.constant 0 : i32
    %c0_i32_0 = arith.constant 0 : i32
    %c0_i32_1 = arith.constant 0 : i32
    return %arg0, %c0_i32, %c0_i32_0 : i32, i32, i32
  }
  func.func @transform_16(%arg0: i32, %arg1: i32) -> (i32, i32) {
    %c0_i32 = arith.constant 0 : i32
    %c0_i32_0 = arith.constant 0 : i32
    %c0_i32_1 = arith.constant 0 : i32
    return %c0_i32, %c0_i32_0 : i32, i32
  }
  func.func @transform_17(%arg0: i32, %arg1: i32) -> (i32, i32) {
    %c0_i32 = arith.constant 0 : i32
    %c0_i32_0 = arith.constant 0 : i32
    %c0_i32_1 = arith.constant 0 : i32
    return %c0_i32, %c0_i32_0 : i32, i32
  }
  func.func @transform_18(%arg0: i32, %arg1: i32) -> (i32, i32) {
    %c0_i32 = arith.constant 0 : i32
    %c0_i32_0 = arith.constant 0 : i32
    %c0_i32_1 = arith.constant 0 : i32
    return %c0_i32, %c0_i32_0 : i32, i32
  }
  func.func @transform_19(%arg0: i32, %arg1: i32) -> (i32, i32) {
    %c0_i32 = arith.constant 0 : i32
    %c0_i32_0 = arith.constant 0 : i32
    %c0_i32_1 = arith.constant 0 : i32
    return %c0_i32, %c0_i32_0 : i32, i32
  }
  func.func @transform_20(%arg0: i32, %arg1: i32) -> (i32, i32) {
    %c0_i32 = arith.constant 0 : i32
    %c0_i32_0 = arith.constant 0 : i32
    %c0_i32_1 = arith.constant 0 : i32
    return %c0_i32, %c0_i32_0 : i32, i32
  }
  func.func @transform_21(%arg0: i32, %arg1: i32) -> (i32, i32) {
    %c0_i32 = arith.constant 0 : i32
    %c0_i32_0 = arith.constant 0 : i32
    %c0_i32_1 = arith.constant 0 : i32
    return %c0_i32, %c0_i32_0 : i32, i32
  }
  func.func @transform_22(%arg0: i32, %arg1: i32) -> (i32, i32, i32) {
    %c0_i32 = arith.constant 0 : i32
    %c0_i32_0 = arith.constant 0 : i32
    return %arg0, %arg1, %c0_i32 : i32, i32, i32
  }
  func.func @transform_23(%arg0: i32, %arg1: i32) -> (i32, i32, i32, i32) {
    %c0_i32 = arith.constant 0 : i32
    %c0_i32_0 = arith.constant 0 : i32
    %c0_i32_1 = arith.constant 0 : i32
    return %arg0, %c0_i32, %arg1, %c0_i32_0 : i32, i32, i32, i32
  }
  func.func @transform_24(%arg0: i32, %arg1: i32) -> (i32, i32, i32) {
    %c0_i32 = arith.constant 0 : i32
    %c0_i32_0 = arith.constant 0 : i32
    return %arg0, %c0_i32, %arg1 : i32, i32, i32
  }
  func.func @transform_25(%arg0: i32, %arg1: i32) -> (i32, i32, i32) {
    %c0_i32 = arith.constant 0 : i32
    %c0_i32_0 = arith.constant 0 : i32
    return %arg0, %arg1, %c0_i32 : i32, i32, i32
  }
}

</mosaic_0001>

<bundles_post_ra>
// kernel: tpu_custom_call.1
= control target key start
LH: loop header
LB: loop body
LE: loop exit
PB: predicated region body
PF: predicated region fallthrough
CT: control target
= control target key end

     0   :  { %s16761_s0 = inlined_call_operand.vmem [shape: f32[2,8,3], index: 0, kind: input, shape index: {}]   ;;  %s16762_s1 = inlined_call_operand.vmem [shape: f32[2,8,3], index: 1, kind: input, shape index: {}]   ;;  %s16763_s2 = inlined_call_operand.vmem [shape: f32[2,3,128], index: 2, kind: input, shape index: {}]   ;;  %s16764_s3 = inlined_call_operand.vmem [shape: f32[2,3,128], index: 3, kind: input, shape index: {}]   ;;  %s16765_s4 = inlined_call_operand.vmem [shape: f32[2,8,1], index: 4, kind: input, shape index: {}]   ;;  %s16766_s5 = inlined_call_operand.vmem [shape: f32[2,1,128], index: 5, kind: input, shape index: {}]   ;;  %s16767_s6 = inlined_call_operand.vmem [shape: f32[2,8,128], index: 6, kind: input, shape index: {}]   ;;  %s16768_s7 = inlined_call_operand.vmem [shape: f32[2,8,128], index: 7, kind: input, shape index: {}]   ;;  %s16769_s8 = inlined_call_operand.vmem [shape: f32[2,8,128], index: 8, kind: input, shape index: {}]   ;;  %s16770_s9 = inlined_call_operand.vmem [shape: f32[2,8,128], index: 9, kind: input, shape index: {}]   ;;  %s16771_s10 = inlined_call_operand.vmem [shape: f32[2,1,128], index: 10, kind: input, shape index: {}]   ;;  %s16772_s11 = inlined_call_operand.vmem [shape: f32[2,1,128], index: 11, kind: input, shape index: {}]   ;;  %s16773_s12 = inlined_call_operand.vmem [shape: f32[2,1,128], index: 12, kind: input, shape index: {}]   ;;  %s16774_s13 = inlined_call_operand.vmem [shape: f32[2,1,128], index: 13, kind: input, shape index: {}]   ;;  %s16775_s14 = inlined_call_operand.vmem [shape: f32[2,1,128], index: 14, kind: input, shape index: {}]   ;;  %s16776_s15 = inlined_call_operand.vmem [shape: f32[2,1,128], index: 15, kind: input, shape index: {}]   ;;  %s16777_s16 = inlined_call_operand.vmem [shape: bf16[128,128], index: 16, kind: input, shape index: {}]   ;;  %s16778_s17 = inlined_call_operand.vmem [shape: f32[1,128], index: 17, kind: input, shape index: {}]   ;;  %s16779_s18 = inlined_call_operand.vmem [shape: bf16[8,128], index: 18, kind: input, shape index: {}]   ;;  %s16780_s19 = inlined_call_operand.vmem [shape: f32[8,1], index: 19, kind: input, shape index: {}]   ;;  %s16781_s20 = inlined_call_operand.vmem [shape: bf16[128,64], index: 20, kind: input, shape index: {}]   ;;  %s16782_s21 = inlined_call_operand.vmem [shape: f32[1,64], index: 21, kind: input, shape index: {}]   ;;  %s16783_s22 = inlined_call_operand.hbm [shape: f32[2,8,128], index: 22, kind: output, shape index: {0}]   ;;  %s16784_s23 = inlined_call_operand.hbm [shape: f32[2,3,8,128], index: 23, kind: output, shape index: {1}]   ;;  %s16785_s24 = inlined_call_operand.hbm [shape: f32[2,8,1024], index: 24, kind: output, shape index: {2}]   ;;  %s16786_s25 = inlined_call_operand.hbm [shape: f32[2,8,64], index: 25, kind: output, shape index: {3}]  }
   0x1   :  { %17067 = sst [smem:[#allocation326_spill]] %s16761_s0 }
   0x2   :  { %17068 = sst [smem:[#allocation327_spill]] %s16762_s1 }
   0x3   :  { %17069 = sst [smem:[#allocation328_spill]] %s16763_s2 }
   0x4   :  { %17070 = sst [smem:[#allocation329_spill]] %s16764_s3 }
   0x5   :  { %17071 = sst [smem:[#allocation330_spill]] %s16765_s4 }
   0x6   :  { %17072 = sst [smem:[#allocation331_spill]] %s16766_s5 }
   0x7   :  { %17073 = sst [smem:[#allocation332_spill]] %s16767_s6 }
   0x8   :  { %17074 = sst [smem:[#allocation333_spill]] %s16768_s7 }
   0x9   :  { %17075 = sst [smem:[#allocation334_spill]] %s16769_s8 }
   0xa   :  { %17076 = sst [smem:[#allocation335_spill]] %s16770_s9 }
   0xb   :  { %17077 = sst [smem:[#allocation336_spill]] %s16771_s10 }
   0xc   :  { %17078 = sst [smem:[#allocation337_spill]] %s16772_s11 }
   0xd   :  { %17079 = sst [smem:[#allocation338_spill]] %s16773_s12 }
   0xe   :  { %17080 = sst [smem:[#allocation339_spill]] %s16774_s13 }
   0xf   :  { %17081 = sst [smem:[#allocation340_spill]] %s16775_s14 }
  0x10   :  { %17082 = sst [smem:[#allocation341_spill]] %s16783_s22 }
  0x11   :  { %17083 = sst [smem:[#allocation342_spill]] %s16784_s23 }
  0x12   :  { %17084 = sst [smem:[#allocation343_spill]] %s16785_s24 }
  0x13   :  { %17085 = sst [smem:[#allocation344_spill]] %s16786_s25 }
  0x14   :  { %31 = vsyncpa [#allocation3], 0 }
  0x15   :  { %33 = vsyncpa [#allocation3 + $0x1], 0 }
  0x16   :  { %34 = vsyncpa [#allocation5], 0 }
  0x17   :  { %36 = vsyncpa [#allocation5 + $0x1], 0 }
  0x18   :  { %37 = vsyncpa [#allocation8], 0 }
  0x19   :  { %39 = vsyncpa [#allocation8 + $0x1], 0  ;;  %s10197_s29 = smov 0   ;;  %s10199_s2 = smov 0  }
  0x1a   :  { %s10201_s6 = smov 0   ;;  %s10203_s30 = smov 0  }
  0x1b   :  { %s10205_s7 = smov 0   ;;  %s10207_s3 = smov 0  }
  0x1c LB: > { %17086 = sst [smem:[#allocation12_spill]] %s10034_s29  ;;  %s16788_s26 = sadd.s32 4294967295, %s10054_s3   ;;  %s10054_s3 = sphi %s10207_s3, %s45_s3   ;;  %s10050_s7 = sphi %s10205_s7, %s18512_s7   ;;  %s10046_s30 = sphi %s10203_s30, %s18511_s30   ;;  %s10042_s6 = sphi %s10201_s6, %s18510_s6   ;;  %s10038_s2 = sphi %s10199_s2, %s18514_s2   ;;  %s10034_s29 = sphi %s10197_s29, %s18513_s29  }
  0x1d   : > { %17087 = sst [smem:[#allocation13_spill]] %s10042_s6  ;;  %s16787_s1 = sadd.s32 4294967294, %s10054_s3  }
  0x1e   : > { %17088 = sst [smem:[#allocation14_spill]] %s10050_s7  ;;  %s57_s8 = sadd.s32 1, %s10050_s7 }
  0x1f   : > { %s622_s27 = sadd.s32 1, %s10042_s6  ;;  %p59_p0 = scmp.ge.s32.totalorder %s57_s8, 2 }
  0x20   : > { %p632_p1 = scmp.ne.s32.totalorder %s10042_s6, %s10038_s2  ;;  %p633_p2 = scmp.eq.s32.totalorder %s16788_s26, 1 }
  0x21   : > { %p638_p3 = scmp.ne.s32.totalorder %s10038_s2, %s10034_s29  ;;  %s18516_s8 = smov (%p59_p0, %s57_s8), 0 }
  0x22   : > { %17089 = sst [smem:[#allocation15_spill]] %s18516_s8  ;;  %p10239_p4 = por %p633_p2, %p632_p1 }
  0x23   : > { %p639_p5 = scmp.eq.s32.totalorder %s16787_s1, 1  ;;  %s617_s28 = ssub.s32 %s10050_s7, %s18516_s8 }
  0x24   : > { %s17090_s4 = scalar_select %p10239_p4, 1, 0 }
  0x25   : > { %p8138_p6 = scmp.ge.s32.totalorder %s10054_s3, 1  ;;  %p620_p7 = scmp.eq.s32.totalorder %s617_s28, 0 }
  0x26   : > { %17091 = sst [smem:[#allocation16_spill]] %s17090_s4  ;;  %p10248_p8 = por %p639_p5, %p638_p3 }
  0x27   : > { %p885_p9 = scmp.lt.s32.totalorder %s10054_s3, 3 }
  0x28   : > { %s17092_s9 = scalar_select %p10248_p8, 1, 0 }
  0x29   : > { %s10254_s5 = scalar_select %p620_p7, %s10042_s6, %s622_s27  }
  0x2a   : > { %17093 = sst [smem:[#allocation17_spill]] %s17092_s9  ;;  %p886_p10 = pnand %p8138_p6, %p885_p9 }
  0x2b   : > { %17094 = sst [smem:[#allocation18_spill]] %s10254_s5 }
  0x2c   : > { %889 = sbr.rel (%p886_p10) target bundleno = 1877 (0x755), region = 108 }
  0x33   : > { %p1041_p11 = scmp.lt.s32.totalorder %s10046_s30, 1  ;;  %v10056_v0 = vmov 2   ;;  %v10057_v1 = vmov 1   ;;  %s17095_s27 = sld [smem:[#allocation326_spill]]  ;;  %v10058_v5 = vmov 0   ;;  %v1126_v9 = vlaneseq  ;;  %v8796_v45 = vld [vmem:[%s16777_s16] sm:$0xff]  }
  0x34   : > { %8792 = vset.pattern.permute.xlu1 %v10056_v0  ;;  %8791 = vset.pattern.permute.xlu0 %v10057_v1  ;;  %s17096_s6 = sld [smem:[#allocation331_spill]]  ;;  %s17097_s25 = sld [smem:[#allocation327_spill]]  ;;  %v8797_v48 = vld [vmem:[%s16777_s16 + $0x8] sm:$0xff]   ;;  %v17106_v49 = vmov 0  ;;  %v8798_v58 = vld [vmem:[%s16777_s16 + $0x10] sm:$0xff]   ;;  %vm10060_vm9 = vmmov 0  }
  0x35   : > { %s10258_s0 = scalar_select %p1041_p11, %s10046_s30, 1  ;;  %v10283_v10 = vshrl.u32 %v1126_v9, 7  ;;  %8696 = vmatprep.subr.bf16.mxu1 %v8796_v45  ;;  %vm4688_vm10 = vcmask 1041409   ;;  %vm4690_vm11 = vcmask 1042434   ;;  %vm4692_vm12 = vcmask 1043459  }
  0x36   : > { %s17098_s1 = sld [smem:[#allocation330_spill]]  ;;  %8704 = vmatpush3.bf16.msra.mxu1 %v8796_v45  ;;  %s17109_s7 = sld [smem:[#allocation333_spill]]  ;;  %vm4694_vm13 = vcmask 1044484   ;;  %vm4696_vm14 = vcmask 1045509   ;;  %vm4698_vm15 = vcmask 1046534  }
  0x37   : > { %s10261_s28 = sshll.u32 %s10258_s0, 3  ;;  %v10292_v11 = vsub.s32 1, %v10283_v10  ;;  %v10295_v13 = vsub.s32 2, %v10283_v10  ;;  %v10298_v15 = vsub.s32 0, %v10283_v10  ;;  %8697 = vmatprep.subr.bf16.mxu1 %v8797_v48  ;;  %v1444_v63 = vsub.s32 3, %v10283_v10  ;;  %s17116_s10 = sld [smem:[#allocation336_spill]] }
  0x38   : > { %s17117_s11 = sld [smem:[#allocation337_spill]]  ;;  %s17118_s12 = sld [smem:[#allocation338_spill]] }
  0x39   : > { %s1047_s8 = scalar_lea.vmem %s17095_s27, %s10261_s28  ;;  %17101 = vst [vmem:[#allocation19_spill] sm:$0xff] %v10298_v15  ;;  %s17110_s27 = sld [smem:[#allocation334_spill]] }
  0x3a   : > { %v1137_v2 = vld [vmem:[%s1047_s8] sm:$0xff]  ;;  %s10271_s9 = scalar_lea.vmem %s17096_s6, %s10258_s0  ;;  %s1054_s22 = scalar_lea.vmem %s17097_s25, %s10261_s28  ;;  %8705 = vmatpush3.bf16.msra.mxu1 %v8797_v48 }
  0x3b   : > { %1159 = vperm.xlu1 %8792, %v1137_v2   ;;  %1150 = vperm.xlu0 %8791, %v1137_v2   ;;  %v1122_v3 = vld [vmem:[%s10271_s9] sm:$0x1]  ;;  %s17099_s25 = sld [smem:[#allocation328_spill]]  ;;  %s17100_s8 = sld [smem:[#allocation329_spill]] }
  0x3c   : > { %v1180_v4 = vld [vmem:[%s1054_s22] sm:$0xff]  ;;  %s1069_s4 = scalar_lea.vmem %s17098_s1, %s10261_s28  ;;  %vm1123_vm0 = vcmp.gt.f32.partialorder %v1122_v3, 0.5  ;;  %s8144_s22 = sshll.u32 %s10258_s0, 2  ;;  %8698 = vmatprep.subr.bf16.mxu1 %v8798_v58  ;;  %v1645_v3 = vsub.s32 6, %v10283_v10 }
  0x3d   : > { %v1121_v6 = vld [vmem:[%s1069_s4] sm:$0xff]  ;;  %v1125_v7 = vsel %vm1123_vm0, 1, %v10058_v5  ;;  %s17155_s13 = sld [smem:[#allocation339_spill]]  ;;  %s17158_s14 = sld [smem:[#allocation340_spill]]  ;;  %vm4700_vm0 = vcmask 1047559  }
  0x3e   : > { %vm1124_vm1 = vcmp.gt.f32.partialorder %v1121_v6, 0.5  ;;  %v1129_v46 = vrot.slane %v1125_v7, %v10298_v15  ;;  %8706 = vmatpush3.bf16.msra.mxu1 %v8798_v58  ;;  %s10495_s6 = scalar_lea.vmem %s17117_s11, %s10258_s0 }
  0x3f   : > { %8793 = vset.pattern.permute.xlu1 %v10058_v5  ;;  %1193 = vperm.xlu0 %8791, %v1180_v4   ;;  %v1131_v8 = vsel %vm1124_vm1, 1, %v10058_v5  ;;  %s1093_s26 = scalar_lea.vmem %s17110_s27, %s10261_s28 }
  0x40   : > { %1184 = vperm.xlu1 %8793, %v1180_v4   ;;  %vm10329_vm2 = vcmp.eq.s32.totalorder %v1129_v46, 1  ;;  %v2691_v62 = vld [vmem:[%s1093_s26] sm:$0xff] }
  0x41   : > { %s1058_s29 = scalar_lea.vmem %s17099_s25, %s8144_s22  ;;  %s1062_s4 = scalar_lea.vmem %s17100_s8, %s8144_s22  ;;  %v17107_v49 = vsel %vm10329_vm2, 4294967295, %v17106_v49 }
  0x42   : > { %v1138_v16 = vld [vmem:[%s1058_s29] sm:$0x7]  ;;  %s17105_s22 = sld [smem:[#allocation332_spill]]  ;;  %17108 = vst [vmem:[#allocation23_spill] sm:$0xff] %v17107_v49  ;;  %s1086_s8 = scalar_lea.vmem %s17109_s7, %s10261_s28 }
  0x43   : > { %8794 = vset.pattern.permute.xlu0 %v10058_v5  ;;  %v1181_v17 = vld [vmem:[%s1062_s4] sm:$0x7]  ;;  %v1156_v18 = vrot.slane %v1138_v16, %v10292_v11  ;;  %v1165_v19 = vrot.slane %v1138_v16, %v10295_v13  ;;  %v1147_v24 = vrot.slane %v1138_v16, %v10298_v15  ;;  %s17114_s25 = sld [smem:[#allocation335_spill]]  ;;  %s10533_s4 = scalar_lea.vmem %s17118_s12, %s10258_s0 }
  0x44   : > { %1133 = vperm.xlu1 %8793, %v1131_v8   ;;  %1141 = vperm.xlu0 %8794, %v1137_v2   ;;  %v1199_v21 = vrot.slane %v1181_v17, %v10292_v11  ;;  %v1190_v22 = vrot.slane %v1181_v17, %v10298_v15  ;;  %v1208_v32 = vrot.slane %v1181_v17, %v10295_v13  ;;  %v1235_v59 = vld [vmem:[%s1086_s8] sm:$0xff]  ;;  %v1511_v2 = vsub.s32 4, %v10283_v10  ;;  %s10782_s26 = scalar_lea.vmem %s17155_s13, %s10258_s0  ;;  %s13164_s7 = sand.u32 1, %s10038_s2  }
  0x45   : > { %s17066_s8 = sshll.u32 %s13164_s7, 3  ;;  %s8712_s1 = smul.u32 24, %s13164_s7 }
  0x46   : > { %s13200_s5 = scalar_lea.vmem [#allocation2], %s17066_s8 }
  0x48   : > { %8795 = vset.pattern.permute.xlu1 %v10056_v0  ;;  %s1079_s23 = scalar_lea.vmem %s17105_s22, %s10261_s28  ;;  %s14014_s22 = scalar_lea.vmem [#allocation4], %s8712_s1 }
  0x49   : > { %1202 = vperm.xlu1 %8795, %v1180_v4   ;;  %v1234_v53 = vld [vmem:[%s1079_s23] sm:$0xff]  ;;  %s1100_s29 = scalar_lea.vmem %s17114_s25, %s10261_s28  ;;  %v1712_v4 = vsub.s32 7, %v10283_v10  ;;  %s10489_s25 = scalar_lea.vmem %s17116_s10, %s10258_s0 }
  0x4a   : > { %v2692_v8 = vld [vmem:[%s1100_s29] sm:$0xff]  ;;  %s10801_s23 = scalar_lea.vmem %s17158_s14, %s10258_s0  ;;  %s10969_s29 = scalar_lea.vmem %s16776_s15, %s10258_s0 }
  0x4b   : > { %s18496_s1 = sadd.s32 4294967295, %s10054_s3   ;;  %s7754_s24 = sshll.u32 %s14014_s22, 4  ;;  %s16607_s24 = int_to_ptr.vmem [resolvable:$true] %s7754_s24 }
  0x4c   : > { %s18497_s28 = sld [smem:[#allocation342_spill]]  ;;  %s9884_s27 = scalar_lea.vmem %s16607_s24, 384 }
  0x4d   : > { %p9885_p12 = scmp.ne.s32.totalorder %s16607_s24, %s9884_s27 }
  0x4f   : > { %p9886_p13 = pnand %p9885_p12, %p10239_p4 }
  0x51   : > { %p9887_p0 = pneg %p9886_p13 }
  0xba   : > { %v1151_v12 = vpop.permute.xlu0 %1150  ;;  %v1160_v14 = vpop.permute.xlu1 %1159 }
  0xbb   : > { %v10305_v25 = vsub.f32 %v1151_v12, %v1156_v18  ;;  %v10307_v26 = vsub.f32 %v1160_v14, %v1165_v19  ;;  %v8799_v12 = vld [vmem:[%s16777_s16 + $0x18] sm:$0xff]  }
  0xbc   : > { %8699 = vmatprep.subr.bf16.mxu1 %v8799_v12 }
  0xbd   : > { %17102 = vst [vmem:[#allocation20_spill] sm:$0xff] %v10305_v25  ;;  %17103 = vst [vmem:[#allocation21_spill] sm:$0xff] %v10307_v26  ;;  %v1168_v33 = vmul.f32 %v10305_v25, %v10305_v25  ;;  %v1170_v34 = vmul.f32 %v10307_v26, %v10307_v26  ;;  %8707 = vmatpush3.bf16.msra.mxu1 %v8799_v12 }
  0xbe   : > { %v1194_v20 = vpop.permute.xlu0 %1193 }
  0xbf   : > { %v1185_v23 = vpop.permute.xlu1 %1184  ;;  %v1200_v27 = vsub.f32 %v1194_v20, %v1199_v21  ;;  %v1578_v20 = vsub.s32 5, %v10283_v10  ;;  %v8800_v21 = vld [vmem:[%s16777_s16 + $0x20] sm:$0xff]   ;;  %v8801_v10 = vld [vmem:[%s16777_s16 + $0x28] sm:$0xff]  }
  0xc0   : > { %v1191_v28 = vsub.f32 %v1185_v23, %v1190_v22  ;;  %8700 = vmatprep.subr.bf16.mxu1 %v8800_v21 }
  0xc1   : > { %v1211_v36 = vmul.f32 %v1200_v27, %v1200_v27  ;;  %8708 = vmatpush3.bf16.msra.mxu1 %v8800_v21 }
  0xc2   : > { %v1210_v37 = vmul.f32 %v1191_v28, %v1191_v28  ;;  %8701 = vmatprep.subr.bf16.mxu1 %v8801_v10 }
  0xc3   : > { %v1142_v29 = vpop.permute.xlu0 %1141  ;;  %v1134_v30 = vpop.permute.xlu1 %1133 }
  0xc4   : > { %v10309_v31 = vsub.f32 %v1142_v29, %v1147_v24  ;;  %v1212_v42 = vadd.f32 %v1211_v36, %v1210_v37  ;;  %vm1135_vm3 = vcmp.eq.s32.totalorder %v1134_v30, 1  ;;  %v8802_v29 = vld [vmem:[%s16777_s16 + $0x30] sm:$0xff]   ;;  %v8803_v30 = vld [vmem:[%s16777_s16 + $0x38] sm:$0xff]  }
  0xc5   : > { %vm10343_vm6 = vmor %vm10329_vm2, %vm1135_vm3  ;;  %8709 = vmatpush3.bf16.msra.mxu1 %v8801_v10 }
  0xc6   : > { %17104 = vst [vmem:[#allocation22_spill] sm:$0xff] %v10309_v31  ;;  %v1167_v35 = vmul.f32 %v10309_v31, %v10309_v31  ;;  %8702 = vmatprep.subr.bf16.mxu1 %v8802_v29 }
  0xc8   : > { %v1169_v38 = vadd.f32 %v1168_v33, %v1167_v35  ;;  %v1203_v39 = vpop.permute.xlu1 %1202 }
  0xc9   : > { %v1209_v40 = vsub.f32 %v1203_v39, %v1208_v32  ;;  %8710 = vmatpush3.bf16.msra.mxu1 %v8802_v29 }
  0xca   : > { %v1171_v41 = vadd.f32 %v1170_v34, %v1169_v38  ;;  %8703 = vmatprep.subr.bf16.mxu1 %v8803_v30 }
  0xcb   : > { %v1213_v43 = vmul.f32 %v1209_v40, %v1209_v40 }
  0xcc   : > { %8812 = vrsqrt.f32 %v1171_v41  ;;  %vm1174_vm4 = vcmp.eq.f32.partialorder %v1171_v41, inf  ;;  %v1177_v51 = vand.u32 2147483648, %v1171_v41  ;;  %vm1176_vm5 = vcmp.eq.f32.partialorder %v1171_v41, 0.0 }
  0xcd   : > { %v1214_v44 = vadd.f32 %v1213_v43, %v1212_v42  ;;  %8711 = vmatpush3.bf16.msra.mxu1 %v8803_v30 }
  0xcf   : > { %8814 = vrsqrt.f32 %v1214_v44  ;;  %vm1217_vm7 = vcmp.eq.f32.partialorder %v1214_v44, inf  ;;  %v1220_v61 = vand.u32 2147483648, %v1214_v44  ;;  %vm1219_vm8 = vcmp.eq.f32.partialorder %v1214_v44, 0.0 }
  0xd6   : > { %v8813_v47 = vpop.eup %8812 }
  0xd7   : > { %v1173_v50 = vmul.f32 %v8813_v47, %v1171_v41 }
  0xd9   : > { %v8815_v52 = vpop.eup %8814  ;;  %v1175_v54 = vsel %vm1174_vm4, %v1171_v41, %v1173_v50 }
  0xda   : > { %v1178_v56 = vsel %vm1176_vm5, %v1177_v51, %v1175_v54  ;;  %v1216_v57 = vmul.f32 %v8815_v52, %v1214_v44 }
  0xdb   : > { %v10352_v60 = vsel %vm10343_vm6, 1.0, %v1178_v56 }
  0xdc   : > { %17113 = vst [vmem:[#allocation24_spill] sm:$0xff] %v10352_v60  ;;  %v1236_v0 = vmul.f32 %v1234_v53, %v10352_v60  ;;  %v1218_v1 = vsel %vm1217_vm7, %v1214_v44, %v1216_v57 }
  0xdd   : > { %v1221_v5 = vsel %vm1219_vm8, %v1220_v61, %v1218_v1 }
  0xde   : > { %v10363_v6 = vadd.f32 %v1236_v0, %v1235_v59  ;;  %v1222_v7 = vsel %vm10343_vm6, 1.0, %v1221_v5 }
  0xdf   : > { %v2693_v9 = vmul.f32 %v2691_v62, %v1222_v7 }
  0xe0   : > { %v10371_v14 = vrot.slane %v10363_v6, %v1444_v63  ;;  %v10374_v16 = vrot.slane %v10363_v6, %v1511_v2  ;;  %v10377_v17 = vrot.slane %v10363_v6, %v1645_v3  ;;  %v10380_v18 = vrot.slane %v10363_v6, %v1712_v4 }
  0xe1   : > { %v2694_v19 = vadd.f32 %v2693_v9, %v2692_v8  ;;  %v10418_v32 = vrot.slane %v10363_v6, %v1578_v20  ;;  %v10428_v33 = vrot.slane %v10363_v6, %v10298_v15  ;;  %v10434_v34 = vrot.slane %v10363_v6, %v10292_v11 }
  0xe2   : > { %17115 = vst [vmem:[#allocation25_spill] sm:$0xff] %v10371_v14  ;;  %1534 = vbcast.lane.b32.xlu1 %v10374_v16, 296  ;;  %1530 = vbcast.lane.b32.xlu0 %v10374_v16, 288  ;;  %v10452_v37 = vrot.slane %v10363_v6, %v10295_v13 }
  0xe3   : > { %v10388_v22 = vrot.slane %v2694_v19, %v1444_v63  ;;  %v10390_v23 = vrot.slane %v2694_v19, %v1511_v2  ;;  %v10392_v24 = vrot.slane %v2694_v19, %v1578_v20  ;;  %v10394_v27 = vrot.slane %v2694_v19, %v1645_v3 }
  0xe4   : > { %v10396_v28 = vrot.slane %v2694_v19, %v1712_v4  ;;  %v10441_v35 = vrot.slane %v2694_v19, %v10298_v15  ;;  %v10446_v36 = vrot.slane %v2694_v19, %v10292_v11  ;;  %v10457_v38 = vrot.slane %v2694_v19, %v10295_v13  ;;  %v10498_v11 = vld [vmem:[%s10489_s25] ss:$0 sm:$0xff] }
  0xe5   : > { %v10503_v13 = vld [vmem:[%s10495_s6] ss:$0 sm:$0xff] }
  0xe6   : > { %1542 = vbcast.lane.b32.xlu1 %v10374_v16, 312  ;;  %1538 = vbcast.lane.b32.xlu0 %v10374_v16, 304 }
  0xea   : > { %1550 = vbcast.lane.b32.xlu1 %v10374_v16, 328  ;;  %1546 = vbcast.lane.b32.xlu0 %v10374_v16, 320 }
  0xee   : > { %1558 = vbcast.lane.b32.xlu1 %v10374_v16, 344  ;;  %1554 = vbcast.lane.b32.xlu0 %v10374_v16, 336 }
  0xf2   : > { %1566 = vbcast.lane.b32.xlu1 %v10374_v16, 360  ;;  %1562 = vbcast.lane.b32.xlu0 %v10374_v16, 352 }
  0xf6   : > { %1574 = vbcast.lane.b32.xlu1 %v10374_v16, 376  ;;  %1570 = vbcast.lane.b32.xlu0 %v10374_v16, 368 }
  0xfa   : > { %1585 = vbcast.lane.b32.xlu1 %v10418_v32, 264  ;;  %1581 = vbcast.lane.b32.xlu0 %v10418_v32, 256 }
  0xfe   : > { %1593 = vbcast.lane.b32.xlu1 %v10418_v32, 280  ;;  %1589 = vbcast.lane.b32.xlu0 %v10418_v32, 272 }
 0x102   : > { %1601 = vbcast.lane.b32.xlu1 %v10418_v32, 296  ;;  %1597 = vbcast.lane.b32.xlu0 %v10418_v32, 288 }
 0x106   : > { %1250 = vbcast.lane.b32.xlu1 %v10428_v33, 264  ;;  %1246 = vbcast.lane.b32.xlu0 %v10428_v33, 256 }
 0x10a   : > { %1317 = vbcast.lane.b32.xlu1 %v10434_v34, 264  ;;  %1313 = vbcast.lane.b32.xlu0 %v10434_v34, 256 }
 0x10e   : > { %1609 = vbcast.lane.b32.xlu1 %v10418_v32, 312  ;;  %1605 = vbcast.lane.b32.xlu0 %v10418_v32, 304 }
 0x112   : > { %2707 = vbcast.lane.b32.xlu1 %v10441_v35, 264  ;;  %2703 = vbcast.lane.b32.xlu0 %v10441_v35, 256 }
 0x116   : > { %2774 = vbcast.lane.b32.xlu1 %v10446_v36, 264  ;;  %2770 = vbcast.lane.b32.xlu0 %v10446_v36, 256 }
 0x11a   : > { %1384 = vbcast.lane.b32.xlu1 %v10452_v37, 264  ;;  %1380 = vbcast.lane.b32.xlu0 %v10452_v37, 256 }
 0x11e   : > { %2841 = vbcast.lane.b32.xlu1 %v10457_v38, 264  ;;  %2837 = vbcast.lane.b32.xlu0 %v10457_v38, 256 }
 0x122   : > { %1321 = vbcast.lane.b32.xlu1 %v10434_v34, 272  ;;  %1254 = vbcast.lane.b32.xlu0 %v10428_v33, 272 }
 0x126   : > { %1451 = vbcast.lane.b32.xlu1 %v10371_v14, 264  ;;  %1447 = vbcast.lane.b32.xlu0 %v10371_v14, 256 }
 0x12a   : > { %2778 = vbcast.lane.b32.xlu1 %v10446_v36, 272  ;;  %2711 = vbcast.lane.b32.xlu0 %v10441_v35, 272 }
 0x12e   : > { %2908 = vbcast.lane.b32.xlu1 %v10388_v22, 264  ;;  %2904 = vbcast.lane.b32.xlu0 %v10388_v22, 256 }
 0x132   : > { %1514 = vbcast.lane.b32.xlu1 %v10374_v16, 256  ;;  %1388 = vbcast.lane.b32.xlu0 %v10452_v37, 272 }
 0x136   : > { %2845 = vbcast.lane.b32.xlu1 %v10457_v38, 272  ;;  %1518 = vbcast.lane.b32.xlu0 %v10374_v16, 264 }
 0x13a   : > { %2975 = vbcast.lane.b32.xlu1 %v10390_v23, 264  ;;  %2971 = vbcast.lane.b32.xlu0 %v10390_v23, 256 }
 0x13e   : > { %1325 = vbcast.lane.b32.xlu1 %v10434_v34, 280  ;;  %1258 = vbcast.lane.b32.xlu0 %v10428_v33, 280 }
 0x142   : > { %2715 = vbcast.lane.b32.xlu1 %v10441_v35, 280  ;;  %1455 = vbcast.lane.b32.xlu0 %v10371_v14, 272 }
 0x146   : > { %2912 = vbcast.lane.b32.xlu1 %v10388_v22, 272  ;;  %2782 = vbcast.lane.b32.xlu0 %v10446_v36, 280 }
 0x14a   : > { %3042 = vbcast.lane.b32.xlu1 %v10392_v24, 264  ;;  %3038 = vbcast.lane.b32.xlu0 %v10392_v24, 256 }
 0x14e   : > { %1522 = vbcast.lane.b32.xlu1 %v10374_v16, 272  ;;  %1392 = vbcast.lane.b32.xlu0 %v10452_v37, 280 }
 0x152   : > { %1652 = vbcast.lane.b32.xlu1 %v10377_v17, 264  ;;  %1648 = vbcast.lane.b32.xlu0 %v10377_v17, 256 }
 0x154   : > { %v1535_v39 = vpop.permute.xlu1 %1534  ;;  %v1531_v40 = vpop.permute.xlu0 %1530 }
 0x155   : > { %v1852_v41 = vsub.f32 %v1535_v39, %v10498_v11  ;;  %v1851_v42 = vsub.f32 %v1531_v40, %v10498_v11 }
 0x156   : > { %2979 = vbcast.lane.b32.xlu1 %v10390_v23, 272  ;;  %2849 = vbcast.lane.b32.xlu0 %v10457_v38, 280 }
 0x157   : > { %v1986_v43 = vmul.f32 %v10503_v13, %v1852_v41  ;;  %v1985_v44 = vmul.f32 %v10503_v13, %v1851_v42 }
 0x158   : > { %v1543_v45 = vpop.permute.xlu1 %1542  ;;  %v1539_v46 = vpop.permute.xlu0 %1538 }
 0x159   : > { %v2114_v47 = vmul.f32 -0.5, %v1986_v43  ;;  %v2113_v48 = vmul.f32 -0.5, %v1985_v44  ;;  %v1854_v50 = vsub.f32 %v1543_v45, %v10498_v11  ;;  %v1853_v51 = vsub.f32 %v1539_v46, %v10498_v11 }
 0x15a   : > { %3109 = vbcast.lane.b32.xlu1 %v10394_v27, 264  ;;  %3105 = vbcast.lane.b32.xlu0 %v10394_v27, 256 }
 0x15b   : > { %v2242_v52 = vmul.f32 %v2114_v47, %v1986_v43  ;;  %v2241_v53 = vmul.f32 %v2113_v48, %v1985_v44  ;;  %v1988_v54 = vmul.f32 %v10503_v13, %v1854_v50  ;;  %v1987_v55 = vmul.f32 %v10503_v13, %v1853_v51  ;;  %v10540_v47 = vld [vmem:[%s10533_s4] ss:$0 sm:$0xff] }
 0x15c   : > { %v1551_v56 = vpop.permute.xlu1 %1550  ;;  %v1547_v57 = vpop.permute.xlu0 %1546 }
 0x15d   : > { %v2439_v58 = vmul.f32 1.442695, %v2242_v52  ;;  %v2437_v59 = vmul.f32 1.442695, %v2241_v53  ;;  %v2116_v61 = vmul.f32 -0.5, %v1988_v54  ;;  %v2115_v62 = vmul.f32 -0.5, %v1987_v55 }
 0x15e   : > { %v1856_v63 = vsub.f32 %v1551_v56, %v10498_v11  ;;  %v1855_v0 = vsub.f32 %v1547_v57, %v10498_v11  ;;  %1329 = vbcast.lane.b32.xlu1 %v10434_v34, 288  ;;  %1262 = vbcast.lane.b32.xlu0 %v10428_v33, 288 }
 0x15f   : > { %8816 = vpow2.f32 %v2439_v58  ;;  %v2244_v1 = vmul.f32 %v2116_v61, %v1988_v54  ;;  %v2243_v2 = vmul.f32 %v2115_v62, %v1987_v55 }
 0x160   : > { %8818 = vpow2.f32 %v2437_v59  ;;  %v1990_v3 = vmul.f32 %v10503_v13, %v1856_v63  ;;  %v1989_v4 = vmul.f32 %v10503_v13, %v1855_v0  ;;  %v1559_v5 = vpop.permute.xlu1 %1558  ;;  %v1555_v6 = vpop.permute.xlu0 %1554 }
 0x161   : > { %v2443_v7 = vmul.f32 1.442695, %v2244_v1  ;;  %v2441_v8 = vmul.f32 1.442695, %v2243_v2  ;;  %v1858_v9 = vsub.f32 %v1559_v5, %v10498_v11  ;;  %v1857_v12 = vsub.f32 %v1555_v6, %v10498_v11 }
 0x162   : > { %v2118_v19 = vmul.f32 -0.5, %v1990_v3  ;;  %v2117_v20 = vmul.f32 -0.5, %v1989_v4  ;;  %1715 = vbcast.lane.b32.xlu1 %v10380_v18, 256  ;;  %1459 = vbcast.lane.b32.xlu0 %v10371_v14, 280 }
 0x163   : > { %8820 = vpow2.f32 %v2443_v7  ;;  %v1992_v21 = vmul.f32 %v10503_v13, %v1858_v9  ;;  %v1991_v10 = vmul.f32 %v10503_v13, %v1857_v12 }
 0x164   : > { %8822 = vpow2.f32 %v2441_v8  ;;  %v2246_v29 = vmul.f32 %v2118_v19, %v1990_v3  ;;  %v2245_v30 = vmul.f32 %v2117_v20, %v1989_v4  ;;  %v1567_v39 = vpop.permute.xlu1 %1566  ;;  %v1563_v40 = vpop.permute.xlu0 %1562 }
 0x165   : > { %v2120_v41 = vmul.f32 -0.5, %v1992_v21  ;;  %v2119_v42 = vmul.f32 -0.5, %v1991_v10  ;;  %v1860_v43 = vsub.f32 %v1567_v39, %v10498_v11  ;;  %v1859_v44 = vsub.f32 %v1563_v40, %v10498_v11 }
 0x166   : > { %v2447_v45 = vmul.f32 1.442695, %v2246_v29  ;;  %v2445_v46 = vmul.f32 1.442695, %v2245_v30  ;;  %2719 = vbcast.lane.b32.xlu1 %v10441_v35, 288  ;;  %1719 = vbcast.lane.b32.xlu0 %v10380_v18, 264 }
 0x167   : > { %v2248_v48 = vmul.f32 %v2120_v41, %v1992_v21  ;;  %v2247_v50 = vmul.f32 %v2119_v42, %v1991_v10  ;;  %v1994_v51 = vmul.f32 %v10503_v13, %v1860_v43  ;;  %v1993_v52 = vmul.f32 %v10503_v13, %v1859_v44 }
 0x168   : > { %8824 = vpow2.f32 %v2447_v45  ;;  %v1575_v53 = vpop.permute.xlu1 %1574  ;;  %v1571_v54 = vpop.permute.xlu0 %1570 }
 0x169   : > { %v8817_v55 = vpop.eup %8816  ;;  %8826 = vpow2.f32 %v2445_v46  ;;  %v2451_v56 = vmul.f32 1.442695, %v2248_v48  ;;  %v2449_v57 = vmul.f32 1.442695, %v2247_v50  ;;  %v2122_v58 = vmul.f32 -0.5, %v1994_v51 }
 0x16a   : > { %v8819_v59 = vpop.eup %8818  ;;  %v2121_v61 = vmul.f32 -0.5, %v1993_v52  ;;  %v1862_v62 = vsub.f32 %v1575_v53, %v10498_v11  ;;  %v1861_v63 = vsub.f32 %v1571_v54, %v10498_v11  ;;  %2916 = vbcast.lane.b32.xlu1 %v10388_v22, 280  ;;  %2786 = vbcast.lane.b32.xlu0 %v10446_v36, 288  ;;  %v10549_v0 = vmul.f32 %v8817_v55, %v10540_v47 }
 0x16b   : > { %8828 = vpow2.f32 %v2451_v56  ;;  %v2250_v1 = vmul.f32 %v2122_v58, %v1994_v51  ;;  %v10552_v2 = vmul.f32 %v8819_v59, %v10540_v47 }
 0x16c   : > { %17119 = vst [vmem:[#allocation26_spill] sm:$0xff] %v10549_v0  ;;  %8830 = vpow2.f32 %v2449_v57  ;;  %v2249_v3 = vmul.f32 %v2121_v61, %v1993_v52  ;;  %v1996_v4 = vmul.f32 %v10503_v13, %v1862_v62  ;;  %v1995_v5 = vmul.f32 %v10503_v13, %v1861_v63  ;;  %v1586_v6 = vpop.permute.xlu1 %1585  ;;  %v1582_v7 = vpop.permute.xlu0 %1581 }
 0x16d   : > { %17120 = vst [vmem:[#allocation27_spill] sm:$0xff] %v10552_v2  ;;  %v8821_v8 = vpop.eup %8820  ;;  %v2455_v9 = vmul.f32 1.442695, %v2250_v1  ;;  %v1864_v12 = vsub.f32 %v1586_v6, %v10498_v11  ;;  %v1863_v19 = vsub.f32 %v1582_v7, %v10498_v11  ;;  %v4828_v20 = vpack.c.bf16 %v10549_v0, %v10552_v2 }
 0x16e   : > { %v8823_v21 = vpop.eup %8822  ;;  %v2453_v10 = vmul.f32 1.442695, %v2249_v3  ;;  %v2124_v29 = vmul.f32 -0.5, %v1996_v4  ;;  %v2123_v30 = vmul.f32 -0.5, %v1995_v5  ;;  %3172 = vbcast.lane.b32.xlu1 %v10396_v28, 256  ;;  %3046 = vbcast.lane.b32.xlu0 %v10392_v24, 272  ;;  %v10563_v39 = vmul.f32 %v8821_v8, %v10540_v47 }
 0x16f   : > { %8832 = vpow2.f32 %v2455_v9  ;;  %v1998_v40 = vmul.f32 %v10503_v13, %v1864_v12  ;;  %v1997_v41 = vmul.f32 %v10503_v13, %v1863_v19  ;;  %8508 = vmatprep.mubr.bf16.mxu1 %v4828_v20  ;;  %v10568_v42 = vmul.f32 %v8823_v21, %v10540_v47 }
 0x170   : > { %17121 = vst [vmem:[#allocation28_spill] sm:$0xff] %v10563_v39  ;;  %8834 = vpow2.f32 %v2453_v10  ;;  %v2252_v43 = vmul.f32 %v2124_v29, %v1996_v4  ;;  %v2251_v44 = vmul.f32 %v2123_v30, %v1995_v5  ;;  %v1594_v45 = vpop.permute.xlu1 %1593  ;;  %v1590_v46 = vpop.permute.xlu0 %1589 }
 0x171   : > { %17122 = vst [vmem:[#allocation29_spill] sm:$0xff] %v10568_v42  ;;  %v2126_v48 = vmul.f32 -0.5, %v1998_v40  ;;  %v2125_v50 = vmul.f32 -0.5, %v1997_v41  ;;  %v1866_v51 = vsub.f32 %v1594_v45, %v10498_v11  ;;  %v1865_v52 = vsub.f32 %v1590_v46, %v10498_v11 }
 0x172   : > { %v8825_v53 = vpop.eup %8824  ;;  %v2459_v54 = vmul.f32 1.442695, %v2252_v43  ;;  %v2457_v55 = vmul.f32 1.442695, %v2251_v44  ;;  %v4829_v56 = vpack.c.bf16 %v10563_v39, %v10568_v42  ;;  %1396 = vbcast.lane.b32.xlu1 %v10452_v37, 288  ;;  %3176 = vbcast.lane.b32.xlu0 %v10396_v28, 264 }
 0x173   : > { %v8827_v57 = vpop.eup %8826  ;;  %v2254_v58 = vmul.f32 %v2126_v48, %v1998_v40  ;;  %v2253_v59 = vmul.f32 %v2125_v50, %v1997_v41  ;;  %v2000_v61 = vmul.f32 %v10503_v13, %v1866_v51  ;;  %v1999_v62 = vmul.f32 %v10503_v13, %v1865_v52 }
 0x174   : > { %8836 = vpow2.f32 %v2459_v54  ;;  %8509 = vmatmul.mubr.bf16.vlgmr.msra.gmra.mrb[0].mxu1 %v4829_v56  ;;  %v1602_v63 = vpop.permute.xlu1 %1601  ;;  %v1598_v1 = vpop.permute.xlu0 %1597  ;;  %v10579_v3 = vmul.f32 %v8827_v57, %v10540_v47  ;;  %v10582_v4 = vmul.f32 %v8825_v53, %v10540_v47 }
 0x175   : > { %v8829_v5 = vpop.eup %8828  ;;  %8838 = vpow2.f32 %v2457_v55  ;;  %v2463_v6 = vmul.f32 1.442695, %v2254_v58  ;;  %v2461_v7 = vmul.f32 1.442695, %v2253_v59  ;;  %v2128_v8 = vmul.f32 -0.5, %v2000_v61 }
 0x176   : > { %17123 = vst [vmem:[#allocation30_spill] sm:$0xff] %v10579_v3  ;;  %17124 = vst [vmem:[#allocation31_spill] sm:$0xff] %v10582_v4  ;;  %v8831_v9 = vpop.eup %8830  ;;  %v2127_v12 = vmul.f32 -0.5, %v1999_v62  ;;  %v1868_v19 = vsub.f32 %v1602_v63, %v10498_v11  ;;  %v1867_v20 = vsub.f32 %v1598_v1, %v10498_v11  ;;  %v4830_v21 = vpack.c.bf16 %v10582_v4, %v10579_v3 }
 0x177   : > { %1613 = vbcast.lane.b32.xlu1 %v10418_v32, 320  ;;  %1526 = vbcast.lane.b32.xlu0 %v10374_v16, 280  ;;  %8840 = vpow2.f32 %v2463_v6  ;;  %v2256_v10 = vmul.f32 %v2128_v8, %v2000_v61  ;;  %v10591_v29 = vmul.f32 %v8831_v9, %v10540_v47  ;;  %v10594_v30 = vmul.f32 %v8829_v5, %v10540_v47 }
 0x178   : > { %8842 = vpow2.f32 %v2461_v7  ;;  %v2255_v40 = vmul.f32 %v2127_v12, %v1999_v62  ;;  %v2002_v41 = vmul.f32 %v10503_v13, %v1868_v19  ;;  %v2001_v43 = vmul.f32 %v10503_v13, %v1867_v20  ;;  %8512 = vmatprep.mubr.bf16.mxu1 %v4830_v21  ;;  %v10598_v44 = vpop.permute.xlu1 %1250  ;;  %v10600_v45 = vpop.permute.xlu0 %1246 }
 0x179   : > { %17125 = vst [vmem:[#allocation32_spill] sm:$0xff] %v10591_v29  ;;  %17126 = vst [vmem:[#allocation33_spill] sm:$0xff] %v10594_v30  ;;  %v8833_v16 = vpop.eup %8832  ;;  %v2467_v46 = vmul.f32 1.442695, %v2256_v10  ;;  %v4831_v48 = vpack.c.bf16 %v10594_v30, %v10591_v29 }
 0x17a   : > { %v8835_v50 = vpop.eup %8834  ;;  %v2465_v51 = vmul.f32 1.442695, %v2255_v40  ;;  %v2130_v52 = vmul.f32 -0.5, %v2002_v41  ;;  %v2129_v53 = vmul.f32 -0.5, %v2001_v43  ;;  %v10607_v54 = vmul.f32 %v8833_v16, %v10540_v47 }
 0x17b   : > { %1656 = vbcast.lane.b32.xlu1 %v10377_v17, 272  ;;  %1617 = vbcast.lane.b32.xlu0 %v10418_v32, 328  ;;  %8844 = vpow2.f32 %v2467_v46  ;;  %v10610_v55 = vmul.f32 %v8835_v50, %v10540_v47 }
 0x17c   : > { %17127 = vst [vmem:[#allocation34_spill] sm:$0xff] %v10607_v54  ;;  %8846 = vpow2.f32 %v2465_v51  ;;  %v2258_v56 = vmul.f32 %v2130_v52, %v2002_v41  ;;  %v2257_v57 = vmul.f32 %v2129_v53, %v2001_v43  ;;  %8513 = vmatmul.mubr.bf16.gmra.mrb[4].mxu1 %v4831_v48  ;;  %v10612_v58 = vpop.permute.xlu1 %1317  ;;  %v10614_v59 = vpop.permute.xlu0 %1313 }
 0x17d   : > { %17128 = vst [vmem:[#allocation35_spill] sm:$0xff] %v10610_v55  ;;  %v4832_v1 = vpack.c.bf16 %v10607_v54, %v10610_v55 }
 0x17e   : > { %v8837_v61 = vpop.eup %8836  ;;  %v2471_v62 = vmul.f32 1.442695, %v2258_v56  ;;  %v2469_v63 = vmul.f32 1.442695, %v2257_v57 }
 0x17f   : > { %2983 = vbcast.lane.b32.xlu1 %v10390_v23, 280  ;;  %2853 = vbcast.lane.b32.xlu0 %v10457_v38, 288  ;;  %v8839_v5 = vpop.eup %8838  ;;  %v10624_v9 = vmul.f32 %v8837_v61, %v10540_v47 }
 0x180   : > { %8848 = vpow2.f32 %v2471_v62  ;;  %8516 = vmatprep.mubr.bf16.mxu1 %v4832_v1  ;;  %v1610_v6 = vpop.permute.xlu1 %1609  ;;  %v1606_v7 = vpop.permute.xlu0 %1605  ;;  %v10621_v8 = vmul.f32 %v8839_v5, %v10540_v47 }
 0x181   : > { %17130 = vst [vmem:[#allocation37_spill] sm:$0xff] %v10624_v9  ;;  %v8841_v12 = vpop.eup %8840  ;;  %8850 = vpow2.f32 %v2469_v63  ;;  %v1870_v20 = vsub.f32 %v1610_v6, %v10498_v11  ;;  %v1869_v21 = vsub.f32 %v1606_v7, %v10498_v11 }
 0x182   : > { %17129 = vst [vmem:[#allocation36_spill] sm:$0xff] %v10621_v8  ;;  %v8843_v19 = vpop.eup %8842  ;;  %v4833_v10 = vpack.c.bf16 %v10624_v9, %v10621_v8  ;;  %v10636_v41 = vmul.f32 %v8841_v12, %v10540_v47 }
 0x183   : > { %1266 = vbcast.lane.b32.xlu1 %v10428_v33, 296  ;;  %3113 = vbcast.lane.b32.xlu0 %v10394_v27, 272  ;;  %v10633_v40 = vmul.f32 %v8843_v19, %v10540_v47  ;;  %v2004_v43 = vmul.f32 %v10503_v13, %v1870_v20  ;;  %v2003_v16 = vmul.f32 %v10503_v13, %v1869_v21 }
 0x184   : > { %17132 = vst [vmem:[#allocation39_spill] sm:$0xff] %v10636_v41  ;;  %8517 = vmatmul.mubr.bf16.gmra.mrb[8].mxu1 %v4833_v10  ;;  %v10640_v46 = vpop.permute.xlu1 %2707  ;;  %v10642_v48 = vpop.permute.xlu0 %2703 }
 0x185   : > { %17131 = vst [vmem:[#allocation38_spill] sm:$0xff] %v10633_v40  ;;  %v8845_v50 = vpop.eup %8844  ;;  %v4834_v51 = vpack.c.bf16 %v10636_v41, %v10633_v40  ;;  %v2132_v53 = vmul.f32 -0.5, %v2004_v43  ;;  %v2131_v56 = vmul.f32 -0.5, %v2003_v16  ;;  %v10789_v40 = vld [vmem:[%s10782_s26] ss:$0 sm:$0xff]  ;;  %v1783_v41 = vsub.f32 %v10600_v45, %v10498_v11 }
 0x186   : > { %v8847_v52 = vpop.eup %8846  ;;  %v10649_v57 = vmul.f32 %v8845_v50, %v10540_v47 }
 0x187   : > { %1463 = vbcast.lane.b32.xlu1 %v10371_v14, 288  ;;  %1333 = vbcast.lane.b32.xlu0 %v10434_v34, 296  ;;  %v10652_v61 = vmul.f32 %v8847_v52, %v10540_v47  ;;  %v2260_v62 = vmul.f32 %v2132_v53, %v2004_v43  ;;  %v2259_v63 = vmul.f32 %v2131_v56, %v2003_v16 }
 0x188   : > { %17133 = vst [vmem:[#allocation40_spill] sm:$0xff] %v10649_v57  ;;  %8520 = vmatprep.mubr.bf16.mxu1 %v4834_v51  ;;  %v10654_v1 = vpop.permute.xlu1 %2774  ;;  %v10656_v5 = vpop.permute.xlu0 %2770 }
 0x189   : > { %17134 = vst [vmem:[#allocation41_spill] sm:$0xff] %v10652_v61  ;;  %v2475_v7 = vmul.f32 1.442695, %v2260_v62  ;;  %v2473_v12 = vmul.f32 1.442695, %v2259_v63  ;;  %v4835_v19 = vpack.c.bf16 %v10649_v57, %v10652_v61  ;;  %v1784_v61 = vsub.f32 %v10598_v44, %v10498_v11 }
 0x18a   : > { %v8849_v6 = vpop.eup %8848  ;;  %v1799_v44 = vsub.f32 %v10614_v59, %v10498_v11 }
 0x18b   : > { %1625 = vbcast.lane.b32.xlu1 %v10418_v32, 344  ;;  %1621 = vbcast.lane.b32.xlu0 %v10418_v32, 336  ;;  %v8851_v20 = vpop.eup %8850  ;;  %8852 = vpow2.f32 %v2475_v7  ;;  %v10670_v16 = vmul.f32 %v8849_v6, %v10540_v47  ;;  %v1918_v45 = vmul.f32 %v10503_v13, %v1784_v61 }
 0x18c   : > { %8521 = vmatmul.mubr.bf16.gmra.mrb[12].mxu1 %v4835_v19  ;;  %v10662_v21 = vpop.permute.xlu1 %1384  ;;  %v10664_v10 = vpop.permute.xlu0 %1380  ;;  %v10667_v43 = vmul.f32 %v8851_v20, %v10540_v47  ;;  %8854 = vpow2.f32 %v2473_v12  ;;  %v1933_v61 = vmul.f32 %v10503_v13, %v1799_v44 }
 0x18d   : > { %17136 = vst [vmem:[#allocation43_spill] sm:$0xff] %v10670_v16 }
 0x18e   : > { %17135 = vst [vmem:[#allocation42_spill] sm:$0xff] %v10667_v43  ;;  %v4836_v50 = vpack.c.bf16 %v10670_v16, %v10667_v43 }
 0x18f   : > { %2723 = vbcast.lane.b32.xlu1 %v10441_v35, 296  ;;  %1723 = vbcast.lane.b32.xlu0 %v10380_v18, 272 }
 0x190   : > { %8524 = vmatprep.mubr.bf16.mxu1 %v4836_v50  ;;  %v10676_v51 = vpop.permute.xlu1 %2841  ;;  %v10678_v52 = vpop.permute.xlu0 %2837 }
 0x193   : > { %2920 = vbcast.lane.b32.xlu1 %v10388_v22, 288  ;;  %2790 = vbcast.lane.b32.xlu0 %v10446_v36, 296 }
 0x194   : > { %v10682_v53 = vpop.permute.xlu1 %1321  ;;  %v10684_v56 = vpop.permute.xlu0 %1254 }
 0x195   : > { %v8853_v62 = vpop.eup %8852 }
 0x196   : > { %v8855_v63 = vpop.eup %8854  ;;  %v10696_v19 = vmul.f32 %v8853_v62, %v10540_v47 }
 0x197   : > { %3180 = vbcast.lane.b32.xlu1 %v10396_v28, 272  ;;  %3050 = vbcast.lane.b32.xlu0 %v10392_v24, 280  ;;  %v10693_v12 = vmul.f32 %v8855_v63, %v10540_v47 }
 0x198   : > { %v10688_v6 = vpop.permute.xlu1 %1451  ;;  %v10690_v7 = vpop.permute.xlu0 %1447  ;;  %17138 = vst [vmem:[#allocation45_spill] sm:$0xff] %v10696_v19 }
 0x199   : > { %17137 = vst [vmem:[#allocation44_spill] sm:$0xff] %v10693_v12  ;;  %v4837_v20 = vpack.c.bf16 %v10696_v19, %v10693_v12 }
 0x19b   : > { %1660 = vbcast.lane.b32.xlu1 %v10377_v17, 280  ;;  %1400 = vbcast.lane.b32.xlu0 %v10452_v37, 296 }
 0x19c   : > { %8525 = vmatmul.mubr.bf16.gmra.mrb[16].mxu1 %v4837_v20  ;;  %v10702_v50 = vpop.permute.xlu1 %2778  ;;  %v10704_v49 = vpop.permute.xlu0 %2711 }
 0x19f   : > { %2987 = vbcast.lane.b32.xlu1 %v10390_v23, 288  ;;  %2857 = vbcast.lane.b32.xlu0 %v10457_v38, 296 }
 0x1a0   : > { %v10708_v63 = vpop.permute.xlu1 %2908  ;;  %v10710_v62 = vpop.permute.xlu0 %2904 }
 0x1a3   : > { %1270 = vbcast.lane.b32.xlu1 %v10428_v33, 304  ;;  %3117 = vbcast.lane.b32.xlu0 %v10394_v27, 280 }
 0x1a4   : > { %v10714_v26 = vpop.permute.xlu1 %1514  ;;  %v10716_v25 = vpop.permute.xlu0 %1388 }
 0x1a7   : > { %1467 = vbcast.lane.b32.xlu1 %v10371_v14, 296  ;;  %1337 = vbcast.lane.b32.xlu0 %v10434_v34, 304 }
 0x1a8   : > { %v10720_v20 = vpop.permute.xlu1 %2845  ;;  %v10722_v31 = vpop.permute.xlu0 %1518 }
 0x1ab   : > { %2727 = vbcast.lane.b32.xlu1 %v10441_v35, 304  ;;  %1727 = vbcast.lane.b32.xlu0 %v10380_v18, 280 }
 0x1ac   : > { %v10726_v9 = vpop.permute.xlu1 %2975  ;;  %v10728_v8 = vpop.permute.xlu0 %2971 }
 0x1af   : > { %2924 = vbcast.lane.b32.xlu1 %v10388_v22, 296  ;;  %2794 = vbcast.lane.b32.xlu0 %v10446_v36, 304 }
 0x1b0   : > { %v10732_v54 = vpop.permute.xlu1 %1325  ;;  %v10734_v55 = vpop.permute.xlu0 %1258 }
 0x1b1   : > { %17139 = vst [vmem:[#allocation46_spill] sm:$0xff] %v10732_v54  ;;  %17140 = vst [vmem:[#allocation47_spill] sm:$0xff] %v10734_v55 }
 0x1b3   : > { %3184 = vbcast.lane.b32.xlu1 %v10396_v28, 280  ;;  %3054 = vbcast.lane.b32.xlu0 %v10392_v24, 288 }
 0x1b4   : > { %v10738_v60 = vpop.permute.xlu1 %2715  ;;  %v10740_v30 = vpop.permute.xlu0 %1455 }
 0x1b5   : > { %17141 = vst [vmem:[#allocation48_spill] sm:$0xff] %v10738_v60  ;;  %17142 = vst [vmem:[#allocation49_spill] sm:$0xff] %v10740_v30 }
 0x1b7   : > { %1664 = vbcast.lane.b32.xlu1 %v10377_v17, 288  ;;  %1404 = vbcast.lane.b32.xlu0 %v10452_v37, 304 }
 0x1b8   : > { %v10744_v29 = vpop.permute.xlu1 %2912  ;;  %v10746_v4 = vpop.permute.xlu0 %2782 }
 0x1b9   : > { %17143 = vst [vmem:[#allocation50_spill] sm:$0xff] %v10744_v29  ;;  %17144 = vst [vmem:[#allocation51_spill] sm:$0xff] %v10746_v4 }
 0x1bb   : > { %2991 = vbcast.lane.b32.xlu1 %v10390_v23, 296  ;;  %2861 = vbcast.lane.b32.xlu0 %v10457_v38, 304 }
 0x1bc   : > { %v10750_v3 = vpop.permute.xlu1 %3042  ;;  %v10752_v19 = vpop.permute.xlu0 %3038 }
 0x1bd   : > { %17145 = vst [vmem:[#allocation52_spill] sm:$0xff] %v10750_v3  ;;  %17146 = vst [vmem:[#allocation53_spill] sm:$0xff] %v10752_v19  ;;  %v2061_v3 = vmul.f32 -0.5, %v1933_v61 }
 0x1bf   : > { %1274 = vbcast.lane.b32.xlu1 %v10428_v33, 312  ;;  %3121 = vbcast.lane.b32.xlu0 %v10394_v27, 288  ;;  %v2189_v55 = vmul.f32 %v2061_v3, %v1933_v61 }
 0x1c0   : > { %v10756_v39 = vpop.permute.xlu1 %1522  ;;  %v10758_v12 = vpop.permute.xlu0 %1392 }
 0x1c1   : > { %17147 = vst [vmem:[#allocation54_spill] sm:$0xff] %v10756_v39  ;;  %17148 = vst [vmem:[#allocation55_spill] sm:$0xff] %v10758_v12  ;;  %v3257_v12 = vsub.f32 %v10654_v1, %v10789_v40  ;;  %v1815_v1 = vsub.f32 %v10664_v10, %v10498_v11 }
 0x1c3   : > { %1471 = vbcast.lane.b32.xlu1 %v10371_v14, 304  ;;  %1341 = vbcast.lane.b32.xlu0 %v10434_v34, 312 }
 0x1c4   : > { %v10762_v42 = vpop.permute.xlu1 %1652  ;;  %v10764_v16 = vpop.permute.xlu0 %1648 }
 0x1c5   : > { %17149 = vst [vmem:[#allocation56_spill] sm:$0xff] %v10762_v42  ;;  %17150 = vst [vmem:[#allocation57_spill] sm:$0xff] %v10764_v16  ;;  %v3240_v16 = vsub.f32 %v10642_v48, %v10789_v40 }
 0x1c7   : > { %2731 = vbcast.lane.b32.xlu1 %v10441_v35, 312  ;;  %1731 = vbcast.lane.b32.xlu0 %v10380_v18, 288 }
 0x1c8   : > { %v10768_v0 = vpop.permute.xlu1 %2979  ;;  %v10770_v43 = vpop.permute.xlu0 %2849 }
 0x1c9   : > { %17151 = vst [vmem:[#allocation58_spill] sm:$0xff] %v10768_v0  ;;  %17152 = vst [vmem:[#allocation59_spill] sm:$0xff] %v10770_v43  ;;  %v1800_v43 = vsub.f32 %v10612_v58, %v10498_v11  ;;  %v1917_v0 = vmul.f32 %v10503_v13, %v1783_v41  ;;  %v2046_v41 = vmul.f32 -0.5, %v1918_v45 }
 0x1cb   : > { %2928 = vbcast.lane.b32.xlu1 %v10388_v22, 304  ;;  %2798 = vbcast.lane.b32.xlu0 %v10446_v36, 312  ;;  %v1934_v59 = vmul.f32 %v10503_v13, %v1800_v43 }
 0x1cc   : > { %v10774_v2 = vpop.permute.xlu1 %3109  ;;  %v10776_v57 = vpop.permute.xlu0 %3105 }
 0x1cd   : > { %17153 = vst [vmem:[#allocation60_spill] sm:$0xff] %v10774_v2  ;;  %17154 = vst [vmem:[#allocation61_spill] sm:$0xff] %v10776_v57 }
 0x1cf   : > { %3188 = vbcast.lane.b32.xlu1 %v10396_v28, 288  ;;  %3058 = vbcast.lane.b32.xlu0 %v10392_v24, 296 }
 0x1d0   : > { %v10793_v2 = vpop.permute.xlu1 %1329  ;;  %v10795_v57 = vpop.permute.xlu0 %1262 }
 0x1d1   : > { %17156 = vst [vmem:[#allocation62_spill] sm:$0xff] %v10793_v2  ;;  %17157 = vst [vmem:[#allocation63_spill] sm:$0xff] %v10795_v57  ;;  %v3241_v57 = vsub.f32 %v10640_v46, %v10789_v40  ;;  %v10813_v2 = vld [vmem:[%s10801_s23] ss:$0 sm:$0xff]  ;;  %v3256_v46 = vsub.f32 %v10656_v5, %v10789_v40  ;;  %v2062_v5 = vmul.f32 -0.5, %v1934_v59 }
 0x1d2   : > { %v3374_v43 = vmul.f32 %v10813_v2, %v3240_v16  ;;  %v3391_v19 = vmul.f32 %v10813_v2, %v3257_v12 }
 0x1d3   : > { %1668 = vbcast.lane.b32.xlu1 %v10377_v17, 296  ;;  %1408 = vbcast.lane.b32.xlu0 %v10452_v37, 312  ;;  %v3375_v48 = vmul.f32 %v10813_v2, %v3241_v57  ;;  %v3390_v4 = vmul.f32 %v10813_v2, %v3256_v46  ;;  %v2174_v57 = vmul.f32 %v2046_v41, %v1918_v45 }
 0x1d4   : > { %v10818_v58 = vpop.permute.xlu1 %1715  ;;  %v10820_v42 = vpop.permute.xlu0 %1459  ;;  %v3502_v10 = vmul.f32 -0.5, %v3374_v43  ;;  %v2190_v12 = vmul.f32 %v2062_v5, %v1934_v59  ;;  %v3519_v60 = vmul.f32 -0.5, %v3391_v19  ;;  %v3273_v46 = vsub.f32 %v10676_v51, %v10789_v40 }
 0x1d5   : > { %17159 = vst [vmem:[#allocation64_spill] sm:$0xff] %v10818_v58  ;;  %17160 = vst [vmem:[#allocation65_spill] sm:$0xff] %v10820_v42  ;;  %v1816_v42 = vsub.f32 %v10662_v21, %v10498_v11  ;;  %v2045_v58 = vmul.f32 -0.5, %v1917_v0  ;;  %v3503_v21 = vmul.f32 -0.5, %v3375_v48  ;;  %v3518_v54 = vmul.f32 -0.5, %v3390_v4 }
 0x1d6   : > { %v3272_v45 = vsub.f32 %v10678_v52, %v10789_v40  ;;  %v1801_v59 = vsub.f32 %v10682_v53, %v10498_v11  ;;  %v2335_v51 = vmul.f32 1.442695, %v2190_v12  ;;  %v3647_v61 = vmul.f32 %v3519_v60, %v3391_v19 }
 0x1d7   : > { %2995 = vbcast.lane.b32.xlu1 %v10390_v23, 304  ;;  %2865 = vbcast.lane.b32.xlu0 %v10457_v38, 312  ;;  %v1950_v16 = vmul.f32 %v10503_v13, %v1816_v42  ;;  %v2173_v29 = vmul.f32 %v2045_v58, %v1917_v0  ;;  %v2303_v0 = vmul.f32 1.442695, %v2174_v57  ;;  %v3631_v42 = vmul.f32 %v3503_v21, %v3375_v48 }
 0x1d8   : > { %v10836_v44 = vpop.permute.xlu1 %2719  ;;  %v10838_v39 = vpop.permute.xlu0 %1719  ;;  %v3407_v52 = vmul.f32 %v10813_v2, %v3273_v46  ;;  %v3406_v57 = vmul.f32 %v10813_v2, %v3272_v45  ;;  %v1785_v53 = vsub.f32 %v10684_v56, %v10498_v11  ;;  %v1935_v60 = vmul.f32 %v10503_v13, %v1801_v59 }
 0x1d9   : > { %17161 = vst [vmem:[#allocation66_spill] sm:$0xff] %v10836_v44  ;;  %17162 = vst [vmem:[#allocation67_spill] sm:$0xff] %v10838_v39  ;;  %v1949_v44 = vmul.f32 %v10503_v13, %v1815_v1  ;;  %v2078_v58 = vmul.f32 -0.5, %v1950_v16  ;;  %v2301_v41 = vmul.f32 1.442695, %v2173_v29  ;;  %v3630_v1 = vmul.f32 %v3502_v10, %v3374_v43 }
 0x1da   : > { %8856 = vpow2.f32 %v2303_v0  ;;  %v3760_v29 = vmul.f32 1.442695, %v3631_v42  ;;  %v3534_v12 = vmul.f32 -0.5, %v3406_v57  ;;  %v2063_v45 = vmul.f32 -0.5, %v1935_v60 }
 0x1db   : > { %1278 = vbcast.lane.b32.xlu1 %v10428_v33, 320  ;;  %3125 = vbcast.lane.b32.xlu0 %v10394_v27, 296  ;;  %v2206_v48 = vmul.f32 %v2078_v58, %v1950_v16  ;;  %8858 = vpow2.f32 %v2301_v41  ;;  %v3758_v43 = vmul.f32 1.442695, %v3630_v1  ;;  %v1832_v16 = vsub.f32 %v10688_v6, %v10498_v11 }
 0x1dc   : > { %v10846_v30 = vpop.permute.xlu1 %2916  ;;  %v10848_v39 = vpop.permute.xlu0 %2786  ;;  %8860 = vpow2.f32 %v2335_v51  ;;  %v3242_v42 = vsub.f32 %v10704_v49, %v10789_v40  ;;  %v3662_v58 = vmul.f32 %v3534_v12, %v3406_v57  ;;  %v3289_v59 = vsub.f32 %v10708_v63, %v10789_v40 }
 0x1dd   : > { %17163 = vst [vmem:[#allocation68_spill] sm:$0xff] %v10846_v30  ;;  %17164 = vst [vmem:[#allocation69_spill] sm:$0xff] %v10848_v39  ;;  %v2077_v39 = vmul.f32 -0.5, %v1949_v44  ;;  %v2333_v30 = vmul.f32 1.442695, %v2189_v55  ;;  %v3535_v55 = vmul.f32 -0.5, %v3407_v52  ;;  %v2191_v51 = vmul.f32 %v2063_v45, %v1935_v60 }
 0x1de   : > { %v2367_v56 = vmul.f32 1.442695, %v2206_v48  ;;  %v3822_v60 = vmul.f32 1.442695, %v3662_v58 }
 0x1df   : > { %1475 = vbcast.lane.b32.xlu1 %v10371_v14, 312  ;;  %1345 = vbcast.lane.b32.xlu0 %v10434_v34, 320  ;;  %v3646_v14 = vmul.f32 %v3518_v54, %v3390_v4  ;;  %v2205_v21 = vmul.f32 %v2077_v39, %v1949_v44  ;;  %v3792_v54 = vmul.f32 1.442695, %v3647_v61  ;;  %8862 = vpow2.f32 %v2333_v30 }
 0x1e0   : > { %v10858_v5 = vpop.permute.xlu1 %3172  ;;  %v10860_v3 = vpop.permute.xlu0 %3046  ;;  %8864 = vpow2.f32 %v3760_v29  ;;  %v1919_v39 = vmul.f32 %v10503_v13, %v1785_v53  ;;  %v1831_v44 = vsub.f32 %v10690_v7, %v10498_v11  ;;  %v3663_v6 = vmul.f32 %v3535_v55, %v3407_v52 }
 0x1e1   : > { %v3790_v10 = vmul.f32 1.442695, %v3646_v14  ;;  %8866 = vpow2.f32 %v3758_v43  ;;  %v2365_v46 = vmul.f32 1.442695, %v2205_v21  ;;  %v3258_v14 = vsub.f32 %v10702_v50, %v10789_v40 }
 0x1e2   : > { %8868 = vpow2.f32 %v3792_v54  ;;  %v1966_v7 = vmul.f32 %v10503_v13, %v1832_v16  ;;  %v2047_v1 = vmul.f32 -0.5, %v1919_v39  ;;  %v1965_v50 = vmul.f32 %v10503_v13, %v1831_v44 }
 0x1e3   : > { %2735 = vbcast.lane.b32.xlu1 %v10441_v35, 320  ;;  %1735 = vbcast.lane.b32.xlu0 %v10380_v18, 296  ;;  %8870 = vpow2.f32 %v3790_v10  ;;  %v3392_v49 = vmul.f32 %v10813_v2, %v3258_v14  ;;  %v3824_v48 = vmul.f32 1.442695, %v3663_v6  ;;  %v3376_v53 = vmul.f32 %v10813_v2, %v3242_v42 }
 0x1e4   : > { %v10869_v19 = vpop.permute.xlu1 %1396  ;;  %v10871_v4 = vpop.permute.xlu0 %3176  ;;  %8872 = vpow2.f32 %v2367_v56  ;;  %v3288_v43 = vsub.f32 %v10710_v62, %v10789_v40  ;;  %v2094_v54 = vmul.f32 -0.5, %v1966_v7  ;;  %v1847_v55 = vsub.f32 %v10714_v26, %v10498_v11 }
 0x1e5   : > { %8874 = vpow2.f32 %v2365_v46  ;;  %v10897_v29 = vpop.eup %8856  ;;  %v2175_v16 = vmul.f32 %v2047_v1, %v1919_v39  ;;  %v2093_v56 = vmul.f32 -0.5, %v1965_v50  ;;  %v3423_v44 = vmul.f32 %v10813_v2, %v3289_v59 }
 0x1e6   : > { %17165 = vst [vmem:[#allocation70_spill] sm:$0xff] %v10897_v29  ;;  %v10903_v21 = vpop.eup %8858  ;;  %v2337_v45 = vmul.f32 1.442695, %v2191_v51  ;;  %v3520_v14 = vmul.f32 -0.5, %v3392_v49  ;;  %v1817_v26 = vsub.f32 %v10716_v25, %v10498_v11  ;;  %8876 = vpow2.f32 %v3824_v48  ;;  %v9842_v29 = vld [vmem:[%s10271_s9] sm:$0x1] }
 0x1e7   : > { %2932 = vbcast.lane.b32.xlu1 %v10388_v22, 312  ;;  %2802 = vbcast.lane.b32.xlu0 %v10446_v36, 320  ;;  %17166 = vst [vmem:[#allocation71_spill] sm:$0xff] %v10903_v21  ;;  %v10908_v12 = vpop.eup %8860  ;;  %v3504_v58 = vmul.f32 -0.5, %v3376_v53  ;;  %8878 = vpow2.f32 %v3822_v60  ;;  %v2222_v51 = vmul.f32 %v2094_v54, %v1966_v7  ;;  %v3274_v48 = vsub.f32 %v10720_v20, %v10789_v40  ;;  %s8713_s9 = smul.u32 384, %s10046_s30 }
 0x1e8   : > { %8880 = vpow2.f32 %v2337_v45  ;;  %v2305_v7 = vmul.f32 1.442695, %v2175_v16  ;;  %v3648_v60 = vmul.f32 %v3520_v14, %v3392_v49  ;;  %v1951_v54 = vmul.f32 %v10503_v13, %v1817_v26 }
 0x1e9   : > { %v1614_v30 = vpop.permute.xlu1 %1613  ;;  %v10882_v0 = vpop.permute.xlu0 %1526  ;;  %v1848_v20 = vsub.f32 %v10722_v31, %v10498_v11  ;;  %v4148_v45 = vsub.f32 1.0, %v9842_v29  ;;  %v2399_v16 = vmul.f32 1.442695, %v2222_v51  ;;  %v3408_v21 = vmul.f32 %v10813_v2, %v3274_v48 }
 0x1ea   : > { %v1871_v41 = vsub.f32 %v1614_v30, %v10498_v11  ;;  %v10913_v46 = vpop.eup %8862  ;;  %v3794_v31 = vmul.f32 1.442695, %v3648_v60  ;;  %v3304_v29 = vsub.f32 %v10728_v8, %v10789_v40 }
 0x1eb   : > { %3192 = vbcast.lane.b32.xlu1 %v10396_v28, 296  ;;  %3062 = vbcast.lane.b32.xlu0 %v10392_v24, 304  ;;  %v10921_v39 = vpop.eup %8864 }
 0x1ec   : > { %v2005_v61 = vmul.f32 %v10503_v13, %v1871_v41  ;;  %17168 = vst [vmem:[#allocation73_spill] sm:$0xff] %v10921_v39  ;;  %v3422_v41 = vmul.f32 %v10813_v2, %v3288_v43  ;;  %v10924_v59 = vpop.eup %8866 }
 0x1ed   : > { %v10895_v52 = vpop.permute.xlu1 %1656  ;;  %v1618_v57 = vpop.permute.xlu0 %1617  ;;  %17169 = vst [vmem:[#allocation74_spill] sm:$0xff] %v10924_v59 }
 0x1ee   : > { %v1872_v63 = vsub.f32 %v1618_v57, %v10498_v11  ;;  %v2133_v10 = vmul.f32 -0.5, %v2005_v61  ;;  %v1981_v57 = vmul.f32 %v10503_v13, %v1847_v55  ;;  %v10928_v25 = vpop.eup %8868  ;;  %v3550_v59 = vmul.f32 -0.5, %v3422_v41 }
 0x1ef   : > { %1629 = vbcast.lane.b32.xlu1 %v10418_v32, 352  ;;  %1412 = vbcast.lane.b32.xlu0 %v10452_v37, 320  ;;  %v10933_v43 = vpop.eup %8870  ;;  %v2079_v11 = vmul.f32 -0.5, %v1951_v54 }
 0x1f0   : > { %v2006_v62 = vmul.f32 %v10503_v13, %v1872_v63  ;;  %v2261_v30 = vmul.f32 %v2133_v10, %v2005_v61  ;;  %v2221_v61 = vmul.f32 %v2093_v56, %v1965_v50  ;;  %v3551_v10 = vmul.f32 -0.5, %v3423_v44  ;;  %v10940_v50 = vpop.eup %8872 }
 0x1f1   : > { %v10917_v6 = vpop.permute.xlu1 %2983  ;;  %v10919_v42 = vpop.permute.xlu0 %2853  ;;  %v3632_v56 = vmul.f32 %v3504_v58, %v3376_v53  ;;  %v2109_v49 = vmul.f32 -0.5, %v1981_v57  ;;  %v3305_v53 = vsub.f32 %v10726_v9, %v10789_v40  ;;  %v3678_v51 = vmul.f32 %v3550_v59, %v3422_v41 }
 0x1f2   : > { %17167 = vst [vmem:[#allocation72_spill] sm:$0xff] %v10919_v42  ;;  %v2134_v1 = vmul.f32 -0.5, %v2006_v62  ;;  %v2477_v63 = vmul.f32 1.442695, %v2261_v30  ;;  %v2397_v14 = vmul.f32 1.442695, %v2221_v61  ;;  %v3679_v26 = vmul.f32 %v3551_v10, %v3423_v44 }
 0x1f3   : > { %1672 = vbcast.lane.b32.xlu1 %v10377_v17, 304  ;;  %1633 = vbcast.lane.b32.xlu0 %v10418_v32, 360  ;;  %v3762_v44 = vmul.f32 1.442695, %v3632_v56  ;;  %v10960_v9 = vrot.slane %v4148_v45, %v10298_v15  ;;  %v2237_v61 = vmul.f32 %v2109_v49, %v1981_v57  ;;  %v3536_v41 = vmul.f32 -0.5, %v3408_v21 }
 0x1f4   : > { %v2262_v39 = vmul.f32 %v2134_v1, %v2006_v62  ;;  %v10944_v1 = vpop.eup %8874  ;;  %8882 = vpow2.f32 %v2477_v63  ;;  %v1982_v63 = vmul.f32 %v10503_v13, %v1848_v20  ;;  %v3856_v8 = vmul.f32 1.442695, %v3679_v26  ;;  %v10981_v45 = vld [vmem:[%s10489_s25] ss:$0 sm:$0xff] }
 0x1f5   : > { %v10936_v55 = vpop.permute.xlu1 %1266  ;;  %v10938_v30 = vpop.permute.xlu0 %3113  ;;  %17174 = vst [vmem:[#allocation79_spill] sm:$0xff] %v10960_v9  ;;  %v3439_v13 = vmul.f32 %v10813_v2, %v3305_v53  ;;  %v10977_v57 = vmul.f32 %v10908_v12, %v10540_v47  ;;  %v2207_v48 = vmul.f32 %v2079_v11, %v1951_v54  ;;  %v3854_v20 = vmul.f32 1.442695, %v3678_v51  ;;  %v10988_v26 = vld [vmem:[%s10969_s29] ss:$0 sm:$0xff]  ;;  %v17177_v54 = vld [vmem:[#allocation47_spill] sm:$0xff] }
 0x1f6   : > { %17170 = vst [vmem:[#allocation75_spill] sm:$0xff] %v10936_v55  ;;  %17171 = vst [vmem:[#allocation76_spill] sm:$0xff] %v10938_v30  ;;  %v2479_v62 = vmul.f32 1.442695, %v2262_v39  ;;  %v10963_v10 = vpop.eup %8876  ;;  %v2429_v12 = vmul.f32 1.442695, %v2237_v61  ;;  %v1786_v53 = vsub.f32 %v17177_v54, %v10981_v45  ;;  %v3664_v51 = vmul.f32 %v3536_v41, %v3408_v21 }
 0x1f7   : > { %2999 = vbcast.lane.b32.xlu1 %v10390_v23, 312  ;;  %2869 = vbcast.lane.b32.xlu0 %v10457_v38, 320  ;;  %v10973_v59 = vpop.eup %8878  ;;  %17175 = vst [vmem:[#allocation80_spill] sm:$0xff] %v10977_v57  ;;  %v2369_v61 = vmul.f32 1.442695, %v2207_v48 }
 0x1f8   : > { %8884 = vpow2.f32 %v2479_v62  ;;  %v2110_v62 = vmul.f32 -0.5, %v1982_v63 }
 0x1f9   : > { %v10954_v39 = vpop.permute.xlu1 %1463  ;;  %v10956_v58 = vpop.permute.xlu0 %1333  ;;  %8886 = vpow2.f32 %v2305_v7  ;;  %v3438_v7 = vmul.f32 %v10813_v2, %v3304_v29  ;;  %v17178_v29 = vld [vmem:[#allocation25_spill] sm:$0xff] }
 0x1fa   : > { %17172 = vst [vmem:[#allocation77_spill] sm:$0xff] %v10954_v39  ;;  %17173 = vst [vmem:[#allocation78_spill] sm:$0xff] %v10956_v58  ;;  %8888 = vpow2.f32 %v2399_v16  ;;  %v17176_v16 = vld [vmem:[#allocation46_spill] sm:$0xff]  ;;  %v11001_v58 = vld [vmem:[%s10495_s6] ss:$0 sm:$0xff] }
 0x1fb   : > { %1282 = vbcast.lane.b32.xlu1 %v10428_v33, 328  ;;  %8890 = vpow2.f32 %v2397_v14  ;;  %3129 = vbcast.lane.b32.xlu0 %v10394_v27, 304  ;;  %v1802_v49 = vsub.f32 %v17176_v16, %v10981_v45  ;;  %v10985_v14 = vpop.eup %8880  ;;  %v3567_v16 = vmul.f32 -0.5, %v3439_v13  ;;  %v3566_v9 = vmul.f32 -0.5, %v3438_v7 }
 0x1fc   : > { %8892 = vpow2.f32 %v3794_v31  ;;  %v1920_v48 = vmul.f32 %v11001_v58, %v1786_v53 }
 0x1fd   : > { %v1626_v60 = vpop.permute.xlu1 %1625  ;;  %v1622_v56 = vpop.permute.xlu0 %1621  ;;  %8894 = vpow2.f32 %v3762_v44  ;;  %v10997_v44 = vmul.f32 %v10928_v25, %v10988_v26  ;;  %v2238_v25 = vmul.f32 %v2110_v62, %v1982_v63  ;;  %v1936_v21 = vmul.f32 %v11001_v58, %v1802_v49 }
 0x1fe   : > { %v1874_v31 = vsub.f32 %v1626_v60, %v10981_v45  ;;  %v1873_v11 = vsub.f32 %v1622_v56, %v10981_v45  ;;  %8896 = vpow2.f32 %v3856_v8  ;;  %v8883_v15 = vpop.eup %8882  ;;  %v17182_v8 = vld [vmem:[#allocation48_spill] sm:$0xff]  ;;  %v3694_v49 = vmul.f32 %v3566_v9, %v3438_v7  ;;  %v17187_v9 = vld [vmem:[#allocation49_spill] sm:$0xff] }
 0x1ff   : > { %1479 = vbcast.lane.b32.xlu1 %v17178_v29, 320  ;;  %17179 = vst [vmem:[#allocation46_spill] sm:$0xff] %v10997_v44  ;;  %1349 = vbcast.lane.b32.xlu0 %v10434_v34, 328  ;;  %8898 = vpow2.f32 %v3854_v20  ;;  %v3243_v41 = vsub.f32 %v17182_v8, %v10789_v40  ;;  %v11018_v63 = vmul.f32 %v8883_v15, %v10540_v47 }
 0x200   : > { %v2008_v60 = vmul.f32 %v11001_v58, %v1874_v31  ;;  %v2007_v56 = vmul.f32 %v11001_v58, %v1873_v11  ;;  %8900 = vpow2.f32 %v2429_v12  ;;  %v3826_v11 = vmul.f32 1.442695, %v3664_v51 }
 0x201   : > { %v11005_v54 = vpop.permute.xlu1 %2723  ;;  %v11007_v39 = vpop.permute.xlu0 %1723  ;;  %17183 = vst [vmem:[#allocation48_spill] sm:$0xff] %v11018_v63  ;;  %8902 = vpow2.f32 %v2369_v61  ;;  %v3377_v15 = vmul.f32 %v10813_v2, %v3243_v41 }
 0x202   : > { %17180 = vst [vmem:[#allocation47_spill] sm:$0xff] %v11005_v54  ;;  %17181 = vst [vmem:[#allocation25_spill] sm:$0xff] %v11007_v39  ;;  %v8885_v55 = vpop.eup %8884  ;;  %v2136_v30 = vmul.f32 -0.5, %v2008_v60  ;;  %v2135_v42 = vmul.f32 -0.5, %v2007_v56  ;;  %v3695_v54 = vmul.f32 %v3567_v16, %v3439_v13  ;;  %v2431_v13 = vmul.f32 1.442695, %v2238_v25 }
 0x203   : > { %1641 = vbcast.lane.b32.xlu1 %v10418_v32, 376  ;;  %v11014_v31 = vpop.eup %8886  ;;  %1637 = vbcast.lane.b32.xlu0 %v10418_v32, 368  ;;  %v11021_v20 = vmul.f32 %v8885_v55, %v10540_v47  ;;  %v2064_v32 = vmul.f32 -0.5, %v1936_v21  ;;  %v2048_v16 = vmul.f32 -0.5, %v1920_v48  ;;  %8904 = vpow2.f32 %v3826_v11  ;;  %v17189_v25 = vld [vmem:[#allocation50_spill] sm:$0xff] }
 0x204   : > { %v11023_v62 = vpop.eup %8888  ;;  %v2264_v12 = vmul.f32 %v2136_v30, %v2008_v60  ;;  %v2263_v53 = vmul.f32 %v2135_v42, %v2007_v56  ;;  %v1833_v30 = vsub.f32 %v17187_v9, %v10981_v45  ;;  %v11041_v60 = vmul.f32 %v10933_v43, %v10988_v26 }
 0x205   : > { %17184 = vst [vmem:[#allocation81_spill] sm:$0xff] %v11021_v20  ;;  %v11025_v8 = vpop.permute.xlu1 %2920  ;;  %v11027_v39 = vpop.permute.xlu0 %2790  ;;  %v4838_v47 = vpack.c.bf16 %v11021_v20, %v11018_v63  ;;  %v3888_v56 = vmul.f32 1.442695, %v3695_v54  ;;  %v3290_v41 = vsub.f32 %v17189_v25, %v10789_v40  ;;  %v11047_v20 = vld [vmem:[%s10533_s4] ss:$0 sm:$0xff]  ;;  %v2192_v25 = vmul.f32 %v2064_v32, %v1936_v21  ;;  %v17200_v32 = vld [vmem:[#allocation52_spill] sm:$0xff] }
 0x206   : > { %17185 = vst [vmem:[#allocation82_spill] sm:$0xff] %v11025_v8  ;;  %17186 = vst [vmem:[#allocation83_spill] sm:$0xff] %v11027_v39  ;;  %v11029_v51 = vpop.eup %8890  ;;  %v2483_v42 = vmul.f32 1.442695, %v2264_v12  ;;  %v2481_v7 = vmul.f32 1.442695, %v2263_v53  ;;  %v11051_v12 = vmul.f32 %v11047_v20, %v10913_v46  ;;  %v11055_v53 = vmul.f32 %v10963_v10, %v10988_v26 }
 0x207   : > { %v8893_v55 = vpop.eup %8892  ;;  %2739 = vbcast.lane.b32.xlu1 %v10441_v35, 328  ;;  %17188 = vst [vmem:[#allocation49_spill] sm:$0xff] %v11041_v60  ;;  %1739 = vbcast.lane.b32.xlu0 %v10380_v18, 304  ;;  %v3886_v9 = vmul.f32 1.442695, %v3694_v49  ;;  %v3505_v63 = vmul.f32 -0.5, %v3377_v15  ;;  %v11065_v46 = vmul.f32 %v10973_v59, %v10988_v26  ;;  %v2176_v10 = vmul.f32 %v2048_v16, %v1920_v48 }
 0x208   : > { %v11037_v61 = vpop.eup %8894  ;;  %17190 = vst [vmem:[#allocation50_spill] sm:$0xff] %v11051_v12  ;;  %17191 = vst [vmem:[#allocation84_spill] sm:$0xff] %v11055_v53  ;;  %8906 = vpow2.f32 %v2483_v42  ;;  %8528 = vmatprep.mubr.bf16.mxu1 %v4838_v47  ;;  %v17194_v39 = vld [vmem:[#allocation51_spill] sm:$0xff]  ;;  %v1967_v49 = vmul.f32 %v11001_v58, %v1833_v30  ;;  %v11071_v42 = vadd.f32 %v10997_v44, %v10977_v57 }
 0x209   : > { %v11057_v43 = vpop.permute.xlu1 %3180  ;;  %v11059_v54 = vpop.permute.xlu0 %3050  ;;  %v3259_v8 = vsub.f32 %v17194_v39, %v10789_v40  ;;  %8908 = vpow2.f32 %v2481_v7  ;;  %17195 = vst [vmem:[#allocation51_spill] sm:$0xff] %v11065_v46  ;;  %v11075_v21 = vadd.f32 %v11041_v60, %v11051_v12  ;;  %v3424_v39 = vmul.f32 %v10813_v2, %v3290_v41  ;;  %v17203_v12 = vld [vmem:[#allocation53_spill] sm:$0xff] }
 0x20a   : > { %17192 = vst [vmem:[#allocation85_spill] sm:$0xff] %v11057_v43  ;;  %17193 = vst [vmem:[#allocation86_spill] sm:$0xff] %v11059_v54  ;;  %v8897_v11 = vpop.eup %8896  ;;  %8910 = vpow2.f32 %v2431_v13  ;;  %v11081_v48 = vmul.f32 %v11047_v20, %v10940_v50  ;;  %v11085_v13 = vmul.f32 %v11047_v20, %v10944_v1  ;;  %v3321_v16 = vsub.f32 %v17200_v32, %v10789_v40 }
 0x20b   : > { %2936 = vbcast.lane.b32.xlu1 %v10388_v22, 320  ;;  %v8899_v47 = vpop.eup %8898  ;;  %17196 = vst [vmem:[#allocation87_spill] sm:$0xff] %v11071_v42  ;;  %17197 = vst [vmem:[#allocation88_spill] sm:$0xff] %v11075_v21  ;;  %8912 = vpow2.f32 %v3888_v56  ;;  %2806 = vbcast.lane.b32.xlu0 %v10446_v36, 328  ;;  %v2339_v56 = vmul.f32 1.442695, %v2192_v25  ;;  %v3633_v41 = vmul.f32 %v3505_v63, %v3377_v15 }
 0x20c   : > { %v8901_v59 = vpop.eup %8900  ;;  %17198 = vst [vmem:[#allocation89_spill] sm:$0xff] %v11081_v48  ;;  %17199 = vst [vmem:[#allocation90_spill] sm:$0xff] %v11085_v13  ;;  %8914 = vpow2.f32 %v3886_v9  ;;  %v3393_v57 = vmul.f32 %v10813_v2, %v3259_v8  ;;  %v3320_v50 = vsub.f32 %v17203_v12, %v10789_v40  ;;  %v11098_v1 = vadd.f32 %v11055_v53, %v11081_v48 }
 0x20d   : > { %v11089_v30 = vpop.permute.xlu1 %1660  ;;  %v11091_v7 = vpop.permute.xlu0 %1400  ;;  %v11102_v9 = vadd.f32 %v11065_v46, %v11085_v13  ;;  %v2307_v32 = vmul.f32 1.442695, %v2176_v10  ;;  %v2095_v60 = vmul.f32 -0.5, %v1967_v49  ;;  %v11107_v63 = vmul.f32 %v11047_v20, %v10985_v14 }
 0x20e   : > { %17201 = vst [vmem:[#allocation52_spill] sm:$0xff] %v11089_v30  ;;  %17202 = vst [vmem:[#allocation91_spill] sm:$0xff] %v11091_v7  ;;  %v8903_v44 = vpop.eup %8902  ;;  %v11110_v8 = vmul.f32 %v8893_v55, %v10988_v26  ;;  %v11113_v15 = vmul.f32 %v8897_v11, %v10988_v26  ;;  %v3552_v12 = vmul.f32 -0.5, %v3424_v39  ;;  %v11118_v25 = vmul.f32 %v11047_v20, %v11014_v31 }
 0x20f   : > { %17204 = vst [vmem:[#allocation53_spill] sm:$0xff] %v11098_v1  ;;  %17205 = vst [vmem:[#allocation92_spill] sm:$0xff] %v11102_v9  ;;  %3196 = vbcast.lane.b32.xlu1 %v10396_v28, 304  ;;  %3066 = vbcast.lane.b32.xlu0 %v10392_v24, 312  ;;  %v11122_v10 = vmul.f32 %v11047_v20, %v11023_v62  ;;  %v11125_v14 = vmul.f32 %v8899_v47, %v10988_v26  ;;  %v8905_v13 = vpop.eup %8904  ;;  %8916 = vpow2.f32 %v2339_v56  ;;  %v17215_v1 = vld [vmem:[#allocation54_spill] sm:$0xff] }
 0x210   : > { %17206 = vst [vmem:[#allocation93_spill] sm:$0xff] %v11107_v63  ;;  %17207 = vst [vmem:[#allocation94_spill] sm:$0xff] %v11110_v8  ;;  %v3455_v55 = vmul.f32 %v10813_v2, %v3321_v16  ;;  %v3764_v53 = vmul.f32 1.442695, %v3633_v41  ;;  %v3521_v46 = vmul.f32 -0.5, %v3393_v57  ;;  %v3454_v31 = vmul.f32 %v10813_v2, %v3320_v50 }
 0x211   : > { %17208 = vst [vmem:[#allocation95_spill] sm:$0xff] %v11113_v15  ;;  %17209 = vst [vmem:[#allocation96_spill] sm:$0xff] %v11118_v25  ;;  %v11128_v48 = vpop.permute.xlu1 %2987  ;;  %v11130_v11 = vpop.permute.xlu0 %2857  ;;  %v11135_v62 = vmul.f32 %v11047_v20, %v11029_v51  ;;  %8918 = vpow2.f32 %v2307_v32  ;;  %v2223_v47 = vmul.f32 %v2095_v60, %v1967_v49  ;;  %v1849_v16 = vsub.f32 %v17215_v1, %v10981_v45  ;;  %v17219_v1 = vld [vmem:[#allocation55_spill] sm:$0xff] }
 0x212   : > { %17210 = vst [vmem:[#allocation97_spill] sm:$0xff] %v11122_v10  ;;  %17211 = vst [vmem:[#allocation98_spill] sm:$0xff] %v11125_v14  ;;  %v8907_v25 = vpop.eup %8906  ;;  %v11142_v56 = vadd.f32 %v11110_v8, %v11107_v63  ;;  %v11146_v41 = vmul.f32 %v11037_v61, %v10988_v26  ;;  %v11150_v51 = vadd.f32 %v11113_v15, %v11122_v10  ;;  %v3583_v49 = vmul.f32 -0.5, %v3455_v55 }
 0x213   : > { %17212 = vst [vmem:[#allocation99_spill] sm:$0xff] %v11128_v48  ;;  %17213 = vst [vmem:[#allocation100_spill] sm:$0xff] %v11130_v11  ;;  %1676 = vbcast.lane.b32.xlu1 %v10377_v17, 312  ;;  %v8909_v42 = vpop.eup %8908  ;;  %v3680_v50 = vmul.f32 %v3552_v12, %v3424_v39  ;;  %1416 = vbcast.lane.b32.xlu0 %v10452_v37, 328  ;;  %v1818_v32 = vsub.f32 %v17219_v1, %v10981_v45  ;;  %8920 = vpow2.f32 %v3764_v53  ;;  %v17228_v53 = vld [vmem:[#allocation56_spill] sm:$0xff]  ;;  %v17257_v11 = vld [vmem:[#allocation69_spill] sm:$0xff] }
 0x214   : > { %17214 = vst [vmem:[#allocation101_spill] sm:$0xff] %v11135_v62  ;;  %17216 = vst [vmem:[#allocation54_spill] sm:$0xff] %v11142_v56  ;;  %v8911_v60 = vpop.eup %8910  ;;  %v11160_v8 = vmul.f32 %v11047_v20, %v8909_v42  ;;  %v11163_v61 = vmul.f32 %v11047_v20, %v8907_v25  ;;  %v11167_v39 = vadd.f32 %v11125_v14, %v11135_v62  ;;  %v3582_v15 = vmul.f32 -0.5, %v3454_v31 }
 0x215   : > { %17217 = vst [vmem:[#allocation102_spill] sm:$0xff] %v11146_v41  ;;  %17218 = vst [vmem:[#allocation103_spill] sm:$0xff] %v11150_v51  ;;  %v11155_v9 = vpop.permute.xlu1 %1270  ;;  %v11157_v63 = vpop.permute.xlu0 %3117  ;;  %v3649_v12 = vmul.f32 %v3521_v46, %v3393_v57  ;;  %v11170_v1 = vmul.f32 %v11047_v20, %v8901_v59  ;;  %v11173_v56 = vmul.f32 %v11047_v20, %v8903_v44  ;;  %v2401_v42 = vmul.f32 1.442695, %v2223_v47 }
 0x216   : > { %17220 = vst [vmem:[#allocation55_spill] sm:$0xff] %v11155_v9  ;;  %17221 = vst [vmem:[#allocation104_spill] sm:$0xff] %v11157_v63  ;;  %v8913_v10 = vpop.eup %8912  ;;  %v1983_v51 = vmul.f32 %v11001_v58, %v1849_v16  ;;  %v11178_v25 = vmul.f32 %v8905_v13, %v10988_v26  ;;  %v3858_v62 = vmul.f32 1.442695, %v3680_v50  ;;  %v1880_v57 = vsub.f32 %v17228_v53, %v10981_v45  ;;  %v17230_v16 = vld [vmem:[#allocation57_spill] sm:$0xff]  ;;  %v17254_v63 = vld [vmem:[#allocation68_spill] sm:$0xff] }
 0x217   : > { %17222 = vst [vmem:[#allocation105_spill] sm:$0xff] %v11160_v8  ;;  %17223 = vst [vmem:[#allocation106_spill] sm:$0xff] %v11163_v61  ;;  %v8915_v41 = vpop.eup %8914  ;;  %3003 = vbcast.lane.b32.xlu1 %v10390_v23, 320  ;;  %2873 = vbcast.lane.b32.xlu0 %v10457_v38, 328  ;;  %v4839_v46 = vpack.c.bf16 %v11163_v61, %v11160_v8  ;;  %v11186_v44 = vmul.f32 %v8913_v10, %v10988_v26  ;;  %v17234_v61 = vld [vmem:[#allocation58_spill] sm:$0xff]  ;;  %8922 = vpow2.f32 %v2401_v42 }
 0x218   : > { %17224 = vst [vmem:[#allocation107_spill] sm:$0xff] %v11167_v39  ;;  %17225 = vst [vmem:[#allocation108_spill] sm:$0xff] %v11170_v1  ;;  %v3711_v59 = vmul.f32 %v3583_v49, %v3455_v55  ;;  %v1952_v47 = vmul.f32 %v11001_v58, %v1818_v32  ;;  %v1879_v14 = vsub.f32 %v17230_v16, %v10981_v45  ;;  %v3796_v39 = vmul.f32 1.442695, %v3649_v12  ;;  %v17236_v49 = vld [vmem:[#allocation59_spill] sm:$0xff] }
 0x219   : > { %17226 = vst [vmem:[#allocation109_spill] sm:$0xff] %v11173_v56  ;;  %17227 = vst [vmem:[#allocation110_spill] sm:$0xff] %v11178_v25  ;;  %v11191_v13 = vpop.permute.xlu1 %1467  ;;  %v11193_v50 = vpop.permute.xlu0 %1337  ;;  %v11196_v53 = vmul.f32 %v11047_v20, %v8911_v60  ;;  %v3710_v21 = vmul.f32 %v3582_v15, %v3454_v31  ;;  %v3306_v8 = vsub.f32 %v17234_v61, %v10789_v40  ;;  %8529 = vmatmul.mubr.bf16.gmra.mrb[20].mxu1 %v4839_v46  ;;  %v17238_v31 = vld [vmem:[#allocation61_spill] sm:$0xff] }
 0x21a   : > { %17229 = vst [vmem:[#allocation56_spill] sm:$0xff] %v11186_v44  ;;  %17231 = vst [vmem:[#allocation57_spill] sm:$0xff] %v11191_v13  ;;  %v11201_v10 = vmul.f32 %v8915_v41, %v10988_v26  ;;  %v2111_v55 = vmul.f32 -0.5, %v1983_v51  ;;  %v3275_v32 = vsub.f32 %v17236_v49, %v10789_v40  ;;  %v8917_v16 = vpop.eup %8916  ;;  %v11208_v60 = vadd.f32 %v11178_v25, %v11173_v56 }
 0x21b   : > { %17232 = vst [vmem:[#allocation111_spill] sm:$0xff] %v11193_v50  ;;  %17233 = vst [vmem:[#allocation112_spill] sm:$0xff] %v11196_v53  ;;  %1286 = vbcast.lane.b32.xlu1 %v10428_v33, 336  ;;  %8924 = vpow2.f32 %v3858_v62  ;;  %v2014_v15 = vmul.f32 %v11001_v58, %v1880_v57  ;;  %v3336_v61 = vsub.f32 %v17238_v31, %v10789_v40  ;;  %3133 = vbcast.lane.b32.xlu0 %v10394_v27, 312  ;;  %v8919_v41 = vpop.eup %8918  ;;  %v17242_v31 = vld [vmem:[#allocation60_spill] sm:$0xff] }
 0x21c   : > { %17235 = vst [vmem:[#allocation58_spill] sm:$0xff] %v11201_v10  ;;  %17237 = vst [vmem:[#allocation59_spill] sm:$0xff] %v11208_v60  ;;  %v11216_v12 = vadd.f32 %v11186_v44, %v11196_v53  ;;  %v3920_v42 = vmul.f32 1.442695, %v3711_v59  ;;  %v2080_v46 = vmul.f32 -0.5, %v1952_v47  ;;  %v2013_v49 = vmul.f32 %v11001_v58, %v1879_v14 }
 0x21d   : > { %v11219_v50 = vpop.permute.xlu1 %2727  ;;  %v11221_v56 = vpop.permute.xlu0 %1727  ;;  %8926 = vpow2.f32 %v3796_v39  ;;  %v3918_v62 = vmul.f32 1.442695, %v3710_v21  ;;  %v3440_v57 = vmul.f32 %v10813_v2, %v3306_v8  ;;  %v3337_v25 = vsub.f32 %v17242_v31, %v10789_v40  ;;  %v17246_v31 = vld [vmem:[#allocation62_spill] sm:$0xff] }
 0x21e   : > { %17239 = vst [vmem:[#allocation61_spill] sm:$0xff] %v11216_v12  ;;  %17240 = vst [vmem:[#allocation113_spill] sm:$0xff] %v11219_v50  ;;  %v11228_v60 = vadd.f32 %v11201_v10, %v11170_v1  ;;  %v11231_v59 = vmul.f32 %v11047_v20, %v8917_v16  ;;  %v2239_v53 = vmul.f32 %v2111_v55, %v1983_v51  ;;  %v8921_v44 = vpop.eup %8920  ;;  %v2142_v8 = vmul.f32 -0.5, %v2014_v15  ;;  %v17247_v51 = vld [vmem:[#allocation63_spill] sm:$0xff] }
 0x21f   : > { %17241 = vst [vmem:[#allocation114_spill] sm:$0xff] %v11221_v56  ;;  %v3409_v14 = vmul.f32 %v10813_v2, %v3275_v32  ;;  %1483 = vbcast.lane.b32.xlu1 %v17178_v29, 328  ;;  %v11236_v21 = vmul.f32 %v11047_v20, %v8919_v41  ;;  %v3470_v39 = vmul.f32 %v10813_v2, %v3336_v61  ;;  %8928 = vpow2.f32 %v3920_v42  ;;  %v17250_v61 = vld [vmem:[#allocation64_spill] sm:$0xff] }
 0x220   : > { %17243 = vst [vmem:[#allocation60_spill] sm:$0xff] %v11228_v60  ;;  %17244 = vst [vmem:[#allocation115_spill] sm:$0xff] %v11231_v59  ;;  %v1803_v12 = vsub.f32 %v17246_v31, %v10981_v45  ;;  %1353 = vbcast.lane.b32.xlu0 %v10434_v34, 336  ;;  %v2208_v16 = vmul.f32 %v2080_v46, %v1952_v47  ;;  %v2141_v1 = vmul.f32 -0.5, %v2013_v49  ;;  %8930 = vpow2.f32 %v3918_v62  ;;  %v17252_v46 = vld [vmem:[#allocation65_spill] sm:$0xff] }
 0x221   : > { %17245 = vst [vmem:[#allocation116_spill] sm:$0xff] %v11236_v21  ;;  %v1787_v55 = vsub.f32 %v17247_v51, %v10981_v45  ;;  %v11244_v32 = vpop.permute.xlu1 %2924  ;;  %v11246_v10 = vpop.permute.xlu0 %2794  ;;  %v3568_v41 = vmul.f32 -0.5, %v3440_v57  ;;  %v3471_v60 = vmul.f32 %v10813_v2, %v3337_v25  ;;  %v1895_v56 = vsub.f32 %v17250_v61, %v10981_v45 }
 0x222   : > { %17248 = vst [vmem:[#allocation62_spill] sm:$0xff] %v11244_v32  ;;  %17249 = vst [vmem:[#allocation63_spill] sm:$0xff] %v11246_v10  ;;  %v11252_v31 = vmul.f32 %v8921_v44, %v10988_v26  ;;  %v2433_v42 = vmul.f32 1.442695, %v2239_v53  ;;  %v3537_v47 = vmul.f32 -0.5, %v3409_v14  ;;  %v1834_v50 = vsub.f32 %v17252_v46, %v10981_v45  ;;  %v17253_v10 = vld [vmem:[#allocation66_spill] sm:$0xff]  ;;  %v11261_v61 = vpop.eup %8922 }
 0x223   : > { %2743 = vbcast.lane.b32.xlu1 %v10441_v35, 336  ;;  %v2270_v51 = vmul.f32 %v2142_v8, %v2014_v15  ;;  %v3598_v32 = vmul.f32 -0.5, %v3470_v39  ;;  %v1937_v62 = vmul.f32 %v11001_v58, %v1803_v12  ;;  %v3244_v25 = vsub.f32 %v17253_v10, %v10789_v40 }
 0x224   : > { %17251 = vst [vmem:[#allocation64_spill] sm:$0xff] %v11252_v31  ;;  %1743 = vbcast.lane.b32.xlu0 %v10380_v18, 312  ;;  %v2371_v44 = vmul.f32 1.442695, %v2208_v16  ;;  %v2269_v13 = vmul.f32 %v2141_v1, %v2013_v49  ;;  %v1921_v53 = vmul.f32 %v11001_v58, %v1787_v55  ;;  %v3291_v46 = vsub.f32 %v17254_v63, %v10789_v40  ;;  %v17258_v16 = vld [vmem:[#allocation67_spill] sm:$0xff] }
 0x225   : > { %v11266_v43 = vpop.permute.xlu1 %3184  ;;  %v11268_v15 = vpop.permute.xlu0 %3054  ;;  %v3696_v12 = vmul.f32 %v3568_v41, %v3440_v57  ;;  %v3599_v9 = vmul.f32 -0.5, %v3471_v60  ;;  %v2029_v10 = vmul.f32 %v11001_v58, %v1895_v56  ;;  %v3260_v48 = vsub.f32 %v17257_v11, %v10789_v40 }
 0x226   : > { %17255 = vst [vmem:[#allocation65_spill] sm:$0xff] %v11266_v43  ;;  %17256 = vst [vmem:[#allocation66_spill] sm:$0xff] %v11268_v15  ;;  %v11270_v8 = vpop.eup %8924  ;;  %8932 = vpow2.f32 %v2433_v42  ;;  %v3665_v1 = vmul.f32 %v3537_v47, %v3409_v14  ;;  %v1968_v49 = vmul.f32 %v11001_v58, %v1834_v50  ;;  %v1896_v63 = vsub.f32 %v17258_v16, %v10981_v45 }
 0x227   : > { %2940 = vbcast.lane.b32.xlu1 %v10388_v22, 328  ;;  %v11279_v55 = vpop.eup %8926  ;;  %v2495_v15 = vmul.f32 1.442695, %v2270_v51  ;;  %v3726_v43 = vmul.f32 %v3598_v32, %v3470_v39  ;;  %v2065_v57 = vmul.f32 -0.5, %v1937_v62  ;;  %v3378_v41 = vmul.f32 %v10813_v2, %v3244_v25 }
 0x228   : > { %2810 = vbcast.lane.b32.xlu0 %v10446_v36, 336  ;;  %8934 = vpow2.f32 %v2371_v44  ;;  %v2493_v11 = vmul.f32 1.442695, %v2269_v13  ;;  %v2049_v56 = vmul.f32 -0.5, %v1921_v53  ;;  %v3425_v14 = vmul.f32 %v10813_v2, %v3291_v46 }
 0x229   : > { %v11284_v50 = vpop.permute.xlu1 %1664  ;;  %v11286_v42 = vpop.permute.xlu0 %1404  ;;  %v3890_v47 = vmul.f32 1.442695, %v3696_v12  ;;  %v3727_v16 = vmul.f32 %v3599_v9, %v3471_v60  ;;  %v2157_v7 = vmul.f32 -0.5, %v2029_v10  ;;  %v3394_v51 = vmul.f32 %v10813_v2, %v3260_v48 }
 0x22a   : > { %17259 = vst [vmem:[#allocation68_spill] sm:$0xff] %v11284_v50  ;;  %17260 = vst [vmem:[#allocation69_spill] sm:$0xff] %v11286_v42  ;;  %v8929_v39 = vpop.eup %8928  ;;  %v3828_v32 = vmul.f32 1.442695, %v3665_v1  ;;  %v2096_v30 = vmul.f32 -0.5, %v1968_v49  ;;  %v2030_v25 = vmul.f32 %v11001_v58, %v1896_v63  ;;  %v3322_v13 = vsub.f32 %v10860_v3, %v10789_v40 }
 0x22b   : > { %3200 = vbcast.lane.b32.xlu1 %v10396_v28, 312  ;;  %v11293_v44 = vpop.eup %8930  ;;  %8936 = vpow2.f32 %v2495_v15  ;;  %v3950_v46 = vmul.f32 1.442695, %v3726_v43  ;;  %v2193_v42 = vmul.f32 %v2065_v57, %v1937_v62  ;;  %v3506_v12 = vmul.f32 -0.5, %v3378_v41 }
 0x22c   : > { %3070 = vbcast.lane.b32.xlu0 %v10392_v24, 320  ;;  %8938 = vpow2.f32 %v2493_v11  ;;  %v2177_v48 = vmul.f32 %v2049_v56, %v1921_v53  ;;  %v3553_v9 = vmul.f32 -0.5, %v3425_v14  ;;  %v3352_v60 = vsub.f32 %v10858_v5, %v10789_v40 }
 0x22d   : > { %v11298_v1 = vpop.permute.xlu1 %2991  ;;  %v11300_v63 = vpop.permute.xlu0 %2861  ;;  %8940 = vpow2.f32 %v3890_v47  ;;  %v3952_v3 = vmul.f32 1.442695, %v3727_v16  ;;  %v2285_v50 = vmul.f32 %v2157_v7, %v2029_v10  ;;  %v3522_v54 = vmul.f32 -0.5, %v3394_v51 }
 0x22e   : > { %8942 = vpow2.f32 %v3828_v32  ;;  %v2224_v43 = vmul.f32 %v2096_v30, %v1968_v49  ;;  %v2158_v62 = vmul.f32 -0.5, %v2030_v25  ;;  %v3456_v15 = vmul.f32 %v10813_v2, %v3322_v13 }
 0x22f   : > { %1680 = vbcast.lane.b32.xlu1 %v10377_v17, 320  ;;  %8944 = vpow2.f32 %v3950_v46  ;;  %v2341_v53 = vmul.f32 1.442695, %v2193_v42  ;;  %v3634_v57 = vmul.f32 %v3506_v12, %v3378_v41  ;;  %v1819_v5 = vsub.f32 %v10869_v19, %v10981_v45 }
 0x230   : > { %1420 = vbcast.lane.b32.xlu0 %v10452_v37, 336  ;;  %v11307_v11 = vpop.eup %8932  ;;  %v2309_v56 = vmul.f32 1.442695, %v2177_v48  ;;  %v3681_v7 = vmul.f32 %v3553_v9, %v3425_v14  ;;  %v3486_v10 = vmul.f32 %v10813_v2, %v3352_v60  ;;  %v3353_v30 = vsub.f32 %v10871_v4, %v10789_v40 }
 0x231   : > { %v11312_v49 = vpop.permute.xlu1 %1274  ;;  %v11314_v47 = vpop.permute.xlu0 %3121  ;;  %v11318_v41 = vmul.f32 %v11047_v20, %v11261_v61  ;;  %8946 = vpow2.f32 %v3952_v3  ;;  %v2525_v19 = vmul.f32 1.442695, %v2285_v50  ;;  %v3650_v42 = vmul.f32 %v3522_v54, %v3394_v51 }
 0x232   : > { %v11320_v16 = vpop.eup %8934  ;;  %v11324_v14 = vmul.f32 %v11270_v8, %v10988_v26  ;;  %v2403_v32 = vmul.f32 1.442695, %v2224_v43  ;;  %v2286_v13 = vmul.f32 %v2158_v62, %v2030_v25  ;;  %v3584_v40 = vmul.f32 -0.5, %v3456_v15 }
 0x233   : > { %17261 = vst [vmem:[#allocation67_spill] sm:$0xff] %v11318_v41  ;;  %3007 = vbcast.lane.b32.xlu1 %v10390_v23, 328  ;;  %v11329_v4 = vmul.f32 %v11279_v55, %v10988_v26  ;;  %8948 = vpow2.f32 %v2341_v53  ;;  %v3766_v61 = vmul.f32 1.442695, %v3634_v57  ;;  %v1953_v50 = vmul.f32 %v11001_v58, %v1819_v5 }
 0x234   : > { %17262 = vst [vmem:[#allocation117_spill] sm:$0xff] %v11324_v14  ;;  %2877 = vbcast.lane.b32.xlu0 %v10457_v38, 336  ;;  %8950 = vpow2.f32 %v2309_v56  ;;  %v3860_v54 = vmul.f32 1.442695, %v3681_v7  ;;  %v3614_v51 = vmul.f32 -0.5, %v3486_v10  ;;  %v3487_v8 = vmul.f32 %v10813_v2, %v3353_v30 }
 0x235   : > { %17263 = vst [vmem:[#allocation118_spill] sm:$0xff] %v11329_v4  ;;  %v11334_v46 = vpop.permute.xlu1 %1471  ;;  %v11336_v25 = vpop.permute.xlu0 %1341  ;;  %v11339_v48 = vmul.f32 %v8929_v39, %v10988_v26  ;;  %8952 = vpow2.f32 %v2525_v19  ;;  %v3798_v55 = vmul.f32 1.442695, %v3650_v42  ;;  %v1850_v9 = vsub.f32 %v10882_v0, %v10981_v45  ;;  %v17269_v42 = vld [vmem:[#allocation39_spill] sm:$0xff] }
 0x236   : > { %v8937_v12 = vpop.eup %8936  ;;  %v11345_v3 = vadd.f32 %v11252_v31, %v11236_v21  ;;  %8954 = vpow2.f32 %v2403_v32  ;;  %v2527_v2 = vmul.f32 1.442695, %v2286_v13  ;;  %v3712_v43 = vmul.f32 %v3584_v40, %v3456_v15 }
 0x237   : > { %17264 = vst [vmem:[#allocation119_spill] sm:$0xff] %v11339_v48  ;;  %v8939_v60 = vpop.eup %8938  ;;  %1290 = vbcast.lane.b32.xlu1 %v10428_v33, 344  ;;  %v11350_v39 = vadd.f32 %v11324_v14, %v11318_v41  ;;  %v11354_v53 = vadd.f32 %v11329_v4, %v11231_v59  ;;  %8956 = vpow2.f32 %v3766_v61  ;;  %v2081_v0 = vmul.f32 -0.5, %v1953_v50  ;;  %v11428_v59 = vld [vmem:[%s10801_s23] ss:$0 sm:$0xff] }
 0x238   : > { %17265 = vst [vmem:[#allocation120_spill] sm:$0xff] %v11345_v3  ;;  %v8941_v62 = vpop.eup %8940  ;;  %3137 = vbcast.lane.b32.xlu0 %v10394_v27, 320  ;;  %8958 = vpow2.f32 %v3860_v54  ;;  %v3742_v5 = vmul.f32 %v3614_v51, %v3486_v10  ;;  %v3615_v56 = vmul.f32 -0.5, %v3487_v8  ;;  %v1881_v15 = vsub.f32 %v10895_v52, %v10981_v45  ;;  %v17293_v3 = vld [vmem:[#allocation75_spill] sm:$0xff] }
 0x239   : > { %17266 = vst [vmem:[#allocation121_spill] sm:$0xff] %v11350_v39  ;;  %17267 = vst [vmem:[#allocation122_spill] sm:$0xff] %v11354_v53  ;;  %v8943_v57 = vpop.eup %8942  ;;  %v11359_v7 = vpop.permute.xlu1 %2731  ;;  %v11365_v32 = vadd.f32 %v11339_v48, %v17269_v42  ;;  %v11369_v13 = vmul.f32 %v11293_v44, %v10988_v26  ;;  %8960 = vpow2.f32 %v3798_v55  ;;  %v1984_v10 = vmul.f32 %v11001_v58, %v1850_v9  ;;  %v11386_v42 = vld [vmem:[%s10782_s26] ss:$0 sm:$0xff] }
 0x23a   : > { %v11361_v30 = vpop.permute.xlu0 %1731  ;;  %v8945_v19 = vpop.eup %8944  ;;  %8962 = vpow2.f32 %v2527_v2  ;;  %v3922_v40 = vmul.f32 1.442695, %v3712_v43  ;;  %v11374_v52 = vmul.f32 %v11047_v20, %v8939_v60  ;;  %v11377_v61 = vmul.f32 %v11047_v20, %v8937_v12 }
 0x23b   : > { %17268 = vst [vmem:[#allocation123_spill] sm:$0xff] %v11361_v30  ;;  %17270 = vst [vmem:[#allocation39_spill] sm:$0xff] %v11365_v32  ;;  %1487 = vbcast.lane.b32.xlu1 %v17178_v29, 336  ;;  %v8947_v54 = vpop.eup %8946  ;;  %v11380_v51 = vmul.f32 %v8941_v62, %v10988_v26  ;;  %v11383_v44 = vmul.f32 %v8943_v57, %v10988_v26  ;;  %v2209_v55 = vmul.f32 %v2081_v0, %v1953_v50  ;;  %v17279_v0 = vld [vmem:[#allocation38_spill] sm:$0xff] }
 0x23c   : > { %17271 = vst [vmem:[#allocation124_spill] sm:$0xff] %v11369_v13  ;;  %17272 = vst [vmem:[#allocation125_spill] sm:$0xff] %v11374_v52  ;;  %v3307_v9 = vsub.f32 %v10917_v6, %v11386_v42  ;;  %1357 = vbcast.lane.b32.xlu0 %v10434_v34, 344  ;;  %v3982_v60 = vmul.f32 1.442695, %v3742_v5  ;;  %v3743_v2 = vmul.f32 %v3615_v56, %v3487_v8  ;;  %v2112_v5 = vmul.f32 -0.5, %v1984_v10 }
 0x23d   : > { %17273 = vst [vmem:[#allocation126_spill] sm:$0xff] %v11377_v61  ;;  %17274 = vst [vmem:[#allocation127_spill] sm:$0xff] %v11380_v51  ;;  %v2015_v12 = vmul.f32 %v11001_v58, %v1881_v15  ;;  %v11392_v43 = vpop.permute.xlu1 %2928  ;;  %v11397_v62 = vmul.f32 %v8945_v19, %v10988_v26  ;;  %v8949_v50 = vpop.eup %8948  ;;  %v11401_v57 = vadd.f32 %v11369_v13, %v17279_v0  ;;  %8964 = vpow2.f32 %v3922_v40  ;;  %v17283_v15 = vld [vmem:[#allocation72_spill] sm:$0xff] }
 0x23e   : > { %17275 = vst [vmem:[#allocation128_spill] sm:$0xff] %v11383_v44  ;;  %17276 = vst [vmem:[#allocation129_spill] sm:$0xff] %v11392_v43  ;;  %v11394_v41 = vpop.permute.xlu0 %2798  ;;  %v11405_v6 = vmul.f32 %v11047_v20, %v11307_v11  ;;  %v11409_v8 = vmul.f32 %v11047_v20, %v11320_v16  ;;  %v8951_v56 = vpop.eup %8950  ;;  %v3276_v19 = vsub.f32 %v17283_v15, %v11386_v42  ;;  %v2373_v40 = vmul.f32 1.442695, %v2209_v55 }
 0x23f   : > { %17277 = vst [vmem:[#allocation130_spill] sm:$0xff] %v11394_v41  ;;  %17278 = vst [vmem:[#allocation131_spill] sm:$0xff] %v11397_v62  ;;  %2747 = vbcast.lane.b32.xlu1 %v10441_v35, 344  ;;  %v11415_v48 = vmul.f32 %v8947_v54, %v10988_v26  ;;  %v8953_v11 = vpop.eup %8952  ;;  %v3441_v15 = vmul.f32 %v11428_v59, %v3307_v9  ;;  %8966 = vpow2.f32 %v3982_v60  ;;  %v3984_v14 = vmul.f32 1.442695, %v3743_v2  ;;  %v17292_v60 = vld [vmem:[#allocation76_spill] sm:$0xff] }
 0x240   : > { %17280 = vst [vmem:[#allocation38_spill] sm:$0xff] %v11401_v57  ;;  %17281 = vst [vmem:[#allocation132_spill] sm:$0xff] %v11405_v6  ;;  %v11421_v13 = vadd.f32 %v11380_v51, %v11405_v6  ;;  %v11425_v16 = vadd.f32 %v11383_v44, %v11409_v8  ;;  %1747 = vbcast.lane.b32.xlu0 %v10380_v18, 320  ;;  %v8955_v54 = vpop.eup %8954  ;;  %v2143_v0 = vmul.f32 -0.5, %v2015_v12  ;;  %8968 = vpow2.f32 %v2373_v40  ;;  %v17303_v57 = vld [vmem:[#allocation47_spill] sm:$0xff] }
 0x241   : > { %17282 = vst [vmem:[#allocation133_spill] sm:$0xff] %v11409_v8  ;;  %17284 = vst [vmem:[#allocation72_spill] sm:$0xff] %v11415_v48  ;;  %v11432_v21 = vpop.permute.xlu1 %3188  ;;  %v11438_v6 = vadd.f32 %v11397_v62, %v11374_v52  ;;  %v8957_v8 = vpop.eup %8956  ;;  %v11441_v55 = vmul.f32 %v11047_v20, %v8949_v50  ;;  %v11444_v9 = vmul.f32 %v11047_v20, %v8951_v56  ;;  %8970 = vpow2.f32 %v3984_v14 }
 0x242   : > { %17285 = vst [vmem:[#allocation134_spill] sm:$0xff] %v11421_v13  ;;  %17286 = vst [vmem:[#allocation135_spill] sm:$0xff] %v11425_v16  ;;  %v11434_v4 = vpop.permute.xlu0 %3058  ;;  %v2240_v51 = vmul.f32 %v2112_v5, %v1984_v10  ;;  %v3338_v2 = vsub.f32 %v17292_v60, %v11386_v42  ;;  %v8959_v44 = vpop.eup %8958  ;;  %v3410_v31 = vmul.f32 %v11428_v59, %v3276_v19  ;;  %v3569_v5 = vmul.f32 -0.5, %v3441_v15  ;;  %v17297_v19 = vld [vmem:[#allocation77_spill] sm:$0xff] }
 0x243   : > { %17287 = vst [vmem:[#allocation136_spill] sm:$0xff] %v11432_v21  ;;  %17288 = vst [vmem:[#allocation137_spill] sm:$0xff] %v11434_v4  ;;  %v1788_v16 = vsub.f32 %v17293_v3, %v10981_v45  ;;  %2944 = vbcast.lane.b32.xlu1 %v10388_v22, 336  ;;  %v11454_v62 = vadd.f32 %v11415_v48, %v11377_v61  ;;  %v11457_v50 = vmul.f32 %v11047_v20, %v8953_v11  ;;  %v8961_v56 = vpop.eup %8960  ;;  %v17299_v11 = vld [vmem:[#allocation78_spill] sm:$0xff] }
 0x244   : > { %17289 = vst [vmem:[#allocation138_spill] sm:$0xff] %v11438_v6  ;;  %17290 = vst [vmem:[#allocation139_spill] sm:$0xff] %v11441_v55  ;;  %v11460_v10 = vmul.f32 %v11047_v20, %v8955_v54  ;;  %v1835_v60 = vsub.f32 %v17297_v19, %v10981_v45  ;;  %2814 = vbcast.lane.b32.xlu0 %v10446_v36, 344  ;;  %v8963_v3 = vpop.eup %8962  ;;  %v11466_v13 = vmul.f32 %v8957_v8, %v10988_v26 }
 0x245   : > { %17291 = vst [vmem:[#allocation140_spill] sm:$0xff] %v11444_v9  ;;  %17294 = vst [vmem:[#allocation76_spill] sm:$0xff] %v11454_v62  ;;  %v2271_v48 = vmul.f32 %v2143_v0, %v2015_v12  ;;  %v1804_v53 = vsub.f32 %v17299_v11, %v10981_v45  ;;  %v11470_v39 = vpop.permute.xlu1 %1668  ;;  %v11475_v40 = vmul.f32 %v8959_v44, %v10988_v26  ;;  %v2435_v32 = vmul.f32 1.442695, %v2240_v51  ;;  %v17305_v0 = vld [vmem:[#allocation82_spill] sm:$0xff]  ;;  %v17306_v51 = vld [vmem:[#allocation83_spill] sm:$0xff] }
 0x246   : > { %17295 = vst [vmem:[#allocation75_spill] sm:$0xff] %v11457_v50  ;;  %17296 = vst [vmem:[#allocation141_spill] sm:$0xff] %v11460_v10  ;;  %v11472_v54 = vpop.permute.xlu0 %1408  ;;  %v3472_v19 = vmul.f32 %v11428_v59, %v3338_v2  ;;  %v3245_v6 = vsub.f32 %v17303_v57, %v11386_v42  ;;  %v11481_v8 = vmul.f32 %v8961_v56, %v10988_v26  ;;  %v3538_v14 = vmul.f32 -0.5, %v3410_v31 }
 0x247   : > { %17298 = vst [vmem:[#allocation77_spill] sm:$0xff] %v11466_v13  ;;  %17300 = vst [vmem:[#allocation78_spill] sm:$0xff] %v11470_v39  ;;  %v1922_v12 = vmul.f32 %v11001_v58, %v1788_v16  ;;  %v3292_v11 = vsub.f32 %v17305_v0, %v11386_v42  ;;  %3204 = vbcast.lane.b32.xlu1 %v10396_v28, 320  ;;  %v3697_v62 = vmul.f32 %v3569_v5, %v3441_v15  ;;  %v11490_v52 = vpop.f32.mrb[0].mxu1  ;;  %v8965_v56 = vpop.eup %8964  ;;  %v17310_v5 = vld [vmem:[#allocation86_spill] sm:$0xff] }
 0x248   : > { %17301 = vst [vmem:[#allocation142_spill] sm:$0xff] %v11472_v54  ;;  %17302 = vst [vmem:[#allocation143_spill] sm:$0xff] %v11475_v40  ;;  %v1969_v44 = vmul.f32 %v11001_v58, %v1835_v60  ;;  %v3261_v2 = vsub.f32 %v17306_v51, %v11386_v42  ;;  %3074 = vbcast.lane.b32.xlu0 %v10392_v24, 328  ;;  %v11494_v57 = vmul.f32 %v11047_v20, %v8963_v3  ;;  %v11503_v61 = vpop.f32.mrb[1].mxu1 }
 0x249   : > { %17304 = vst [vmem:[#allocation47_spill] sm:$0xff] %v11481_v8  ;;  %17307 = vst [vmem:[#allocation82_spill] sm:$0xff] %v11490_v52  ;;  %v11498_v16 = vadd.f32 %v11466_v13, %v11444_v9  ;;  %v2497_v0 = vmul.f32 1.442695, %v2271_v48  ;;  %v1938_v15 = vmul.f32 %v11001_v58, %v1804_v53  ;;  %v3323_v60 = vsub.f32 %v17310_v5, %v11386_v42  ;;  %v11505_v51 = vpop.permute.xlu1 %2995  ;;  %v11512_v9 = vpop.f32.mrb[2].mxu1 }
 0x24a   : > { %17308 = vst [vmem:[#allocation83_spill] sm:$0xff] %v11494_v57  ;;  %17311 = vst [vmem:[#allocation86_spill] sm:$0xff] %v11503_v61  ;;  %v11509_v52 = vadd.f32 %v11475_v40, %v11460_v10  ;;  %8972 = vpow2.f32 %v2435_v32  ;;  %v3600_v3 = vmul.f32 -0.5, %v3472_v19  ;;  %v3379_v54 = vmul.f32 %v11428_v59, %v3245_v6  ;;  %v11514_v48 = vpop.permute.xlu0 %2865  ;;  %v8967_v53 = vpop.eup %8966 }
 0x24b   : > { %17309 = vst [vmem:[#allocation144_spill] sm:$0xff] %v11498_v16  ;;  %17312 = vst [vmem:[#allocation145_spill] sm:$0xff] %v11505_v51  ;;  %v11518_v5 = vadd.f32 %v11481_v8, %v11441_v55  ;;  %v3666_v61 = vmul.f32 %v3538_v14, %v3410_v31  ;;  %v2050_v13 = vmul.f32 -0.5, %v1922_v12  ;;  %v3426_v16 = vmul.f32 %v11428_v59, %v3292_v11  ;;  %v11521_v51 = vpop.f32.mrb[3].mxu1  ;;  %v17319_v14 = vld [vmem:[#allocation52_spill] sm:$0xff]  ;;  %v17321_v8 = vld [vmem:[#allocation91_spill] sm:$0xff] }
 0x24c   : > { %17313 = vst [vmem:[#allocation146_spill] sm:$0xff] %v11509_v52  ;;  %17314 = vst [vmem:[#allocation147_spill] sm:$0xff] %v11512_v9  ;;  %v11524_v32 = vmul.f32 %v8965_v56, %v10988_v26  ;;  %v3892_v10 = vmul.f32 1.442695, %v3697_v62  ;;  %v2097_v6 = vmul.f32 -0.5, %v1969_v44  ;;  %v3395_v9 = vmul.f32 %v11428_v59, %v3261_v2  ;;  %1684 = vbcast.lane.b32.xlu1 %v10377_v17, 328 }
 0x24d   : > { %17315 = vst [vmem:[#allocation148_spill] sm:$0xff] %v11514_v48  ;;  %17316 = vst [vmem:[#allocation149_spill] sm:$0xff] %v11518_v5  ;;  %1424 = vbcast.lane.b32.xlu0 %v10452_v37, 344  ;;  %8974 = vpow2.f32 %v2497_v0  ;;  %v2066_v55 = vmul.f32 -0.5, %v1938_v15  ;;  %v3457_v31 = vmul.f32 %v11428_v59, %v3323_v60  ;;  %v1882_v11 = vsub.f32 %v17319_v14, %v10981_v45  ;;  %v11532_v40 = vpop.permute.xlu1 %1278  ;;  %v17324_v14 = vld [vmem:[#allocation99_spill] sm:$0xff] }
 0x24e   : > { %17317 = vst [vmem:[#allocation150_spill] sm:$0xff] %v11521_v51  ;;  %17318 = vst [vmem:[#allocation151_spill] sm:$0xff] %v11524_v32  ;;  %v11534_v51 = vpop.eup %8968  ;;  %v3728_v56 = vmul.f32 %v3600_v3, %v3472_v19  ;;  %v3507_v62 = vmul.f32 -0.5, %v3379_v54  ;;  %v1820_v2 = vsub.f32 %v17321_v8, %v10981_v45  ;;  %v11538_v52 = vpop.permute.xlu0 %3125  ;;  %v11541_v5 = vmul.f32 %v8967_v53, %v10988_v26  ;;  %v17325_v19 = vld [vmem:[#allocation100_spill] sm:$0xff]  ;;  %v17327_v53 = vld [vmem:[#allocation25_spill] sm:$0xff] }
 0x24f   : > { %17320 = vst [vmem:[#allocation52_spill] sm:$0xff] %v11532_v40  ;;  %17322 = vst [vmem:[#allocation91_spill] sm:$0xff] %v11538_v52  ;;  %v8971_v0 = vpop.eup %8970  ;;  %v3830_v48 = vmul.f32 1.442695, %v3666_v61  ;;  %v2178_v60 = vmul.f32 %v2050_v13, %v1922_v12  ;;  %v3554_v39 = vmul.f32 -0.5, %v3426_v16  ;;  %v3308_v4 = vsub.f32 %v17324_v14, %v11386_v42  ;;  %v11547_v30 = vpop.f32.mrb[4].mxu1 }
 0x250   : > { %17323 = vst [vmem:[#allocation152_spill] sm:$0xff] %v11541_v5  ;;  %8976 = vpow2.f32 %v3892_v10  ;;  %v2225_v40 = vmul.f32 %v2097_v6, %v1969_v44  ;;  %v3523_v21 = vmul.f32 -0.5, %v3395_v9  ;;  %v3277_v3 = vsub.f32 %v17325_v19, %v11386_v42  ;;  %17326 = vst [vmem:[#allocation99_spill] sm:$0xff] %v11547_v30  ;;  %3011 = vbcast.lane.b32.xlu1 %v10390_v23, 336  ;;  %v11553_v12 = vpop.f32.mrb[5].mxu1  ;;  %v17330_v44 = vld [vmem:[#allocation41_spill] sm:$0xff] }
 0x251   : > { %v2194_v8 = vmul.f32 %v2066_v55, %v1938_v15  ;;  %v1897_v52 = vsub.f32 %v17327_v53, %v10981_v45  ;;  %v3585_v61 = vmul.f32 -0.5, %v3457_v31  ;;  %v2016_v13 = vmul.f32 %v11001_v58, %v1882_v11  ;;  %17328 = vst [vmem:[#allocation100_spill] sm:$0xff] %v11553_v12  ;;  %2881 = vbcast.lane.b32.xlu0 %v10457_v38, 344  ;;  %v11556_v10 = vpop.permute.xlu1 %1475  ;;  %v11563_v15 = vpop.f32.mrb[6].mxu1 }
 0x252   : > { %17329 = vst [vmem:[#allocation25_spill] sm:$0xff] %v11556_v10  ;;  %v11560_v6 = vadd.f32 %v11524_v32, %v17330_v44  ;;  %v3954_v14 = vmul.f32 1.442695, %v3728_v56  ;;  %v3635_v19 = vmul.f32 %v3507_v62, %v3379_v54  ;;  %v1954_v55 = vmul.f32 %v11001_v58, %v1820_v2  ;;  %17332 = vst [vmem:[#allocation153_spill] sm:$0xff] %v11563_v15  ;;  %v11565_v53 = vpop.permute.xlu0 %1345  ;;  %v11568_v41 = vpop.f32.mrb[7].mxu1 }
 0x253   : > { %8978 = vpow2.f32 %v3830_v48  ;;  %v2311_v11 = vmul.f32 1.442695, %v2178_v60  ;;  %v3682_v30 = vmul.f32 %v3554_v39, %v3426_v16  ;;  %v3442_v12 = vmul.f32 %v11428_v59, %v3308_v4  ;;  %17333 = vst [vmem:[#allocation154_spill] sm:$0xff] %v11568_v41 }
 0x254   : > { %17331 = vst [vmem:[#allocation41_spill] sm:$0xff] %v11560_v6  ;;  %v11570_v10 = vpop.eup %8972  ;;  %v2405_v43 = vmul.f32 1.442695, %v2225_v40  ;;  %v3651_v44 = vmul.f32 %v3523_v21, %v3395_v9  ;;  %v3411_v56 = vmul.f32 %v11428_v59, %v3277_v3  ;;  %1294 = vbcast.lane.b32.xlu1 %v10428_v33, 352  ;;  %v11575_v54 = vmul.f32 %v8971_v0, %v10988_v26  ;;  %v17335_v21 = vld [vmem:[#allocation55_spill] sm:$0xff] }
 0x255   : > { %v2343_v62 = vmul.f32 1.442695, %v2194_v8  ;;  %v2031_v48 = vmul.f32 %v11001_v58, %v1897_v52  ;;  %v3713_v2 = vmul.f32 %v3585_v61, %v3457_v31  ;;  %v2144_v39 = vmul.f32 -0.5, %v2016_v13  ;;  %3141 = vbcast.lane.b32.xlu0 %v10394_v27, 328  ;;  %v11579_v4 = vpop.permute.xlu1 %2735  ;;  %v17337_v52 = vld [vmem:[#allocation85_spill] sm:$0xff] }
 0x256   : > { %17334 = vst [vmem:[#allocation155_spill] sm:$0xff] %v11575_v54  ;;  %8980 = vpow2.f32 %v3954_v14  ;;  %v3768_v16 = vmul.f32 1.442695, %v3635_v19  ;;  %v2082_v40 = vmul.f32 -0.5, %v1954_v55  ;;  %v1789_v9 = vsub.f32 %v17335_v21, %v10981_v45  ;;  %v11583_v60 = vpop.permute.xlu0 %1735  ;;  %v17338_v14 = vld [vmem:[#allocation104_spill] sm:$0xff] }
 0x257   : > { %17336 = vst [vmem:[#allocation55_spill] sm:$0xff] %v11583_v60  ;;  %v11585_v3 = vpop.eup %8974  ;;  %8982 = vpow2.f32 %v2311_v11  ;;  %v3862_v26 = vmul.f32 1.442695, %v3682_v30  ;;  %v3354_v31 = vsub.f32 %v17337_v52, %v11386_v42  ;;  %v3570_v0 = vmul.f32 -0.5, %v3442_v12  ;;  %v11591_v32 = vpop.f32.mrb[8].mxu1 }
 0x258   : > { %8984 = vpow2.f32 %v2405_v43  ;;  %v3800_v8 = vmul.f32 1.442695, %v3651_v44  ;;  %v3539_v61 = vmul.f32 -0.5, %v3411_v56  ;;  %v3339_v19 = vsub.f32 %v17338_v14, %v11386_v42  ;;  %17339 = vst [vmem:[#allocation85_spill] sm:$0xff] %v11591_v32  ;;  %1491 = vbcast.lane.b32.xlu1 %v17178_v29, 344  ;;  %v11594_v11 = vpop.f32.mrb[9].mxu1 }
 0x259   : > { %8986 = vpow2.f32 %v2343_v62  ;;  %v2159_v45 = vmul.f32 -0.5, %v2031_v48  ;;  %v3924_v21 = vmul.f32 1.442695, %v3713_v2  ;;  %v2272_v41 = vmul.f32 %v2144_v39, %v2016_v13  ;;  %17340 = vst [vmem:[#allocation104_spill] sm:$0xff] %v11594_v11  ;;  %1361 = vbcast.lane.b32.xlu0 %v10434_v34, 352  ;;  %v11597_v30 = vpop.permute.xlu1 %2932  ;;  %v11604_v62 = vpop.f32.mrb[10].mxu1 }
 0x25a   : > { %17341 = vst [vmem:[#allocation156_spill] sm:$0xff] %v11597_v30  ;;  %v8977_v43 = vpop.eup %8976  ;;  %v11601_v44 = vmul.f32 %v11047_v20, %v11534_v51  ;;  %8988 = vpow2.f32 %v3768_v16  ;;  %v2210_v52 = vmul.f32 %v2082_v40, %v1954_v55  ;;  %v1923_v14 = vmul.f32 %v11001_v58, %v1789_v9  ;;  %17343 = vst [vmem:[#allocation158_spill] sm:$0xff] %v11604_v62  ;;  %v11606_v2 = vpop.permute.xlu0 %2802  ;;  %v11617_v58 = vld [vmem:[%s10489_s25] ss:$0 sm:$0xff] }
 0x25b   : > { %17344 = vst [vmem:[#allocation159_spill] sm:$0xff] %v11606_v2  ;;  %8990 = vpow2.f32 %v3862_v26  ;;  %v3488_v13 = vmul.f32 %v11428_v59, %v3354_v31  ;;  %v3698_v39 = vmul.f32 %v3570_v0, %v3442_v12  ;;  %v11609_v11 = vpop.f32.mrb[11].mxu1  ;;  %v11613_v32 = vadd.f32 %v11541_v5, %v11457_v50  ;;  %v17347_v16 = vld [vmem:[#allocation57_spill] sm:$0xff] }
 0x25c   : > { %17342 = vst [vmem:[#allocation157_spill] sm:$0xff] %v11601_v44  ;;  %17345 = vst [vmem:[#allocation160_spill] sm:$0xff] %v11609_v11  ;;  %8992 = vpow2.f32 %v3800_v8  ;;  %v3667_v51 = vmul.f32 %v3539_v61, %v3411_v56  ;;  %v3473_v55 = vmul.f32 %v11428_v59, %v3339_v19  ;;  %v1836_v40 = vsub.f32 %v17347_v16, %v11617_v58  ;;  %v11630_v0 = vld [vmem:[%s10969_s29] ss:$0 sm:$0xff] }
 0x25d   : > { %17346 = vst [vmem:[#allocation161_spill] sm:$0xff] %v11613_v32  ;;  %2751 = vbcast.lane.b32.xlu1 %v10441_v35, 352  ;;  %v8979_v9 = vpop.eup %8978  ;;  %v2287_v12 = vmul.f32 %v2159_v45, %v2031_v48  ;;  %8994 = vpow2.f32 %v3924_v21  ;;  %v2499_v26 = vmul.f32 1.442695, %v2272_v41  ;;  %1751 = vbcast.lane.b32.xlu0 %v10380_v18, 328  ;;  %v11623_v31 = vpop.permute.xlu1 %3192  ;;  %v11627_v56 = vadd.f32 %v11575_v54, %v11494_v57  ;;  %v17351_v48 = vld [vmem:[#allocation111_spill] sm:$0xff] }
 0x25e   : > { %17348 = vst [vmem:[#allocation57_spill] sm:$0xff] %v11623_v31  ;;  %v11633_v8 = vmul.f32 %v11630_v0, %v8977_v43  ;;  %v2375_v61 = vmul.f32 1.442695, %v2210_v52  ;;  %v2051_v19 = vmul.f32 -0.5, %v1923_v14  ;;  %v1805_v45 = vsub.f32 %v17351_v48, %v11617_v58  ;;  %v11637_v41 = vpop.permute.xlu0 %3062  ;;  %v17354_v54 = vld [vmem:[#allocation113_spill] sm:$0xff] }
 0x25f   : > { %17349 = vst [vmem:[#allocation162_spill] sm:$0xff] %v11627_v56  ;;  %17352 = vst [vmem:[#allocation111_spill] sm:$0xff] %v11637_v41  ;;  %v11641_v21 = vmul.f32 %v11047_v20, %v11570_v10  ;;  %v3616_v16 = vmul.f32 -0.5, %v3488_v13  ;;  %v3894_v5 = vmul.f32 1.442695, %v3698_v39  ;;  %v3246_v11 = vsub.f32 %v17354_v54, %v11386_v42  ;;  %v11652_v56 = vpop.f32.mrb[12].mxu1 }
 0x260   : > { %17350 = vst [vmem:[#allocation163_spill] sm:$0xff] %v11633_v8  ;;  %v8981_v62 = vpop.eup %8980  ;;  %v11646_v43 = vmul.f32 %v11630_v0, %v8979_v9  ;;  %v3832_v52 = vmul.f32 1.442695, %v3667_v51  ;;  %v3601_v15 = vmul.f32 -0.5, %v3473_v55  ;;  %v11649_v32 = vld [vmem:[%s10495_s6] ss:$0 sm:$0xff]  ;;  %8996 = vpow2.f32 %v2499_v26 }
 0x261   : > { %17353 = vst [vmem:[#allocation164_spill] sm:$0xff] %v11641_v21  ;;  %v1970_v48 = vmul.f32 %v11649_v32, %v1836_v40  ;;  %17356 = vst [vmem:[#allocation165_spill] sm:$0xff] %v11652_v56  ;;  %2948 = vbcast.lane.b32.xlu1 %v10388_v22, 344  ;;  %v8983_v10 = vpop.eup %8982  ;;  %v2529_v6 = vmul.f32 1.442695, %v2287_v12  ;;  %v17357_v39 = vld [vmem:[#allocation114_spill] sm:$0xff]  ;;  %v11660_v51 = vpop.permute.xlu1 %1629  ;;  %v11664_v9 = vmul.f32 %v11047_v20, %v11585_v3  ;;  %8998 = vpow2.f32 %v2375_v61 }
 0x262   : > { %17355 = vst [vmem:[#allocation113_spill] sm:$0xff] %v11646_v43  ;;  %v1898_v54 = vsub.f32 %v17357_v39, %v11617_v58  ;;  %v11657_v31 = vpop.f32.mrb[13].mxu1  ;;  %2818 = vbcast.lane.b32.xlu0 %v10446_v36, 352  ;;  %v8985_v40 = vpop.eup %8984  ;;  %v11668_v56 = vadd.f32 %v11633_v8, %v11641_v21  ;;  %v2179_v12 = vmul.f32 %v2051_v19, %v1923_v14  ;;  %9000 = vpow2.f32 %v3894_v5  ;;  %v17375_v30 = vld [vmem:[#allocation65_spill] sm:$0xff] }
 0x263   : > { %17358 = vst [vmem:[#allocation114_spill] sm:$0xff] %v11657_v31  ;;  %17359 = vst [vmem:[#allocation166_spill] sm:$0xff] %v11664_v9  ;;  %v1939_v26 = vmul.f32 %v11649_v32, %v1805_v45  ;;  %v11671_v39 = vpop.f32.mrb[14].mxu1  ;;  %v11673_v31 = vpop.permute.xlu0 %1412  ;;  %v3744_v41 = vmul.f32 %v3616_v16, %v3488_v13  ;;  %v3380_v20 = vmul.f32 %v11428_v59, %v3246_v11  ;;  %9002 = vpow2.f32 %v3832_v52  ;;  %v11687_v13 = vld [vmem:[%s10533_s4] ss:$0 sm:$0xff] }
 0x264   : > { %17360 = vst [vmem:[#allocation167_spill] sm:$0xff] %v11668_v56  ;;  %17361 = vst [vmem:[#allocation168_spill] sm:$0xff] %v11671_v39  ;;  %v8987_v60 = vpop.eup %8986  ;;  %v11676_v3 = vpop.f32.mrb[15].mxu1  ;;  %v11679_v2 = vmul.f32 %v11630_v0, %v8981_v62  ;;  %v11683_v14 = vadd.f32 %v11646_v43, %v11601_v44  ;;  %v3729_v61 = vmul.f32 %v3601_v15, %v3473_v55  ;;  %v2098_v19 = vmul.f32 -0.5, %v1970_v48  ;;  %v17367_v62 = vld [vmem:[#allocation62_spill] sm:$0xff]  ;;  %v17369_v44 = vld [vmem:[#allocation63_spill] sm:$0xff] }
 0x265   : > { %17362 = vst [vmem:[#allocation169_spill] sm:$0xff] %v11673_v31  ;;  %17363 = vst [vmem:[#allocation170_spill] sm:$0xff] %v11676_v3  ;;  %v8989_v21 = vpop.eup %8988  ;;  %3208 = vbcast.lane.b32.xlu1 %v10396_v28, 328  ;;  %v11690_v5 = vmul.f32 %v11687_v13, %v8983_v10  ;;  %9004 = vpow2.f32 %v2529_v6  ;;  %v2032_v11 = vmul.f32 %v11649_v32, %v1898_v54  ;;  %v11696_v3 = vpop.permute.xlu1 %1672  ;;  %v2313_v52 = vmul.f32 1.442695, %v2179_v12 }
 0x266   : > { %17364 = vst [vmem:[#allocation171_spill] sm:$0xff] %v11679_v2  ;;  %17365 = vst [vmem:[#allocation172_spill] sm:$0xff] %v11683_v14  ;;  %v8991_v45 = vpop.eup %8990  ;;  %v3293_v16 = vsub.f32 %v17367_v62, %v11386_v42  ;;  %3078 = vbcast.lane.b32.xlu0 %v10392_v24, 336  ;;  %v11699_v55 = vmul.f32 %v11687_v13, %v8985_v40  ;;  %v2067_v39 = vmul.f32 -0.5, %v1939_v26  ;;  %v3986_v62 = vmul.f32 1.442695, %v3744_v41 }
 0x267   : > { %17366 = vst [vmem:[#allocation173_spill] sm:$0xff] %v11690_v5  ;;  %v8993_v15 = vpop.eup %8992  ;;  %v3262_v10 = vsub.f32 %v17369_v44, %v11386_v42  ;;  %v11703_v8 = vpop.permute.xlu0 %1633  ;;  %v11706_v54 = vmul.f32 %v11630_v0, %v8989_v21  ;;  %v3508_v43 = vmul.f32 -0.5, %v3380_v20  ;;  %v11710_v14 = vadd.f32 %v11679_v2, %v11664_v9 }
 0x268   : > { %17368 = vst [vmem:[#allocation62_spill] sm:$0xff] %v11699_v55  ;;  %v8995_v6 = vpop.eup %8994  ;;  %v11713_v40 = vmul.f32 %v11687_v13, %v8987_v60  ;;  %v11716_v12 = vmul.f32 %v11630_v0, %v8991_v45  ;;  %v3956_v56 = vmul.f32 1.442695, %v3729_v61  ;;  %v2226_v44 = vmul.f32 %v2098_v19, %v1970_v48 }
 0x269   : > { %17370 = vst [vmem:[#allocation63_spill] sm:$0xff] %v11706_v54  ;;  %17371 = vst [vmem:[#allocation174_spill] sm:$0xff] %v11710_v14  ;;  %1688 = vbcast.lane.b32.xlu1 %v10377_v17, 336  ;;  %v11720_v31 = vmul.f32 %v11630_v0, %v8993_v15  ;;  %v2160_v21 = vmul.f32 -0.5, %v2032_v11  ;;  %v3427_v41 = vmul.f32 %v11428_v59, %v3293_v16  ;;  %v11726_v60 = vpop.permute.xlu1 %2999  ;;  %9006 = vpow2.f32 %v2313_v52 }
 0x26a   : > { %17372 = vst [vmem:[#allocation175_spill] sm:$0xff] %v11713_v40  ;;  %17373 = vst [vmem:[#allocation176_spill] sm:$0xff] %v11716_v12  ;;  %v3355_v2 = vsub.f32 %v17375_v30, %v11386_v42  ;;  %1428 = vbcast.lane.b32.xlu0 %v10452_v37, 352  ;;  %v11729_v45 = vmul.f32 %v11630_v0, %v8995_v6  ;;  %v2195_v48 = vmul.f32 %v2067_v39, %v1939_v26  ;;  %v8997_v15 = vpop.eup %8996  ;;  %v17380_v39 = vld [vmem:[#allocation66_spill] sm:$0xff] }
 0x26b   : > { %17374 = vst [vmem:[#allocation177_spill] sm:$0xff] %v11720_v31  ;;  %17376 = vst [vmem:[#allocation65_spill] sm:$0xff] %v11726_v60  ;;  %v3396_v61 = vmul.f32 %v11428_v59, %v3262_v10  ;;  %v11732_v19 = vpop.permute.xlu0 %2869  ;;  %v11736_v16 = vadd.f32 %v11706_v54, %v11690_v5  ;;  %9008 = vpow2.f32 %v3986_v62  ;;  %v3636_v30 = vmul.f32 %v3508_v43, %v3380_v20  ;;  %v8999_v60 = vpop.eup %8998  ;;  %v17385_v54 = vld [vmem:[#allocation68_spill] sm:$0xff] }
 0x26c   : > { %17377 = vst [vmem:[#allocation178_spill] sm:$0xff] %v11729_v45  ;;  %v11742_v6 = vadd.f32 %v11716_v12, %v11699_v55  ;;  %9010 = vpow2.f32 %v3956_v56  ;;  %v2407_v26 = vmul.f32 1.442695, %v2226_v44  ;;  %v3324_v52 = vsub.f32 %v17380_v39, %v11386_v42  ;;  %v9001_v10 = vpop.eup %9000  ;;  %v17383_v44 = vld [vmem:[#allocation40_spill] sm:$0xff] }
 0x26d   : > { %17378 = vst [vmem:[#allocation179_spill] sm:$0xff] %v11736_v16  ;;  %3015 = vbcast.lane.b32.xlu1 %v10390_v23, 344  ;;  %v11749_v62 = vadd.f32 %v11720_v31, %v11713_v40  ;;  %v2288_v43 = vmul.f32 %v2160_v21, %v2032_v11  ;;  %v3555_v20 = vmul.f32 -0.5, %v3427_v41  ;;  %v3489_v14 = vmul.f32 %v11428_v59, %v3355_v2  ;;  %v11753_v55 = vpop.permute.xlu1 %1282  ;;  %v9003_v56 = vpop.eup %9002  ;;  %v17388_v31 = vld [vmem:[#allocation69_spill] sm:$0xff] }
 0x26e   : > { %17379 = vst [vmem:[#allocation180_spill] sm:$0xff] %v11742_v6  ;;  %2885 = vbcast.lane.b32.xlu0 %v10457_v38, 352  ;;  %17382 = vst [vmem:[#allocation181_spill] sm:$0xff] %v11753_v55  ;;  %v11757_v12 = vadd.f32 %v11729_v45, %v17383_v44  ;;  %v2345_v39 = vmul.f32 1.442695, %v2195_v48  ;;  %v3524_v5 = vmul.f32 -0.5, %v3396_v61  ;;  %v1883_v16 = vsub.f32 %v17385_v54, %v11617_v58 }
 0x26f   : > { %17381 = vst [vmem:[#allocation66_spill] sm:$0xff] %v11749_v62  ;;  %v11761_v40 = vpop.permute.xlu0 %3129  ;;  %v11763_v11 = vpop.eup %9004  ;;  %v11766_v2 = vmul.f32 %v11687_v13, %v8999_v60  ;;  %v3770_v21 = vmul.f32 1.442695, %v3636_v30  ;;  %v1821_v50 = vsub.f32 %v17388_v31, %v11617_v58  ;;  %v11771_v57 = vmul.f32 %v11687_v13, %v8997_v15 }
 0x270   : > { %17384 = vst [vmem:[#allocation40_spill] sm:$0xff] %v11757_v12  ;;  %17386 = vst [vmem:[#allocation68_spill] sm:$0xff] %v11761_v40  ;;  %v11774_v48 = vmul.f32 %v11630_v0, %v9001_v10  ;;  %9012 = vpow2.f32 %v2407_v26  ;;  %v3458_v54 = vmul.f32 %v11428_v59, %v3324_v52  ;;  %v3309_v44 = vsub.f32 %v11298_v1, %v11386_v42  ;;  %v11779_v45 = vpop.f32.mrb[16].mxu1 }
 0x271   : > { %17387 = vst [vmem:[#allocation182_spill] sm:$0xff] %v11766_v2  ;;  %17390 = vst [vmem:[#allocation183_spill] sm:$0xff] %v11779_v45  ;;  %v11782_v60 = vmul.f32 %v11630_v0, %v9003_v56  ;;  %v2531_v30 = vmul.f32 1.442695, %v2288_v43  ;;  %v3683_v6 = vmul.f32 %v3555_v20, %v3427_v41  ;;  %v3617_v31 = vmul.f32 -0.5, %v3489_v14  ;;  %1298 = vbcast.lane.b32.xlu1 %v10428_v33, 360  ;;  %v11788_v26 = vpop.permute.xlu1 %1479 }
 0x272   : > { %17389 = vst [vmem:[#allocation69_spill] sm:$0xff] %v11774_v48  ;;  %v11785_v15 = vpop.f32.mrb[17].mxu1  ;;  %3145 = vbcast.lane.b32.xlu0 %v10394_v27, 336  ;;  %17393 = vst [vmem:[#allocation186_spill] sm:$0xff] %v11788_v26  ;;  %9014 = vpow2.f32 %v2345_v39  ;;  %v3652_v52 = vmul.f32 %v3524_v5, %v3396_v61  ;;  %v2017_v1 = vmul.f32 %v11649_v32, %v1883_v16  ;;  %v17397_v16 = vld [vmem:[#allocation27_spill] sm:$0xff] }
 0x273   : > { %17391 = vst [vmem:[#allocation184_spill] sm:$0xff] %v11782_v60  ;;  %17392 = vst [vmem:[#allocation185_spill] sm:$0xff] %v11785_v15  ;;  %v3278_v10 = vsub.f32 %v11300_v63, %v11386_v42  ;;  %v11793_v56 = vpop.f32.mrb[18].mxu1  ;;  %v11795_v43 = vpop.permute.xlu0 %1349  ;;  %9016 = vpow2.f32 %v3770_v21  ;;  %v1955_v41 = vmul.f32 %v11649_v32, %v1821_v50  ;;  %v1790_v20 = vsub.f32 %v11312_v49, %v11617_v58 }
 0x274   : > { %17394 = vst [vmem:[#allocation187_spill] sm:$0xff] %v11793_v56  ;;  %17395 = vst [vmem:[#allocation188_spill] sm:$0xff] %v11795_v43  ;;  %v11800_v15 = vpop.f32.mrb[19].mxu1  ;;  %v9007_v61 = vpop.eup %9006  ;;  %v11806_v39 = vadd.f32 %v11774_v48, %v17397_v16  ;;  %v3586_v63 = vmul.f32 -0.5, %v3458_v54  ;;  %v3443_v56 = vmul.f32 %v11428_v59, %v3309_v44  ;;  %v3340_v21 = vsub.f32 %v11314_v47, %v11386_v42 }
 0x275   : > { %17396 = vst [vmem:[#allocation189_spill] sm:$0xff] %v11800_v15  ;;  %v11811_v50 = vpop.eup %9008  ;;  %v11815_v49 = vadd.f32 %v11782_v60, %v11766_v2  ;;  %9018 = vpow2.f32 %v2531_v30  ;;  %v3864_v15 = vmul.f32 1.442695, %v3683_v6  ;;  %v3745_v5 = vmul.f32 %v3617_v31, %v3489_v14  ;;  %1495 = vbcast.lane.b32.xlu1 %v17178_v29, 352  ;;  %v11818_v45 = vpop.permute.xlu1 %1641 }
 0x276   : > { %17398 = vst [vmem:[#allocation27_spill] sm:$0xff] %v11806_v39  ;;  %17399 = vst [vmem:[#allocation190_spill] sm:$0xff] %v11811_v50  ;;  %v9011_v16 = vpop.eup %9010  ;;  %v3802_v48 = vmul.f32 1.442695, %v3652_v52  ;;  %v2145_v39 = vmul.f32 -0.5, %v2017_v1  ;;  %v3412_v44 = vmul.f32 %v11428_v59, %v3278_v10  ;;  %v3247_v47 = vsub.f32 %v11359_v7, %v11386_v42  ;;  %1365 = vbcast.lane.b32.xlu0 %v10434_v34, 360 }
 0x277   : > { %17400 = vst [vmem:[#allocation191_spill] sm:$0xff] %v11815_v49  ;;  %v11824_v50 = vpop.permute.xlu0 %1637  ;;  %v11827_v30 = vmul.f32 %v11687_v13, %v9007_v61  ;;  %v2083_v14 = vmul.f32 -0.5, %v1955_v41  ;;  %v1924_v6 = vmul.f32 %v11649_v32, %v1790_v20  ;;  %v1837_v31 = vsub.f32 %v11334_v46, %v11617_v58 }
 0x278   : > { %v3714_v52 = vmul.f32 %v3586_v63, %v3458_v54  ;;  %v3571_v2 = vmul.f32 -0.5, %v3443_v56  ;;  %v3474_v10 = vmul.f32 %v11428_v59, %v3340_v21  ;;  %v1806_v7 = vsub.f32 %v11336_v25, %v11617_v58 }
 0x279   : > { %17401 = vst [vmem:[#allocation192_spill] sm:$0xff] %v11827_v30  ;;  %9020 = vpow2.f32 %v3864_v15  ;;  %v3988_v60 = vmul.f32 1.442695, %v3745_v5  ;;  %v1875_v49 = vsub.f32 %v11660_v51, %v11617_v58  ;;  %2755 = vbcast.lane.b32.xlu1 %v10441_v35, 360  ;;  %v11838_v61 = vpop.permute.xlu1 %2739  ;;  %v11841_v20 = vmul.f32 %v11630_v0, %v9011_v16 }
 0x27a   : > { %17402 = vst [vmem:[#allocation193_spill] sm:$0xff] %v11838_v61  ;;  %v9013_v46 = vpop.eup %9012  ;;  %9022 = vpow2.f32 %v3802_v48  ;;  %v2273_v54 = vmul.f32 %v2145_v39, %v2017_v1  ;;  %v3540_v63 = vmul.f32 -0.5, %v3412_v44  ;;  %v3381_v21 = vmul.f32 %v11428_v59, %v3247_v47  ;;  %1755 = vbcast.lane.b32.xlu0 %v10380_v18, 336  ;;  %v17406_v47 = vld [vmem:[#allocation129_spill] sm:$0xff] }
 0x27b   : > { %17403 = vst [vmem:[#allocation194_spill] sm:$0xff] %v11841_v20  ;;  %v11845_v25 = vpop.permute.xlu0 %1739  ;;  %v2211_v15 = vmul.f32 %v2083_v14, %v1955_v41  ;;  %v2052_v5 = vmul.f32 -0.5, %v1924_v6  ;;  %v1971_v51 = vmul.f32 %v11649_v32, %v1837_v31  ;;  %v1876_v12 = vsub.f32 %v11703_v8, %v11617_v58 }
 0x27c   : > { %17404 = vst [vmem:[#allocation195_spill] sm:$0xff] %v11845_v25  ;;  %v9015_v62 = vpop.eup %9014  ;;  %v3926_v16 = vmul.f32 1.442695, %v3714_v52  ;;  %v3699_v9 = vmul.f32 %v3571_v2, %v3443_v56  ;;  %v3602_v61 = vmul.f32 -0.5, %v3474_v10  ;;  %v1940_v48 = vmul.f32 %v11649_v32, %v1806_v7 }
 0x27d   : > { %v9017_v1 = vpop.eup %9016  ;;  %v11852_v39 = vmul.f32 %v11687_v13, %v9013_v46  ;;  %9024 = vpow2.f32 %v3988_v60  ;;  %v3294_v41 = vsub.f32 %v17406_v47, %v11386_v42  ;;  %v2009_v14 = vmul.f32 %v11649_v32, %v1875_v49  ;;  %2952 = vbcast.lane.b32.xlu1 %v10388_v22, 352  ;;  %v11858_v31 = vpop.permute.xlu1 %2936  ;;  %v17410_v49 = vld [vmem:[#allocation130_spill] sm:$0xff] }
 0x27e   : > { %17407 = vst [vmem:[#allocation129_spill] sm:$0xff] %v11858_v31  ;;  %v2501_v8 = vmul.f32 1.442695, %v2273_v54  ;;  %v3668_v52 = vmul.f32 %v3540_v63, %v3412_v44  ;;  %v3509_v2 = vmul.f32 -0.5, %v3381_v21  ;;  %v2010_v56 = vmul.f32 %v11649_v32, %v1876_v12  ;;  %2822 = vbcast.lane.b32.xlu0 %v10446_v36, 360  ;;  %v17412_v12 = vld [vmem:[#allocation123_spill] sm:$0xff] }
 0x27f   : > { %17405 = vst [vmem:[#allocation196_spill] sm:$0xff] %v11852_v39  ;;  %v11862_v7 = vpop.permute.xlu0 %2806  ;;  %v11864_v46 = vpop.eup %9018  ;;  %v2377_v60 = vmul.f32 1.442695, %v2211_v15  ;;  %v2180_v25 = vmul.f32 %v2052_v5, %v1924_v6  ;;  %v2099_v47 = vmul.f32 -0.5, %v1971_v51  ;;  %v3263_v40 = vsub.f32 %v17410_v49, %v11386_v42 }
 0x280   : > { %17408 = vst [vmem:[#allocation197_spill] sm:$0xff] %v11862_v7  ;;  %17409 = vst [vmem:[#allocation198_spill] sm:$0xff] %v11864_v46  ;;  %9026 = vpow2.f32 %v3926_v16  ;;  %v3896_v43 = vmul.f32 1.442695, %v3699_v9  ;;  %v3730_v31 = vmul.f32 %v3602_v61, %v3474_v10  ;;  %v2068_v54 = vmul.f32 -0.5, %v1940_v48 }
 0x281   : > { %v11869_v44 = vmul.f32 %v11630_v0, %v9017_v1  ;;  %v1899_v63 = vsub.f32 %v17412_v12, %v11617_v58  ;;  %v3428_v7 = vmul.f32 %v11428_v59, %v3294_v41  ;;  %v2137_v26 = vmul.f32 -0.5, %v2009_v14  ;;  %3212 = vbcast.lane.b32.xlu1 %v10396_v28, 336  ;;  %v11875_v6 = vpop.permute.xlu1 %3196 }
 0x282   : > { %17413 = vst [vmem:[#allocation123_spill] sm:$0xff] %v11875_v6  ;;  %9028 = vpow2.f32 %v2501_v8  ;;  %v3834_v15 = vmul.f32 1.442695, %v3668_v52  ;;  %v3637_v5 = vmul.f32 %v3509_v2, %v3381_v21  ;;  %v2138_v16 = vmul.f32 -0.5, %v2010_v56  ;;  %3082 = vbcast.lane.b32.xlu0 %v10392_v24, 344  ;;  %v17415_v6 = vld [vmem:[#allocation136_spill] sm:$0xff] }
 0x283   : > { %17411 = vst [vmem:[#allocation130_spill] sm:$0xff] %v11869_v44  ;;  %v11878_v9 = vpop.permute.xlu0 %3066  ;;  %v9021_v10 = vpop.eup %9020  ;;  %9030 = vpow2.f32 %v2377_v60  ;;  %v2315_v61 = vmul.f32 1.442695, %v2180_v25  ;;  %v2227_v1 = vmul.f32 %v2099_v47, %v1971_v51  ;;  %v3397_v49 = vmul.f32 %v11428_v59, %v3263_v40  ;;  %v17416_v2 = vld [vmem:[#allocation137_spill] sm:$0xff] }
 0x284   : > { %17414 = vst [vmem:[#allocation199_spill] sm:$0xff] %v11878_v9  ;;  %v9023_v41 = vpop.eup %9022  ;;  %9032 = vpow2.f32 %v3896_v43  ;;  %v3958_v12 = vmul.f32 1.442695, %v3730_v31  ;;  %v2196_v46 = vmul.f32 %v2068_v54, %v1940_v48  ;;  %v3356_v8 = vsub.f32 %v17415_v6, %v11386_v42 }
 0x285   : > { %v2033_v21 = vmul.f32 %v11649_v32, %v1899_v63  ;;  %v3556_v52 = vmul.f32 -0.5, %v3428_v7  ;;  %v3325_v55 = vsub.f32 %v17416_v2, %v11386_v42  ;;  %v2265_v9 = vmul.f32 %v2137_v26, %v2009_v14  ;;  %1692 = vbcast.lane.b32.xlu1 %v10377_v17, 344  ;;  %v11887_v25 = vpop.permute.xlu1 %1676  ;;  %v17422_v2 = vld [vmem:[#allocation142_spill] sm:$0xff] }
 0x286   : > { %v11890_v40 = vmul.f32 %v11687_v13, %v9015_v62  ;;  %9034 = vpow2.f32 %v3834_v15  ;;  %v3772_v43 = vmul.f32 1.442695, %v3637_v5  ;;  %v2266_v51 = vmul.f32 %v2138_v16, %v2010_v56  ;;  %1432 = vbcast.lane.b32.xlu0 %v10452_v37, 360 }
 0x287   : > { %v11893_v48 = vpop.permute.xlu0 %1416  ;;  %v11895_v31 = vpop.eup %9024  ;;  %9036 = vpow2.f32 %v2315_v61  ;;  %v2409_v60 = vmul.f32 1.442695, %v2227_v1  ;;  %v3525_v47 = vmul.f32 -0.5, %v3397_v49  ;;  %v11899_v26 = vadd.f32 %v11841_v20, %v11771_v57  ;;  %v17421_v61 = vld [vmem:[#allocation78_spill] sm:$0xff] }
 0x288   : > { %17417 = vst [vmem:[#allocation136_spill] sm:$0xff] %v11890_v40  ;;  %17418 = vst [vmem:[#allocation137_spill] sm:$0xff] %v11895_v31  ;;  %v11903_v62 = vadd.f32 %v11869_v44, %v11827_v30  ;;  %9038 = vpow2.f32 %v3958_v12  ;;  %v2347_v14 = vmul.f32 1.442695, %v2196_v46  ;;  %v3490_v56 = vmul.f32 %v11428_v59, %v3356_v8 }
 0x289   : > { %17419 = vst [vmem:[#allocation200_spill] sm:$0xff] %v11899_v26  ;;  %v2161_v54 = vmul.f32 -0.5, %v2033_v21  ;;  %v3684_v63 = vmul.f32 %v3556_v52, %v3428_v7  ;;  %v3459_v6 = vmul.f32 %v11428_v59, %v3325_v55  ;;  %v2485_v15 = vmul.f32 1.442695, %v2265_v9  ;;  %3019 = vbcast.lane.b32.xlu1 %v10390_v23, 352  ;;  %v11908_v5 = vpop.permute.xlu1 %3003 }
 0x28a   : > { %17420 = vst [vmem:[#allocation201_spill] sm:$0xff] %v11903_v62  ;;  %v9027_v16 = vpop.eup %9026  ;;  %9040 = vpow2.f32 %v3772_v43  ;;  %v1884_v1 = vsub.f32 %v17421_v61, %v11617_v58  ;;  %v1822_v12 = vsub.f32 %v17422_v2, %v11617_v58  ;;  %v2487_v46 = vmul.f32 1.442695, %v2266_v51  ;;  %2889 = vbcast.lane.b32.xlu0 %v10457_v38, 360 }
 0x28b   : > { %v11914_v20 = vpop.permute.xlu0 %2873  ;;  %v11917_v7 = vmul.f32 %v11630_v0, %v9021_v10  ;;  %9042 = vpow2.f32 %v2409_v60  ;;  %v3653_v55 = vmul.f32 %v3525_v47, %v3397_v49  ;;  %v11922_v9 = vmul.f32 %v11687_v13, %v11763_v11  ;;  %v17426_v60 = vld [vmem:[#allocation79_spill] sm:$0xff] }
 0x28c   : > { %v9029_v8 = vpop.eup %9028  ;;  %v11925_v52 = vmul.f32 %v11630_v0, %v9023_v41  ;;  %9044 = vpow2.f32 %v2347_v14  ;;  %v3618_v43 = vmul.f32 -0.5, %v3490_v56  ;;  %v1878_v51 = vsub.f32 %v11818_v45, %v11617_v58 }
 0x28d   : > { %17423 = vst [vmem:[#allocation78_spill] sm:$0xff] %v11917_v7  ;;  %17424 = vst [vmem:[#allocation142_spill] sm:$0xff] %v11922_v9  ;;  %v9031_v61 = vpop.eup %9030  ;;  %v3866_v10 = vmul.f32 1.442695, %v3684_v63  ;;  %v3587_v2 = vmul.f32 -0.5, %v3459_v6  ;;  %9046 = vpow2.f32 %v2485_v15  ;;  %v1877_v49 = vsub.f32 %v11824_v50, %v11617_v58  ;;  %4154 = vbcast.lane.b32.xlu1 %v17426_v60, 256  ;;  %v11932_v11 = vpop.permute.xlu1 %1286 }
 0x28e   : > { %17425 = vst [vmem:[#allocation202_spill] sm:$0xff] %v11925_v52  ;;  %v9033_v47 = vpop.eup %9032  ;;  %v2289_v30 = vmul.f32 %v2161_v54, %v2033_v21  ;;  %v2018_v41 = vmul.f32 %v11649_v32, %v1884_v1  ;;  %v1956_v14 = vmul.f32 %v11649_v32, %v1822_v12  ;;  %9048 = vpow2.f32 %v2487_v46  ;;  %3149 = vbcast.lane.b32.xlu0 %v10394_v27, 344  ;;  %v17431_v12 = vld [vmem:[#allocation145_spill] sm:$0xff] }
 0x28f   : > { %v11936_v44 = vpop.permute.xlu0 %3133  ;;  %v11940_v45 = vadd.f32 %v11917_v7, %v11852_v39  ;;  %v11943_v63 = vmul.f32 %v11630_v0, %v9027_v16  ;;  %v3804_v50 = vmul.f32 1.442695, %v3653_v55  ;;  %v2012_v15 = vmul.f32 %v11649_v32, %v1878_v51 }
 0x290   : > { %17427 = vst [vmem:[#allocation79_spill] sm:$0xff] %v11936_v44  ;;  %v9035_v21 = vpop.eup %9034  ;;  %v11949_v54 = vadd.f32 %v11925_v52, %v11890_v40  ;;  %v3746_v1 = vmul.f32 %v3618_v43, %v3490_v56  ;;  %v3310_v46 = vsub.f32 %v17431_v12, %v11386_v42  ;;  %v2011_v39 = vmul.f32 %v11649_v32, %v1877_v49  ;;  %v17435_v12 = vld [vmem:[#allocation42_spill] sm:$0xff]  ;;  %v17482_v44 = vld [vmem:[#allocation125_spill] sm:$0xff] }
 0x291   : > { %17428 = vst [vmem:[#allocation203_spill] sm:$0xff] %v11940_v45  ;;  %17429 = vst [vmem:[#allocation204_spill] sm:$0xff] %v11943_v63  ;;  %v9037_v7 = vpop.eup %9036  ;;  %v11955_v16 = vmul.f32 %v11630_v0, %v9033_v47  ;;  %9050 = vpow2.f32 %v3866_v10  ;;  %v3715_v55 = vmul.f32 %v3587_v2, %v3459_v6  ;;  %v2140_v51 = vmul.f32 -0.5, %v2012_v15  ;;  %1302 = vbcast.lane.b32.xlu1 %v10428_v33, 368  ;;  %v11958_v62 = vpop.permute.xlu1 %1483 }
 0x292   : > { %17430 = vst [vmem:[#allocation205_spill] sm:$0xff] %v11949_v54  ;;  %17433 = vst [vmem:[#allocation206_spill] sm:$0xff] %v11958_v62  ;;  %v9039_v9 = vpop.eup %9038  ;;  %v2533_v40 = vmul.f32 1.442695, %v2289_v30  ;;  %v2146_v52 = vmul.f32 -0.5, %v2018_v41  ;;  %v2084_v56 = vmul.f32 -0.5, %v1956_v14  ;;  %v11964_v49 = vadd.f32 %v11943_v63, %v17435_v12 }
 0x293   : > { %17432 = vst [vmem:[#allocation145_spill] sm:$0xff] %v11955_v16  ;;  %v2139_v43 = vmul.f32 -0.5, %v2011_v39  ;;  %v11960_v31 = vpop.permute.xlu0 %1353  ;;  %v11967_v47 = vmul.f32 %v11630_v0, %v9035_v21  ;;  %9052 = vpow2.f32 %v3804_v50  ;;  %4158 = vbcast.lane.b32.xlu0 %v17426_v60, 264  ;;  %v11971_v6 = vmul.f32 %v11687_v13, %v9029_v8  ;;  %v17439_v12 = vld [vmem:[#allocation26_spill] sm:$0xff]  ;;  %v17441_v63 = vld [vmem:[#allocation148_spill] sm:$0xff] }
 0x294   : > { %17434 = vst [vmem:[#allocation207_spill] sm:$0xff] %v11960_v31  ;;  %17436 = vst [vmem:[#allocation42_spill] sm:$0xff] %v11964_v49  ;;  %v9041_v10 = vpop.eup %9040  ;;  %v3990_v30 = vmul.f32 1.442695, %v3746_v1  ;;  %v3444_v2 = vmul.f32 %v11428_v59, %v3310_v46  ;;  %v2268_v45 = vmul.f32 %v2140_v51, %v2012_v15  ;;  %v11975_v31 = vmul.f32 %v11687_v13, %v9031_v61 }
 0x295   : > { %17437 = vst [vmem:[#allocation208_spill] sm:$0xff] %v11967_v47  ;;  %v2267_v54 = vmul.f32 %v2139_v43, %v2011_v39  ;;  %v9043_v26 = vpop.eup %9042  ;;  %v11979_v21 = vadd.f32 %v11955_v16, %v17439_v12  ;;  %v3928_v50 = vmul.f32 1.442695, %v3715_v55  ;;  %v3279_v49 = vsub.f32 %v17441_v63, %v11386_v42  ;;  %1499 = vbcast.lane.b32.xlu1 %v17178_v29, 360  ;;  %v11984_v8 = vpop.permute.xlu1 %2743 }
 0x296   : > { %17438 = vst [vmem:[#allocation209_spill] sm:$0xff] %v11975_v31  ;;  %17442 = vst [vmem:[#allocation148_spill] sm:$0xff] %v11984_v8  ;;  %v9045_v1 = vpop.eup %9044  ;;  %9054 = vpow2.f32 %v2533_v40  ;;  %v2274_v15 = vmul.f32 %v2146_v52, %v2018_v41  ;;  %v2212_v39 = vmul.f32 %v2084_v56, %v1956_v14  ;;  %v11990_v43 = vadd.f32 %v11967_v47, %v11975_v31  ;;  %v17447_v41 = vld [vmem:[#allocation52_spill] sm:$0xff] }
 0x297   : > { %17440 = vst [vmem:[#allocation26_spill] sm:$0xff] %v11979_v21  ;;  %v2489_v46 = vmul.f32 1.442695, %v2267_v54  ;;  %v11986_v51 = vpop.permute.xlu0 %1743  ;;  %v9047_v61 = vpop.eup %9046  ;;  %v11993_v55 = vmul.f32 %v11687_v13, %v9037_v7  ;;  %v11996_v42 = vmul.f32 %v11630_v0, %v9041_v10  ;;  %v1885_v63 = vsub.f32 %v11696_v3, %v11617_v58  ;;  %1369 = vbcast.lane.b32.xlu0 %v10434_v34, 368 }
 0x298   : > { %17443 = vst [vmem:[#allocation210_spill] sm:$0xff] %v11986_v51  ;;  %17444 = vst [vmem:[#allocation211_spill] sm:$0xff] %v11990_v43  ;;  %v9049_v40 = vpop.eup %9048  ;;  %9056 = vpow2.f32 %v3990_v30  ;;  %v3572_v52 = vmul.f32 -0.5, %v3444_v2  ;;  %v1791_v14 = vsub.f32 %v17447_v41, %v11617_v58  ;;  %v2491_v54 = vmul.f32 1.442695, %v2268_v45 }
 0x299   : > { %17445 = vst [vmem:[#allocation212_spill] sm:$0xff] %v11993_v55  ;;  %17446 = vst [vmem:[#allocation213_spill] sm:$0xff] %v11996_v42  ;;  %v12004_v56 = vmul.f32 %v11687_v13, %v9043_v26  ;;  %9058 = vpow2.f32 %v3928_v50  ;;  %v3413_v7 = vmul.f32 %v11428_v59, %v3279_v49  ;;  %2759 = vbcast.lane.b32.xlu1 %v10441_v35, 368  ;;  %v12011_v3 = vpop.permute.xlu1 %2940  ;;  %v2503_v12 = vmul.f32 1.442695, %v2274_v15 }
 0x29a   : > { %v12009_v10 = vmul.f32 %v11630_v0, %v9039_v9  ;;  %17450 = vst [vmem:[#allocation215_spill] sm:$0xff] %v12011_v3  ;;  %v12014_v30 = vmul.f32 %v11687_v13, %v9045_v1  ;;  %v2379_v31 = vmul.f32 1.442695, %v2212_v39  ;;  %9060 = vpow2.f32 %v2489_v46  ;;  %v17456_v39 = vld [vmem:[#allocation25_spill] sm:$0xff] }
 0x29b   : > { %17448 = vst [vmem:[#allocation52_spill] sm:$0xff] %v12004_v56  ;;  %v12016_v45 = vpop.permute.xlu0 %2810  ;;  %v9051_v26 = vpop.eup %9050  ;;  %v12020_v50 = vadd.f32 %v11996_v42, %v11993_v55  ;;  %v2019_v59 = vmul.f32 %v11649_v32, %v1885_v63  ;;  %v12024_v9 = vmul.f32 %v11687_v13, %v9047_v61  ;;  %v12027_v49 = vmul.f32 %v11687_v13, %v9049_v40 }
 0x29c   : > { %17449 = vst [vmem:[#allocation214_spill] sm:$0xff] %v12009_v10  ;;  %17451 = vst [vmem:[#allocation216_spill] sm:$0xff] %v12014_v30  ;;  %1759 = vbcast.lane.b32.xlu0 %v10380_v18, 344  ;;  %v3700_v1 = vmul.f32 %v3572_v52, %v3444_v2  ;;  %v1925_v15 = vmul.f32 %v11649_v32, %v1791_v14  ;;  %v1838_v46 = vsub.f32 %v17456_v39, %v11617_v58  ;;  %v12046_v14 = vld [vmem:[%s10782_s26] ss:$0 sm:$0xff] }
 0x29d   : > { %17452 = vst [vmem:[#allocation217_spill] sm:$0xff] %v12016_v45  ;;  %17453 = vst [vmem:[#allocation218_spill] sm:$0xff] %v12020_v50  ;;  %9062 = vpow2.f32 %v2491_v54  ;;  %v9053_v41 = vpop.eup %9052  ;;  %v3541_v16 = vmul.f32 -0.5, %v3413_v7  ;;  %v1807_v63 = vsub.f32 %v11565_v53, %v11617_v58  ;;  %v4840_v61 = vpack.c.bf16 %v12027_v49, %v12024_v9  ;;  %2956 = vbcast.lane.b32.xlu1 %v10388_v22, 360  ;;  %v12040_v2 = vpop.permute.xlu1 %3200  ;;  %v17459_v53 = vld [vmem:[#allocation156_spill] sm:$0xff] }
 0x29e   : > { %17454 = vst [vmem:[#allocation219_spill] sm:$0xff] %v12024_v9  ;;  %17455 = vst [vmem:[#allocation220_spill] sm:$0xff] %v12027_v49  ;;  %v1886_v40 = vsub.f32 %v11887_v25, %v11617_v58  ;;  %v12043_v52 = vmul.f32 %v11630_v0, %v9051_v26  ;;  %9064 = vpow2.f32 %v2503_v12  ;;  %v3248_v54 = vsub.f32 %v11579_v4, %v12046_v14  ;;  %v17461_v25 = vld [vmem:[#allocation91_spill] sm:$0xff] }
 0x29f   : > { %17457 = vst [vmem:[#allocation25_spill] sm:$0xff] %v12040_v2  ;;  %v3295_v39 = vsub.f32 %v17459_v53, %v12046_v14  ;;  %v12052_v55 = vpop.permute.xlu0 %3070  ;;  %9066 = vpow2.f32 %v2379_v31  ;;  %v3341_v47 = vsub.f32 %v17461_v25, %v12046_v14  ;;  %v2147_v42 = vmul.f32 -0.5, %v2019_v59  ;;  %8532 = vmatprep.mubr.bf16.mxu1 %v4840_v61  ;;  %v17464_v25 = vld [vmem:[#allocation159_spill] sm:$0xff] }
 0x2a0   : > { %17458 = vst [vmem:[#allocation221_spill] sm:$0xff] %v12043_v52  ;;  %17460 = vst [vmem:[#allocation156_spill] sm:$0xff] %v12052_v55  ;;  %v2020_v26 = vmul.f32 %v11649_v32, %v1886_v40  ;;  %v12057_v12 = vpop.eup %9054  ;;  %v12060_v50 = vmul.f32 %v11630_v0, %v9053_v41  ;;  %v3898_v4 = vmul.f32 1.442695, %v3700_v1  ;;  %v2053_v43 = vmul.f32 -0.5, %v1925_v15  ;;  %2826 = vbcast.lane.b32.xlu0 %v10446_v36, 368 }
 0x2a1   : > { %17462 = vst [vmem:[#allocation91_spill] sm:$0xff] %v12057_v12  ;;  %v1972_v53 = vmul.f32 %v11649_v32, %v1838_v46  ;;  %v3669_v31 = vmul.f32 %v3541_v16, %v3413_v7  ;;  %v1941_v21 = vmul.f32 %v11649_v32, %v1807_v63  ;;  %v3264_v61 = vsub.f32 %v17464_v25, %v12046_v14  ;;  %v12068_v40 = vpop.permute.xlu1 %1680  ;;  %v12077_v46 = vld [vmem:[%s10801_s23] ss:$0 sm:$0xff]  ;;  %v17467_v41 = vld [vmem:[#allocation111_spill] sm:$0xff] }
 0x2a2   : > { %17463 = vst [vmem:[#allocation222_spill] sm:$0xff] %v12060_v50  ;;  %v2148_v49 = vmul.f32 -0.5, %v2020_v26  ;;  %3216 = vbcast.lane.b32.xlu1 %v10396_v28, 344  ;;  %v12070_v12 = vpop.eup %9056  ;;  %v12074_v1 = vadd.f32 %v12043_v52, %v12004_v56  ;;  %v3382_v16 = vmul.f32 %v12077_v46, %v3248_v54  ;;  %v3429_v7 = vmul.f32 %v12077_v46, %v3295_v39  ;;  %v17469_v56 = vld [vmem:[#allocation65_spill] sm:$0xff] }
 0x2a3   : > { %17465 = vst [vmem:[#allocation159_spill] sm:$0xff] %v12070_v12  ;;  %v3326_v63 = vsub.f32 %v17467_v41, %v12046_v14  ;;  %v12083_v25 = vpop.permute.xlu0 %1420  ;;  %v12085_v9 = vpop.eup %9058  ;;  %v12088_v10 = vmul.f32 %v12077_v46, %v3341_v47  ;;  %v2275_v12 = vmul.f32 %v2147_v42, %v2019_v59  ;;  %v3311_v52 = vsub.f32 %v17469_v56, %v12046_v14 }
 0x2a4   : > { %17466 = vst [vmem:[#allocation223_spill] sm:$0xff] %v12074_v1  ;;  %17468 = vst [vmem:[#allocation111_spill] sm:$0xff] %v12083_v25  ;;  %v3280_v1 = vsub.f32 %v11732_v19, %v12046_v14  ;;  %v9061_v54 = vpop.eup %9060  ;;  %v12096_v39 = vadd.f32 %v12060_v50, %v12014_v30  ;;  %v2181_v41 = vmul.f32 %v2053_v43, %v1925_v15  ;;  %v2100_v55 = vmul.f32 -0.5, %v1972_v53  ;;  %v17472_v30 = vld [vmem:[#allocation169_spill] sm:$0xff] }
 0x2a5   : > { %v2276_v25 = vmul.f32 %v2148_v49, %v2020_v26  ;;  %3086 = vbcast.lane.b32.xlu0 %v10392_v24, 352  ;;  %9068 = vpow2.f32 %v3898_v4  ;;  %v3836_v47 = vmul.f32 1.442695, %v3669_v31  ;;  %v2069_v2 = vmul.f32 -0.5, %v1941_v21  ;;  %v12100_v59 = vpop.permute.xlu1 %3007 }
 0x2a6   : > { %17470 = vst [vmem:[#allocation65_spill] sm:$0xff] %v12096_v39  ;;  %v3398_v42 = vmul.f32 %v12077_v46, %v3264_v61  ;;  %17471 = vst [vmem:[#allocation224_spill] sm:$0xff] %v12100_v59  ;;  %v3510_v45 = vmul.f32 -0.5, %v3382_v16  ;;  %v3557_v19 = vmul.f32 -0.5, %v3429_v7  ;;  %v3460_v3 = vmul.f32 %v12077_v46, %v3326_v63  ;;  %1696 = vbcast.lane.b32.xlu1 %v10377_v17, 352  ;;  %v17475_v63 = vld [vmem:[#allocation181_spill] sm:$0xff] }
 0x2a7   : > { %v9063_v56 = vpop.eup %9062  ;;  %v1823_v50 = vsub.f32 %v17472_v30, %v11617_v58  ;;  %v12106_v43 = vpop.permute.xlu0 %2877  ;;  %v2505_v49 = vmul.f32 1.442695, %v2275_v12  ;;  %v3445_v15 = vmul.f32 %v12077_v46, %v3311_v52  ;;  %v3414_v26 = vmul.f32 %v12077_v46, %v3280_v1  ;;  %v17476_v12 = vld [vmem:[#allocation55_spill] sm:$0xff] }
 0x2a8   : > { %17473 = vst [vmem:[#allocation169_spill] sm:$0xff] %v12106_v43  ;;  %v12111_v4 = vmul.f32 %v11687_v13, %v9061_v54  ;;  %v9065_v31 = vpop.eup %9064  ;;  %v2317_v61 = vmul.f32 1.442695, %v2181_v41  ;;  %v2228_v39 = vmul.f32 %v2100_v55, %v1972_v53  ;;  %v1792_v59 = vsub.f32 %v17475_v63, %v11617_v58 }
 0x2a9   : > { %v2507_v51 = vmul.f32 1.442695, %v2276_v25  ;;  %1436 = vbcast.lane.b32.xlu0 %v10452_v37, 368  ;;  %v12116_v30 = vpop.eup %9066  ;;  %v2197_v43 = vmul.f32 %v2069_v2, %v1941_v21  ;;  %v1900_v52 = vsub.f32 %v17476_v12, %v11617_v58  ;;  %v3526_v8 = vmul.f32 -0.5, %v3398_v42  ;;  %v12123_v54 = vpop.permute.xlu1 %1290 }
 0x2aa   : > { %17474 = vst [vmem:[#allocation225_spill] sm:$0xff] %v12111_v4  ;;  %v12121_v1 = vmul.f32 %v11687_v13, %v9063_v56  ;;  %17478 = vst [vmem:[#allocation55_spill] sm:$0xff] %v12123_v54  ;;  %v3638_v41 = vmul.f32 %v3510_v45, %v3382_v16  ;;  %v3685_v55 = vmul.f32 %v3557_v19, %v3429_v7  ;;  %v3588_v53 = vmul.f32 -0.5, %v3460_v3 }
 0x2ab   : > { %v1957_v63 = vmul.f32 %v11649_v32, %v1823_v50  ;;  %3023 = vbcast.lane.b32.xlu1 %v10390_v23, 360  ;;  %v12127_v25 = vpop.permute.xlu0 %3137  ;;  %9070 = vpow2.f32 %v2505_v49  ;;  %v3573_v21 = vmul.f32 -0.5, %v3445_v15  ;;  %v3542_v2 = vmul.f32 -0.5, %v3414_v26  ;;  %v17480_v49 = vld [vmem:[#allocation57_spill] sm:$0xff] }
 0x2ac   : > { %17477 = vst [vmem:[#allocation181_spill] sm:$0xff] %v12121_v1  ;;  %17479 = vst [vmem:[#allocation226_spill] sm:$0xff] %v12127_v25  ;;  %v4841_v12 = vpack.c.bf16 %v12121_v1, %v12111_v4  ;;  %v3603_v56 = vmul.f32 -0.5, %v12088_v10  ;;  %v2411_v62 = vmul.f32 1.442695, %v2228_v39  ;;  %v1926_v54 = vmul.f32 %v11649_v32, %v1792_v59  ;;  %v17481_v39 = vld [vmem:[#allocation126_spill] sm:$0xff] }
 0x2ad   : > { %9072 = vpow2.f32 %v2507_v51  ;;  %2893 = vbcast.lane.b32.xlu0 %v10457_v38, 368  ;;  %v2349_v45 = vmul.f32 1.442695, %v2197_v43  ;;  %v2034_v50 = vmul.f32 %v11649_v32, %v1900_v52  ;;  %v3654_v16 = vmul.f32 %v3526_v8, %v3398_v42  ;;  %v12135_v7 = vpop.permute.xlu1 %1487 }
 0x2ae   : > { %9074 = vpow2.f32 %v3836_v47  ;;  %8533 = vmatmul.mubr.bf16.gmra.mrb[24].mxu1 %v4841_v12  ;;  %v3774_v19 = vmul.f32 1.442695, %v3638_v41  ;;  %v3357_v1 = vsub.f32 %v17480_v49, %v12046_v14  ;;  %v3716_v4 = vmul.f32 %v3588_v53, %v3460_v3  ;;  %v17485_v41 = vld [vmem:[#allocation186_spill] sm:$0xff]  ;;  %v17486_v49 = vld [vmem:[#allocation188_spill] sm:$0xff] }
 0x2af   : > { %v2085_v25 = vmul.f32 -0.5, %v1957_v63  ;;  %v17483_v59 = vpack.c.bf16 %v17481_v39, %v17482_v44  ;;  %4162 = vbcast.lane.b32.xlu1 %v17426_v60, 272  ;;  %v12143_v51 = vpop.permute.xlu0 %1357  ;;  %v12145_v47 = vpop.eup %9068  ;;  %9076 = vpow2.f32 %v2317_v61  ;;  %v3868_v8 = vmul.f32 1.442695, %v3685_v55 }
 0x2b0   : > { %17484 = vst [vmem:[#allocation57_spill] sm:$0xff] %v12143_v51  ;;  %v3701_v42 = vmul.f32 %v3573_v21, %v3445_v15  ;;  %v3670_v43 = vmul.f32 %v3542_v2, %v3414_v26  ;;  %9078 = vpow2.f32 %v2411_v62  ;;  %v2054_v52 = vmul.f32 -0.5, %v1926_v54  ;;  %v17488_v2 = vld [vmem:[#allocation68_spill] sm:$0xff] }
 0x2b1   : > { %8536 = vmatprep.mubr.bf16.mxu1 %v17483_v59  ;;  %v1839_v3 = vsub.f32 %v17485_v41, %v11617_v58  ;;  %v12150_v53 = vmul.f32 %v11687_v13, %v9065_v31  ;;  %3153 = vbcast.lane.b32.xlu0 %v10394_v27, 352  ;;  %9080 = vpow2.f32 %v2349_v45  ;;  %v2162_v44 = vmul.f32 -0.5, %v2034_v50  ;;  %v12155_v61 = vpop.permute.xlu1 %2747  ;;  %v17489_v41 = vld [vmem:[#allocation193_spill] sm:$0xff] }
 0x2b2   : > { %v3806_v12 = vmul.f32 1.442695, %v3654_v16  ;;  %v1808_v39 = vsub.f32 %v17486_v49, %v11617_v58  ;;  %9082 = vpow2.f32 %v3774_v19  ;;  %v3491_v62 = vmul.f32 %v12077_v46, %v3357_v1 }
 0x2b3   : > { %v3930_v15 = vmul.f32 1.442695, %v3716_v4  ;;  %v2213_v26 = vmul.f32 %v2085_v25, %v1957_v63  ;;  %1373 = vbcast.lane.b32.xlu1 %v10434_v34, 376  ;;  %v12159_v55 = vpop.permute.xlu0 %1747  ;;  %9084 = vpow2.f32 %v3868_v8  ;;  %v3900_v31 = vmul.f32 1.442695, %v3701_v42  ;;  %v17492_v8 = vld [vmem:[#allocation166_spill] sm:$0xff] }
 0x2b4   : > { %17487 = vst [vmem:[#allocation126_spill] sm:$0xff] %v12159_v55  ;;  %v3838_v21 = vmul.f32 1.442695, %v3670_v43  ;;  %v3342_v45 = vsub.f32 %v17488_v2, %v12046_v14  ;;  %v2182_v16 = vmul.f32 %v2054_v52, %v1926_v54  ;;  %v1973_v59 = vmul.f32 %v11649_v32, %v1839_v3  ;;  %v17491_v54 = vld [vmem:[#allocation195_spill] sm:$0xff] }
 0x2b5   : > { %v3249_v19 = vsub.f32 %v17489_v41, %v12046_v14  ;;  %v4844_v4 = vpack.c.bf16 %v12150_v53, %v11971_v6  ;;  %1306 = vbcast.lane.b32.xlu0 %v10428_v33, 376  ;;  %v9071_v34 = vpop.eup %9070  ;;  %v12171_v1 = vmul.f32 %v11630_v0, %v12085_v9  ;;  %9086 = vpow2.f32 %v3806_v12  ;;  %v12179_v43 = vpop.permute.xlu1 %2944  ;;  %v17494_v0 = vld [vmem:[#allocation129_spill] sm:$0xff] }
 0x2b6   : > { %v1942_v63 = vmul.f32 %v11649_v32, %v1808_v39  ;;  %v1901_v25 = vsub.f32 %v17491_v54, %v11617_v58  ;;  %v17493_v42 = vpack.c.bf16 %v11771_v57, %v17492_v8  ;;  %v3731_v33 = vmul.f32 %v3603_v56, %v12088_v10 }
 0x2b7   : > { %17490 = vst [vmem:[#allocation125_spill] sm:$0xff] %v12171_v1  ;;  %v9073_v52 = vpop.eup %9072  ;;  %9088 = vpow2.f32 %v3930_v15  ;;  %v2381_v3 = vmul.f32 1.442695, %v2213_v26  ;;  %v3296_v9 = vsub.f32 %v17494_v0, %v12046_v14  ;;  %1763 = vbcast.lane.b32.xlu1 %v10380_v18, 352  ;;  %v12185_v12 = vpop.permute.xlu0 %2814  ;;  %v2290_v49 = vmul.f32 %v2162_v44, %v2034_v50 }
 0x2b8   : > { %8537 = vmatmul.mubr.bf16.gmra.mrb[28].mxu1 %v17493_v42  ;;  %v9075_v58 = vpop.eup %9074  ;;  %v3619_v57 = vmul.f32 -0.5, %v3491_v62  ;;  %9090 = vpow2.f32 %v3900_v31  ;;  %v3476_v39 = vmul.f32 %v12077_v46, %v3342_v45  ;;  %v2319_v2 = vmul.f32 1.442695, %v2182_v16 }
 0x2b9   : > { %8540 = vmatprep.mubr.bf16.mxu1 %v4844_v4  ;;  %9092 = vpow2.f32 %v3838_v21  ;;  %v2101_v10 = vmul.f32 -0.5, %v1973_v59  ;;  %v3383_v56 = vmul.f32 %v12077_v46, %v3249_v19  ;;  %1503 = vbcast.lane.b32.xlu0 %v17178_v29, 368  ;;  %v9077_v15 = vpop.eup %9076  ;;  %v2070_v26 = vmul.f32 -0.5, %v1942_v63  ;;  %v12197_v44 = vpop.permute.xlu1 %3204  ;;  %v12200_v21 = vld [vmem:[%s10969_s29] ss:$0 sm:$0xff] }
 0x2ba   : > { %v2035_v41 = vmul.f32 %v11649_v32, %v1901_v25  ;;  %v12192_v4 = vmul.f32 %v11687_v13, %v9071_v34  ;;  %v12195_v50 = vmul.f32 %v11687_v13, %v9073_v52  ;;  %v9079_v31 = vpop.eup %9078  ;;  %v12204_v45 = vmul.f32 %v12200_v21, %v12145_v47 }
 0x2bb   : > { %v3960_v16 = vmul.f32 1.442695, %v3731_v33  ;;  %9094 = vpow2.f32 %v2381_v3  ;;  %v3430_v19 = vmul.f32 %v12077_v46, %v3296_v9  ;;  %2830 = vbcast.lane.b32.xlu1 %v10446_v36, 376  ;;  %v12208_v32 = vpop.permute.xlu0 %3074  ;;  %v9081_v34 = vpop.eup %9080  ;;  %v12211_v54 = vmul.f32 %v12200_v21, %v9075_v58  ;;  %v17497_v36 = vld [vmem:[#allocation43_spill] sm:$0xff] }
 0x2bc   : > { %17495 = vst [vmem:[#allocation186_spill] sm:$0xff] %v12204_v45  ;;  %v3747_v25 = vmul.f32 %v3619_v57, %v3491_v62  ;;  %v3604_v8 = vmul.f32 -0.5, %v3476_v39  ;;  %v4845_v42 = vpack.c.bf16 %v12195_v50, %v12192_v4  ;;  %v9083_v52 = vpop.eup %9082  ;;  %v2535_v47 = vmul.f32 1.442695, %v2290_v49  ;;  %v17499_v62 = vld [vmem:[#allocation197_spill] sm:$0xff] }
 0x2bd   : > { %17496 = vst [vmem:[#allocation188_spill] sm:$0xff] %v12211_v54  ;;  %9096 = vpow2.f32 %v2319_v2  ;;  %v2229_v33 = vmul.f32 %v2101_v10, %v1973_v59  ;;  %v3511_v3 = vmul.f32 -0.5, %v3383_v56  ;;  %2763 = vbcast.lane.b32.xlu0 %v10441_v35, 376  ;;  %v9085_v0 = vpop.eup %9084  ;;  %v12218_v9 = vadd.f32 %v12171_v1, %v17497_v36  ;;  %v17501_v49 = vld [vmem:[#allocation29_spill] sm:$0xff] }
 0x2be   : > { %v2198_v55 = vmul.f32 %v2070_v26, %v1942_v63  ;;  %v2163_v58 = vmul.f32 -0.5, %v2035_v41  ;;  %v3265_v57 = vsub.f32 %v17499_v62, %v12046_v14  ;;  %v12224_v51 = vmul.f32 %v11687_v13, %v12116_v30  ;;  %v12231_v2 = vpop.permute.xlu1 %1684 }
 0x2bf   : > { %17498 = vst [vmem:[#allocation68_spill] sm:$0xff] %v12218_v9  ;;  %v12228_v59 = vadd.f32 %v12204_v45, %v17501_v49  ;;  %9098 = vpow2.f32 %v3960_v16  ;;  %v3558_v35 = vmul.f32 -0.5, %v3430_v19  ;;  %3090 = vbcast.lane.b32.xlu1 %v10392_v24, 360  ;;  %v12233_v63 = vpop.permute.xlu0 %1424  ;;  %v9087_v10 = vpop.eup %9086  ;;  %v12236_v26 = vmul.f32 %v11687_v13, %v9077_v15 }
 0x2c0   : > { %8541 = vmatmul.mubr.bf16.gmra.mrb[32].mxu1 %v4845_v42  ;;  %17500 = vst [vmem:[#allocation193_spill] sm:$0xff] %v12224_v51  ;;  %v12239_v30 = vmul.f32 %v12200_v21, %v9083_v52  ;;  %v3992_v42 = vmul.f32 1.442695, %v3747_v25  ;;  %v3732_v36 = vmul.f32 %v3604_v8, %v3476_v39  ;;  %v12243_v16 = vadd.f32 %v12211_v54, %v12224_v51 }
 0x2c1   : > { %17502 = vst [vmem:[#allocation195_spill] sm:$0xff] %v12228_v59  ;;  %17503 = vst [vmem:[#allocation166_spill] sm:$0xff] %v12236_v26  ;;  %v9089_v62 = vpop.eup %9088  ;;  %9100 = vpow2.f32 %v2535_v47  ;;  %v2413_v49 = vmul.f32 1.442695, %v2229_v33  ;;  %v3639_v1 = vmul.f32 %v3511_v3, %v3383_v56  ;;  %2960 = vbcast.lane.b32.xlu0 %v10388_v22, 368  ;;  %v2291_v52 = vmul.f32 %v2163_v58, %v2035_v41 }
 0x2c2   : > { %17504 = vst [vmem:[#allocation129_spill] sm:$0xff] %v12239_v30  ;;  %17505 = vst [vmem:[#allocation43_spill] sm:$0xff] %v12243_v16  ;;  %v9091_v45 = vpop.eup %9090  ;;  %v12247_v59 = vld [vmem:[%s10533_s4] ss:$0 sm:$0xff]  ;;  %v2351_v15 = vmul.f32 1.442695, %v2198_v55  ;;  %v3399_v39 = vmul.f32 %v12077_v46, %v3265_v57  ;;  %v12257_v47 = vmul.f32 %v12200_v21, %v9085_v0  ;;  %v12260_v56 = vmul.f32 %v12200_v21, %v9087_v10  ;;  %v12263_v3 = vpop.permute.xlu1 %3011 }
 0x2c3   : > { %v12250_v13 = vmul.f32 %v12247_v59, %v9079_v31  ;;  %v9093_v25 = vpop.eup %9092  ;;  %v12254_v8 = vmul.f32 %v12247_v59, %v9081_v34  ;;  %v3686_v33 = vmul.f32 %v3558_v35, %v3430_v19  ;;  %1440 = vbcast.lane.b32.xlu1 %v10452_v37, 376  ;;  %v12267_v55 = vadd.f32 %v12239_v30, %v12236_v26  ;;  %v12272_v34 = vpop.permute.xlu0 %2881  ;;  %v17513_v37 = vld [vmem:[#allocation123_spill] sm:$0xff] }
 0x2c4   : > { %17508 = vst [vmem:[#allocation227_spill] sm:$0xff] %v12257_v47  ;;  %17509 = vst [vmem:[#allocation228_spill] sm:$0xff] %v12260_v56  ;;  %9102 = vpow2.f32 %v3992_v42  ;;  %v12270_v41 = vmul.f32 %v12200_v21, %v9089_v62  ;;  %v3962_v31 = vmul.f32 1.442695, %v3732_v36  ;;  %v12275_v58 = vmul.f32 %v12200_v21, %v9091_v45 }
 0x2c5   : > { %17506 = vst [vmem:[#allocation197_spill] sm:$0xff] %v12250_v13  ;;  %17507 = vst [vmem:[#allocation29_spill] sm:$0xff] %v12254_v8  ;;  %v9095_v0 = vpop.eup %9094  ;;  %9104 = vpow2.f32 %v2413_v49  ;;  %v3776_v19 = vmul.f32 1.442695, %v3639_v1  ;;  %v3358_v57 = vsub.f32 %v17513_v37, %v12046_v14  ;;  %3220 = vbcast.lane.b32.xlu0 %v10396_v28, 352  ;;  %v12281_v35 = vmul.f32 %v12200_v21, %v9093_v25  ;;  %v17517_v49 = vld [vmem:[#allocation199_spill] sm:$0xff] }
 0x2c6   : > { %17510 = vst [vmem:[#allocation229_spill] sm:$0xff] %v12267_v55  ;;  %17511 = vst [vmem:[#allocation230_spill] sm:$0xff] %v12270_v41  ;;  %9106 = vpow2.f32 %v2351_v15  ;;  %v2537_v10 = vmul.f32 1.442695, %v2291_v52  ;;  %v3527_v42 = vmul.f32 -0.5, %v3399_v39  ;;  %v12285_v62 = vadd.f32 %v12257_v47, %v12250_v13  ;;  %v12294_v25 = vpop.permute.xlu1 %1294  ;;  %v17518_v15 = vld [vmem:[#allocation44_spill] sm:$0xff] }
 0x2c7   : > { %17512 = vst [vmem:[#allocation231_spill] sm:$0xff] %v12275_v58  ;;  %17514 = vst [vmem:[#allocation123_spill] sm:$0xff] %v12281_v35  ;;  %v9097_v36 = vpop.eup %9096  ;;  %v12289_v1 = vadd.f32 %v12260_v56, %v12254_v8  ;;  %v3870_v45 = vmul.f32 1.442695, %v3686_v33  ;;  %v3327_v37 = vsub.f32 %v17517_v49, %v12046_v14  ;;  %2897 = vbcast.lane.b32.xlu1 %v10457_v38, 376  ;;  %9108 = vpow2.f32 %v3962_v31  ;;  %v12308_v8 = vpop.permute.xlu0 %3141  ;;  %v17521_v38 = vld [vmem:[#allocation28_spill] sm:$0xff] }
 0x2c8   : > { %17515 = vst [vmem:[#allocation232_spill] sm:$0xff] %v12285_v62  ;;  %v12298_v52 = vadd.f32 %v12270_v41, %v17518_v15  ;;  %v12301_v51 = vmul.f32 %v12247_v59, %v9095_v0  ;;  %v12304_v13 = vld [vmem:[%s10489_s25] ss:$0 sm:$0xff]  ;;  %v12314_v47 = vadd.f32 %v12275_v58, %v17521_v38  ;;  %9110 = vpow2.f32 %v3776_v19 }
 0x2c9   : > { %17516 = vst [vmem:[#allocation233_spill] sm:$0xff] %v12289_v1  ;;  %v1824_v33 = vsub.f32 %v11893_v48, %v12304_v13  ;;  %v12310_v49 = vpop.eup %9098  ;;  %v3492_v15 = vmul.f32 %v12077_v46, %v3358_v57  ;;  %v3251_v31 = vsub.f32 %v12155_v61, %v12046_v14  ;;  %1700 = vbcast.lane.b32.xlu0 %v10377_v17, 360  ;;  %9112 = vpow2.f32 %v2537_v10  ;;  %v17547_v1 = vld [vmem:[#allocation215_spill] sm:$0xff] }
 0x2ca   : > { %17519 = vst [vmem:[#allocation199_spill] sm:$0xff] %v12298_v52  ;;  %17520 = vst [vmem:[#allocation44_spill] sm:$0xff] %v12301_v51  ;;  %v12322_v48 = vadd.f32 %v12281_v35, %v12301_v51  ;;  %v12325_v0 = vmul.f32 %v12247_v59, %v9097_v36  ;;  %v3655_v41 = vmul.f32 %v3527_v42, %v3399_v39  ;;  %9114 = vpow2.f32 %v3870_v45  ;;  %v12334_v58 = vpop.permute.xlu1 %1491  ;;  %v12337_v51 = vld [vmem:[%s10495_s6] ss:$0 sm:$0xff] }
 0x2cb   : > { %17522 = vst [vmem:[#allocation28_spill] sm:$0xff] %v12314_v47  ;;  %v12327_v38 = vpop.eup %9100  ;;  %v3461_v19 = vmul.f32 %v12077_v46, %v3327_v37  ;;  %v3385_v57 = vmul.f32 %v12077_v46, %v3251_v31  ;;  %v3298_v61 = vsub.f32 %v12179_v43, %v12046_v14  ;;  %3157 = vbcast.lane.b32.xlu1 %v10394_v27, 360  ;;  %v12346_v45 = vpop.permute.xlu0 %1361  ;;  %v3620_v43 = vmul.f32 -0.5, %v3492_v15 }
 0x2cc   : > { %17523 = vst [vmem:[#allocation234_spill] sm:$0xff] %v12322_v48  ;;  %17524 = vst [vmem:[#allocation235_spill] sm:$0xff] %v12325_v0  ;;  %v1958_v36 = vmul.f32 %v12337_v51, %v1824_v33  ;;  %v3312_v39 = vsub.f32 %v11908_v5, %v12046_v14  ;;  %v1887_v10 = vsub.f32 %v12068_v40, %v12304_v13  ;;  %v3808_v5 = vmul.f32 1.442695, %v3655_v41 }
 0x2cd   : > { %17525 = vst [vmem:[#allocation236_spill] sm:$0xff] %v12327_v38  ;;  %v3267_v42 = vsub.f32 %v12185_v12, %v12046_v14  ;;  %v3513_v37 = vmul.f32 -0.5, %v3385_v57  ;;  %v3432_v31 = vmul.f32 %v12077_v46, %v3298_v61  ;;  %v3360_v26 = vsub.f32 %v12197_v44, %v12046_v14  ;;  %3027 = vbcast.lane.b32.xlu0 %v10390_v23, 368 }
 0x2ce   : > { %v12352_v33 = vpop.eup %9102  ;;  %v3281_v40 = vsub.f32 %v11914_v20, %v12046_v14  ;;  %v1793_v12 = vsub.f32 %v11932_v11, %v12304_v13  ;;  %v3589_v56 = vmul.f32 -0.5, %v3461_v19  ;;  %v2021_v20 = vmul.f32 %v12337_v51, %v1887_v10 }
 0x2cf   : > { %17526 = vst [vmem:[#allocation237_spill] sm:$0xff] %v12352_v33  ;;  %v3401_v35 = vmul.f32 %v12077_v46, %v3267_v42  ;;  %v9105_v54 = vpop.eup %9104  ;;  %v3641_v30 = vmul.f32 %v3513_v37, %v3385_v57  ;;  %v3560_v61 = vmul.f32 -0.5, %v3432_v31  ;;  %v12360_v55 = vmul.f32 %v12077_v46, %v3360_v26  ;;  %1507 = vbcast.lane.b32.xlu1 %v17178_v29, 376  ;;  %v12363_v44 = vpop.permute.xlu1 %2751 }
 0x2d0   : > { %v9107_v41 = vpop.eup %9106  ;;  %v2086_v33 = vmul.f32 -0.5, %v1958_v36  ;;  %v3329_v11 = vsub.f32 %v12208_v32, %v12046_v14  ;;  %v12368_v42 = vpop.permute.xlu0 %1751  ;;  %v3748_v48 = vmul.f32 %v3620_v43, %v3492_v15  ;;  %v3446_v57 = vmul.f32 %v12077_v46, %v3312_v39 }
 0x2d1   : > { %v3529_v38 = vmul.f32 -0.5, %v3401_v35  ;;  %v3780_v37 = vmul.f32 1.442695, %v3641_v30  ;;  %v3688_v26 = vmul.f32 %v3560_v61, %v3432_v31  ;;  %4166 = vbcast.lane.b32.xlu0 %v17426_v60, 280  ;;  %v12372_v29 = vpop.eup %9108  ;;  %v3415_v47 = vmul.f32 %v12077_v46, %v3281_v40 }
 0x2d2   : > { %v3463_v10 = vmul.f32 %v12077_v46, %v3329_v11  ;;  %v1888_v16 = vsub.f32 %v12231_v2, %v12304_v13  ;;  %v9111_v32 = vpop.eup %9110  ;;  %v12379_v52 = vmul.f32 %v12247_v59, %v9105_v54  ;;  %v12382_v15 = vmul.f32 %v12247_v59, %v9107_v41 }
 0x2d3   : > { %v3657_v62 = vmul.f32 %v3529_v38, %v3401_v35  ;;  %9116 = vpow2.f32 %v3780_v37  ;;  %v3874_v30 = vmul.f32 1.442695, %v3688_v26  ;;  %2964 = vbcast.lane.b32.xlu1 %v10388_v22, 376  ;;  %v12385_v39 = vpop.permute.xlu1 %2948  ;;  %v12387_v43 = vpop.eup %9112  ;;  %v3717_v35 = vmul.f32 %v3589_v56, %v3461_v19  ;;  %v17530_v56 = vld [vmem:[#allocation79_spill] sm:$0xff] }
 0x2d4   : > { %17527 = vst [vmem:[#allocation238_spill] sm:$0xff] %v12379_v52  ;;  %17528 = vst [vmem:[#allocation239_spill] sm:$0xff] %v12382_v15  ;;  %v2149_v38 = vmul.f32 -0.5, %v2021_v20  ;;  %v3591_v40 = vmul.f32 -0.5, %v3463_v10  ;;  %v12389_v2 = vpop.permute.xlu0 %2818  ;;  %v9115_v61 = vpop.eup %9114  ;;  %9118 = vpow2.f32 %v3808_v5  ;;  %v2214_v54 = vmul.f32 %v2086_v33, %v1958_v36 }
 0x2d5   : > { %17529 = vst [vmem:[#allocation240_spill] sm:$0xff] %v12387_v43  ;;  %v3812_v31 = vmul.f32 1.442695, %v3657_v62  ;;  %v3574_v11 = vmul.f32 -0.5, %v3446_v57  ;;  %v2022_v41 = vmul.f32 %v12337_v51, %v1888_v16  ;;  %1767 = vbcast.lane.b32.xlu0 %v10380_v18, 360  ;;  %v3543_v22 = vmul.f32 -0.5, %v3415_v47 }
 0x2d6   : > { %v3994_v37 = vmul.f32 1.442695, %v3748_v48  ;;  %v1927_v26 = vmul.f32 %v12337_v51, %v1793_v12  ;;  %9120 = vpow2.f32 %v3874_v30  ;;  %v3343_v19 = vsub.f32 %v17530_v56, %v12046_v14 }
 0x2d7   : > { %9122 = vpow2.f32 %v3812_v31  ;;  %v3719_v62 = vmul.f32 %v3591_v40, %v3463_v10  ;;  %v2150_v43 = vmul.f32 -0.5, %v2022_v41  ;;  %3224 = vbcast.lane.b32.xlu1 %v10396_v28, 360  ;;  %v12397_v5 = vpop.permute.xlu1 %3208  ;;  %v3932_v36 = vmul.f32 1.442695, %v3717_v35 }
 0x2d8   : > { %v2277_v33 = vmul.f32 %v2149_v38, %v2021_v20  ;;  %v3314_v16 = vsub.f32 %v12263_v3, %v12046_v14  ;;  %v3283_v48 = vsub.f32 %v12272_v34, %v12046_v14  ;;  %v12403_v12 = vpop.permute.xlu0 %3078  ;;  %v3702_v30 = vmul.f32 %v3574_v11, %v3446_v57 }
 0x2d9   : > { %v3936_v9 = vmul.f32 1.442695, %v3719_v62  ;;  %v2278_v56 = vmul.f32 %v2150_v43, %v2022_v41  ;;  %v3345_v10 = vsub.f32 %v12308_v8, %v12046_v14  ;;  %3094 = vbcast.lane.b32.xlu0 %v10392_v24, 368  ;;  %v12409_v31 = vmul.f32 %v12200_v21, %v9111_v32 }
 0x2da   : > { %v2383_v20 = vmul.f32 1.442695, %v2214_v54  ;;  %v3448_v35 = vmul.f32 %v12077_v46, %v3314_v16  ;;  %v3417_v3 = vmul.f32 %v12077_v46, %v3283_v48  ;;  %v3671_v38 = vmul.f32 %v3543_v22, %v3415_v47 }
 0x2db   : > { %17531 = vst [vmem:[#allocation79_spill] sm:$0xff] %v12409_v31  ;;  %v2055_v34 = vmul.f32 -0.5, %v1927_v26  ;;  %9124 = vpow2.f32 %v3936_v9  ;;  %v2511_v40 = vmul.f32 1.442695, %v2278_v56  ;;  %3031 = vbcast.lane.b32.xlu1 %v10390_v23, 376  ;;  %v12414_v57 = vpop.permute.xlu1 %1688  ;;  %v3477_v62 = vmul.f32 %v12077_v46, %v3343_v19 }
 0x2dc   : > { %9126 = vpow2.f32 %v3994_v37  ;;  %v2509_v8 = vmul.f32 1.442695, %v2277_v33  ;;  %v3576_v43 = vmul.f32 -0.5, %v3448_v35  ;;  %v3545_v11 = vmul.f32 -0.5, %v3417_v3  ;;  %v12416_v41 = vpop.permute.xlu0 %1428 }
 0x2dd   : > { %v9117_v32 = vpop.eup %9116  ;;  %9128 = vpow2.f32 %v3932_v36  ;;  %v3902_v54 = vmul.f32 1.442695, %v3702_v30  ;;  %v3479_v47 = vmul.f32 %v12077_v46, %v3345_v10  ;;  %1704 = vbcast.lane.b32.xlu0 %v10377_v17, 368  ;;  %v3840_v33 = vmul.f32 1.442695, %v3671_v38 }
 0x2de   : > { %9130 = vpow2.f32 %v2383_v20  ;;  %v12422_v23 = vmul.f32 %v12200_v21, %v9117_v32  ;;  %v3704_v9 = vmul.f32 %v3576_v43, %v3448_v35  ;;  %v3673_v37 = vmul.f32 %v3545_v11, %v3417_v3  ;;  %v9119_v22 = vpop.eup %9118  ;;  %v17534_v3 = vld [vmem:[#allocation206_spill] sm:$0xff]  ;;  %v17539_v32 = vld [vmem:[#allocation148_spill] sm:$0xff] }
 0x2df   : > { %v2183_v16 = vmul.f32 %v2055_v34, %v1927_v26  ;;  %9132 = vpow2.f32 %v2511_v40  ;;  %v3607_v48 = vmul.f32 -0.5, %v3479_v47  ;;  %4170 = vbcast.lane.b32.xlu1 %v17426_v60, 288  ;;  %v12425_v36 = vpop.permute.xlu1 %3015  ;;  %v12428_v30 = vmul.f32 %v12200_v21, %v9115_v61  ;;  %v17536_v40 = vld [vmem:[#allocation207_spill] sm:$0xff] }
 0x2e0   : > { %17532 = vst [vmem:[#allocation241_spill] sm:$0xff] %v12422_v23  ;;  %v9121_v19 = vpop.eup %9120  ;;  %9134 = vpow2.f32 %v2509_v8  ;;  %v3906_v56 = vmul.f32 1.442695, %v3704_v9  ;;  %v3844_v10 = vmul.f32 1.442695, %v3673_v37  ;;  %v12430_v20 = vpop.permute.xlu0 %2885  ;;  %v1840_v26 = vsub.f32 %v17534_v3, %v12304_v13 }
 0x2e1   : > { %17533 = vst [vmem:[#allocation242_spill] sm:$0xff] %v12428_v30  ;;  %v9123_v35 = vpop.eup %9122  ;;  %9136 = vpow2.f32 %v3902_v54  ;;  %v12435_v38 = vmul.f32 %v12200_v21, %v9121_v19  ;;  %v3735_v34 = vmul.f32 %v3607_v48, %v3479_v47  ;;  %3161 = vbcast.lane.b32.xlu0 %v10394_v27, 368  ;;  %v1809_v61 = vsub.f32 %v17536_v40, %v12304_v13 }
 0x2e2   : > { %v12441_v8 = vmul.f32 %v12200_v21, %v9123_v35  ;;  %9138 = vpow2.f32 %v3906_v56  ;;  %v3252_v43 = vsub.f32 %v12363_v44, %v12046_v14  ;;  %v12447_v11 = vadd.f32 %v12409_v31, %v12325_v0 }
 0x2e3   : > { %17535 = vst [vmem:[#allocation206_spill] sm:$0xff] %v12435_v38  ;;  %v3250_v54 = vsub.f32 %v17539_v32, %v12046_v14  ;;  %9140 = vpow2.f32 %v3844_v10  ;;  %v3968_v47 = vmul.f32 1.442695, %v3735_v34  ;;  %3098 = vbcast.lane.b32.xlu1 %v10392_v24, 376  ;;  %v2321_v9 = vmul.f32 1.442695, %v2183_v16  ;;  %v12453_v19 = vpop.permute.xlu1 %1298 }
 0x2e4   : > { %17537 = vst [vmem:[#allocation207_spill] sm:$0xff] %v12441_v8  ;;  %17538 = vst [vmem:[#allocation243_spill] sm:$0xff] %v12447_v11  ;;  %9142 = vpow2.f32 %v3840_v33  ;;  %v3605_v37 = vmul.f32 -0.5, %v3477_v62  ;;  %v3386_v48 = vmul.f32 %v12077_v46, %v3252_v43  ;;  %v12455_v56 = vpop.permute.xlu0 %3145  ;;  %v12459_v35 = vadd.f32 %v12428_v30, %v12379_v52 }
 0x2e5   : > { %v9125_v44 = vpop.eup %9124  ;;  %9144 = vpow2.f32 %v3968_v47  ;;  %v3299_v10 = vsub.f32 %v12385_v39, %v12046_v14  ;;  %v3268_v24 = vsub.f32 %v12389_v2, %v12046_v14  ;;  %1771 = vbcast.lane.b32.xlu0 %v10380_v18, 368  ;;  %v1974_v16 = vmul.f32 %v12337_v51, %v1840_v26 }
 0x2e6   : > { %17540 = vst [vmem:[#allocation148_spill] sm:$0xff] %v12459_v35  ;;  %v12466_v33 = vpop.eup %9126  ;;  %v1943_v3 = vmul.f32 %v12337_v51, %v1809_v61  ;;  %v12471_v34 = vmul.f32 %v12200_v21, %v9125_v44  ;;  %v3514_v40 = vmul.f32 -0.5, %v3386_v48  ;;  %v3384_v32 = vmul.f32 %v12077_v46, %v3250_v54 }
 0x2e7   : > { %17541 = vst [vmem:[#allocation244_spill] sm:$0xff] %v12466_v33  ;;  %v12473_v43 = vpop.eup %9128  ;;  %v3433_v39 = vmul.f32 %v12077_v46, %v3299_v10  ;;  %v3402_v2 = vmul.f32 %v12077_v46, %v3268_v24  ;;  %v3361_v47 = vsub.f32 %v12397_v5, %v12046_v14  ;;  %1708 = vbcast.lane.b32.xlu1 %v10377_v17, 376  ;;  %9146 = vpow2.f32 %v2321_v9  ;;  %v12485_v30 = vpop.permute.xlu1 %1495 }
 0x2e8   : > { %17542 = vst [vmem:[#allocation245_spill] sm:$0xff] %v12471_v34  ;;  %v12481_v26 = vpop.eup %9130  ;;  %v3733_v61 = vmul.f32 %v3605_v37, %v3477_v62  ;;  %v3642_v44 = vmul.f32 %v3514_v40, %v3386_v48  ;;  %v3330_v52 = vsub.f32 %v12403_v12, %v12046_v14  ;;  %v12488_v10 = vmul.f32 %v12200_v21, %v9119_v22  ;;  %v12494_v17 = vpop.permute.xlu0 %1365  ;;  %v17546_v37 = vld [vmem:[#allocation210_spill] sm:$0xff] }
 0x2e9   : > { %v9133_v54 = vpop.eup %9132  ;;  %v3561_v24 = vmul.f32 -0.5, %v3433_v39  ;;  %v3530_v0 = vmul.f32 -0.5, %v3402_v2  ;;  %v12491_v5 = vmul.f32 %v12077_v46, %v3361_v47  ;;  %3228 = vbcast.lane.b32.xlu0 %v10396_v28, 368  ;;  %17545 = vst [vmem:[#allocation248_spill] sm:$0xff] %v12494_v17  ;;  %v2102_v9 = vmul.f32 -0.5, %v1974_v16 }
 0x2ea   : > { %17543 = vst [vmem:[#allocation246_spill] sm:$0xff] %v12488_v10  ;;  %v9135_v62 = vpop.eup %9134  ;;  %v1902_v12 = vsub.f32 %v17546_v37, %v12304_v13  ;;  %v3782_v48 = vmul.f32 1.442695, %v3642_v44  ;;  %v3464_v40 = vmul.f32 %v12077_v46, %v3330_v52  ;;  %v2071_v22 = vmul.f32 -0.5, %v1943_v3 }
 0x2eb   : > { %17544 = vst [vmem:[#allocation247_spill] sm:$0xff] %v12491_v5  ;;  %v12499_v31 = vpop.eup %9136  ;;  %v3512_v11 = vmul.f32 -0.5, %v3384_v32  ;;  %v3689_v33 = vmul.f32 %v3561_v24, %v3433_v39  ;;  %v3658_v35 = vmul.f32 %v3530_v0, %v3402_v2  ;;  %4174 = vbcast.lane.b32.xlu1 %v17426_v60, 296  ;;  %v3297_v34 = vsub.f32 %v17547_v1, %v12046_v14  ;;  %v12507_v44 = vpop.permute.xlu1 %2755 }
 0x2ec   : > { %v9139_v47 = vpop.eup %9138  ;;  %9148 = vpow2.f32 %v3782_v48  ;;  %v3592_v8 = vmul.f32 -0.5, %v3464_v40  ;;  %v12505_v38 = vmul.f32 %v12247_v59, %v9133_v54  ;;  %v12513_v0 = vmul.f32 %v12247_v59, %v9135_v62  ;;  %v12515_v2 = vpop.permute.xlu0 %1755  ;;  %v17549_v48 = vld [vmem:[#allocation217_spill] sm:$0xff] }
 0x2ed   : > { %v9141_v52 = vpop.eup %9140  ;;  %v12510_v37 = vmul.f32 %v12200_v21, %v9139_v47  ;;  %v3876_v17 = vmul.f32 1.442695, %v3689_v33  ;;  %v3814_v39 = vmul.f32 1.442695, %v3658_v35  ;;  %v3964_v1 = vmul.f32 1.442695, %v3733_v61 }
 0x2ee   : > { %v12517_v24 = vpop.eup %9142  ;;  %v3266_v54 = vsub.f32 %v17549_v48, %v12046_v14  ;;  %v12522_v23 = vmul.f32 %v12200_v21, %v9141_v52  ;;  %v3720_v5 = vmul.f32 %v3592_v8, %v3464_v40  ;;  %3165 = vbcast.lane.b32.xlu0 %v10394_v27, 376  ;;  %v12525_v47 = vpop.f32.mrb[20].mxu1  ;;  %v2230_v33 = vmul.f32 %v2102_v9, %v1974_v16  ;;  %v17554_v27 = vld [vmem:[#allocation25_spill] sm:$0xff] }
 0x2ef   : > { %17548 = vst [vmem:[#allocation210_spill] sm:$0xff] %v12510_v37  ;;  %17551 = vst [vmem:[#allocation217_spill] sm:$0xff] %v12525_v47  ;;  %v9145_v35 = vpop.eup %9144  ;;  %v2036_v62 = vmul.f32 %v12337_v51, %v1902_v12  ;;  %v12530_v37 = vmul.f32 %v12200_v21, %v12310_v49  ;;  %v4846_v61 = vpack.c.bf16 %v12505_v38, %v12513_v0  ;;  %3232 = vbcast.lane.b32.xlu1 %v10396_v28, 376  ;;  %v12535_v52 = vpop.f32.mrb[21].mxu1 }
 0x2f0   : > { %17550 = vst [vmem:[#allocation215_spill] sm:$0xff] %v12522_v23  ;;  %17553 = vst [vmem:[#allocation250_spill] sm:$0xff] %v12535_v52  ;;  %v2199_v8 = vmul.f32 %v2071_v22, %v1943_v3  ;;  %v3359_v40 = vsub.f32 %v17554_v27, %v12046_v14  ;;  %9150 = vpow2.f32 %v3876_v17  ;;  %v3938_v48 = vmul.f32 1.442695, %v3720_v5  ;;  %v12539_v16 = vpop.f32.mrb[22].mxu1  ;;  %v12541_v9 = vpop.permute.xlu1 %2952  ;;  %v17558_v17 = vld [vmem:[#allocation156_spill] sm:$0xff] }
 0x2f1   : > { %17552 = vst [vmem:[#allocation249_spill] sm:$0xff] %v12530_v37  ;;  %17555 = vst [vmem:[#allocation25_spill] sm:$0xff] %v12539_v16  ;;  %v3640_v12 = vmul.f32 %v3512_v11, %v3384_v32  ;;  %v3431_v49 = vmul.f32 %v12077_v46, %v3297_v34  ;;  %9152 = vpow2.f32 %v3814_v39  ;;  %v12545_v47 = vmul.f32 %v12200_v21, %v9145_v35  ;;  %v12547_v28 = vpop.f32.mrb[23].mxu1  ;;  %v12549_v3 = vpop.permute.xlu0 %2822 }
 0x2f2   : > { %8544 = vmatprep.mubr.bf16.mxu1 %v4846_v61  ;;  %17557 = vst [vmem:[#allocation252_spill] sm:$0xff] %v12547_v28  ;;  %v12551_v22 = vpop.eup %9146  ;;  %9154 = vpow2.f32 %v3964_v1  ;;  %v3400_v5 = vmul.f32 %v12077_v46, %v3266_v54  ;;  %v3328_v27 = vsub.f32 %v17558_v17, %v12046_v14  ;;  %v3315_v11 = vsub.f32 %v12425_v36, %v12046_v14 }
 0x2f3   : > { %17556 = vst [vmem:[#allocation251_spill] sm:$0xff] %v12545_v47  ;;  %1775 = vbcast.lane.b32.xlu0 %v10380_v18, 376  ;;  %v2415_v34 = vmul.f32 1.442695, %v2230_v33  ;;  %v2164_v32 = vmul.f32 -0.5, %v2036_v62  ;;  %9156 = vpow2.f32 %v3938_v48  ;;  %v3284_v39 = vsub.f32 %v12430_v20, %v12046_v14  ;;  %4182 = vbcast.lane.b32.xlu1 %v17426_v60, 312 }
 0x2f4   : > { %v2353_v35 = vmul.f32 1.442695, %v2199_v8  ;;  %v3493_v1 = vmul.f32 %v12077_v46, %v3359_v40  ;;  %v3449_v54 = vmul.f32 %v12077_v46, %v3315_v11  ;;  %v3346_v61 = vsub.f32 %v12455_v56, %v12046_v14  ;;  %v12566_v17 = vpop.permute.xlu1 %3212 }
 0x2f5   : > { %v12570_v18 = vadd.f32 %v12488_v10, %v12382_v15  ;;  %v3778_v36 = vmul.f32 1.442695, %v3640_v12  ;;  %v3559_v33 = vmul.f32 -0.5, %v3431_v49  ;;  %v3418_v20 = vmul.f32 %v12077_v46, %v3284_v39  ;;  %v12573_v48 = vpop.permute.xlu0 %3082 }
 0x2f6   : > { %v9149_v8 = vpop.eup %9148  ;;  %v3528_v28 = vmul.f32 -0.5, %v3400_v5  ;;  %v3462_v40 = vmul.f32 %v12077_v46, %v3328_v27  ;;  %v3577_v11 = vmul.f32 -0.5, %v3449_v54  ;;  %v12577_v16 = vmul.f32 %v12077_v46, %v3346_v61  ;;  %v17562_v46 = vld [vmem:[#allocation214_spill] sm:$0xff] }
 0x2f7   : > { %17559 = vst [vmem:[#allocation156_spill] sm:$0xff] %v12570_v18  ;;  %4178 = vbcast.lane.b32.xlu0 %v17426_v60, 304  ;;  %v12582_v14 = vmul.f32 %v12200_v21, %v12473_v43  ;;  %9158 = vpow2.f32 %v2415_v34  ;;  %v12585_v56 = vmul.f32 %v12200_v21, %v9149_v8  ;;  %v3546_v12 = vmul.f32 -0.5, %v3418_v20  ;;  %4190 = vbcast.lane.b32.xlu1 %v17426_v60, 328 }
 0x2f8   : > { %9160 = vpow2.f32 %v2353_v35  ;;  %v2292_v39 = vmul.f32 %v2164_v32, %v2036_v62  ;;  %v3621_v27 = vmul.f32 -0.5, %v3493_v1  ;;  %v3705_v52 = vmul.f32 %v3577_v11, %v3449_v54  ;;  %v12588_v15 = vpop.permute.xlu1 %1692  ;;  %v17565_v11 = vld [vmem:[#allocation45_spill] sm:$0xff] }
 0x2f9   : > { %17560 = vst [vmem:[#allocation253_spill] sm:$0xff] %v12582_v14  ;;  %17561 = vst [vmem:[#allocation254_spill] sm:$0xff] %v12585_v56  ;;  %9162 = vpow2.f32 %v3778_v36  ;;  %v12592_v61 = vadd.f32 %v17562_v46, %v11971_v6  ;;  %v3687_v43 = vmul.f32 %v3559_v33, %v3431_v49  ;;  %v3674_v10 = vmul.f32 %v3546_v12, %v3418_v20  ;;  %v12594_v34 = vpop.permute.xlu0 %1432  ;;  %v17575_v46 = vld [vmem:[#allocation224_spill] sm:$0xff] }
 0x2fa   : > { %v9151_v8 = vpop.eup %9150  ;;  %v12598_v18 = vadd.f32 %v12530_v37, %v12150_v53  ;;  %v3656_v35 = vmul.f32 %v3528_v28, %v3400_v5  ;;  %v3590_v62 = vmul.f32 -0.5, %v3462_v40  ;;  %v3908_v32 = vmul.f32 1.442695, %v3705_v52 }
 0x2fb   : > { %17563 = vst [vmem:[#allocation255_spill] sm:$0xff] %v12592_v61  ;;  %v9153_v54 = vpop.eup %9152  ;;  %v12602_v36 = vadd.f32 %v12582_v14, %v17565_v11  ;;  %v12606_v6 = vmul.f32 %v12247_v59, %v12481_v26  ;;  %v12609_v49 = vmul.f32 %v12200_v21, %v9151_v8  ;;  %v3846_v33 = vmul.f32 1.442695, %v3674_v10  ;;  %4186 = vbcast.lane.b32.xlu0 %v17426_v60, 320  ;;  %v12645_v14 = vld [vmem:[%s10801_s23] ss:$0 sm:$0xff] }
 0x2fc   : > { %17564 = vst [vmem:[#allocation256_spill] sm:$0xff] %v12598_v18  ;;  %4198 = vbcast.lane.b32.xlu1 %v17426_v60, 344  ;;  %v9155_v53 = vpop.eup %9154  ;;  %v12615_v52 = vmul.f32 %v12200_v21, %v12499_v31  ;;  %v2539_v28 = vmul.f32 1.442695, %v2292_v39  ;;  %v3749_v5 = vmul.f32 %v3621_v27, %v3493_v1  ;;  %v12618_v20 = vmul.f32 %v12200_v21, %v9153_v54  ;;  %v12620_v26 = vpop.permute.xlu1 %3019  ;;  %v12631_v31 = vld [vmem:[%s10782_s26] ss:$0 sm:$0xff] }
 0x2fd   : > { %17566 = vst [vmem:[#allocation45_spill] sm:$0xff] %v12602_v36  ;;  %17567 = vst [vmem:[#allocation257_spill] sm:$0xff] %v12606_v6  ;;  %v9157_v12 = vpop.eup %9156  ;;  %v12624_v10 = vmul.f32 %v12200_v21, %v12517_v24  ;;  %v3872_v8 = vmul.f32 1.442695, %v3687_v43  ;;  %v12628_v11 = vmul.f32 %v12200_v21, %v12372_v29  ;;  %v3253_v1 = vsub.f32 %v12507_v44, %v12631_v31  ;;  %v12638_v37 = vpop.permute.xlu0 %2889  ;;  %v17574_v24 = vld [vmem:[#allocation111_spill] sm:$0xff]  ;;  %v17576_v44 = vld [vmem:[#allocation30_spill] sm:$0xff] }
 0x2fe   : > { %17568 = vst [vmem:[#allocation258_spill] sm:$0xff] %v12609_v49  ;;  %17569 = vst [vmem:[#allocation259_spill] sm:$0xff] %v12615_v52  ;;  %v3810_v39 = vmul.f32 1.442695, %v3656_v35  ;;  %v3718_v27 = vmul.f32 %v3590_v62, %v3462_v40  ;;  %v12636_v54 = vmul.f32 %v12200_v21, %v9157_v12  ;;  %9164 = vpow2.f32 %v3908_v32  ;;  %v17579_v32 = vld [vmem:[#allocation169_spill] sm:$0xff] }
 0x2ff   : > { %17570 = vst [vmem:[#allocation260_spill] sm:$0xff] %v12618_v20  ;;  %17571 = vst [vmem:[#allocation261_spill] sm:$0xff] %v12624_v10  ;;  %v1825_v43 = vsub.f32 %v17574_v24, %v12304_v13  ;;  %v3313_v29 = vsub.f32 %v17575_v46, %v12631_v31  ;;  %9166 = vpow2.f32 %v3846_v33  ;;  %v3387_v36 = vmul.f32 %v12645_v14, %v3253_v1  ;;  %v17582_v24 = vld [vmem:[#allocation55_spill] sm:$0xff] }
 0x300   : > { %17572 = vst [vmem:[#allocation262_spill] sm:$0xff] %v12628_v11  ;;  %17573 = vst [vmem:[#allocation263_spill] sm:$0xff] %v12636_v54  ;;  %4194 = vbcast.lane.b32.xlu0 %v17426_v60, 336  ;;  %4206 = vbcast.lane.b32.xlu1 %v17426_v60, 360  ;;  %v12652_v40 = vadd.f32 %v12615_v52, %v17576_v44  ;;  %v3996_v35 = vmul.f32 1.442695, %v3749_v5  ;;  %v12655_v62 = vmul.f32 %v12200_v21, %v9155_v53  ;;  %v12659_v33 = vpop.permute.xlu1 %4154 }
 0x301   : > { %v3282_v46 = vsub.f32 %v17579_v32, %v12631_v31  ;;  %17580 = vst [vmem:[#allocation30_spill] sm:$0xff] %v12659_v33  ;;  %v9159_v12 = vpop.eup %9158  ;;  %v12663_v1 = vmul.f32 %v12247_v59, %v12551_v22  ;;  %9168 = vpow2.f32 %v2539_v28  ;;  %v1794_v18 = vsub.f32 %v17582_v24, %v12304_v13 }
 0x302   : > { %17577 = vst [vmem:[#allocation111_spill] sm:$0xff] %v12652_v40  ;;  %17578 = vst [vmem:[#allocation224_spill] sm:$0xff] %v12655_v62  ;;  %v3515_v44 = vmul.f32 -0.5, %v3387_v36  ;;  %v9161_v52 = vpop.eup %9160  ;;  %v12669_v53 = vadd.f32 %v12624_v10, %v12606_v6  ;;  %9170 = vpow2.f32 %v3872_v8  ;;  %v3934_v5 = vmul.f32 1.442695, %v3718_v27  ;;  %v12675_v40 = vpop.permute.xlu0 %3149 }
 0x303   : > { %17581 = vst [vmem:[#allocation169_spill] sm:$0xff] %v12663_v1  ;;  %v12673_v32 = vadd.f32 %v12628_v11, %v12192_v4  ;;  %v9163_v22 = vpop.eup %9162  ;;  %9172 = vpow2.f32 %v3810_v39  ;;  %v1959_v28 = vmul.f32 %v12337_v51, %v1825_v43  ;;  %v3447_v24 = vmul.f32 %v12645_v14, %v3313_v29  ;;  %v17588_v29 = vld [vmem:[#allocation226_spill] sm:$0xff] }
 0x304   : > { %17583 = vst [vmem:[#allocation55_spill] sm:$0xff] %v12669_v53  ;;  %v3643_v61 = vmul.f32 %v3515_v44, %v3387_v36  ;;  %4202 = vbcast.lane.b32.xlu0 %v17426_v60, 352  ;;  %4214 = vbcast.lane.b32.xlu1 %v17426_v60, 376  ;;  %9174 = vpow2.f32 %v3996_v35  ;;  %v12683_v8 = vadd.f32 %v12655_v62, %v12195_v50  ;;  %v12688_v39 = vpop.permute.xlu1 %1302 }
 0x305   : > { %17584 = vst [vmem:[#allocation264_spill] sm:$0xff] %v12673_v32  ;;  %v3416_v4 = vmul.f32 %v12645_v14, %v3282_v46  ;;  %v3300_v27 = vsub.f32 %v12541_v9, %v12631_v31  ;;  %17586 = vst [vmem:[#allocation266_spill] sm:$0xff] %v12688_v39  ;;  %v12691_v43 = vmul.f32 %v12247_v59, %v9159_v12  ;;  %9176 = vpow2.f32 %v3934_v5 }
 0x306   : > { %17585 = vst [vmem:[#allocation265_spill] sm:$0xff] %v12683_v8  ;;  %v1928_v36 = vmul.f32 %v12337_v51, %v1794_v18  ;;  %v3344_v44 = vsub.f32 %v17588_v29, %v12631_v31  ;;  %v3784_v35 = vmul.f32 1.442695, %v3643_v61  ;;  %v12697_v11 = vmul.f32 %v12247_v59, %v9161_v52  ;;  %v12703_v46 = vpop.permute.xlu0 %4158 }
 0x307   : > { %17587 = vst [vmem:[#allocation267_spill] sm:$0xff] %v12691_v43  ;;  %v12700_v50 = vmul.f32 %v12200_v21, %v9163_v22  ;;  %v3434_v9 = vmul.f32 %v12645_v14, %v3300_v27  ;;  %17591 = vst [vmem:[#allocation269_spill] sm:$0xff] %v12703_v46  ;;  %v2087_v62 = vmul.f32 -0.5, %v1959_v28  ;;  %v3575_v12 = vmul.f32 -0.5, %v3447_v24 }
 0x308   : > { %17589 = vst [vmem:[#allocation226_spill] sm:$0xff] %v12697_v11  ;;  %9178 = vpow2.f32 %v3784_v35  ;;  %v3269_v18 = vsub.f32 %v12549_v3, %v12631_v31  ;;  %4210 = vbcast.lane.b32.xlu0 %v17426_v60, 368  ;;  %v9165_v61 = vpop.eup %9164  ;;  %v3544_v29 = vmul.f32 -0.5, %v3416_v4  ;;  %v1889_v59 = vsub.f32 %v12414_v57, %v12304_v13  ;;  %v12712_v22 = vpop.permute.xlu1 %1499 }
 0x309   : > { %17590 = vst [vmem:[#allocation268_spill] sm:$0xff] %v12700_v50  ;;  %v3562_v52 = vmul.f32 -0.5, %v3434_v9  ;;  %v3362_v5 = vsub.f32 %v12566_v17, %v12631_v31  ;;  %17592 = vst [vmem:[#allocation270_spill] sm:$0xff] %v12712_v22  ;;  %v9167_v27 = vpop.eup %9166  ;;  %v2056_v6 = vmul.f32 -0.5, %v1928_v36  ;;  %v12715_v35 = vmul.f32 %v12200_v21, %v9165_v61 }
 0x30a   : > { %v3403_v3 = vmul.f32 %v12645_v14, %v3269_v18  ;;  %v3331_v60 = vsub.f32 %v12573_v48, %v12631_v31  ;;  %v3478_v10 = vmul.f32 %v12645_v14, %v3344_v44  ;;  %v12722_v57 = vmul.f32 %v12200_v21, %v9167_v27  ;;  %v12727_v8 = vpop.permute.xlu0 %1369 }
 0x30b   : > { %17593 = vst [vmem:[#allocation271_spill] sm:$0xff] %v12715_v35  ;;  %v3690_v53 = vmul.f32 %v3562_v52, %v3434_v9  ;;  %v12725_v17 = vmul.f32 %v12645_v14, %v3362_v5  ;;  %17595 = vst [vmem:[#allocation273_spill] sm:$0xff] %v12727_v8  ;;  %v12729_v32 = vpop.eup %9168  ;;  %v12733_v61 = vadd.f32 %v12700_v50, %v12663_v1 }
 0x30c   : > { %17594 = vst [vmem:[#allocation272_spill] sm:$0xff] %v12722_v57  ;;  %17596 = vst [vmem:[#allocation274_spill] sm:$0xff] %v12729_v32  ;;  %v2215_v18 = vmul.f32 %v2087_v62, %v1959_v28  ;;  %v3531_v22 = vmul.f32 -0.5, %v3403_v3  ;;  %v3465_v48 = vmul.f32 %v12645_v14, %v3331_v60  ;;  %v9171_v44 = vpop.eup %9170  ;;  %v3703_v35 = vmul.f32 %v3575_v12, %v3447_v24  ;;  %v12739_v5 = vpop.permute.xlu1 %2759 }
 0x30d   : > { %17597 = vst [vmem:[#allocation275_spill] sm:$0xff] %v12733_v61  ;;  %v2023_v27 = vmul.f32 %v12337_v51, %v1889_v59  ;;  %v3878_v9 = vmul.f32 1.442695, %v3690_v53  ;;  %v1890_v52 = vsub.f32 %v12588_v15, %v12304_v13  ;;  %v9173_v8 = vpop.eup %9172  ;;  %v3672_v32 = vmul.f32 %v3544_v29, %v3416_v4 }
 0x30e   : > { %v2184_v57 = vmul.f32 %v2056_v6, %v1928_v36  ;;  %v3659_v39 = vmul.f32 %v3531_v22, %v3403_v3  ;;  %v3593_v1 = vmul.f32 -0.5, %v3465_v48  ;;  %v12741_v50 = vpop.eup %9174  ;;  %v1841_v62 = vsub.f32 %v12135_v7, %v12304_v13  ;;  %v12748_v24 = vpop.permute.xlu0 %1759 }
 0x30f   : > { %17598 = vst [vmem:[#allocation276_spill] sm:$0xff] %v12741_v50  ;;  %9180 = vpow2.f32 %v3878_v9  ;;  %v2024_v28 = vmul.f32 %v12337_v51, %v1890_v52  ;;  %v3316_v53 = vsub.f32 %v12620_v26, %v12631_v31  ;;  %17599 = vst [vmem:[#allocation277_spill] sm:$0xff] %v12748_v24  ;;  %v2385_v15 = vmul.f32 1.442695, %v2215_v18  ;;  %v12750_v6 = vpop.eup %9176  ;;  %v17600_v9 = vld [vmem:[#allocation57_spill] sm:$0xff] }
 0x310   : > { %v3606_v12 = vmul.f32 -0.5, %v3478_v10  ;;  %v3816_v59 = vmul.f32 1.442695, %v3659_v39  ;;  %v3721_v4 = vmul.f32 %v3593_v1, %v3465_v48  ;;  %v3904_v36 = vmul.f32 1.442695, %v3703_v35  ;;  %v12753_v7 = vpop.permute.xlu1 %2956 }
 0x311   : > { %v2151_v29 = vmul.f32 -0.5, %v2023_v27  ;;  %v2152_v22 = vmul.f32 -0.5, %v2024_v28  ;;  %v3450_v3 = vmul.f32 %v12645_v14, %v3316_v53  ;;  %v1810_v52 = vsub.f32 %v17600_v9, %v12304_v13  ;;  %v17603_v53 = vld [vmem:[#allocation126_spill] sm:$0xff] }
 0x312   : > { %v9179_v60 = vpop.eup %9178  ;;  %v3608_v26 = vmul.f32 -0.5, %v12577_v16  ;;  %9182 = vpow2.f32 %v3816_v59  ;;  %v3940_v18 = vmul.f32 1.442695, %v3721_v4  ;;  %v12759_v39 = vmul.f32 %v12200_v21, %v9171_v44  ;;  %v12767_v9 = vpop.permute.xlu0 %2826 }
 0x313   : > { %v3842_v1 = vmul.f32 1.442695, %v3672_v32  ;;  %v1975_v35 = vmul.f32 %v12337_v51, %v1841_v62  ;;  %v12763_v48 = vmul.f32 %v12200_v21, %v9179_v60  ;;  %v1903_v61 = vsub.f32 %v17603_v53, %v12304_v13 }
 0x314   : > { %17601 = vst [vmem:[#allocation57_spill] sm:$0xff] %v12759_v39  ;;  %9184 = vpow2.f32 %v3940_v18  ;;  %v2280_v50 = vmul.f32 %v2152_v22, %v2024_v28  ;;  %v3578_v24 = vmul.f32 -0.5, %v3450_v3  ;;  %v2323_v54 = vmul.f32 1.442695, %v2184_v57  ;;  %v12771_v32 = vpop.permute.xlu1 %3216 }
 0x315   : > { %17602 = vst [vmem:[#allocation278_spill] sm:$0xff] %v12763_v48  ;;  %v3734_v59 = vmul.f32 %v3606_v12, %v3478_v10  ;;  %v2279_v4 = vmul.f32 %v2151_v29, %v2023_v27  ;;  %v3285_v44 = vsub.f32 %v12638_v37, %v12631_v31  ;;  %v12774_v62 = vmul.f32 %v12200_v21, %v9173_v8 }
 0x316   : > { %9186 = vpow2.f32 %v2385_v15  ;;  %v3736_v60 = vmul.f32 %v3608_v26, %v12577_v16  ;;  %v3706_v53 = vmul.f32 %v3578_v24, %v3450_v3  ;;  %v12779_v28 = vadd.f32 %v12759_v39, %v12691_v43  ;;  %v12791_v3 = vld [vmem:[%s10969_s29] ss:$0 sm:$0xff] }
 0x317   : > { %17604 = vst [vmem:[#allocation126_spill] sm:$0xff] %v12774_v62  ;;  %9188 = vpow2.f32 %v3904_v36  ;;  %v1944_v10 = vmul.f32 %v12337_v51, %v1810_v52  ;;  %v3419_v57 = vmul.f32 %v12645_v14, %v3285_v44  ;;  %v2103_v37 = vmul.f32 -0.5, %v1975_v35  ;;  %v12784_v8 = vpop.permute.xlu0 %3086 }
 0x318   : > { %17605 = vst [vmem:[#allocation279_spill] sm:$0xff] %v12779_v28  ;;  %v2037_v27 = vmul.f32 %v12337_v51, %v1903_v61  ;;  %v2515_v12 = vmul.f32 1.442695, %v2280_v50  ;;  %v3910_v21 = vmul.f32 1.442695, %v3706_v53  ;;  %9190 = vpow2.f32 %v3842_v1  ;;  %v12796_v50 = vpop.permute.xlu1 %1696 }
 0x319   : > { %v9181_v15 = vpop.eup %9180  ;;  %v2513_v16 = vmul.f32 1.442695, %v2279_v4  ;;  %v3547_v24 = vmul.f32 -0.5, %v3419_v57  ;;  %v3347_v29 = vsub.f32 %v12675_v40, %v12631_v31  ;;  %9192 = vpow2.f32 %v2323_v54 }
 0x31a   : > { %v1826_v36 = vsub.f32 %v12233_v63, %v12304_v13  ;;  %v3970_v22 = vmul.f32 1.442695, %v3736_v60  ;;  %v12794_v61 = vmul.f32 %v12791_v3, %v9181_v15  ;;  %v3966_v52 = vmul.f32 1.442695, %v3734_v59 }
 0x31b   : > { %9194 = vpow2.f32 %v3910_v21  ;;  %v3675_v26 = vmul.f32 %v3547_v24, %v3419_v57  ;;  %v3481_v18 = vmul.f32 %v12645_v14, %v3347_v29  ;;  %v2231_v4 = vmul.f32 %v2103_v37, %v1975_v35  ;;  %v12799_v44 = vpop.permute.xlu0 %1436  ;;  %v17608_v35 = vld [vmem:[#allocation76_spill] sm:$0xff]  ;;  %v17610_v24 = vld [vmem:[#allocation138_spill] sm:$0xff] }
 0x31c   : > { %17606 = vst [vmem:[#allocation280_spill] sm:$0xff] %v12794_v61  ;;  %v9183_v1 = vpop.eup %9182  ;;  %v2072_v40 = vmul.f32 -0.5, %v1944_v10  ;;  %v2165_v54 = vmul.f32 -0.5, %v2037_v27  ;;  %9196 = vpow2.f32 %v2515_v12  ;;  %v1960_v59 = vmul.f32 %v12337_v51, %v1826_v36  ;;  %v7523_v12 = vld [vmem:[%s16780_s19] sm:$0xff] }
 0x31d   : > { %9198 = vpow2.f32 %v2513_v16  ;;  %v12802_v63 = vmul.f32 %v12791_v3, %v9183_v1  ;;  %v3848_v60 = vmul.f32 1.442695, %v3675_v26  ;;  %v3609_v53 = vmul.f32 -0.5, %v3481_v18  ;;  %v12812_v21 = vpop.permute.xlu1 %3023 }
 0x31e   : > { %v9185_v15 = vpop.eup %9184  ;;  %v1795_v57 = vsub.f32 %v12294_v25, %v12304_v13  ;;  %9200 = vpow2.f32 %v3970_v22  ;;  %v4441_v37 = vmul.f32 %v17608_v35, %v12703_v46  ;;  %v4440_v29 = vmul.f32 %v17610_v24, %v12659_v33 }
 0x31f   : > { %17607 = vst [vmem:[#allocation281_spill] sm:$0xff] %v12802_v63  ;;  %v12815_v16 = vmul.f32 %v12791_v3, %v9185_v15  ;;  %9202 = vpow2.f32 %v3848_v60  ;;  %v3737_v36 = vmul.f32 %v3609_v53, %v3481_v18  ;;  %v12823_v25 = vadd.f32 %v12774_v62, %v12697_v11  ;;  %v12827_v35 = vpop.permute.xlu0 %2893 }
 0x320   : > { %v12819_v26 = vpop.eup %9186  ;;  %9204 = vpow2.f32 %v3966_v52  ;;  %v2200_v22 = vmul.f32 %v2072_v40, %v1944_v10  ;;  %v1842_v1 = vsub.f32 %v12334_v58, %v12304_v13  ;;  %v12831_v60 = vmul.f32 %v12791_v3, %v12750_v6 }
 0x321   : > { %17609 = vst [vmem:[#allocation76_spill] sm:$0xff] %v12815_v16  ;;  %17611 = vst [vmem:[#allocation138_spill] sm:$0xff] %v12823_v25  ;;  %v9189_v15 = vpop.eup %9188  ;;  %v3972_v24 = vmul.f32 1.442695, %v3737_v36  ;;  %v12833_v18 = vadd.f32 %v4441_v37, %v4440_v29  ;;  %v7524_v53 = vmul.f32 2.0, %v7523_v12  ;;  %v2293_v39 = vmul.f32 %v2165_v54, %v2037_v27  ;;  %v12837_v52 = vpop.permute.xlu1 %4162  ;;  %v17614_v36 = vld [vmem:[#allocation48_spill] sm:$0xff] }
 0x322   : > { %17612 = vst [vmem:[#allocation282_spill] sm:$0xff] %v12831_v60  ;;  %v2417_v43 = vmul.f32 1.442695, %v2231_v4  ;;  %v2088_v11 = vmul.f32 -0.5, %v1960_v59  ;;  %v3254_v10 = vsub.f32 %v12739_v5, %v12631_v31  ;;  %17613 = vst [vmem:[#allocation283_spill] sm:$0xff] %v12837_v52  ;;  %v12839_v58 = vpop.eup %9190  ;;  %v1929_v40 = vmul.f32 %v12337_v51, %v1795_v57 }
 0x323   : > { %9206 = vpow2.f32 %v3972_v24  ;;  %7527 = vperm.xlu0 %8794, %v7524_v53   ;;  %v3301_v6 = vsub.f32 %v12753_v7, %v12631_v31  ;;  %v3270_v37 = vsub.f32 %v12767_v9, %v12631_v31  ;;  %v12846_v4 = vpop.eup %9192  ;;  %v2355_v27 = vmul.f32 1.442695, %v2200_v22  ;;  %v12851_v29 = vpop.permute.xlu0 %3153 }
 0x324   : > { %v3622_v54 = vmul.f32 -0.5, %v12360_v55  ;;  %v1976_v5 = vmul.f32 %v12337_v51, %v1842_v1  ;;  %v3388_v12 = vmul.f32 %v12645_v14, %v3254_v10  ;;  %v12855_v24 = vadd.f32 %v12831_v60, %v17614_v36 }
 0x325   : > { %v9195_v57 = vpop.eup %9194  ;;  %v1811_v7 = vsub.f32 %v12346_v45, %v12304_v13  ;;  %v3435_v9 = vmul.f32 %v12645_v14, %v3301_v6  ;;  %v3404_v22 = vmul.f32 %v12645_v14, %v3270_v37  ;;  %9208 = vpow2.f32 %v2417_v43  ;;  %v12864_v28 = vpop.permute.xlu1 %1373 }
 0x326   : > { %17615 = vst [vmem:[#allocation48_spill] sm:$0xff] %v12855_v24  ;;  %v9197_v53 = vpop.eup %9196  ;;  %v2541_v62 = vmul.f32 1.442695, %v2293_v39  ;;  %v12862_v1 = vmul.f32 %v12791_v3, %v9195_v57  ;;  %v3516_v10 = vmul.f32 -0.5, %v3388_v12  ;;  %17617 = vst [vmem:[#allocation285_spill] sm:$0xff] %v12864_v28  ;;  %v2216_v36 = vmul.f32 %v2088_v11, %v1960_v59 }
 0x327   : > { %v9199_v25 = vpop.eup %9198  ;;  %v2057_v60 = vmul.f32 -0.5, %v1929_v40  ;;  %v3563_v24 = vmul.f32 -0.5, %v3435_v9  ;;  %v3532_v16 = vmul.f32 -0.5, %v3404_v22  ;;  %9210 = vpow2.f32 %v2355_v27  ;;  %v12867_v43 = vpop.permute.xlu0 %1306  ;;  %v12871_v28 = vld [vmem:[%s10533_s4] ss:$0 sm:$0xff] }
 0x328   : > { %17616 = vst [vmem:[#allocation284_spill] sm:$0xff] %v12862_v1  ;;  %v9201_v13 = vpop.eup %9200  ;;  %v3750_v45 = vmul.f32 %v3622_v54, %v12360_v55  ;;  %v2104_v6 = vmul.f32 -0.5, %v1976_v5  ;;  %v3644_v37 = vmul.f32 %v3516_v10, %v3388_v12  ;;  %v1945_v57 = vmul.f32 %v12337_v51, %v1811_v7 }
 0x329   : > { %v9203_v39 = vpop.eup %9202  ;;  %v3691_v1 = vmul.f32 %v3563_v24, %v3435_v9  ;;  %v3660_v63 = vmul.f32 %v3532_v16, %v3404_v22  ;;  %v12874_v11 = vmul.f32 %v12871_v28, %v9197_v53  ;;  %v12879_v27 = vmul.f32 %v12791_v3, %v9189_v15  ;;  %v12887_v51 = vpop.permute.xlu1 %1763 }
 0x32a   : > { %v12876_v59 = vpop.eup %9204  ;;  %v12882_v55 = vmul.f32 %v12791_v3, %v9203_v39  ;;  %v3786_v54 = vmul.f32 1.442695, %v3644_v37  ;;  %v12885_v12 = vmul.f32 %v12871_v28, %v9199_v25  ;;  %9212 = vpow2.f32 %v2541_v62 }
 0x32b   : > { %17618 = vst [vmem:[#allocation286_spill] sm:$0xff] %v12874_v11  ;;  %17619 = vst [vmem:[#allocation287_spill] sm:$0xff] %v12879_v27  ;;  %v2387_v16 = vmul.f32 1.442695, %v2216_v36  ;;  %v2185_v24 = vmul.f32 %v2057_v60, %v1929_v40  ;;  %v12890_v7 = vmul.f32 %v12791_v3, %v9201_v13  ;;  %v2232_v9 = vmul.f32 %v2104_v6, %v1976_v5  ;;  %v12896_v10 = vpop.permute.xlu0 %1503  ;;  %v12901_v60 = vld [vmem:[%s10489_s25] ss:$0 sm:$0xff] }
 0x32c   : > { %17620 = vst [vmem:[#allocation288_spill] sm:$0xff] %v12882_v55  ;;  %v3880_v22 = vmul.f32 1.442695, %v3691_v1  ;;  %v4847_v15 = vpack.c.bf16 %v12874_v11, %v12885_v12  ;;  %v3363_v53 = vsub.f32 %v12771_v32, %v12631_v31  ;;  %v3998_v37 = vmul.f32 1.442695, %v3750_v45  ;;  %v17624_v13 = vld [vmem:[#allocation31_spill] sm:$0xff] }
 0x32d   : > { %17621 = vst [vmem:[#allocation289_spill] sm:$0xff] %v12890_v7  ;;  %v9207_v25 = vpop.eup %9206  ;;  %v2073_v39 = vmul.f32 -0.5, %v1945_v57  ;;  %v3818_v55 = vmul.f32 1.442695, %v3660_v63  ;;  %v3332_v62 = vsub.f32 %v12784_v8, %v12631_v31  ;;  %v1904_v40 = vsub.f32 %v12368_v42, %v12901_v60  ;;  %v12911_v1 = vpop.permute.xlu1 %2830 }
 0x32e   : > { %9214 = vpow2.f32 %v3786_v54  ;;  %v12906_v5 = vmul.f32 %v12791_v3, %v9207_v25  ;;  %8545 = vmatmul.mubr.bf16.gmra.mrb[36].mxu1 %v4847_v15  ;;  %v12909_v32 = vmul.f32 %v12645_v14, %v3363_v53  ;;  %v12915_v63 = vmul.f32 %v12871_v28, %v12819_v26 }
 0x32f   : > { %9216 = vpow2.f32 %v2387_v16  ;;  %v2325_v8 = vmul.f32 1.442695, %v2185_v24  ;;  %v3466_v36 = vmul.f32 %v12645_v14, %v3332_v62  ;;  %v9209_v42 = vpop.eup %9208  ;;  %v12920_v45 = vadd.f32 %v12879_v27, %v17624_v13  ;;  %v12926_v15 = vpop.permute.xlu0 %2763  ;;  %v12933_v62 = vld [vmem:[%s10495_s6] ss:$0 sm:$0xff] }
 0x330   : > { %17622 = vst [vmem:[#allocation290_spill] sm:$0xff] %v12906_v5  ;;  %17623 = vst [vmem:[#allocation291_spill] sm:$0xff] %v12915_v63  ;;  %v12924_v6 = vmul.f32 %v12791_v3, %v12839_v58  ;;  %v2419_v54 = vmul.f32 1.442695, %v2232_v9  ;;  %9218 = vpow2.f32 %v3880_v22  ;;  %v1827_v26 = vsub.f32 %v12416_v41, %v12901_v60 }
 0x331   : > { %17625 = vst [vmem:[#allocation31_spill] sm:$0xff] %v12920_v45  ;;  %9220 = vpow2.f32 %v3818_v55  ;;  %v3594_v16 = vmul.f32 -0.5, %v3466_v36  ;;  %v3317_v24 = vsub.f32 %v12812_v21, %v12631_v31  ;;  %v9211_v53 = vpop.eup %9210  ;;  %v2201_v25 = vmul.f32 %v2073_v39, %v1945_v57  ;;  %v12938_v22 = vpop.permute.xlu1 %3090 }
 0x332   : > { %17626 = vst [vmem:[#allocation292_spill] sm:$0xff] %v12924_v6  ;;  %9222 = vpow2.f32 %v3998_v37  ;;  %v2038_v58 = vmul.f32 %v12933_v62, %v1904_v40  ;;  %v3286_v9 = vsub.f32 %v12827_v35, %v12631_v31  ;;  %v12942_v41 = vmul.f32 %v12871_v28, %v12846_v4 }
 0x333   : > { %9224 = vpow2.f32 %v2325_v8  ;;  %v3722_v55 = vmul.f32 %v3594_v16, %v3466_v36  ;;  %v3451_v21 = vmul.f32 %v12645_v14, %v3317_v24  ;;  %v12947_v57 = vadd.f32 %v12924_v6, %v12915_v63  ;;  %v12952_v39 = vpop.permute.xlu0 %2960  ;;  %v17630_v63 = vld [vmem:[#allocation247_spill] sm:$0xff] }
 0x334   : > { %17627 = vst [vmem:[#allocation293_spill] sm:$0xff] %v12942_v41  ;;  %9226 = vpow2.f32 %v2419_v54  ;;  %v1796_v37 = vsub.f32 %v12453_v19, %v12901_v60  ;;  %v3420_v35 = vmul.f32 %v12645_v14, %v3286_v9  ;;  %v12954_v40 = vpop.eup %9212  ;;  %v1961_v4 = vmul.f32 %v12933_v62, %v1827_v26 }
 0x335   : > { %17628 = vst [vmem:[#allocation294_spill] sm:$0xff] %v12947_v57  ;;  %17629 = vst [vmem:[#allocation295_spill] sm:$0xff] %v12954_v40  ;;  %v1843_v8 = vsub.f32 %v12485_v30, %v12901_v60  ;;  %v3942_v36 = vmul.f32 1.442695, %v3722_v55  ;;  %v3579_v13 = vmul.f32 -0.5, %v3451_v21  ;;  %v2166_v24 = vmul.f32 -0.5, %v2038_v58  ;;  %v12960_v6 = vpop.permute.xlu1 %1440 }
 0x336   : > { %v2357_v16 = vmul.f32 1.442695, %v2201_v25  ;;  %v3623_v54 = vmul.f32 -0.5, %v17630_v63  ;;  %v3548_v27 = vmul.f32 -0.5, %v3420_v35  ;;  %v12963_v19 = vmul.f32 %v12871_v28, %v9209_v42  ;;  %v17632_v40 = vld [vmem:[#allocation174_spill] sm:$0xff]  ;;  %v17634_v25 = vld [vmem:[#allocation241_spill] sm:$0xff] }
 0x337   : > { %9228 = vpow2.f32 %v3942_v36  ;;  %v3707_v9 = vmul.f32 %v3579_v13, %v3451_v21  ;;  %v4442_v26 = vmul.f32 %v17632_v40, %v12837_v52  ;;  %v12968_v30 = vmul.f32 %v12871_v28, %v9211_v53  ;;  %v12975_v11 = vpop.permute.xlu0 %3220 }
 0x338   : > { %17631 = vst [vmem:[#allocation247_spill] sm:$0xff] %v12963_v19  ;;  %v9215_v57 = vpop.eup %9214  ;;  %v12972_v55 = vadd.f32 %v17634_v25, %v12942_v41  ;;  %v1930_v45 = vmul.f32 %v12933_v62, %v1796_v37  ;;  %v3676_v5 = vmul.f32 %v3548_v27, %v3420_v35  ;;  %v2089_v7 = vmul.f32 -0.5, %v1961_v4  ;;  %v17637_v27 = vld [vmem:[#allocation248_spill] sm:$0xff] }
 0x339   : > { %17633 = vst [vmem:[#allocation174_spill] sm:$0xff] %v12968_v30  ;;  %v9217_v42 = vpop.eup %9216  ;;  %v1977_v21 = vmul.f32 %v12933_v62, %v1843_v8  ;;  %v12979_v36 = vmul.f32 %v12791_v3, %v9215_v57  ;;  %v3912_v40 = vmul.f32 1.442695, %v3707_v9  ;;  %9230 = vpow2.f32 %v2357_v16 }
 0x33a   : > { %17635 = vst [vmem:[#allocation296_spill] sm:$0xff] %v12972_v55  ;;  %v9219_v13 = vpop.eup %9218  ;;  %v2294_v53 = vmul.f32 %v2166_v24, %v2038_v58  ;;  %v3751_v52 = vmul.f32 %v3623_v54, %v17630_v63  ;;  %v3850_v41 = vmul.f32 1.442695, %v3676_v5  ;;  %v12982_v55 = vpop.permute.xlu1 %2897  ;;  %v1812_v35 = vsub.f32 %v17637_v27, %v12901_v60  ;;  %v17641_v54 = vld [vmem:[#allocation206_spill] sm:$0xff] }
 0x33b   : > { %17636 = vst [vmem:[#allocation297_spill] sm:$0xff] %v12979_v36  ;;  %v9221_v37 = vpop.eup %9220  ;;  %v12987_v25 = vmul.f32 %v12791_v3, %v9219_v13  ;;  %9232 = vpow2.f32 %v3912_v40  ;;  %v12990_v57 = vadd.f32 %v12833_v18, %v4442_v26  ;;  %v2058_v16 = vmul.f32 -0.5, %v1930_v45  ;;  %v12999_v63 = vpop.permute.xlu0 %1700  ;;  %v17643_v18 = vld [vmem:[#allocation207_spill] sm:$0xff]  ;;  %v17646_v36 = vld [vmem:[#allocation245_spill] sm:$0xff] }
 0x33c   : > { %v12992_v8 = vpop.eup %9222  ;;  %v12995_v58 = vmul.f32 %v12791_v3, %v9221_v37  ;;  %9234 = vpow2.f32 %v3850_v41  ;;  %v3348_v5 = vsub.f32 %v12851_v29, %v12631_v31  ;;  %v13003_v9 = vadd.f32 %v17641_v54, %v12963_v19  ;;  %v17645_v37 = vld [vmem:[#allocation81_spill] sm:$0xff] }
 0x33d   : > { %17638 = vst [vmem:[#allocation248_spill] sm:$0xff] %v12987_v25  ;;  %17639 = vst [vmem:[#allocation298_spill] sm:$0xff] %v12992_v8  ;;  %v9225_v24 = vpop.eup %9224  ;;  %v13007_v26 = vadd.f32 %v17643_v18, %v12968_v30  ;;  %v2217_v40 = vmul.f32 %v2089_v7, %v1961_v4  ;;  %v2105_v13 = vmul.f32 -0.5, %v1977_v21  ;;  %v13011_v41 = vadd.f32 %v17646_v36, %v17645_v37 }
 0x33e   : > { %17640 = vst [vmem:[#allocation299_spill] sm:$0xff] %v12995_v58  ;;  %17642 = vst [vmem:[#allocation300_spill] sm:$0xff] %v13003_v9  ;;  %v9227_v27 = vpop.eup %9226  ;;  %v13014_v29 = vmul.f32 %v12871_v28, %v9217_v42  ;;  %v13017_v8 = vmul.f32 %v12645_v14, %v3348_v5  ;;  %v3271_v19 = vsub.f32 %v12911_v1, %v12631_v31  ;;  %v2543_v54 = vmul.f32 1.442695, %v2294_v53  ;;  %v13028_v37 = vpop.permute.xlu1 %3157 }
 0x33f   : > { %17644 = vst [vmem:[#allocation301_spill] sm:$0xff] %v13007_v26  ;;  %17647 = vst [vmem:[#allocation81_spill] sm:$0xff] %v13011_v41  ;;  %v13023_v30 = vmul.f32 %v12791_v3, %v12876_v59  ;;  %v1946_v7 = vmul.f32 %v12933_v62, %v1812_v35  ;;  %v3255_v4 = vsub.f32 %v12926_v15, %v12631_v31  ;;  %v4000_v42 = vmul.f32 1.442695, %v3751_v52  ;;  %v13033_v1 = vpop.permute.xlu0 %3027  ;;  %v17650_v15 = vld [vmem:[#allocation32_spill] sm:$0xff]  ;;  %v17651_v26 = vld [vmem:[#allocation210_spill] sm:$0xff] }
 0x340   : > { %17648 = vst [vmem:[#allocation302_spill] sm:$0xff] %v13014_v29  ;;  %v2186_v36 = vmul.f32 %v2058_v16, %v1930_v45  ;;  %v3405_v5 = vmul.f32 %v12645_v14, %v3271_v19  ;;  %v3333_v18 = vsub.f32 %v12938_v22, %v12631_v31  ;;  %v2389_v9 = vmul.f32 1.442695, %v2217_v40 }
 0x341   : > { %17649 = vst [vmem:[#allocation303_spill] sm:$0xff] %v13023_v30  ;;  %v9229_v53 = vpop.eup %9228  ;;  %v2233_v59 = vmul.f32 %v2105_v13, %v1977_v21  ;;  %v1905_v35 = vsub.f32 %v12515_v2, %v12901_v60  ;;  %v3389_v41 = vmul.f32 %v12645_v14, %v3255_v4  ;;  %v13040_v58 = vadd.f32 %v17651_v26, %v17650_v15 }
 0x342   : > { %v13043_v52 = vmul.f32 %v12871_v28, %v9225_v24  ;;  %v13046_v45 = vmul.f32 %v12791_v3, %v9229_v53  ;;  %v3533_v22 = vmul.f32 -0.5, %v3405_v5  ;;  %v13050_v19 = vadd.f32 %v12522_v23, %v13014_v29  ;;  %v13062_v26 = vpop.permute.xlu1 %1507 }
 0x343   : > { %17652 = vst [vmem:[#allocation32_spill] sm:$0xff] %v13040_v58  ;;  %9236 = vpow2.f32 %v2543_v54  ;;  %v2074_v21 = vmul.f32 -0.5, %v1946_v7  ;;  %v3517_v2 = vmul.f32 -0.5, %v3389_v41  ;;  %v9231_v16 = vpop.eup %9230  ;;  %v13053_v40 = vmul.f32 %v12871_v28, %v9227_v27  ;;  %v13059_v4 = vpop.permute.xlu0 %4166 }
 0x344   : > { %17653 = vst [vmem:[#allocation304_spill] sm:$0xff] %v13043_v52  ;;  %17654 = vst [vmem:[#allocation305_spill] sm:$0xff] %v13046_v45  ;;  %9238 = vpow2.f32 %v4000_v42  ;;  %v13057_v24 = vadd.f32 %v13023_v30, %v12513_v0  ;;  %v2327_v13 = vmul.f32 1.442695, %v2186_v36  ;;  %v2421_v15 = vmul.f32 1.442695, %v2233_v59 }
 0x345   : > { %17655 = vst [vmem:[#allocation306_spill] sm:$0xff] %v13050_v19  ;;  %17656 = vst [vmem:[#allocation307_spill] sm:$0xff] %v13053_v40  ;;  %v9233_v53 = vpop.eup %9232  ;;  %9240 = vpow2.f32 %v2389_v9  ;;  %v2039_v29 = vmul.f32 %v12933_v62, %v1905_v35  ;;  %v3661_v54 = vmul.f32 %v3533_v22, %v3405_v5  ;;  %v1891_v27 = vsub.f32 %v12796_v50, %v12901_v60  ;;  %v17668_v19 = vld [vmem:[#allocation263_spill] sm:$0xff] }
 0x346   : > { %17657 = vst [vmem:[#allocation308_spill] sm:$0xff] %v13059_v4  ;;  %v9235_v23 = vpop.eup %9234  ;;  %v13067_v42 = vmul.f32 %v12791_v3, %v9233_v53  ;;  %v3645_v0 = vmul.f32 %v3517_v2, %v3389_v41  ;;  %v3467_v36 = vmul.f32 %v12645_v14, %v3333_v18  ;;  %v2202_v30 = vmul.f32 %v2074_v21, %v1946_v7  ;;  %v13092_v53 = vpop.permute.xlu1 %2964 }
 0x347   : > { %v13071_v58 = vmul.f32 %v12791_v3, %v9235_v23  ;;  %v3820_v9 = vmul.f32 1.442695, %v3661_v54  ;;  %v3302_v5 = vsub.f32 %v12952_v39, %v12631_v31  ;;  %v13077_v59 = vadd.f32 %v12545_v47, %v12505_v38  ;;  %v13083_v23 = vpop.permute.xlu0 %1767 }
 0x348   : > { %17658 = vst [vmem:[#allocation309_spill] sm:$0xff] %v13067_v42  ;;  %9242 = vpow2.f32 %v2327_v13  ;;  %v3788_v50 = vmul.f32 1.442695, %v3645_v0  ;;  %v3595_v35 = vmul.f32 -0.5, %v3467_v36  ;;  %v13080_v22 = vmul.f32 %v12871_v28, %v9231_v16 }
 0x349   : > { %17659 = vst [vmem:[#allocation310_spill] sm:$0xff] %v13071_v58  ;;  %17660 = vst [vmem:[#allocation311_spill] sm:$0xff] %v13077_v59  ;;  %9244 = vpow2.f32 %v2421_v15  ;;  %v2167_v18 = vmul.f32 -0.5, %v2039_v29  ;;  %v3436_v41 = vmul.f32 %v12645_v14, %v3302_v5  ;;  %v2025_v7 = vmul.f32 %v12933_v62, %v1891_v27 }
 0x34a   : > { %17661 = vst [vmem:[#allocation312_spill] sm:$0xff] %v13080_v22  ;;  %v3723_v21 = vmul.f32 %v3595_v35, %v3467_v36  ;;  %v3364_v39 = vsub.f32 %v12975_v11, %v12631_v31  ;;  %v3287_v38 = vsub.f32 %v12982_v55, %v12631_v31  ;;  %v2359_v2 = vmul.f32 1.442695, %v2202_v30 }
 0x34b   : > { %9246 = vpow2.f32 %v3820_v9  ;;  %v3564_v13 = vmul.f32 -0.5, %v3436_v41  ;;  %v1892_v16 = vsub.f32 %v12999_v63, %v12901_v60  ;;  %v1828_v11 = vsub.f32 %v12594_v34, %v12901_v60 }
 0x34c   : > { %9248 = vpow2.f32 %v3788_v50  ;;  %v3944_v15 = vmul.f32 1.442695, %v3723_v21  ;;  %v13095_v54 = vmul.f32 %v12645_v14, %v3364_v39  ;;  %v3421_v27 = vmul.f32 %v12645_v14, %v3287_v38 }
 0x34d   : > { %v13098_v0 = vpop.eup %9236  ;;  %v3692_v30 = vmul.f32 %v3564_v13, %v3436_v41  ;;  %v2026_v55 = vmul.f32 %v12933_v62, %v1892_v16  ;;  %v3349_v63 = vsub.f32 %v13028_v37, %v12631_v31  ;;  %v2153_v9 = vmul.f32 -0.5, %v2025_v7  ;;  %v13111_v41 = vpop.permute.xlu0 %3094 }
 0x34e   : > { %17662 = vst [vmem:[#allocation313_spill] sm:$0xff] %v13098_v0  ;;  %v13105_v36 = vpop.eup %9238  ;;  %9250 = vpow2.f32 %v3944_v15  ;;  %v3549_v5 = vmul.f32 -0.5, %v3421_v27  ;;  %v3318_v50 = vsub.f32 %v13033_v1, %v12631_v31  ;;  %v2295_v21 = vmul.f32 %v2167_v18, %v2039_v29 }
 0x34f   : > { %17663 = vst [vmem:[#allocation314_spill] sm:$0xff] %v13105_v36  ;;  %v9241_v35 = vpop.eup %9240  ;;  %v3610_v39 = vmul.f32 -0.5, %v13017_v8  ;;  %v3882_v38 = vmul.f32 1.442695, %v3692_v30  ;;  %v3483_v34 = vmul.f32 %v12645_v14, %v3349_v63  ;;  %9252 = vpow2.f32 %v2359_v2  ;;  %v3225_v36 = vpop.permute.xlu1 %3224 }
 0x350   : > { %v3677_v13 = vmul.f32 %v3549_v5, %v3421_v27  ;;  %v2154_v37 = vmul.f32 -0.5, %v2026_v55  ;;  %v3452_v16 = vmul.f32 %v12645_v14, %v3318_v50  ;;  %v3624_v15 = vmul.f32 -0.5, %v12725_v17 }
 0x351   : > { %v1962_v47 = vmul.f32 %v12933_v62, %v1828_v11  ;;  %9254 = vpow2.f32 %v3882_v38  ;;  %v3611_v1 = vmul.f32 -0.5, %v3483_v34  ;;  %v13118_v18 = vadd.f32 %v12585_v56, %v13043_v52  ;;  %v17667_v38 = vld [vmem:[#allocation105_spill] sm:$0xff] }
 0x352   : > { %v9243_v29 = vpop.eup %9242  ;;  %v2281_v30 = vmul.f32 %v2153_v9, %v2025_v7  ;;  %v3852_v63 = vmul.f32 1.442695, %v3677_v13  ;;  %v3580_v0 = vmul.f32 -0.5, %v3452_v16  ;;  %v13122_v27 = vadd.f32 %v12609_v49, %v13053_v40 }
 0x353   : > { %17664 = vst [vmem:[#allocation315_spill] sm:$0xff] %v13118_v18  ;;  %v9245_v2 = vpop.eup %9244  ;;  %v13126_v5 = vadd.f32 %v12618_v20, %v13080_v22  ;;  %v2545_v11 = vmul.f32 1.442695, %v2295_v21  ;;  %v3738_v50 = vmul.f32 %v3610_v39, %v13017_v8  ;;  %v13131_v59 = vadd.f32 %v17668_v19, %v17667_v38  ;;  %v13137_v22 = vpop.permute.xlu0 %1704  ;;  %v17671_v8 = vld [vmem:[#allocation266_spill] sm:$0xff] }
 0x354   : > { %17665 = vst [vmem:[#allocation316_spill] sm:$0xff] %v13122_v27  ;;  %v13134_v7 = vmul.f32 %v12871_v28, %v9241_v35  ;;  %v2282_v9 = vmul.f32 %v2154_v37, %v2026_v55  ;;  %v3708_v13 = vmul.f32 %v3580_v0, %v3452_v16  ;;  %v3752_v40 = vmul.f32 %v3624_v15, %v12725_v17  ;;  %v17673_v55 = vld [vmem:[#allocation33_spill] sm:$0xff]  ;;  %v17674_v0 = vld [vmem:[#allocation271_spill] sm:$0xff]  ;;  %v3032_v16 = vpop.permute.xlu1 %3031  ;;  %v17682_v19 = vld [vmem:[#allocation270_spill] sm:$0xff] }
 0x355   : > { %17666 = vst [vmem:[#allocation317_spill] sm:$0xff] %v13126_v5  ;;  %17669 = vst [vmem:[#allocation105_spill] sm:$0xff] %v13131_v59  ;;  %v9247_v52 = vpop.eup %9246  ;;  %v2090_v49 = vmul.f32 -0.5, %v1962_v47  ;;  %9256 = vpow2.f32 %v3852_v63  ;;  %v3739_v18 = vmul.f32 %v3611_v1, %v3483_v34  ;;  %v1797_v39 = vsub.f32 %v17671_v8, %v12901_v60 }
 0x356   : > { %17670 = vst [vmem:[#allocation318_spill] sm:$0xff] %v13134_v7  ;;  %v9249_v21 = vpop.eup %9248  ;;  %v2517_v20 = vmul.f32 1.442695, %v2281_v30  ;;  %v13142_v38 = vmul.f32 %v12791_v3, %v9247_v52  ;;  %v3914_v35 = vmul.f32 1.442695, %v3708_v13  ;;  %v13146_v37 = vadd.f32 %v17674_v0, %v17673_v55  ;;  %v17678_v52 = vld [vmem:[#allocation200_spill] sm:$0xff] }
 0x357   : > { %9258 = vpow2.f32 %v2545_v11  ;;  %v3974_v17 = vmul.f32 1.442695, %v3738_v50  ;;  %v13149_v34 = vmul.f32 %v12791_v3, %v9249_v21  ;;  %v13152_v1 = vmul.f32 %v12871_v28, %v9243_v29  ;;  %v17679_v13 = vld [vmem:[#allocation272_spill] sm:$0xff] }
 0x358   : > { %17672 = vst [vmem:[#allocation266_spill] sm:$0xff] %v13142_v38  ;;  %17675 = vst [vmem:[#allocation33_spill] sm:$0xff] %v13146_v37  ;;  %v9251_v15 = vpop.eup %9250  ;;  %v2519_v30 = vmul.f32 1.442695, %v2282_v9  ;;  %9260 = vpow2.f32 %v3914_v35  ;;  %v4443_v63 = vmul.f32 %v17678_v52, %v13059_v4  ;;  %v13158_v8 = vadd.f32 %v17679_v13, %v13134_v7  ;;  %v17701_v37 = vld [vmem:[#allocation255_spill] sm:$0xff] }
 0x359   : > { %17676 = vst [vmem:[#allocation319_spill] sm:$0xff] %v13149_v34  ;;  %17677 = vst [vmem:[#allocation320_spill] sm:$0xff] %v13152_v1  ;;  %v4002_v55 = vmul.f32 1.442695, %v3752_v40  ;;  %v13161_v11 = vmul.f32 %v12791_v3, %v9251_v15  ;;  %v3976_v50 = vmul.f32 1.442695, %v3739_v18  ;;  %v9253_v21 = vpop.eup %9252  ;;  %v2218_v29 = vmul.f32 %v2090_v49, %v1962_v47  ;;  %v13175_v15 = vpop.permute.xlu0 %3161 }
 0x35a   : > { %17680 = vst [vmem:[#allocation200_spill] sm:$0xff] %v13158_v8  ;;  %v1931_v9 = vmul.f32 %v12933_v62, %v1797_v39  ;;  %9262 = vpow2.f32 %v2517_v20  ;;  %v13168_v35 = vadd.f32 %v12990_v57, %v4443_v63  ;;  %v1844_v7 = vsub.f32 %v17682_v19, %v12901_v60  ;;  %v17687_v63 = vld [vmem:[#allocation273_spill] sm:$0xff] }
 0x35b   : > { %17681 = vst [vmem:[#allocation321_spill] sm:$0xff] %v13161_v11  ;;  %v9255_v52 = vpop.eup %9254  ;;  %9264 = vpow2.f32 %v3974_v17  ;;  %v3303_v40 = vsub.f32 %v13092_v53, %v12631_v31  ;;  %v3365_v18 = vsub.f32 %v3225_v36, %v12631_v31  ;;  %v3334_v49 = vsub.f32 %v13111_v41, %v12631_v31  ;;  %v13191_v36 = vpop.permute.xlu1 %4170 }
 0x35c   : > { %v13178_v47 = vmul.f32 %v12791_v3, %v9255_v52  ;;  %9266 = vpow2.f32 %v2519_v30  ;;  %v3319_v20 = vsub.f32 %v3032_v16, %v12631_v31  ;;  %v13185_v57 = vmul.f32 %v12871_v28, %v9245_v2  ;;  %v17686_v2 = vld [vmem:[#allocation24_spill] sm:$0xff] }
 0x35d   : > { %9268 = vpow2.f32 %v3976_v50  ;;  %v3437_v19 = vmul.f32 %v12645_v14, %v3303_v40  ;;  %v13189_v53 = vmul.f32 %v12645_v14, %v3365_v18  ;;  %v13194_v39 = vmul.f32 %v12871_v28, %v9253_v21  ;;  %1223 = vst [vmem:[%s13200_s5] sm:$0xff] %v17686_v2 }
 0x35e   : > { %17683 = vst [vmem:[#allocation270_spill] sm:$0xff] %v13178_v47  ;;  %17684 = vst [vmem:[#allocation322_spill] sm:$0xff] %v13185_v57  ;;  %v2059_v17 = vmul.f32 -0.5, %v1931_v9  ;;  %v3468_v41 = vmul.f32 %v12645_v14, %v3334_v49  ;;  %v3453_v31 = vmul.f32 %v12645_v14, %v3319_v20  ;;  %9270 = vpow2.f32 %v4002_v55  ;;  %v17691_v55 = vld [vmem:[#allocation88_spill] sm:$0xff] }
 0x35f   : > { %17685 = vst [vmem:[#allocation323_spill] sm:$0xff] %v13194_v39  ;;  %v9257_v16 = vpop.eup %9256  ;;  %v1978_v30 = vmul.f32 %v12933_v62, %v1844_v7  ;;  %v1813_v50 = vsub.f32 %v17687_v63, %v12901_v60  ;;  %v3565_v21 = vmul.f32 -0.5, %v3437_v19  ;;  %v2391_v52 = vmul.f32 1.442695, %v2218_v29  ;;  %v17692_v7 = vld [vmem:[#allocation92_spill] sm:$0xff]  ;;  %v13222_v29 = vpop.permute.xlu0 %1771 }
 0x360   : > { %v13208_v40 = vmul.f32 %v12791_v3, %v9257_v16  ;;  %v3596_v18 = vmul.f32 -0.5, %v3468_v41  ;;  %v3581_v14 = vmul.f32 -0.5, %v3453_v31  ;;  %v13214_v20 = vadd.f32 %v12763_v48, %v13152_v1  ;;  %v3099_v48 = vpop.permute.xlu1 %3098 }
 0x361   : > { %v13210_v49 = vpop.eup %9258  ;;  %v4360_v0 = vmul.f32 %v17691_v55, %v12659_v33  ;;  %v13220_v13 = vmul.f32 %v17692_v7, %v12659_v33  ;;  %v3693_v63 = vmul.f32 %v3565_v21, %v3437_v19  ;;  %v2187_v56 = vmul.f32 %v2059_v17, %v1931_v9  ;;  %v17695_v19 = vld [vmem:[#allocation107_spill] sm:$0xff] }
 0x362   : > { %17688 = vst [vmem:[#allocation273_spill] sm:$0xff] %v13208_v40  ;;  %17689 = vst [vmem:[#allocation324_spill] sm:$0xff] %v13210_v49  ;;  %v9261_v16 = vpop.eup %9260  ;;  %v17693_v40 = vld [vmem:[#allocation277_spill] sm:$0xff]  ;;  %v3724_v8 = vmul.f32 %v3596_v18, %v3468_v41  ;;  %v3709_v49 = vmul.f32 %v3581_v14, %v3453_v31  ;;  %v2106_v59 = vmul.f32 -0.5, %v1978_v30  ;;  %v1947_v1 = vmul.f32 %v12933_v62, %v1813_v50  ;;  %v17696_v41 = vld [vmem:[#allocation60_spill] sm:$0xff] }
 0x363   : > { %17690 = vst [vmem:[#allocation325_spill] sm:$0xff] %v13214_v20  ;;  %v1906_v2 = vsub.f32 %v17693_v40, %v12901_v60  ;;  %v13228_v20 = vmul.f32 %v12791_v3, %v9261_v16  ;;  %v3884_v55 = vmul.f32 1.442695, %v3693_v63  ;;  %9272 = vpow2.f32 %v2391_v52  ;;  %v17697_v50 = vld [vmem:[#allocation38_spill] sm:$0xff]  ;;  %v17699_v16 = vld [vmem:[#allocation87_spill] sm:$0xff] }
 0x364   : > { %v9263_v7 = vpop.eup %9262  ;;  %v4392_v21 = vmul.f32 %v17695_v19, %v12659_v33  ;;  %v1829_v9 = vsub.f32 %v12799_v44, %v12901_v60  ;;  %v3946_v17 = vmul.f32 1.442695, %v3724_v8  ;;  %v4408_v31 = vmul.f32 %v17696_v41, %v12659_v33  ;;  %v17700_v44 = vld [vmem:[#allocation53_spill] sm:$0xff] }
 0x365   : > { %17694 = vst [vmem:[#allocation88_spill] sm:$0xff] %v13228_v20  ;;  %v9265_v40 = vpop.eup %9264  ;;  %v4424_v18 = vmul.f32 %v17697_v50, %v12659_v33  ;;  %9274 = vpow2.f32 %v3884_v55  ;;  %v3916_v14 = vmul.f32 1.442695, %v3709_v49  ;;  %v13240_v52 = vadd.f32 %v12794_v61, %v13185_v57  ;;  %v13249_v55 = vpop.permute.xlu0 %3228  ;;  %v17702_v61 = vld [vmem:[#allocation285_spill] sm:$0xff] }
 0x366   : > { %v9267_v63 = vpop.eup %9266  ;;  %v4361_v19 = vmul.f32 %v17699_v16, %v12703_v46  ;;  %v4377_v8 = vmul.f32 %v17700_v44, %v12703_v46  ;;  %v4444_v27 = vmul.f32 %v17701_v37, %v13191_v36  ;;  %v2329_v38 = vmul.f32 1.442695, %v2187_v56 }
 0x367   : > { %17698 = vst [vmem:[#allocation92_spill] sm:$0xff] %v13240_v52  ;;  %v9269_v41 = vpop.eup %9268  ;;  %v2234_v34 = vmul.f32 %v2106_v59, %v1978_v30  ;;  %v2075_v50 = vmul.f32 -0.5, %v1947_v1  ;;  %v2040_v49 = vmul.f32 %v12933_v62, %v1906_v2  ;;  %v1963_v57 = vmul.f32 %v12933_v62, %v1829_v9  ;;  %v13267_v2 = vpop.permute.xlu1 %1708 }
 0x368   : > { %v1814_v16 = vsub.f32 %v17702_v61, %v12901_v60  ;;  %9276 = vpow2.f32 %v3946_v17  ;;  %v13255_v44 = vadd.f32 %v13168_v35, %v4444_v27  ;;  %v13257_v52 = vpop.eup %9270  ;;  %v1798_v56 = vsub.f32 %v12867_v43, %v12901_v60  ;;  %v13278_v43 = vld [vmem:[%s10782_s26] ss:$0 sm:$0xff] }
 0x369   : > { %17703 = vst [vmem:[#allocation277_spill] sm:$0xff] %v13257_v52  ;;  %9278 = vpow2.f32 %v3916_v14  ;;  %v13262_v59 = vmul.f32 %v12871_v28, %v9263_v7  ;;  %v13265_v37 = vmul.f32 %v12871_v28, %v9267_v63  ;;  %v1845_v61 = vsub.f32 %v12896_v10, %v12901_v60  ;;  %v17708_v7 = vld [vmem:[#allocation103_spill] sm:$0xff]  ;;  %v17709_v10 = vld [vmem:[#allocation61_spill] sm:$0xff] }
 0x36a   : > { %v13272_v27 = vmul.f32 %v12791_v3, %v9265_v40  ;;  %v13275_v35 = vmul.f32 %v12791_v3, %v9269_v41  ;;  %v3335_v30 = vsub.f32 %v3099_v48, %v13278_v43  ;;  %9280 = vpow2.f32 %v2329_v38  ;;  %v13289_v41 = vld [vmem:[%s10801_s23] ss:$0 sm:$0xff]  ;;  %v17710_v48 = vld [vmem:[#allocation39_spill] sm:$0xff]  ;;  %s16598_s23 = sand.u32 1, %s18496_s1   ;;  %s10061_s1 = smov [#allocation4]  }
 0x36b   : > { %17704 = vst [vmem:[#allocation107_spill] sm:$0xff] %v13262_v59  ;;  %17705 = vst [vmem:[#allocation60_spill] sm:$0xff] %v13265_v37  ;;  %v4393_v9 = vmul.f32 %v17708_v7, %v12703_v46  ;;  %v2203_v17 = vmul.f32 %v2075_v50, %v1947_v1  ;;  %v4848_v14 = vpack.c.bf16 %v13265_v37, %v13262_v59  ;;  %v2168_v40 = vmul.f32 -0.5, %v2040_v49  ;;  %v13297_v50 = vpop.permute.xlu0 %3165  ;;  %v17712_v59 = vld [vmem:[#allocation281_spill] sm:$0xff] }
 0x36c   : > { %17706 = vst [vmem:[#allocation38_spill] sm:$0xff] %v13272_v27  ;;  %17707 = vst [vmem:[#allocation87_spill] sm:$0xff] %v13275_v35  ;;  %v4409_v63 = vmul.f32 %v17709_v10, %v12703_v46  ;;  %v1948_v52 = vmul.f32 %v12933_v62, %v1814_v16  ;;  %v3469_v33 = vmul.f32 %v13289_v41, %v3335_v30  ;;  %v2091_v7 = vmul.f32 -0.5, %v1963_v57 }
 0x36d   : > { %v4425_v38 = vmul.f32 %v17710_v48, %v12703_v46  ;;  %v13294_v35 = vadd.f32 %v4361_v19, %v4360_v0  ;;  %v1932_v1 = vmul.f32 %v12933_v62, %v1798_v56  ;;  %8548 = vmatprep.mubr.bf16.mxu1 %v4848_v14  ;;  %17711 = vst [vmem:[#allocation53_spill] sm:$0xff] %v13297_v50  ;;  %v9273_v37 = vpop.eup %9272  ;;  %v2423_v16 = vmul.f32 1.442695, %v2234_v34  ;;  %v13310_v14 = vpop.permute.xlu1 %4174 }
 0x36e   : > { %v13300_v10 = vadd.f32 %v4377_v8, %v13220_v13  ;;  %v1979_v5 = vmul.f32 %v12933_v62, %v1845_v61  ;;  %v3597_v27 = vmul.f32 -0.5, %v3469_v33  ;;  %v13305_v48 = vadd.f32 %v17712_v59, %v13194_v39  ;;  %17714 = vst [vmem:[#allocation285_spill] sm:$0xff] %v13310_v14 }
 0x36f   : > { %v9275_v30 = vpop.eup %9274  ;;  %v13307_v0 = vadd.f32 %v4393_v9, %v4392_v21  ;;  %v2361_v19 = vmul.f32 1.442695, %v2203_v17  ;;  %v3625_v56 = vmul.f32 -0.5, %v12909_v32  ;;  %v2296_v46 = vmul.f32 %v2168_v40, %v2040_v49  ;;  %v17716_v17 = vld [vmem:[#allocation256_spill] sm:$0xff] }
 0x370   : > { %17713 = vst [vmem:[#allocation255_spill] sm:$0xff] %v13305_v48  ;;  %v2076_v20 = vmul.f32 -0.5, %v1948_v52  ;;  %v13313_v13 = vmul.f32 %v12791_v3, %v9275_v30  ;;  %v3725_v34 = vmul.f32 %v3597_v27, %v3469_v33  ;;  %v13315_v8 = vadd.f32 %v4409_v63, %v4408_v31 }
 0x371   : > { %v13317_v61 = vadd.f32 %v4425_v38, %v4424_v18  ;;  %v2219_v50 = vmul.f32 %v2091_v7, %v1963_v57  ;;  %v2060_v39 = vmul.f32 -0.5, %v1932_v1  ;;  %9282 = vpow2.f32 %v2423_v16  ;;  %v13327_v18 = vpop.permute.xlu0 %1775  ;;  %v17720_v16 = vld [vmem:[#allocation106_spill] sm:$0xff] }
 0x372   : > { %17715 = vst [vmem:[#allocation103_spill] sm:$0xff] %v13313_v13  ;;  %v9277_v59 = vpop.eup %9276  ;;  %v2107_v21 = vmul.f32 -0.5, %v1979_v5  ;;  %v3948_v9 = vmul.f32 1.442695, %v3725_v34  ;;  %v4445_v48 = vmul.f32 %v17716_v17, %v13310_v14  ;;  %9284 = vpow2.f32 %v2361_v19  ;;  %v17722_v19 = vld [vmem:[#allocation35_spill] sm:$0xff]  ;;  %v17729_v17 = vld [vmem:[#allocation54_spill] sm:$0xff] }
 0x373   : > { %v9279_v47 = vpop.eup %9278  ;;  %v3753_v49 = vmul.f32 %v3625_v56, %v12909_v32  ;;  %v1830_v33 = vsub.f32 %v12960_v6, %v12901_v60  ;;  %v13325_v31 = vmul.f32 %v12791_v3, %v9277_v59  ;;  %v2547_v57 = vmul.f32 1.442695, %v2296_v46  ;;  %v17721_v59 = vld [vmem:[#allocation76_spill] sm:$0xff] }
 0x374   : > { %v2204_v27 = vmul.f32 %v2076_v20, %v1948_v52  ;;  %v13330_v63 = vmul.f32 %v12791_v3, %v9279_v47  ;;  %9286 = vpow2.f32 %v3948_v9  ;;  %v9281_v40 = vpop.eup %9280  ;;  %v13333_v38 = vmul.f32 %v12871_v28, %v9273_v37  ;;  %v17723_v46 = vld [vmem:[#allocation284_spill] sm:$0xff]  ;;  %v17728_v9 = vld [vmem:[#allocation283_spill] sm:$0xff] }
 0x375   : > { %17717 = vst [vmem:[#allocation61_spill] sm:$0xff] %v13325_v31  ;;  %v2393_v7 = vmul.f32 1.442695, %v2219_v50  ;;  %v2188_v32 = vmul.f32 %v2060_v39, %v1932_v1  ;;  %v1907_v6 = vsub.f32 %v12887_v51, %v12901_v60  ;;  %v13339_v30 = vadd.f32 %v17721_v59, %v17720_v16  ;;  %v17724_v56 = vld [vmem:[#allocation288_spill] sm:$0xff]  ;;  %v17726_v39 = vld [vmem:[#allocation289_spill] sm:$0xff] }
 0x376   : > { %17718 = vst [vmem:[#allocation39_spill] sm:$0xff] %v13330_v63  ;;  %17719 = vst [vmem:[#allocation256_spill] sm:$0xff] %v13333_v38  ;;  %v13343_v20 = vadd.f32 %v17723_v46, %v17722_v19  ;;  %v2235_v47 = vmul.f32 %v2107_v21, %v1979_v5  ;;  %v4602_v52 = vadd.f32 %v13255_v44, %v4445_v48  ;;  %v4004_v51 = vmul.f32 1.442695, %v3753_v49  ;;  %v17730_v44 = vld [vmem:[#allocation286_spill] sm:$0xff]  ;;  %v13367_v49 = vpop.permute.xlu0 %4178 }
 0x377   : > { %v13348_v37 = vadd.f32 %v17724_v56, %v13333_v38  ;;  %v13352_v1 = vadd.f32 %v17726_v39, %v12885_v12  ;;  %v1964_v50 = vmul.f32 %v12933_v62, %v1830_v33  ;;  %v13356_v34 = vmul.f32 %v12871_v28, %v9281_v40  ;;  %v17731_v48 = vld [vmem:[#allocation290_spill] sm:$0xff]  ;;  %v13365_v39 = vpop.permute.xlu1 %3232  ;;  %v17732_v33 = vld [vmem:[#allocation59_spill] sm:$0xff] }
 0x378   : > { %9288 = vpow2.f32 %v2547_v57  ;;  %v4362_v5 = vmul.f32 %v17729_v17, %v17728_v9  ;;  %v2363_v21 = vmul.f32 1.442695, %v2204_v27  ;;  %v13362_v16 = vadd.f32 %v17731_v48, %v17730_v44  ;;  %v17733_v57 = vld [vmem:[#allocation121_spill] sm:$0xff]  ;;  %v17734_v27 = vld [vmem:[#allocation122_spill] sm:$0xff] }
 0x379   : > { %17725 = vst [vmem:[#allocation106_spill] sm:$0xff] %v13348_v37  ;;  %17727 = vst [vmem:[#allocation35_spill] sm:$0xff] %v13356_v34  ;;  %9290 = vpow2.f32 %v2393_v7  ;;  %v2331_v19 = vmul.f32 1.442695, %v2188_v32  ;;  %v2041_v12 = vmul.f32 %v12933_v62, %v1907_v6  ;;  %v4378_v40 = vmul.f32 %v17732_v33, %v17728_v9  ;;  %v17735_v7 = vld [vmem:[#allocation134_spill] sm:$0xff]  ;;  %v17736_v33 = vld [vmem:[#allocation149_spill] sm:$0xff] }
 0x37a   : > { %v4394_v59 = vmul.f32 %v17733_v57, %v17728_v9  ;;  %v2425_v17 = vmul.f32 1.442695, %v2235_v47  ;;  %v4363_v38 = vmul.f32 %v17734_v27, %v13059_v4  ;;  %9292 = vpow2.f32 %v4004_v51  ;;  %v17737_v47 = vld [vmem:[#allocation264_spill] sm:$0xff]  ;;  %v17738_v51 = vld [vmem:[#allocation41_spill] sm:$0xff] }
 0x37b   : > { %v4410_v32 = vmul.f32 %v17735_v7, %v17728_v9  ;;  %v2092_v44 = vmul.f32 -0.5, %v1964_v50  ;;  %v1893_v6 = vsub.f32 %v13137_v22, %v12901_v60  ;;  %v9283_v48 = vpop.eup %9282  ;;  %v4494_v46 = vadd.f32 %v13294_v35, %v4362_v5 }
 0x37c   : > { %9294 = vpow2.f32 %v2363_v21  ;;  %v4364_v56 = vmul.f32 %v17736_v33, %v13191_v36  ;;  %v4446_v57 = vmul.f32 %v17737_v47, %v13367_v49  ;;  %v9285_v34 = vpop.eup %9284  ;;  %v4426_v27 = vmul.f32 %v17738_v51, %v17728_v9  ;;  %v17739_v21 = vld [vmem:[#allocation66_spill] sm:$0xff] }
 0x37d   : > { %9296 = vpow2.f32 %v2331_v19  ;;  %v2169_v7 = vmul.f32 -0.5, %v2041_v12  ;;  %v1894_v63 = vsub.f32 %v13267_v2, %v12901_v60  ;;  %v1846_v35 = vsub.f32 %v13062_v26, %v12901_v60  ;;  %v13396_v19 = vpop.permute.xlu1 %4182  ;;  %v17742_v26 = vld [vmem:[#allocation205_spill] sm:$0xff] }
 0x37e   : > { %v9287_v22 = vpop.eup %9286  ;;  %9298 = vpow2.f32 %v2425_v17  ;;  %v4495_v5 = vadd.f32 %v4494_v46, %v4363_v38  ;;  %v4365_v33 = vmul.f32 %v17739_v21, %v13310_v14  ;;  %v2220_v13 = vmul.f32 %v2092_v44, %v1964_v50 }
 0x37f   : > { %v2027_v47 = vmul.f32 %v12933_v62, %v1893_v6  ;;  %v13394_v37 = vmul.f32 %v12791_v3, %v9287_v22  ;;  %v4603_v51 = vadd.f32 %v4602_v52, %v4446_v57  ;;  %v13399_v2 = vmul.f32 %v12871_v28, %v9283_v48  ;;  %v17744_v57 = vld [vmem:[#allocation265_spill] sm:$0xff] }
 0x380   : > { %v3626_v17 = vmul.f32 -0.5, %v13095_v54  ;;  %v4496_v31 = vadd.f32 %v4495_v5, %v4364_v56  ;;  %v4366_v38 = vmul.f32 %v17742_v26, %v13367_v49  ;;  %v13405_v46 = vmul.f32 %v12871_v28, %v9285_v34 }
 0x381   : > { %17740 = vst [vmem:[#allocation54_spill] sm:$0xff] %v13394_v37  ;;  %17741 = vst [vmem:[#allocation286_spill] sm:$0xff] %v13399_v2  ;;  %v13408_v50 = vadd.f32 %v13300_v10, %v4378_v40  ;;  %v2297_v3 = vmul.f32 %v2169_v7, %v2041_v12  ;;  %v2028_v44 = vmul.f32 %v12933_v62, %v1894_v63  ;;  %v13418_v5 = vpop.f32.mrb[24].mxu1  ;;  %v2395_v63 = vmul.f32 1.442695, %v2220_v13  ;;  %v17749_v13 = vld [vmem:[#allocation299_spill] sm:$0xff] }
 0x382   : > { %17743 = vst [vmem:[#allocation59_spill] sm:$0xff] %v13405_v46  ;;  %v13411_v6 = vpop.eup %9288  ;;  %v1980_v52 = vmul.f32 %v12933_v62, %v1846_v35  ;;  %v1908_v48 = vsub.f32 %v13083_v23, %v12901_v60  ;;  %v4497_v56 = vadd.f32 %v4496_v31, %v4365_v33  ;;  %v4447_v22 = vmul.f32 %v17744_v57, %v13396_v19  ;;  %v13426_v7 = vpop.f32.mrb[25].mxu1 }
 0x383   : > { %17745 = vst [vmem:[#allocation121_spill] sm:$0xff] %v13418_v5  ;;  %v9291_v34 = vpop.eup %9290  ;;  %v13421_v10 = vadd.f32 %v13307_v0, %v4394_v59  ;;  %v13424_v12 = vadd.f32 %v13315_v8, %v4410_v32  ;;  %v2155_v40 = vmul.f32 -0.5, %v2027_v47  ;;  %17746 = vst [vmem:[#allocation122_spill] sm:$0xff] %v13426_v7  ;;  %v13429_v35 = vadd.f32 %v13317_v61, %v4426_v27  ;;  %v13432_v21 = vpop.f32.mrb[26].mxu1 }
 0x384   : > { %v3754_v23 = vmul.f32 %v3626_v17, %v13095_v54  ;;  %v4498_v31 = vadd.f32 %v4497_v56, %v4366_v38  ;;  %17747 = vst [vmem:[#allocation134_spill] sm:$0xff] %v13432_v21  ;;  %v4604_v33 = vadd.f32 %v4603_v51, %v4447_v22  ;;  %v13434_v26 = vpop.eup %9292  ;;  %v13438_v0 = vadd.f32 %v12987_v25, %v13399_v2  ;;  %v13444_v61 = vpop.f32.mrb[27].mxu1  ;;  %v17752_v56 = vld [vmem:[#allocation65_spill] sm:$0xff]  ;;  %v17753_v2 = vld [vmem:[#allocation219_spill] sm:$0xff] }
 0x385   : > { %v13442_v8 = vadd.f32 %v17749_v13, %v13405_v46  ;;  %v2549_v59 = vmul.f32 1.442695, %v2297_v3  ;;  %v2156_v32 = vmul.f32 -0.5, %v2028_v44  ;;  %17750 = vst [vmem:[#allocation264_spill] sm:$0xff] %v13444_v61  ;;  %v13446_v27 = vpop.permute.xlu0 %4186  ;;  %v13449_v17 = vmul.f32 %v12871_v28, %v9291_v34  ;;  %v17755_v3 = vld [vmem:[#allocation34_spill] sm:$0xff] }
 0x386   : > { %17748 = vst [vmem:[#allocation149_spill] sm:$0xff] %v13438_v0  ;;  %v9295_v54 = vpop.eup %9294  ;;  %v2108_v51 = vmul.f32 -0.5, %v1980_v52  ;;  %v2042_v38 = vmul.f32 %v12933_v62, %v1908_v48  ;;  %v4367_v57 = vmul.f32 %v17752_v56, %v13396_v19  ;;  %v13456_v21 = vadd.f32 %v13046_v45, %v17753_v2  ;;  %v17758_v56 = vld [vmem:[#allocation233_spill] sm:$0xff]  ;;  %v13471_v45 = vpop.permute.xlu1 %4190 }
 0x387   : > { %17751 = vst [vmem:[#allocation41_spill] sm:$0xff] %v13449_v17  ;;  %v9297_v22 = vpop.eup %9296  ;;  %v13460_v61 = vadd.f32 %v13067_v42, %v17755_v3  ;;  %9300 = vpow2.f32 %v2395_v63  ;;  %v2283_v7 = vmul.f32 %v2155_v40, %v2027_v47  ;;  %v13464_v34 = vadd.f32 %v13071_v58, %v13449_v17  ;;  %v17772_v58 = vld [vmem:[#allocation138_spill] sm:$0xff] }
 0x388   : > { %17754 = vst [vmem:[#allocation66_spill] sm:$0xff] %v13456_v21  ;;  %v9299_v5 = vpop.eup %9298  ;;  %v4006_v48 = vmul.f32 1.442695, %v3754_v23  ;;  %v4499_v46 = vadd.f32 %v4498_v31, %v4367_v57  ;;  %v4368_v25 = vmul.f32 %v17758_v56, %v13446_v27  ;;  %v13469_v13 = vmul.f32 %v12871_v28, %v9295_v54  ;;  %v17761_v23 = vld [vmem:[#allocation135_spill] sm:$0xff]  ;;  %v17863_v21 = vld [vmem:[#allocation324_spill] sm:$0xff] }
 0x389   : > { %17756 = vst [vmem:[#allocation205_spill] sm:$0xff] %v13460_v61  ;;  %17757 = vst [vmem:[#allocation265_spill] sm:$0xff] %v13464_v34  ;;  %9302 = vpow2.f32 %v2549_v59  ;;  %v2284_v2 = vmul.f32 %v2156_v32, %v2028_v44  ;;  %v4448_v47 = vmul.f32 %v13057_v24, %v13446_v27  ;;  %v13476_v63 = vmul.f32 %v12871_v28, %v9297_v22 }
 0x38a   : > { %17759 = vst [vmem:[#allocation65_spill] sm:$0xff] %v13469_v13  ;;  %v2236_v40 = vmul.f32 %v2108_v51, %v1980_v52  ;;  %v4379_v31 = vmul.f32 %v17761_v23, %v13059_v4  ;;  %v2170_v57 = vmul.f32 -0.5, %v2042_v38  ;;  %v3627_v54 = vmul.f32 -0.5, %v13189_v53  ;;  %v17765_v52 = vld [vmem:[#allocation311_spill] sm:$0xff] }
 0x38b   : > { %17760 = vst [vmem:[#allocation219_spill] sm:$0xff] %v13476_v63  ;;  %v13480_v3 = vpop.f32.mrb[28].mxu1  ;;  %v2521_v56 = vmul.f32 1.442695, %v2283_v7  ;;  %v3350_v44 = vsub.f32 %v13175_v15, %v13278_v43  ;;  %v4605_v59 = vadd.f32 %v4604_v33, %v4448_v47  ;;  %v13488_v24 = vmul.f32 %v12871_v28, %v9299_v5  ;;  %v17768_v7 = vld [vmem:[#allocation167_spill] sm:$0xff]  ;;  %v17769_v15 = vld [vmem:[#allocation40_spill] sm:$0xff] }
 0x38c   : > { %17762 = vst [vmem:[#allocation34_spill] sm:$0xff] %v13480_v3  ;;  %v13485_v32 = vpop.f32.mrb[29].mxu1  ;;  %9304 = vpow2.f32 %v4006_v48  ;;  %v4449_v51 = vmul.f32 %v17765_v52, %v13471_v45  ;;  %v4500_v22 = vadd.f32 %v4499_v46, %v4368_v25  ;;  %v17767_v3 = vld [vmem:[#allocation146_spill] sm:$0xff]  ;;  %v4411_v42 = vmul.f32 %v17768_v7, %v13059_v4  ;;  %v17771_v25 = vld [vmem:[#allocation156_spill] sm:$0xff] }
 0x38d   : > { %17763 = vst [vmem:[#allocation233_spill] sm:$0xff] %v13485_v32  ;;  %17764 = vst [vmem:[#allocation135_spill] sm:$0xff] %v13488_v24  ;;  %v13492_v23 = vpop.f32.mrb[30].mxu1  ;;  %v4395_v17 = vmul.f32 %v17767_v3, %v13059_v4  ;;  %v4427_v33 = vmul.f32 %v17769_v15, %v13059_v4  ;;  %v2523_v47 = vmul.f32 1.442695, %v2284_v2  ;;  %v13500_v32 = vpop.permute.xlu0 %4194  ;;  %v2298_v48 = vmul.f32 %v2170_v57, %v2042_v38 }
 0x38e   : > { %17766 = vst [vmem:[#allocation311_spill] sm:$0xff] %v13492_v23  ;;  %v13502_v28 = vpop.f32.mrb[31].mxu1  ;;  %v2427_v5 = vmul.f32 1.442695, %v2236_v40  ;;  %v4369_v46 = vmul.f32 %v17771_v25, %v13471_v45  ;;  %v4606_v52 = vadd.f32 %v4605_v59, %v4449_v51  ;;  %v4516_v23 = vadd.f32 %v13408_v50, %v4379_v31  ;;  %v17773_v31 = vld [vmem:[#allocation220_spill] sm:$0xff]  ;;  %v17778_v59 = vld [vmem:[#allocation270_spill] sm:$0xff] }
 0x38f   : > { %17770 = vst [vmem:[#allocation146_spill] sm:$0xff] %v13502_v28  ;;  %v3755_v3 = vmul.f32 %v3627_v54, %v13189_v53  ;;  %9306 = vpow2.f32 %v2521_v56  ;;  %v3484_v7 = vmul.f32 %v13289_v41, %v3350_v44  ;;  %v1909_v2 = vsub.f32 %v13222_v29, %v12901_v60 }
 0x390   : > { %v4501_v15 = vadd.f32 %v4500_v22, %v4369_v46  ;;  %v4370_v28 = vmul.f32 %v17772_v58, %v13500_v32  ;;  %v4450_v38 = vmul.f32 %v13352_v1, %v13500_v32  ;;  %v4537_v57 = vadd.f32 %v13421_v10, %v4395_v17  ;;  %v17776_v10 = vld [vmem:[#allocation172_spill] sm:$0xff]  ;;  %v13539_v22 = vld [vmem:[%s10533_s4] ss:$0 sm:$0xff] }
 0x391   : > { %v9301_v40 = vpop.eup %9300  ;;  %v4558_v50 = vadd.f32 %v13424_v12, %v4411_v42  ;;  %v4579_v53 = vadd.f32 %v13429_v35, %v4427_v33  ;;  %9308 = vpow2.f32 %v2523_v47  ;;  %v13520_v54 = vadd.f32 %v13161_v11, %v17773_v31  ;;  %v13530_v35 = vpop.permute.xlu1 %4198  ;;  %v17784_v46 = vld [vmem:[#allocation180_spill] sm:$0xff]  ;;  %v17786_v31 = vld [vmem:[#allocation53_spill] sm:$0xff] }
 0x392   : > { %9310 = vpow2.f32 %v2427_v5  ;;  %v2551_v60 = vmul.f32 1.442695, %v2298_v48  ;;  %v4607_v29 = vadd.f32 %v4606_v52, %v4450_v38  ;;  %v4008_v1 = vmul.f32 1.442695, %v3755_v3  ;;  %v17785_v3 = vld [vmem:[#allocation27_spill] sm:$0xff] }
 0x393   : > { %17774 = vst [vmem:[#allocation167_spill] sm:$0xff] %v13520_v54  ;;  %v13522_v58 = vpop.f32.mrb[32].mxu1  ;;  %v13524_v56 = vpop.eup %9302  ;;  %v4380_v17 = vmul.f32 %v17776_v10, %v13191_v36  ;;  %v3612_v42 = vmul.f32 -0.5, %v3484_v7  ;;  %v3366_v12 = vsub.f32 %v13249_v55, %v13278_v43  ;;  %v13536_v51 = vadd.f32 %v17778_v59, %v13488_v24  ;;  %v17782_v55 = vld [vmem:[#allocation144_spill] sm:$0xff] }
 0x394   : > { %17775 = vst [vmem:[#allocation40_spill] sm:$0xff] %v13522_v58  ;;  %v13532_v44 = vpop.f32.mrb[33].mxu1  ;;  %v13542_v33 = vmul.f32 %v13539_v22, %v9301_v40  ;;  %v2043_v47 = vmul.f32 %v12933_v62, %v1909_v2  ;;  %v4502_v5 = vadd.f32 %v4501_v15, %v4370_v28  ;;  %v13549_v25 = vmul.f32 %v17782_v55, %v13191_v36  ;;  %v17788_v28 = vld [vmem:[#allocation36_spill] sm:$0xff]  ;;  %v17791_v55 = vld [vmem:[#allocation42_spill] sm:$0xff] }
 0x395   : > { %17777 = vst [vmem:[#allocation156_spill] sm:$0xff] %v13532_v44  ;;  %17779 = vst [vmem:[#allocation138_spill] sm:$0xff] %v13536_v51  ;;  %v13545_v48 = vpop.f32.mrb[34].mxu1  ;;  %v4396_v52 = vmul.f32 %v17784_v46, %v13191_v36  ;;  %v4412_v38 = vmul.f32 %v17785_v3, %v13191_v36  ;;  %v3351_v40 = vsub.f32 %v17786_v31, %v13278_v43  ;;  %v17789_v2 = vld [vmem:[#allocation88_spill] sm:$0xff]  ;;  %9312 = vpow2.f32 %v2551_v60  ;;  %v17792_v46 = vld [vmem:[#allocation301_spill] sm:$0xff]  ;;  %v13574_v60 = vpop.permute.xlu0 %4202 }
 0x396   : > { %17780 = vst [vmem:[#allocation220_spill] sm:$0xff] %v13542_v33  ;;  %17781 = vst [vmem:[#allocation172_spill] sm:$0xff] %v13545_v48  ;;  %v13557_v10 = vpop.f32.mrb[35].mxu1  ;;  %v13559_v62 = vpop.eup %9304  ;;  %v13563_v15 = vadd.f32 %v17789_v2, %v17788_v28  ;;  %v4428_v24 = vmul.f32 %v17791_v55, %v13191_v36  ;;  %v4371_v11 = vmul.f32 %v17792_v46, %v13530_v35  ;;  %9314 = vpow2.f32 %v4008_v1  ;;  %v17796_v46 = vld [vmem:[#allocation203_spill] sm:$0xff] }
 0x397   : > { %17783 = vst [vmem:[#allocation144_spill] sm:$0xff] %v13549_v25  ;;  %17787 = vst [vmem:[#allocation180_spill] sm:$0xff] %v13557_v10  ;;  %v4517_v3 = vadd.f32 %v4516_v23, %v4380_v17  ;;  %v3740_v48 = vmul.f32 %v3612_v42, %v3484_v7  ;;  %v3500_v31 = vmul.f32 %v13289_v41, %v3366_v12  ;;  %v2171_v44 = vmul.f32 -0.5, %v2043_v47  ;;  %v9867_v10 = vld [vmem:[%s10489_s25] ss:$0 sm:$0xff]  ;;  %v17793_v17 = vld [vmem:[#allocation107_spill] sm:$0xff] }
 0x398   : > { %17790 = vst [vmem:[#allocation27_spill] sm:$0xff] %v13563_v15  ;;  %v1910_v58 = vsub.f32 %v13327_v18, %v9867_v10  ;;  %v4451_v28 = vmul.f32 %v13362_v16, %v13530_v35  ;;  %v4503_v2 = vadd.f32 %v4502_v5, %v4371_v11  ;;  %v4538_v55 = vadd.f32 %v4537_v57, %v4396_v52  ;;  %v17794_v42 = vld [vmem:[#allocation38_spill] sm:$0xff]  ;;  %v17795_v18 = vld [vmem:[#allocation191_spill] sm:$0xff]  ;;  %s8140_s25 = sshll.u32 %s13164_s7, 6 }
 0x399   : > { %v9307_v59 = vpop.eup %9306  ;;  %v4559_v37 = vadd.f32 %v4558_v50, %v4412_v38  ;;  %v3485_v1 = vmul.f32 %v13289_v41, %v3351_v40  ;;  %v3367_v23 = vsub.f32 %v13365_v39, %v13278_v43  ;;  %v4580_v7 = vadd.f32 %v4579_v53, %v4428_v24  ;;  %v17797_v50 = vld [vmem:[#allocation26_spill] sm:$0xff]  ;;  %v17798_v38 = vld [vmem:[#allocation317_spill] sm:$0xff]  ;;  %v17805_v51 = vld [vmem:[#allocation255_spill] sm:$0xff]  ;;  %s16579_s4 = scalar_lea.vmem [#allocation6], %s8140_s25  ;;  %s16605_s25 = scalar_lea.hbm %s18497_s28, %s8713_s9 }
 0x39a   : > { %v4324_v12 = vadd.f32 %v17794_v42, %v17793_v17  ;;  %v4381_v10 = vmul.f32 %v17795_v18, %v13310_v14  ;;  %v4608_v16 = vadd.f32 %v4607_v29, %v4451_v28  ;;  %v3628_v5 = vmul.f32 -0.5, %v3500_v31  ;;  %v9868_v53 = vld [vmem:[%s10495_s6] ss:$0 sm:$0xff]  ;;  %v17799_v42 = vld [vmem:[#allocation211_spill] sm:$0xff] }
 0x39b   : > { %v9309_v11 = vpop.eup %9308  ;;  %v4397_v57 = vmul.f32 %v17796_v46, %v13310_v14  ;;  %v4413_v52 = vmul.f32 %v17797_v50, %v13310_v14  ;;  %v4372_v40 = vmul.f32 %v17798_v38, %v13574_v60  ;;  %v3978_v39 = vmul.f32 1.442695, %v3740_v48  ;;  %v8804_v50 = vld [vmem:[%s16781_s20] sm:$0xff]   ;;  %v17800_v38 = vld [vmem:[#allocation223_spill] sm:$0xff] }
 0x39c   : > { %v13589_v43 = vpop.eup %9310  ;;  %v2299_v24 = vmul.f32 %v2171_v44, %v2043_v47  ;;  %v2044_v17 = vmul.f32 %v9868_v53, %v1910_v58  ;;  %v4452_v18 = vmul.f32 %v4324_v12, %v13574_v60  ;;  %v3613_v29 = vmul.f32 -0.5, %v3485_v1  ;;  %v17802_v47 = vld [vmem:[#allocation68_spill] sm:$0xff]  ;;  %v17803_v53 = vld [vmem:[#allocation195_spill] sm:$0xff] }
 0x39d   : > { %v3501_v28 = vmul.f32 %v13289_v41, %v3367_v23  ;;  %v4382_v46 = vmul.f32 %v17799_v42, %v13367_v49  ;;  %v4504_v15 = vadd.f32 %v4503_v2, %v4372_v40  ;;  %v4398_v25 = vmul.f32 %v17800_v38, %v13367_v49 }
 0x39e   : > { %v13601_v48 = vadd.f32 %v4608_v16, %v4452_v18  ;;  %v13604_v58 = vmul.f32 %v13539_v22, %v9307_v59  ;;  %v13607_v44 = vmul.f32 %v13539_v22, %v9309_v11  ;;  %v3756_v41 = vmul.f32 %v3628_v5, %v3500_v31  ;;  %v13615_v16 = vpop.permute.xlu1 %4206  ;;  %v8805_v5 = vld [vmem:[%s16781_s20 + $0x8] sm:$0xff]  }
 0x39f   : > { %v4429_v23 = vmul.f32 %v17802_v47, %v13310_v14  ;;  %v4518_v2 = vadd.f32 %v4517_v3, %v4381_v10  ;;  %v13611_v42 = vpop.eup %9312  ;;  %v4539_v12 = vadd.f32 %v4538_v55, %v4397_v57  ;;  %v2172_v40 = vmul.f32 -0.5, %v2044_v17  ;;  %v17804_v10 = vld [vmem:[#allocation199_spill] sm:$0xff] }
 0x3a0   : > { %17801 = vst [vmem:[#allocation53_spill] sm:$0xff] %v13601_v48  ;;  %v4414_v38 = vmul.f32 %v17803_v53, %v13367_v49  ;;  %v4849_v59 = vpack.c.bf16 %v13607_v44, %v13604_v58  ;;  %v17032_v18 = vmov 0.0   ;;  %v13620_v31 = vpop.eup %9314  ;;  %9316 = vpow2.f32 %v3978_v39  ;;  %v17856_v48 = vld [vmem:[#allocation276_spill] sm:$0xff] }
 0x3a1   : > { %8404 = vmatprep.subr.bf16.mxu0 %v17032_v18  ;;  %v2553_v11 = vmul.f32 1.442695, %v2299_v24  ;;  %v4560_v3 = vadd.f32 %v4559_v37, %v4413_v52  ;;  %v4430_v55 = vmul.f32 %v17804_v10, %v13367_v49  ;;  %v3741_v57 = vmul.f32 %v3613_v29, %v3485_v1  ;;  %v17806_v24 = vld [vmem:[#allocation83_spill] sm:$0xff] }
 0x3a2   : > { %8405 = vmatpush3.bf16.msra.mxu0 %v8804_v50  ;;  %v3629_v47 = vmul.f32 -0.5, %v3501_v28  ;;  %v4519_v53 = vadd.f32 %v4518_v2, %v4382_v46  ;;  %v4540_v33 = vadd.f32 %v4539_v12, %v4398_v25  ;;  %8549 = vmatmul.mubr.bf16.gmra.mrb[40].mxu1 %v4849_v59  ;;  %v4010_v54 = vmul.f32 1.442695, %v3756_v41  ;;  %v17807_v37 = vld [vmem:[#allocation75_spill] sm:$0xff]  ;;  %v17813_v46 = vld [vmem:[#allocation232_spill] sm:$0xff]  ;;  %v17815_v12 = vld [vmem:[#allocation45_spill] sm:$0xff] }
 0x3a3   : > { %v4581_v18 = vadd.f32 %v4580_v7, %v4429_v23  ;;  %v4373_v39 = vmul.f32 %v17805_v51, %v13615_v16  ;;  %v17808_v52 = vpack.c.bf16 %v17806_v24, %v17807_v37  ;;  %v17809_v50 = vld [vmem:[#allocation319_spill] sm:$0xff]  ;;  %v17811_v61 = vmov 0.0   ;;  %v13641_v23 = vpop.permute.xlu0 %4210  ;;  %v17814_v51 = vld [vmem:[#allocation28_spill] sm:$0xff] }
 0x3a4   : > { %v13634_v10 = vadd.f32 %v17809_v50, %v13476_v63  ;;  %8406 = vmatprep.subr.bf16.mxu0 %v17811_v61  ;;  %v2300_v1 = vmul.f32 %v2172_v40, %v2044_v17  ;;  %v17812_v29 = vld [vmem:[#allocation43_spill] sm:$0xff]  ;;  %v4399_v7 = vmul.f32 %v17813_v46, %v13396_v19  ;;  %v4561_v41 = vadd.f32 %v4560_v3, %v4414_v38  ;;  %v13650_v38 = vpop.permute.xlu1 %4214  ;;  %v17817_v3 = vld [vmem:[#allocation234_spill] sm:$0xff] }
 0x3a5   : > { %8552 = vmatprep.mubr.bf16.mxu1 %v17808_v52  ;;  %v4383_v25 = vmul.f32 %v17812_v29, %v13396_v19  ;;  %v4415_v2 = vmul.f32 %v17814_v51, %v13396_v19  ;;  %v4431_v59 = vmul.f32 %v17815_v12, %v13396_v19  ;;  %v4582_v24 = vadd.f32 %v4581_v18, %v4430_v55  ;;  %v8806_v17 = vld [vmem:[%s16781_s20 + $0x10] sm:$0xff]   ;;  %v17818_v12 = vld [vmem:[#allocation148_spill] sm:$0xff] }
 0x3a6   : > { %17810 = vst [vmem:[#allocation36_spill] sm:$0xff] %v13634_v10  ;;  %v4505_v37 = vadd.f32 %v4504_v15, %v4373_v39  ;;  %8407 = vmatpush3.bf16.msra.mxu0 %v8805_v5  ;;  %v3980_v40 = vmul.f32 1.442695, %v3741_v57  ;;  %v3757_v52 = vmul.f32 %v3629_v47, %v3501_v28  ;;  %v4541_v46 = vadd.f32 %v4540_v33, %v4399_v7  ;;  %v17819_v15 = vld [vmem:[#allocation266_spill] sm:$0xff]  ;;  %v17820_v33 = vld [vmem:[#allocation111_spill] sm:$0xff]  ;;  %v17821_v39 = vld [vmem:[#allocation48_spill] sm:$0xff] }
 0x3a7   : > { %v4520_v29 = vadd.f32 %v4519_v53, %v4383_v25  ;;  %17816 = vst [vmem:[#allocation42_spill] sm:$0xff] %v13650_v38  ;;  %8408 = vmatprep.subr.bf16.mxu0 %v17811_v61  ;;  %v4384_v51 = vmul.f32 %v17817_v3, %v13446_v27  ;;  %v4400_v18 = vmul.f32 %v17818_v12, %v13446_v27  ;;  %9318 = vpow2.f32 %v2553_v11  ;;  %v8807_v12 = vld [vmem:[%s16781_s20 + $0x18] sm:$0xff]  }
 0x3a8   : > { %v4247_v55 = vadd.f32 %v17819_v15, %v13469_v13  ;;  %v4374_v5 = vmul.f32 %v13442_v8, %v13641_v23  ;;  %v2555_v28 = vmul.f32 1.442695, %v2300_v1  ;;  %v4562_v57 = vadd.f32 %v4561_v41, %v4415_v2  ;;  %v17823_v11 = vld [vmem:[#allocation60_spill] sm:$0xff]  ;;  %v17824_v1 = vld [vmem:[#allocation87_spill] sm:$0xff]  ;;  %v17839_v13 = vld [vmem:[#allocation161_spill] sm:$0xff]  ;;  %8420 = vmatprep.mubr.msk.bf16.mxu0 %vm10060_vm9, %v17811_v61 }
 0x3a9   : > { %v4416_v47 = vmul.f32 %v17820_v33, %v13446_v27  ;;  %v4583_v53 = vadd.f32 %v4582_v24, %v4431_v59  ;;  %v4432_v25 = vmul.f32 %v17821_v39, %v13446_v27  ;;  %v13671_v8 = vmul.f32 %v13539_v22, %v13589_v43  ;;  %v17828_v39 = vld [vmem:[#allocation31_spill] sm:$0xff]  ;;  %v17842_v15 = vld [vmem:[#allocation142_spill] sm:$0xff] }
 0x3aa   : > { %v4375_v7 = vmul.f32 %v4247_v55, %v13650_v38  ;;  %v4506_v3 = vadd.f32 %v4505_v37, %v4374_v5  ;;  %8409 = vmatpush3.bf16.msra.mxu0 %v8806_v17  ;;  %v13675_v41 = vadd.f32 %v17824_v1, %v17823_v11  ;;  %9320 = vpow2.f32 %v4010_v54  ;;  %v13680_v59 = vpop.eup %9316  ;;  %v17826_v55 = vld [vmem:[#allocation55_spill] sm:$0xff]  ;;  %v17829_v11 = vld [vmem:[#allocation81_spill] sm:$0xff] }
 0x3ab   : > { %17822 = vst [vmem:[#allocation301_spill] sm:$0xff] %v13671_v8  ;;  %v13677_v2 = vmul.f32 1.442695, %v3757_v52  ;;  %8410 = vmatprep.subr.bf16.mxu0 %v17811_v61  ;;  %9322 = vpow2.f32 %v3980_v40  ;;  %v4521_v24 = vadd.f32 %v4520_v29, %v4384_v51  ;;  %v4542_v37 = vadd.f32 %v4541_v46, %v4400_v18  ;;  %v17827_v5 = vld [vmem:[#allocation279_spill] sm:$0xff]  ;;  %v17830_v29 = vld [vmem:[#allocation306_spill] sm:$0xff]  ;;  %v8808_v51 = vld [vmem:[%s16781_s20 + $0x20] sm:$0xff]  }
 0x3ac   : > { %v13682_v17 = vadd.f32 %v4506_v3, %v4375_v7  ;;  %v4385_v43 = vmul.f32 %v17826_v55, %v13471_v45  ;;  %v4401_v33 = vmul.f32 %v17827_v5, %v13471_v45  ;;  %v4417_v54 = vmul.f32 %v17828_v39, %v13471_v45  ;;  %v17831_v18 = vld [vmem:[#allocation316_spill] sm:$0xff]  ;;  %v17834_v3 = vld [vmem:[#allocation162_spill] sm:$0xff]  ;;  %v17847_v8 = vld [vmem:[#allocation237_spill] sm:$0xff] }
 0x3ad   : > { %v4563_v52 = vadd.f32 %v4562_v57, %v4416_v47  ;;  %9324 = vpow2.f32 %v2555_v28  ;;  %v4433_v1 = vmul.f32 %v17829_v11, %v13471_v45  ;;  %v4584_v40 = vadd.f32 %v4583_v53, %v4432_v25  ;;  %v17832_v57 = vld [vmem:[#allocation33_spill] sm:$0xff]  ;;  %v17835_v25 = vld [vmem:[#allocation198_spill] sm:$0xff] }
 0x3ae   : > { %17825 = vst [vmem:[#allocation107_spill] sm:$0xff] %v13682_v17  ;;  %v13694_v46 = vmul.f32 %v17830_v29, %v13530_v35  ;;  %8411 = vmatpush3.bf16.msra.mxu0 %v8807_v12  ;;  %v13701_v7 = vmul.f32 %v17831_v18, %v13530_v35  ;;  %v13705_v28 = vmul.f32 %v17832_v57, %v13530_v35  ;;  %v17833_v47 = vld [vmem:[#allocation269_spill] sm:$0xff]  ;;  %v17836_v29 = vld [vmem:[#allocation190_spill] sm:$0xff]  ;;  %9326 = vpow2.f32 %v13677_v2 }
 0x3af   : > { %v4457_v53 = vmul.f32 %v17834_v3, %v17833_v47  ;;  %v2678_v55 = vmul.f32 %v13539_v22, %v17835_v25  ;;  %8412 = vmatprep.subr.bf16.mxu0 %v17811_v61  ;;  %v13714_v12 = vmul.f32 %v13339_v30, %v13530_v35  ;;  %v4522_v5 = vadd.f32 %v4521_v24, %v4385_v43  ;;  %v13717_v11 = vld [vmem:[%s10969_s29] ss:$0 sm:$0xff]  ;;  %v17838_v3 = vld [vmem:[#allocation30_spill] sm:$0xff] }
 0x3b0   : > { %v4543_v39 = vadd.f32 %v4542_v37, %v4401_v33  ;;  %v13721_v18 = vmul.f32 %v13717_v11, %v17836_v29  ;;  %v13723_v57 = vadd.f32 %v4563_v52, %v4417_v54  ;;  %v4456_v63 = vmul.f32 %v17839_v13, %v17838_v3  ;;  %v17840_v25 = vld [vmem:[#allocation137_spill] sm:$0xff]  ;;  %v17843_v37 = vld [vmem:[#allocation91_spill] sm:$0xff]  ;;  %v17844_v33 = vld [vmem:[#allocation236_spill] sm:$0xff] }
 0x3b1   : > { %v13729_v10 = vmul.f32 %v13717_v11, %v17840_v25  ;;  %v4851_v30 = vpack.c.bf16 %v2678_v55, %v17842_v15  ;;  %v2679_v43 = vmul.f32 %v13539_v22, %v17843_v37  ;;  %v2680_v29 = vmul.f32 %v13539_v22, %v17844_v33  ;;  %v17845_v54 = vld [vmem:[#allocation159_spill] sm:$0xff]  ;;  %v13742_v13 = vpop.eup %9318  ;;  %v8809_v37 = vld [vmem:[%s16781_s20 + $0x28] sm:$0xff]   ;;  %v17864_v47 = vld [vmem:[#allocation277_spill] sm:$0xff] }
 0x3b2   : > { %17837 = vst [vmem:[#allocation191_spill] sm:$0xff] %v13721_v18  ;;  %v4330_v24 = vadd.f32 %v13721_v18, %v17842_v15  ;;  %v13740_v52 = vmul.f32 %v13717_v11, %v17845_v54  ;;  %8413 = vmatpush3.bf16.msra.mxu0 %v8808_v51  ;;  %v4585_v25 = vadd.f32 %v4584_v40, %v4433_v1  ;;  %v17849_v18 = vld [vmem:[#allocation244_spill] sm:$0xff] }
 0x3b3   : > { %17841 = vst [vmem:[#allocation203_spill] sm:$0xff] %v13729_v10  ;;  %v4619_v50 = vadd.f32 %v4457_v53, %v4456_v63  ;;  %v4331_v17 = vadd.f32 %v13729_v10, %v2678_v55  ;;  %8553 = vmatmul.mubr.bf16.gmra.mrb[44].mxu1 %v4851_v30  ;;  %v13747_v15 = vmul.f32 %v13717_v11, %v17847_v8  ;;  %v17852_v8 = vld [vmem:[#allocation294_spill] sm:$0xff]  ;;  %v17853_v55 = vld [vmem:[#allocation240_spill] sm:$0xff] }
 0x3b4   : > { %17846 = vst [vmem:[#allocation26_spill] sm:$0xff] %v13740_v52  ;;  %v4458_v33 = vmul.f32 %v4330_v24, %v17728_v9  ;;  %v4332_v54 = vadd.f32 %v13740_v52, %v2679_v43  ;;  %v4852_v51 = vpack.c.bf16 %v2680_v29, %v2679_v43  ;;  %v13756_v1 = vmul.f32 %v13717_v11, %v17849_v18  ;;  %v13759_v63 = vpop.eup %9320  ;;  %v17854_v24 = vld [vmem:[#allocation274_spill] sm:$0xff]  ;;  %v17855_v10 = vld [vmem:[#allocation300_spill] sm:$0xff] }
 0x3b5   : > { %17848 = vst [vmem:[#allocation317_spill] sm:$0xff] %v13747_v15  ;;  %8414 = vmatprep.subr.bf16.mxu0 %v17811_v61  ;;  %17851 = vst [vmem:[#allocation223_spill] sm:$0xff] %v13759_v63  ;;  %v4386_v40 = vmul.f32 %v17852_v8, %v13500_v32  ;;  %v4459_v53 = vmul.f32 %v4331_v17, %v13059_v4  ;;  %v2681_v30 = vmul.f32 %v13539_v22, %v17853_v55  ;;  %v9323_v43 = vpop.eup %9322  ;;  %v17857_v55 = vld [vmem:[#allocation313_spill] sm:$0xff] }
 0x3b6   : > { %17850 = vst [vmem:[#allocation211_spill] sm:$0xff] %v13756_v1  ;;  %v2682_v52 = vmul.f32 %v13539_v22, %v17854_v24  ;;  %v4402_v18 = vmul.f32 %v17855_v10, %v13500_v32  ;;  %v4620_v34 = vadd.f32 %v4619_v50, %v4458_v33  ;;  %v4333_v0 = vadd.f32 %v13747_v15, %v2680_v29  ;;  %v17858_v24 = vld [vmem:[#allocation298_spill] sm:$0xff]  ;;  %v17859_v29 = vld [vmem:[#allocation295_spill] sm:$0xff] }
 0x3b7   : > { %v4460_v63 = vmul.f32 %v4332_v54, %v13191_v36  ;;  %8556 = vmatprep.mubr.bf16.mxu1 %v4852_v51  ;;  %v13774_v8 = vmul.f32 %v13717_v11, %v17856_v48  ;;  %v4334_v17 = vadd.f32 %v13756_v1, %v2681_v30  ;;  %v2684_v4 = vmul.f32 %v13539_v22, %v17857_v55  ;;  %v13783_v50 = vpop.eup %9324  ;;  %v17860_v48 = vld [vmem:[#allocation314_spill] sm:$0xff]  ;;  %v8810_v51 = vld [vmem:[%s16781_s20 + $0x30] sm:$0xff]  }
 0x3b8   : > { %v13781_v38 = vmul.f32 %v13717_v11, %v17858_v24  ;;  %8415 = vmatpush3.bf16.msra.mxu0 %v8809_v37  ;;  %v4621_v10 = vadd.f32 %v4620_v34, %v4459_v53  ;;  %v4461_v36 = vmul.f32 %v4333_v0, %v13310_v14  ;;  %v2683_v33 = vmul.f32 %v13539_v22, %v17859_v29  ;;  %v17861_v37 = vld [vmem:[#allocation32_spill] sm:$0xff]  ;;  %v17862_v34 = vld [vmem:[#allocation105_spill] sm:$0xff] }
 0x3b9   : > { %v13790_v54 = vmul.f32 %v13717_v11, %v17860_v48  ;;  %8416 = vmatprep.subr.bf16.mxu0 %v17811_v61  ;;  %v4418_v55 = vmul.f32 %v17861_v37, %v13500_v32  ;;  %v4434_v53 = vmul.f32 %v17862_v34, %v13500_v32  ;;  %v4523_v0 = vadd.f32 %v4522_v5, %v4386_v40 }
 0x3ba   : > { %v4853_v24 = vpack.c.bf16 %v2682_v52, %v2681_v30  ;;  %v4622_v1 = vadd.f32 %v4621_v10, %v4460_v63  ;;  %v4462_v29 = vmul.f32 %v4334_v17, %v13367_v49  ;;  %v4854_v15 = vpack.c.bf16 %v2684_v4, %v2683_v33 }
 0x3bb   : > { %v2686_v48 = vmul.f32 %v13539_v22, %v13411_v6  ;;  %v4544_v14 = vadd.f32 %v4543_v39, %v4402_v18  ;;  %v2685_v9 = vmul.f32 %v13539_v22, %v17863_v21  ;;  %v13807_v37 = vmul.f32 %v13717_v11, %v17864_v47  ;;  %v8811_v21 = vld [vmem:[%s16781_s20 + $0x38] sm:$0xff]  }
 0x3bc   : > { %8557 = vmatmul.mubr.bf16.gmra.mrb[48].mxu1 %v4853_v24  ;;  %v13811_v5 = vmul.f32 %v13717_v11, %v13434_v26  ;;  %v4623_v63 = vadd.f32 %v4622_v1, %v4461_v36  ;;  %v4335_v40 = vadd.f32 %v13774_v8, %v2682_v52  ;;  %v4336_v6 = vadd.f32 %v13781_v38, %v2683_v33 }
 0x3bd   : > { %17865 = vst [vmem:[#allocation68_spill] sm:$0xff] %v13807_v37  ;;  %8560 = vmatprep.mubr.bf16.mxu1 %v4854_v15  ;;  %8417 = vmatpush3.bf16.msra.mxu0 %v8810_v51  ;;  %v4565_v47 = vadd.f32 %v13723_v57, %v4418_v55  ;;  %v4586_v39 = vadd.f32 %v4585_v25, %v4434_v53  ;;  %v17870_v55 = vld [vmem:[#allocation24_spill] sm:$0xff] }
 0x3be   : > { %17866 = vst [vmem:[#allocation195_spill] sm:$0xff] %v13811_v5  ;;  %v13822_v26 = vmul.f32 %v13675_v41, %v13615_v16  ;;  %v4855_v30 = vpack.c.bf16 %v2686_v48, %v2685_v9  ;;  %8418 = vmatprep.subr.bf16.mxu0 %v17811_v61  ;;  %v4463_v2 = vmul.f32 %v4335_v40, %v13396_v19  ;;  %v13869_v34 = vadd.f32 1e-05, %v17870_v55 }
 0x3bf   : > { %v4624_v52 = vadd.f32 %v4623_v63, %v4462_v29  ;;  %v4464_v15 = vmul.f32 %v4336_v6, %v13446_v27  ;;  %v13829_v1 = vmul.f32 %v13539_v22, %v13611_v42  ;;  %v4524_v18 = vadd.f32 %v4523_v0, %v13694_v46  ;;  %v17872_v29 = vld [vmem:[#allocation70_spill] sm:$0xff]  ;;  %v17874_v6 = vld [vmem:[#allocation73_spill] sm:$0xff] }
 0x3c0   : > { %v13834_v57 = vmul.f32 %v13717_v11, %v13680_v59  ;;  %v4337_v41 = vadd.f32 %v13790_v54, %v2684_v4  ;;  %v13839_v25 = vmul.f32 %v13717_v11, %v13559_v62  ;;  %v4338_v10 = vadd.f32 %v13807_v37, %v2685_v9  ;;  %v13857_v9 = vld [vmem:[%s16777_s16] sm:$0xff]   ;;  %v17873_v63 = vld [vmem:[#allocation74_spill] sm:$0xff] }
 0x3c1   : > { %v4625_v17 = vadd.f32 %v4624_v52, %v4463_v2  ;;  %v2687_v36 = vmul.f32 %v13539_v22, %v13524_v56  ;;  %v13846_v42 = vmul.f32 %v13717_v11, %v13620_v31  ;;  %8419 = vmatpush3.bf16.msra.mxu0 %v8811_v21  ;;  %v4545_v59 = vadd.f32 %v4544_v14, %v13701_v7  ;;  %v17869_v7 = vld [vmem:[#allocation200_spill] sm:$0xff] }
 0x3c2   : > { %17867 = vst [vmem:[#allocation199_spill] sm:$0xff] %v13839_v25  ;;  %v4566_v46 = vadd.f32 %v4565_v47, %v13705_v28  ;;  %v13851_v4 = vmul.f32 %v13717_v11, %v9323_v43  ;;  %v4465_v62 = vmul.f32 %v4337_v41, %v13471_v45  ;;  %8424 = vmatprep.subr.bf16.mxu0 %v13857_v9  ;;  %v9327_v47 = vpop.eup %9326  ;;  %v17875_v41 = vld [vmem:[#allocation96_spill] sm:$0xff]  ;;  %9328 = vrcp.f32 %v13869_v34  ;;  %v17930_v34 = vld [vmem:[#allocation207_spill] sm:$0xff] }
 0x3c3   : > { %17868 = vst [vmem:[#allocation255_spill] sm:$0xff] %v13846_v42  ;;  %v4626_v56 = vadd.f32 %v4625_v17, %v4464_v15  ;;  %v4466_v31 = vmul.f32 %v4338_v10, %v13500_v32  ;;  %v4856_v33 = vpack.c.bf16 %v13829_v1, %v2687_v36  ;;  %v4587_v14 = vadd.f32 %v4586_v39, %v13714_v12  ;;  %v17871_v12 = vld [vmem:[#allocation71_spill] sm:$0xff]  ;;  %v17876_v17 = vld [vmem:[#allocation102_spill] sm:$0xff] }
 0x3c4   : > { %v4388_v28 = vmul.f32 %v17869_v7, %v13574_v60  ;;  %v4326_v43 = vadd.f32 %v13834_v57, %v13604_v58  ;;  %v4339_v51 = vadd.f32 %v13811_v5, %v2686_v48  ;;  %8561 = vmatmul.mubr.bf16.gmra.mrb[52].mxu1 %v4855_v30  ;;  %v4340_v0 = vadd.f32 %v13839_v25, %v2687_v36  ;;  %v17877_v36 = vld [vmem:[#allocation92_spill] sm:$0xff]  ;;  %v17884_v25 = vld [vmem:[#allocation53_spill] sm:$0xff] }
 0x3c5   : > { %v4627_v53 = vadd.f32 %v4626_v56, %v4465_v62  ;;  %8564 = vmatprep.mubr.bf16.mxu1 %v4856_v33  ;;  %v13874_v24 = vmul.f32 %v13539_v22, %v13783_v50  ;;  %v13879_v58 = vmul.f32 %v13539_v22, %v17871_v12  ;;  %v13883_v48 = vmul.f32 %v13539_v22, %v17872_v29 }
 0x3c6   : > { %v4020_v40 = vmul.f32 %v13717_v11, %v17873_v63  ;;  %v4021_v21 = vmul.f32 %v13717_v11, %v17874_v6  ;;  %v4327_v50 = vadd.f32 %v13851_v4, %v13607_v44  ;;  %v4467_v61 = vmul.f32 %v4339_v51, %v13530_v35  ;;  %v17879_v51 = vld [vmem:[#allocation283_spill] sm:$0xff]  ;;  %v17881_v6 = vld [vmem:[#allocation42_spill] sm:$0xff] }
 0x3c7   : > { %v4628_v39 = vadd.f32 %v4627_v53, %v4466_v31  ;;  %v4468_v30 = vmul.f32 %v4340_v0, %v13574_v60  ;;  %v2689_v2 = vmul.f32 %v13539_v22, %v13742_v13  ;;  %v4218_v10 = vadd.f32 %v17876_v17, %v17875_v41  ;;  %v17878_v13 = vld [vmem:[#allocation269_spill] sm:$0xff]  ;;  %v17880_v53 = vld [vmem:[#allocation66_spill] sm:$0xff] }
 0x3c8   : > { %v4216_v52 = vadd.f32 %v4020_v40, %v13879_v58  ;;  %v4217_v15 = vadd.f32 %v4021_v21, %v13883_v48  ;;  %v4404_v62 = vmul.f32 %v17877_v36, %v13574_v60  ;;  %v4420_v44 = vmul.f32 %v13343_v20, %v13574_v60  ;;  %v17882_v20 = vld [vmem:[#allocation308_spill] sm:$0xff] }
 0x3c9   : > { %v4454_v56 = vmul.f32 %v4326_v43, %v13641_v23  ;;  %v4629_v31 = vadd.f32 %v4628_v39, %v4467_v61  ;;  %v4857_v33 = vpack.c.bf16 %v13874_v24, %v2689_v2  ;;  %v4346_v55 = vmul.f32 %v4218_v10, %v17879_v51  ;;  %v17883_v43 = vld [vmem:[#allocation120_spill] sm:$0xff]  ;;  %v17887_v10 = vld [vmem:[#allocation285_spill] sm:$0xff]  ;;  %v17888_v51 = vld [vmem:[#allocation179_spill] sm:$0xff] }
 0x3ca   : > { %v4344_v22 = vmul.f32 %v4216_v52, %v17838_v3  ;;  %v4345_v7 = vmul.f32 %v4217_v15, %v17878_v13  ;;  %v4436_v0 = vmul.f32 %v17880_v53, %v13574_v60  ;;  %v4525_v12 = vadd.f32 %v4524_v18, %v4388_v28  ;;  %v17885_v52 = vld [vmem:[#allocation225_spill] sm:$0xff]  ;;  %v17889_v18 = vld [vmem:[#allocation106_spill] sm:$0xff] }
 0x3cb   : > { %v4630_v29 = vadd.f32 %v4629_v31, %v4468_v30  ;;  %v4858_v63 = vpack.c.bf16 %v4021_v21, %v4020_v40  ;;  %v4455_v36 = vmul.f32 %v4327_v50, %v17881_v6  ;;  %v4347_v61 = vmul.f32 %v17883_v43, %v17882_v20  ;;  %v17886_v15 = vld [vmem:[#allocation61_spill] sm:$0xff]  ;;  %v17890_v21 = vld [vmem:[#allocation218_spill] sm:$0xff] }
 0x3cc   : > { %8565 = vmatmul.mubr.bf16.gmra.mrb[56].mxu1 %v4857_v33  ;;  %v4472_v39 = vadd.f32 %v4345_v7, %v4344_v22  ;;  %v4610_v3 = vadd.f32 %v17884_v25, %v13822_v26  ;;  %v4310_v13 = vadd.f32 %v17886_v15, %v17885_v52  ;;  %v4349_v5 = vmul.f32 %v17888_v51, %v17887_v10  ;;  %v17891_v30 = vld [vmem:[#allocation201_spill] sm:$0xff] }
 0x3cd   : > { %v4389_v28 = vmul.f32 %v17889_v18, %v13615_v16  ;;  %v4546_v40 = vadd.f32 %v4545_v59, %v4404_v62  ;;  %8568 = vmatprep.mubr.bf16.mxu1 %v4858_v63  ;;  %v4351_v50 = vmul.f32 %v17890_v21, %v13396_v19  ;;  %v4350_v31 = vmul.f32 %v17891_v30, %v13367_v49  ;;  %v17892_v26 = vld [vmem:[#allocation149_spill] sm:$0xff]  ;;  %v17895_v49 = vld [vmem:[#allocation138_spill] sm:$0xff]  ;;  %v17904_v18 = vld [vmem:[#allocation144_spill] sm:$0xff] }
 0x3ce   : > { %v4473_v33 = vadd.f32 %v4472_v39, %v4346_v55  ;;  %v4611_v22 = vadd.f32 %v4610_v3, %v4454_v56  ;;  %v4405_v25 = vmul.f32 %v17892_v26, %v13615_v16  ;;  %v4567_v7 = vadd.f32 %v4566_v46, %v4420_v44  ;;  %v17893_v20 = vld [vmem:[#allocation265_spill] sm:$0xff]  ;;  %v17896_v56 = vld [vmem:[#allocation223_spill] sm:$0xff]  ;;  %v17900_v3 = vld [vmem:[#allocation220_spill] sm:$0xff] }
 0x3cf   : > { %v4526_v53 = vadd.f32 %v4525_v12, %v4389_v28  ;;  %v4390_v43 = vmul.f32 %v17893_v20, %v13641_v23  ;;  %v17894_v52 = vld [vmem:[#allocation205_spill] sm:$0xff]  ;;  %v4588_v62 = vadd.f32 %v4587_v14, %v4436_v0  ;;  %v4406_v55 = vmul.f32 %v17895_v49, %v13641_v23  ;;  %v17899_v44 = vld [vmem:[#allocation167_spill] sm:$0xff] }
 0x3d0   : > { %v4421_v59 = vmul.f32 %v17894_v52, %v13615_v16  ;;  %v4474_v63 = vadd.f32 %v4473_v33, %v4347_v61  ;;  %v13931_v10 = vadd.f32 %v4611_v22, %v4455_v36  ;;  %v4547_v19 = vadd.f32 %v4546_v40, %v4405_v25  ;;  %v17901_v51 = vld [vmem:[#allocation273_spill] sm:$0xff]  ;;  %v17903_v36 = vld [vmem:[#allocation103_spill] sm:$0xff] }
 0x3d1   : > { %v13937_v39 = vmul.f32 %v13717_v11, %v17896_v56  ;;  %v13940_v46 = vmul.f32 %v13717_v11, %v9327_v47  ;;  %v4437_v12 = vmul.f32 %v17899_v44, %v13615_v16  ;;  %v4263_v14 = vadd.f32 %v17901_v51, %v17900_v3  ;;  %v17902_v0 = vld [vmem:[#allocation301_spill] sm:$0xff]  ;;  %v17905_v21 = vld [vmem:[#allocation27_spill] sm:$0xff] }
 0x3d2   : > { %v4279_v61 = vadd.f32 %v17903_v36, %v17902_v0  ;;  %v4475_v28 = vadd.f32 %v4474_v63, %v17904_v18  ;;  %v4568_v40 = vadd.f32 %v4567_v7, %v4421_v59  ;;  %v4422_v30 = vmul.f32 %v17905_v21, %v13641_v23  ;;  %v17906_v59 = vld [vmem:[#allocation229_spill] sm:$0xff]  ;;  %v17908_v63 = vld [vmem:[#allocation39_spill] sm:$0xff] }
 0x3d3   : > { %17897 = vst [vmem:[#allocation83_spill] sm:$0xff] %v13937_v39  ;;  %17898 = vst [vmem:[#allocation75_spill] sm:$0xff] %v13940_v46  ;;  %v4527_v33 = vadd.f32 %v4526_v53, %v4390_v43  ;;  %v4341_v11 = vadd.f32 %v13846_v42, %v13829_v1  ;;  %v4391_v47 = vmul.f32 %v4263_v14, %v17881_v6  ;;  %v17907_v43 = vld [vmem:[#allocation37_spill] sm:$0xff]  ;;  %v17911_v14 = vld [vmem:[#allocation107_spill] sm:$0xff] }
 0x3d4   : > { %v4589_v22 = vadd.f32 %v4588_v62, %v4437_v12  ;;  %v4438_v26 = vmul.f32 %v4310_v13, %v13641_v23  ;;  %v4476_v25 = vadd.f32 %v4475_v28, %v4349_v5  ;;  %v4548_v20 = vadd.f32 %v4547_v19, %v4406_v55  ;;  %v17909_v55 = vld [vmem:[#allocation181_spill] sm:$0xff]  ;;  %v17910_v12 = vld [vmem:[#allocation54_spill] sm:$0xff] }
 0x3d5   : > { %v4469_v52 = vmul.f32 %v4341_v11, %v13615_v16  ;;  %v4342_v49 = vadd.f32 %v13937_v39, %v2689_v2  ;;  %v4343_v7 = vadd.f32 %v13940_v46, %v13874_v24  ;;  %v4352_v53 = vmul.f32 %v17906_v59, %v13446_v27  ;;  %v17912_v27 = vld [vmem:[#allocation243_spill] sm:$0xff] }
 0x3d6   : > { %v4295_v1 = vadd.f32 %v17908_v63, %v17907_v43  ;;  %v4407_v56 = vmul.f32 %v4279_v61, %v17881_v6  ;;  %v4477_v62 = vadd.f32 %v4476_v25, %v4350_v31  ;;  %v4528_v44 = vadd.f32 %v4527_v33, %v4391_v47  ;;  %v17913_v61 = vld [vmem:[#allocation275_spill] sm:$0xff]  ;;  %v17914_v33 = vld [vmem:[#allocation64_spill] sm:$0xff] }
 0x3d7   : > { %v4569_v13 = vadd.f32 %v4568_v40, %v4422_v30  ;;  %v4631_v5 = vadd.f32 %v4630_v29, %v4469_v52  ;;  %v4470_v19 = vmul.f32 %v4342_v49, %v13641_v23  ;;  %v4311_v2 = vadd.f32 %v17910_v12, %v17909_v55  ;;  %v17916_v52 = vld [vmem:[#allocation63_spill] sm:$0xff]  ;;  %v17920_v55 = vld [vmem:[#allocation278_spill] sm:$0xff] }
 0x3d8   : > { %v4508_v18 = vrot.slane %v17911_v14, 4  ;;  %v4590_v24 = vadd.f32 %v4589_v22, %v4438_v26  ;;  %v4478_v28 = vadd.f32 %v4477_v62, %v4351_v50  ;;  %v4353_v21 = vmul.f32 %v17912_v27, %v13471_v45  ;;  %v17915_v26 = vld [vmem:[#allocation77_spill] sm:$0xff] }
 0x3d9   : > { %v4423_v11 = vmul.f32 %v4295_v1, %v17881_v6  ;;  %v4549_v59 = vadd.f32 %v4548_v20, %v4407_v56  ;;  %v4471_v31 = vmul.f32 %v4343_v7, %v17881_v6  ;;  %v4354_v29 = vmul.f32 %v17913_v61, %v13500_v32  ;;  %v17917_v7 = vld [vmem:[#allocation268_spill] sm:$0xff]  ;;  %v17918_v1 = vld [vmem:[#allocation241_spill] sm:$0xff] }
 0x3da   : > { %v4439_v40 = vmul.f32 %v4311_v2, %v17881_v6  ;;  %v4479_v30 = vadd.f32 %v4478_v28, %v4352_v53  ;;  %v4859_v47 = vpack.c.bf16 %v17914_v33, %v17876_v17  ;;  %v4529_v25 = vrot.slane %v4528_v44, 4  ;;  %v17919_v53 = vld [vmem:[#allocation254_spill] sm:$0xff]  ;;  %v17921_v2 = vld [vmem:[#allocation297_spill] sm:$0xff] }
 0x3db   : > { %v4632_v22 = vadd.f32 %v4631_v5, %v4470_v19  ;;  %v4570_v50 = vadd.f32 %v4569_v13, %v4423_v11  ;;  %v4860_v45 = vpack.c.bf16 %v17916_v52, %v17915_v26  ;;  %v4509_v49 = vadd.f32 %v4508_v18, %v17911_v14  ;;  %v17922_v5 = vld [vmem:[#allocation319_spill] sm:$0xff]  ;;  %v17924_v14 = vld [vmem:[#allocation296_spill] sm:$0xff]  ;;  %v17926_v61 = vld [vmem:[#allocation325_spill] sm:$0xff]  ;;  %v9329_v13 = vpop.eup %9328 }
 0x3dc   : > { %v4480_v20 = vadd.f32 %v4479_v30, %v4353_v21  ;;  %v4591_v43 = vadd.f32 %v4590_v24, %v4439_v40  ;;  %8569 = vmatmul.mubr.bf16.gmra.mrb[60].mxu1 %v4859_v47  ;;  %v4863_v32 = vpack.c.bf16 %v17918_v1, %v17917_v7  ;;  %v4550_v62 = vrot.slane %v4549_v59, 4  ;;  %v17923_v19 = vld [vmem:[#allocation35_spill] sm:$0xff]  ;;  %v17927_v7 = vld [vmem:[#allocation130_spill] sm:$0xff]  ;;  %v17932_v1 = vld [vmem:[#allocation281_spill] sm:$0xff] }
 0x3dd   : > { %v4633_v56 = vadd.f32 %v4632_v22, %v4471_v31  ;;  %8572 = vmatprep.mubr.bf16.mxu1 %v4860_v45  ;;  %v4864_v17 = vpack.c.bf16 %v17920_v55, %v17919_v53  ;;  %v4230_v28 = vadd.f32 %v17921_v2, %v17923_v19  ;;  %v4355_v18 = vmul.f32 %v17924_v14, %v13530_v35  ;;  %v17925_v24 = vld [vmem:[#allocation315_spill] sm:$0xff] }
 0x3de   : > { %v4356_v27 = vmul.f32 %v17925_v24, %v13574_v60  ;;  %v4481_v21 = vadd.f32 %v4480_v20, %v4354_v29  ;;  %v4530_v11 = vadd.f32 %v4529_v25, %v4528_v44  ;;  %v4571_v31 = vrot.slane %v4570_v50, 4  ;;  %v17928_v60 = vld [vmem:[#allocation213_spill] sm:$0xff]  ;;  %v17929_v20 = vld [vmem:[#allocation126_spill] sm:$0xff]  ;;  %v17931_v25 = vld [vmem:[#allocation260_spill] sm:$0xff] }
 0x3df   : > { %v4357_v40 = vmul.f32 %v17926_v61, %v13615_v16  ;;  %v4358_v30 = vmul.f32 %v4230_v28, %v13641_v23  ;;  %v4592_v47 = vrot.slane %v4591_v43, 4  ;;  %v4634_v22 = vrot.slane %v4633_v56, 4  ;;  %v17933_v23 = vld [vmem:[#allocation129_spill] sm:$0xff]  ;;  %v17934_v28 = vld [vmem:[#allocation79_spill] sm:$0xff]  ;;  %v17936_v24 = vld [vmem:[#allocation266_spill] sm:$0xff] }
 0x3e0   : > { %v4482_v33 = vadd.f32 %v4481_v21, %v4355_v18  ;;  %v4510_v26 = vrot.slane %v4509_v49, 2  ;;  %v4551_v52 = vadd.f32 %v4550_v62, %v4549_v59  ;;  %v4613_v35 = vrot.slane %v13931_v10, 4  ;;  %v17935_v18 = vld [vmem:[#allocation299_spill] sm:$0xff]  ;;  %v17937_v21 = vld [vmem:[#allocation36_spill] sm:$0xff] }
 0x3e1   : > { %v4861_v29 = vpack.c.bf16 %v17928_v60, %v17927_v7  ;;  %v4531_v16 = vrot.slane %v4530_v11, 2  ;;  %v4572_v55 = vadd.f32 %v4571_v31, %v4570_v50  ;;  %v4862_v14 = vpack.c.bf16 %v17934_v28, %v17933_v23 }
 0x3e2   : > { %v4483_v45 = vadd.f32 %v4482_v33, %v4356_v27  ;;  %v4593_v27 = vadd.f32 %v4592_v47, %v4591_v43  ;;  %v4359_v61 = vmul.f32 %v17937_v21, %v17881_v6  ;;  %v4614_v33 = vadd.f32 %v4613_v35, %v13931_v10 }
 0x3e3   : > { %v4511_v60 = vadd.f32 %v4510_v26, %v4509_v49  ;;  %v4552_v53 = vrot.slane %v4551_v52, 2  ;;  %v4635_v50 = vadd.f32 %v4634_v22, %v4633_v56  ;;  %v4532_v31 = vadd.f32 %v4531_v16, %v4530_v11  ;;  %v17938_v49 = vld [vmem:[#allocation22_spill] sm:$0xff]  ;;  %v17939_v11 = vld [vmem:[#allocation20_spill] sm:$0xff]  ;;  %v17940_v26 = vld [vmem:[#allocation21_spill] sm:$0xff] }
 0x3e4   : > { %v4484_v62 = vadd.f32 %v4483_v45, %v4357_v40  ;;  %8573 = vmatmul.mubr.bf16.gmra.mrb[64].mxu1 %v4861_v29  ;;  %v4573_v44 = vrot.slane %v4572_v55, 2  ;;  %v4594_v28 = vrot.slane %v4593_v27, 2  ;;  %v4615_v59 = vrot.slane %v4614_v33, 2 }
 0x3e5   : > { %8576 = vmatprep.mubr.bf16.mxu1 %v4862_v14  ;;  %v4512_v43 = vrot.slane %v4511_v60, 1  ;;  %v4553_v47 = vadd.f32 %v4552_v53, %v4551_v52  ;;  %v4636_v45 = vrot.slane %v4635_v50, 2  ;;  %v4533_v29 = vrot.slane %v4532_v31, 1 }
 0x3e6   : > { %v4485_v7 = vadd.f32 %v4484_v62, %v4358_v30  ;;  %v4574_v6 = vadd.f32 %v4573_v44, %v4572_v55  ;;  %v4595_v10 = vadd.f32 %v4594_v28, %v4593_v27  ;;  %v4616_v30 = vadd.f32 %v4615_v59, %v4614_v33 }
 0x3e7   : > { %v1226_v56 = vmul.f32 %v9329_v13, %v17938_v49  ;;  %v1228_v22 = vmul.f32 %v9329_v13, %v17939_v11  ;;  %v1231_v35 = vmul.f32 %v9329_v13, %v17940_v26  ;;  %v4513_v14 = vadd.f32 %v4512_v43, %v4511_v60  ;;  %v17941_v60 = vld [vmem:[#allocation49_spill] sm:$0xff] }
 0x3e8   : > { %v4486_v23 = vadd.f32 %v4485_v7, %v4359_v61  ;;  %v4554_v62 = vrot.slane %v4553_v47, 1  ;;  %v4637_v61 = vadd.f32 %v4636_v45, %v4635_v50  ;;  %v4534_v7 = vadd.f32 %v4533_v29, %v4532_v31  ;;  %v17942_v50 = vld [vmem:[#allocation46_spill] sm:$0xff] }
 0x3e9   : > { %v4575_v52 = vrot.slane %v4574_v6, 1  ;;  %1227 = vst [vmem:[%s14014_s22] sm:$0xff] %v1226_v56  ;;  %8151 = vst [vmem:[%s14014_s22 + $0x8] sm:$0xff] %v1228_v22  ;;  %v4617_v44 = vrot.slane %v4616_v30, 1  ;;  %v4641_v59 = vpack.c.bf16 %v4513_v14, %v4513_v14  ;;  %v4866_v31 = vpack.c.bf16 %v17942_v50, %v17941_v60  ;;  %v17948_v60 = vld [vmem:[#allocation202_spill] sm:$0xff] }
 0x3ea   : > { %v4487_v40 = vrot.slane %v4486_v23, 4  ;;  %8152 = vst [vmem:[%s14014_s22 + $0x10] sm:$0xff] %v1231_v35  ;;  %v4555_v55 = vadd.f32 %v4554_v62, %v4553_v47  ;;  %v4638_v13 = vrot.slane %v4637_v61, 1  ;;  %v4642_v33 = vpack.c.bf16 %v4534_v7, %v4534_v7  ;;  %v17946_v62 = vld [vmem:[#allocation47_spill] sm:$0xff]  ;;  %v17949_v50 = vld [vmem:[#allocation222_spill] sm:$0xff]  ;;  %s9888_s22 = sshll.u32 %s10061_s1, 4  ;;  %s9889_s22 = int_to_ptr.vmem [resolvable:$false] %s9888_s22 }
 0x3eb   : > { %v4576_v27 = vadd.f32 %v4575_v52, %v4574_v6  ;;  %v4618_v43 = vadd.f32 %v4617_v44, %v4616_v30  ;;  %v4681_v49 = vunpack.c.l.b16 %v4641_v59  ;;  %s9890_s8 = scalar_lea.vmem %s9889_s22, 768  ;;  %p9891_p1 = scmp.lt.s32.totalorder %s16607_s24, %s9889_s22 }
 0x3ec   : > { %v4488_v21 = vadd.f32 %v4487_v40, %v4486_v23  ;;  %8577 = vmatmul.mubr.bf16.gmra.mrb[68].mxu1 %v4863_v32  ;;  %v17943_v40 = vpack.c.bf16 %v17922_v5, %v17921_v2  ;;  %v4639_v45 = vadd.f32 %v4638_v13, %v4637_v61  ;;  %v4682_v56 = vunpack.c.l.b16 %v4642_v33  ;;  %v17944_v2 = vld [vmem:[#allocation94_spill] sm:$0xff]  ;;  %v17947_v61 = vld [vmem:[#allocation177_spill] sm:$0xff]  ;;  %p9892_p2 = scmp.lt.s32.totalorder %s9890_s8, %s9884_s27 }
 0x3ed   : > { %8580 = vmatprep.mubr.bf16.mxu1 %v4864_v17  ;;  %v4596_v17 = vrot.slane %v4595_v10, 1  ;;  %v4644_v47 = vpack.c.bf16 %v4576_v27, %v4576_v27  ;;  %v4646_v22 = vpack.c.bf16 %v4618_v43, %v4618_v43  ;;  %v17945_v5 = vld [vmem:[#allocation118_spill] sm:$0xff]  ;;  %v4868_v7 = vpack.c.bf16 %v17947_v61, %v17946_v62  ;;  %v17964_v61 = vld [vmem:[#allocation208_spill] sm:$0xff] }
 0x3ee   : > { %v4489_v16 = vrot.slane %v4488_v21, 2  ;;  %v4867_v30 = vpack.c.bf16 %v17945_v5, %v17944_v2  ;;  %v4794_v33 = vpack.c.bf16 %v13883_v48, %v13879_v58  ;;  %v17960_v2 = vld [vmem:[#allocation184_spill] sm:$0xff]  ;;  %p9893_p3 = por %p9892_p2, %p9891_p1 }
 0x3ef   : > { %v4597_v28 = vadd.f32 %v4596_v17, %v4595_v10  ;;  %v4647_v10 = vpack.c.bf16 %v4639_v45, %v4639_v45  ;;  %v4686_v17 = vunpack.c.l.b16 %v4646_v22 }
 0x3f0   : > { %v4490_v32 = vadd.f32 %v4489_v16, %v4488_v21  ;;  %v4643_v21 = vpack.c.bf16 %v4555_v55, %v4555_v55  ;;  %v4684_v16 = vunpack.c.l.b16 %v4644_v47  ;;  %v17953_v47 = vpack.c.bf16 %v17932_v1, %v17931_v25  ;;  %v17957_v25 = vld [vmem:[#allocation110_spill] sm:$0xff]  ;;  %v17958_v1 = vld [vmem:[#allocation128_spill] sm:$0xff]  ;;  %p9894_p5 = pnand %p9893_p3, %p9887_p0 }
 0x3f1   : > { %v4645_v6 = vpack.c.bf16 %v4597_v28, %v4597_v28  ;;  %v17950_v28 = vld [vmem:[#allocation228_spill] sm:$0xff] }
 0x3f2   : > { %v4491_v53 = vrot.slane %v4490_v32, 1  ;;  %v4683_v26 = vunpack.c.l.b16 %v4643_v21  ;;  %v9873_v21 = vld [vmem:[%s16777_s16 + $0x18] sm:$0xff]  }
 0x3f3   : > { %v4685_v52 = vunpack.c.l.b16 %v4645_v6  ;;  %v17954_v6 = vld [vmem:[#allocation51_spill] sm:$0xff] }
 0x3f4   : > { %v4492_v23 = vadd.f32 %v4491_v53, %v4490_v32  ;;  %8581 = vmatmul.mubr.bf16.gmra.mrb[72].mxu1 %v17943_v40  ;;  %v4687_v53 = vunpack.c.l.b16 %v4647_v10  ;;  %v17951_v40 = vld [vmem:[#allocation246_spill] sm:$0xff] }
 0x3f5   : > { %8584 = vmatprep.mubr.bf16.mxu1 %v4866_v31  ;;  %v4869_v31 = vpack.c.bf16 %v17949_v50, %v17948_v60  ;;  %v4870_v43 = vpack.c.bf16 %v17951_v40, %v17950_v28  ;;  %v9875_v10 = vld [vmem:[%s16777_s16 + $0x28] sm:$0xff]   ;;  %v17973_v60 = vld [vmem:[#allocation215_spill] sm:$0xff]  ;;  %v17975_v28 = vld [vmem:[#allocation288_spill] sm:$0xff] }
 0x3f6   : > { %v4640_v29 = vpack.c.bf16 %v4492_v23, %v4492_v23 }
 0x3f8   : > { %v4680_v11 = vunpack.c.l.b16 %v4640_v29  ;;  %v9871_v29 = vld [vmem:[%s16777_s16 + $0x8] sm:$0xff]  }
 0x3fa   : > { %v4689_v35 = vsel %vm4688_vm10, %v4681_v49, %v4680_v11  ;;  %v17952_v49 = vpack.c.bf16 %v17930_v34, %v17929_v20  ;;  %v17955_v11 = vld [vmem:[#allocation84_spill] sm:$0xff]  ;;  %v17956_v20 = vpack.c.bf16 %v17936_v24, %v17935_v18  ;;  %v9876_v34 = vld [vmem:[%s16777_s16 + $0x30] sm:$0xff]  }
 0x3fb   : > { %v4691_v14 = vsel %vm4690_vm11, %v4682_v56, %v4689_v35  ;;  %v9874_v56 = vld [vmem:[%s16777_s16 + $0x20] sm:$0xff]   ;;  %v4874_v22 = vpack.c.bf16 %v17955_v11, %v17954_v6  ;;  %v17961_v18 = vld [vmem:[#allocation116_spill] sm:$0xff]  ;;  %v17981_v11 = vld [vmem:[#allocation98_spill] sm:$0xff] }
 0x3fc   : > { %v4693_v32 = vsel %vm4692_vm12, %v4683_v26, %v4691_v14  ;;  %8585 = vmatmul.mubr.bf16.gmra.mrb[76].mxu1 %v4867_v30  ;;  %v4875_v26 = vpack.c.bf16 %v17958_v1, %v17957_v25  ;;  %v17959_v35 = vld [vmem:[#allocation113_spill] sm:$0xff]  ;;  %v9877_v30 = vld [vmem:[%s16777_s16 + $0x38] sm:$0xff]   ;;  %v4795_v24 = vpack.c.bf16 %v17961_v18, %v17875_v41  ;;  %v17984_v25 = vld [vmem:[#allocation50_spill] sm:$0xff] }
 0x3fd   : > { %v4695_v44 = vsel %vm4694_vm13, %v4684_v16, %v4693_v32  ;;  %8588 = vmatprep.mubr.bf16.mxu1 %v4868_v7  ;;  %v4876_v5 = vpack.c.bf16 %v17960_v2, %v17959_v35  ;;  %v17962_v16 = vld [vmem:[#allocation140_spill] sm:$0xff]  ;;  %v17963_v14 = vld [vmem:[#allocation173_spill] sm:$0xff]  ;;  %v17966_v32 = vld [vmem:[#allocation123_spill] sm:$0xff] }
 0x3fe   : > { %v4697_v55 = vsel %vm4696_vm14, %v4685_v52, %v4695_v44  ;;  %v4796_v62 = vpack.c.bf16 %v17963_v14, %v17962_v16  ;;  %v17965_v7 = vld [vmem:[#allocation188_spill] sm:$0xff]  ;;  %v17986_v35 = vld [vmem:[#allocation117_spill] sm:$0xff]  ;;  %v17987_v2 = vld [vmem:[#allocation143_spill] sm:$0xff] }
 0x3ff   : > { %v4699_v13 = vsel %vm4698_vm15, %v4686_v17, %v4697_v55  ;;  %v4877_v52 = vpack.c.bf16 %v17965_v7, %v17964_v61  ;;  %v17967_v17 = vld [vmem:[#allocation261_spill] sm:$0xff]  ;;  %v17969_v55 = vld [vmem:[#allocation212_spill] sm:$0xff]  ;;  %v17989_v18 = vld [vmem:[#allocation78_spill] sm:$0xff] }
 0x400   : > { %v4701_v59 = vsel %vm4700_vm0, %v4687_v53, %v4699_v13  ;;  %v4878_v44 = vpack.c.bf16 %v17967_v17, %v17966_v32  ;;  %v17968_v53 = vld [vmem:[#allocation192_spill] sm:$0xff]  ;;  %v17991_v16 = vld [vmem:[#allocation115_spill] sm:$0xff]  ;;  %v17996_v17 = vld [vmem:[#allocation242_spill] sm:$0xff] }
 0x401   : > { %v4702_v27 = vpack.c.b16 %v4701_v59, %v4701_v59  ;;  %v14032_v23 = vpop.f32.mrb[36].mxu1  ;;  %v4797_v13 = vpack.c.bf16 %v17969_v55, %v17968_v53  ;;  %v17970_v59 = vld [vmem:[#allocation166_spill] sm:$0xff]  ;;  %v17972_v41 = vld [vmem:[#allocation292_spill] sm:$0xff]  ;;  %v17993_v61 = vld [vmem:[#allocation175_spill] sm:$0xff] }
 0x402   : > { %v14037_v45 = vpop.f32.mrb[37].mxu1  ;;  %v4879_v50 = vpack.c.bf16 %v17973_v60, %v17972_v41  ;;  %v17985_v1 = vld [vmem:[#allocation80_spill] sm:$0xff]  ;;  %v18002_v60 = vld [vmem:[#allocation206_spill] sm:$0xff] }
 0x403   : > { %8421 = vmatmul.mubr.bf16.vlgmr.msra.gmra.mrb[0].mxu0 %v4702_v27  ;;  %v14042_v58 = vpop.f32.mrb[38].mxu1  ;;  %v17971_v27 = vld [vmem:[#allocation235_spill] sm:$0xff]  ;;  %v17998_v55 = vld [vmem:[#allocation136_spill] sm:$0xff] }
 0x404   : > { %8425 = vmatpush3.bf16.msra.mxu0 %v13857_v9  ;;  %8440 = vmatprep.mubr.bf16.mxu0 %v4794_v33  ;;  %v14044_v48 = vpop.f32.mrb[39].mxu1  ;;  %v9872_v9 = vld [vmem:[%s16777_s16 + $0x10] sm:$0xff]   ;;  %v4798_v33 = vpack.c.bf16 %v17971_v27, %v17970_v59  ;;  %v18000_v27 = vld [vmem:[#allocation29_spill] sm:$0xff] }
 0x405   : > { %8426 = vmatprep.subr.bf16.mxu0 %v9871_v29  ;;  %8589 = vmatmul.mubr.bf16.gmra.mrb[80].mxu1 %v4869_v31  ;;  %v17974_v31 = vld [vmem:[#allocation272_spill] sm:$0xff] }
 0x406   : > { %8592 = vmatprep.mubr.bf16.mxu1 %v4870_v43  ;;  %v4880_v40 = vpack.c.bf16 %v17975_v28, %v17974_v31  ;;  %v17976_v43 = vld [vmem:[#allocation169_spill] sm:$0xff]  ;;  %v18004_v28 = vld [vmem:[#allocation280_spill] sm:$0xff] }
 0x408   : > { %8427 = vmatpush3.bf16.msra.mxu0 %v9871_v29  ;;  %v17977_v29 = vld [vmem:[#allocation293_spill] sm:$0xff] }
 0x409   : > { %8428 = vmatprep.subr.bf16.mxu0 %v9872_v9 }
 0x40c   : > { %8429 = vmatpush3.bf16.msra.mxu0 %v9872_v9  ;;  %v4799_v9 = vpack.c.bf16 %v17977_v29, %v17976_v43  ;;  %v18006_v29 = vld [vmem:[#allocation226_spill] sm:$0xff] }
 0x40d   : > { %8430 = vmatprep.subr.bf16.mxu0 %v9873_v21  ;;  %8593 = vmatmul.mubr.bf16.gmra.mrb[84].mxu1 %v17952_v49  ;;  %v17979_v49 = vld [vmem:[#allocation320_spill] sm:$0xff] }
 0x40e   : > { %8596 = vmatprep.mubr.bf16.mxu1 %v17953_v47 }
 0x410   : > { %8431 = vmatpush3.bf16.msra.mxu0 %v9873_v21  ;;  %v17978_v21 = vld [vmem:[#allocation304_spill] sm:$0xff] }
 0x411   : > { %8432 = vmatprep.subr.bf16.mxu0 %v9874_v56  ;;  %v4800_v47 = vpack.c.bf16 %v17979_v49, %v17978_v21  ;;  %v18008_v49 = vld [vmem:[#allocation312_spill] sm:$0xff] }
 0x414   : > { %8433 = vmatpush3.bf16.msra.mxu0 %v9874_v56  ;;  %v17980_v56 = vld [vmem:[#allocation310_spill] sm:$0xff] }
 0x415   : > { %8434 = vmatprep.subr.bf16.mxu0 %v9875_v10  ;;  %8597 = vmatmul.mubr.bf16.gmra.mrb[88].mxu1 %v17956_v20  ;;  %v4881_v6 = vpack.c.bf16 %v17901_v51, %v17980_v56  ;;  %v17983_v20 = vld [vmem:[#allocation219_spill] sm:$0xff] }
 0x416   : > { %8600 = vmatprep.mubr.bf16.mxu1 %v4874_v22  ;;  %v17982_v22 = vld [vmem:[#allocation95_spill] sm:$0xff] }
 0x418   : > { %8435 = vmatpush3.bf16.msra.mxu0 %v9875_v10  ;;  %v4882_v10 = vpack.c.bf16 %v17982_v22, %v17981_v11  ;;  %v18011_v22 = vld [vmem:[#allocation58_spill] sm:$0xff] }
 0x419   : > { %8436 = vmatprep.subr.bf16.mxu0 %v9876_v34 }
 0x41c   : > { %8437 = vmatpush3.bf16.msra.mxu0 %v9876_v34  ;;  %v4801_v34 = vpack.c.bf16 %v17983_v20, %v17923_v19  ;;  %v17994_v19 = vld [vmem:[#allocation221_spill] sm:$0xff] }
 0x41d   : > { %8438 = vmatprep.subr.bf16.mxu0 %v9877_v30  ;;  %8601 = vmatmul.mubr.bf16.gmra.mrb[92].mxu1 %v4875_v26  ;;  %v4802_v26 = vpack.c.bf16 %v17985_v1, %v17984_v25  ;;  %v18013_v25 = vld [vmem:[#allocation59_spill] sm:$0xff]  ;;  %v18014_v1 = vld [vmem:[#allocation65_spill] sm:$0xff] }
 0x41e   : > { %8604 = vmatprep.mubr.bf16.mxu1 %v4876_v5  ;;  %v4883_v5 = vpack.c.bf16 %v17987_v2, %v17986_v35  ;;  %v18015_v35 = vld [vmem:[#allocation82_spill] sm:$0xff] }
 0x420   : > { %8439 = vmatpush3.bf16.msra.mxu0 %v9877_v30  ;;  %v17988_v30 = vld [vmem:[#allocation176_spill] sm:$0xff] }
 0x421   : > { %v4884_v51 = vpack.c.bf16 %v17989_v18, %v17988_v30  ;;  %v18017_v30 = vld [vmem:[#allocation89_spill] sm:$0xff]  ;;  %v18018_v18 = vld [vmem:[#allocation86_spill] sm:$0xff] }
 0x423   : > { %8441 = vmatmul.mubr.bf16.vlgmr.msra.gmra.mrb[4].mxu0 %v4795_v24  ;;  %v17990_v24 = vld [vmem:[#allocation93_spill] sm:$0xff] }
 0x424   : > { %8444 = vmatprep.mubr.bf16.mxu0 %v4796_v62  ;;  %v4803_v14 = vpack.c.bf16 %v17991_v16, %v17990_v24  ;;  %v17992_v62 = vld [vmem:[#allocation139_spill] sm:$0xff] }
 0x425   : > { %8605 = vmatmul.mubr.bf16.gmra.mrb[96].mxu1 %v4877_v52  ;;  %v4804_v7 = vpack.c.bf16 %v17993_v61, %v17992_v62  ;;  %v17995_v52 = vld [vmem:[#allocation227_spill] sm:$0xff] }
 0x426   : > { %8608 = vmatprep.mubr.bf16.mxu1 %v4878_v44  ;;  %v4885_v32 = vpack.c.bf16 %v17995_v52, %v17994_v19  ;;  %v17997_v44 = vld [vmem:[#allocation57_spill] sm:$0xff]  ;;  %v18019_v24 = vld [vmem:[#allocation127_spill] sm:$0xff] }
 0x427   : > { %v4886_v53 = vpack.c.bf16 %v17997_v44, %v17996_v17  ;;  %v18020_v16 = vld [vmem:[#allocation163_spill] sm:$0xff]  ;;  %v18023_v19 = vld [vmem:[#allocation145_spill] sm:$0xff] }
 0x428   : > { %v18021_v62 = vld [vmem:[#allocation147_spill] sm:$0xff] }
 0x42b   : > { %8445 = vmatmul.mubr.bf16.gmra.mrb[8].mxu0 %v4797_v13  ;;  %v17999_v13 = vld [vmem:[#allocation216_spill] sm:$0xff] }
 0x42c   : > { %8448 = vmatprep.mubr.bf16.mxu0 %v4798_v33  ;;  %v4805_v59 = vpack.c.bf16 %v17999_v13, %v17998_v55  ;;  %v18001_v33 = vld [vmem:[#allocation239_spill] sm:$0xff] }
 0x42d   : > { %8609 = vmatmul.mubr.bf16.gmra.mrb[100].mxu1 %v4879_v50  ;;  %v4806_v41 = vpack.c.bf16 %v18001_v33, %v18000_v27  ;;  %v18003_v50 = vld [vmem:[#allocation258_spill] sm:$0xff] }
 0x42e   : > { %8612 = vmatprep.mubr.bf16.mxu1 %v4880_v40  ;;  %v4887_v31 = vpack.c.bf16 %v18003_v50, %v18002_v60  ;;  %v18005_v40 = vld [vmem:[#allocation248_spill] sm:$0xff] }
 0x42f   : > { %v4888_v43 = vpack.c.bf16 %v18005_v40, %v18004_v28  ;;  %v18029_v28 = vld [vmem:[#allocation133_spill] sm:$0xff] }
 0x433   : > { %8449 = vmatmul.mubr.bf16.gmra.mrb[12].mxu0 %v4799_v9  ;;  %v18007_v9 = vld [vmem:[#allocation174_spill] sm:$0xff] }
 0x434   : > { %8452 = vmatprep.mubr.bf16.mxu0 %v4800_v47  ;;  %v4807_v21 = vpack.c.bf16 %v18007_v9, %v18006_v29  ;;  %v18009_v47 = vld [vmem:[#allocation323_spill] sm:$0xff]  ;;  %v18030_v29 = vld [vmem:[#allocation157_spill] sm:$0xff]  ;;  %v18031_v9 = vld [vmem:[#allocation182_spill] sm:$0xff] }
 0x435   : > { %8613 = vmatmul.mubr.bf16.gmra.mrb[104].mxu1 %v4881_v6  ;;  %v4808_v56 = vpack.c.bf16 %v18009_v47, %v18008_v49  ;;  %v18010_v6 = vld [vmem:[#allocation270_spill] sm:$0xff] }
 0x436   : > { %8616 = vmatprep.mubr.bf16.mxu1 %v4882_v10  ;;  %v4889_v11 = vpack.c.bf16 %v17903_v36, %v18010_v6  ;;  %v18012_v10 = vld [vmem:[#allocation56_spill] sm:$0xff]  ;;  %v18032_v47 = vld [vmem:[#allocation154_spill] sm:$0xff] }
 0x437   : > { %v4890_v20 = vpack.c.bf16 %v18012_v10, %v18011_v22  ;;  %v18033_v6 = vld [vmem:[#allocation186_spill] sm:$0xff] }
 0x43b   : > { %8453 = vmatmul.mubr.bf16.gmra.mrb[16].mxu0 %v4801_v34  ;;  %v14138_v34 = vld [vmem:[%s16778_s17] ss:$0 sm:$0xff] }
 0x43c   : > { %8456 = vmatprep.mubr.bf16.mxu0 %v4802_v26  ;;  %v4809_v26 = vpack.c.bf16 %v18014_v1, %v18013_v25  ;;  %v5308_v2 = vadd.f32 %v18015_v35, %v14138_v34  ;;  %v5311_v61 = vadd.f32 %v18021_v62, %v14138_v34  ;;  %v18036_v1 = vld [vmem:[#allocation259_spill] sm:$0xff] }
 0x43d   : > { %8617 = vmatmul.mubr.bf16.gmra.mrb[108].mxu1 %v4883_v5  ;;  %v18016_v5 = vld [vmem:[#allocation90_spill] sm:$0xff] }
 0x43e   : > { %8620 = vmatprep.mubr.bf16.mxu1 %v4884_v51  ;;  %v4810_v36 = vpack.c.bf16 %v18017_v30, %v18016_v5  ;;  %v5300_v51 = vadd.f32 %v14138_v34, %v18018_v18  ;;  %v6376_v44 = vmul.f32 0.70710677, %v5308_v2  ;;  %v6377_v33 = vmul.f32 0.70710677, %v5311_v61  ;;  %v18038_v5 = vld [vmem:[#allocation104_spill] sm:$0xff] }
 0x43f   : > { %v14180_v30 = vadd.f32 %v14138_v34, %v18038_v5  ;;  %v6121_v5 = vmul.f32 0.5, %v5311_v61 }
 0x440   : > { %v6374_v13 = vmul.f32 0.70710677, %v5300_v51  ;;  %9330 = verf.f32 %v6376_v44 }
 0x442   : > { %9332 = verf.f32 %v6374_v13 }
 0x443   : > { %8457 = vmatmul.mubr.bf16.gmra.mrb[20].mxu0 %v4803_v14  ;;  %v4891_v14 = vpack.c.bf16 %v18020_v16, %v18019_v24  ;;  %9334 = verf.f32 %v6377_v33  ;;  %v18040_v16 = vld [vmem:[#allocation160_spill] sm:$0xff]  ;;  %v18045_v33 = vld [vmem:[#allocation257_spill] sm:$0xff] }
 0x444   : > { %8460 = vmatprep.mubr.bf16.mxu0 %v4804_v7  ;;  %v18022_v7 = vld [vmem:[#allocation69_spill] sm:$0xff] }
 0x445   : > { %8621 = vmatmul.mubr.bf16.gmra.mrb[112].mxu1 %v4885_v32  ;;  %v4892_v52 = vpack.c.bf16 %v18023_v19, %v18022_v7  ;;  %v18024_v32 = vld [vmem:[#allocation150_spill] sm:$0xff]  ;;  %v6382_v7 = vmul.f32 0.70710677, %v14180_v30  ;;  %v18041_v19 = vld [vmem:[#allocation209_spill] sm:$0xff] }
 0x446   : > { %8624 = vmatprep.mubr.bf16.mxu1 %v4886_v53  ;;  %v5303_v17 = vadd.f32 %v14138_v34, %v18024_v32  ;;  %v18025_v53 = vld [vmem:[#allocation99_spill] sm:$0xff] }
 0x447   : > { %v5324_v55 = vadd.f32 %v18025_v53, %v14138_v34  ;;  %v18043_v53 = vld [vmem:[#allocation165_spill] sm:$0xff] }
 0x448   : > { %v6375_v50 = vmul.f32 0.70710677, %v5303_v17  ;;  %v14198_v13 = vadd.f32 %v18043_v53, %v14138_v34 }
 0x44a   : > { %9336 = verf.f32 %v6375_v50 }
 0x44b   : > { %8461 = vmatmul.mubr.bf16.gmra.mrb[24].mxu0 %v4805_v59  ;;  %v18026_v59 = vld [vmem:[#allocation100_spill] sm:$0xff] }
 0x44c   : > { %8464 = vmatprep.mubr.bf16.mxu0 %v4806_v41  ;;  %v5316_v27 = vadd.f32 %v14138_v34, %v18026_v59  ;;  %v18027_v41 = vld [vmem:[#allocation153_spill] sm:$0xff]  ;;  %v18044_v59 = vld [vmem:[#allocation44_spill] sm:$0xff] }
 0x44d   : > { %8625 = vmatmul.mubr.bf16.gmra.mrb[116].mxu1 %v4887_v31  ;;  %v5327_v60 = vadd.f32 %v18027_v41, %v14138_v34  ;;  %v18028_v31 = vld [vmem:[#allocation109_spill] sm:$0xff]  ;;  %v4814_v41 = vpack.c.bf16 %v18045_v33, %v18044_v59 }
 0x44e   : > { %8628 = vmatprep.mubr.bf16.mxu1 %v4888_v43  ;;  %v4811_v40 = vpack.c.bf16 %v18029_v28, %v18028_v31  ;;  %v6380_v43 = vmul.f32 0.70710677, %v5324_v55  ;;  %v6378_v49 = vmul.f32 0.70710677, %v5316_v27  ;;  %v18046_v31 = vld [vmem:[#allocation114_spill] sm:$0xff] }
 0x44f   : > { %v6381_v10 = vmul.f32 0.70710677, %v5327_v60  ;;  %v14205_v28 = vadd.f32 %v14138_v34, %v18046_v31  ;;  %v18055_v31 = vld [vmem:[#allocation302_spill] sm:$0xff] }
 0x450   : > { %9338 = verf.f32 %v6380_v43  ;;  %v18048_v43 = vld [vmem:[#allocation271_spill] sm:$0xff] }
 0x451   : > { %9340 = verf.f32 %v6378_v49 }
 0x452   : > { %9342 = verf.f32 %v6381_v10  ;;  %v6120_v10 = vmul.f32 0.5, %v5308_v2  ;;  %v6386_v2 = vmul.f32 0.70710677, %v14205_v28 }
 0x453   : > { %8465 = vmatmul.mubr.bf16.gmra.mrb[28].mxu0 %v4807_v21  ;;  %v4812_v21 = vpack.c.bf16 %v18031_v9, %v18030_v29  ;;  %v9331_v9 = vpop.eup %9330 }
 0x454   : > { %8468 = vmatprep.mubr.bf16.mxu0 %v4808_v56  ;;  %v14168_v56 = vadd.f32 %v14138_v34, %v18032_v47  ;;  %v18050_v47 = vld [vmem:[#allocation284_spill] sm:$0xff] }
 0x455   : > { %8629 = vmatmul.mubr.bf16.gmra.mrb[120].mxu1 %v4889_v11  ;;  %v18034_v11 = vld [vmem:[#allocation231_spill] sm:$0xff] }
 0x456   : > { %8632 = vmatprep.mubr.bf16.mxu1 %v4890_v20  ;;  %v4893_v22 = vpack.c.bf16 %v18034_v11, %v18033_v6  ;;  %v18035_v20 = vld [vmem:[#allocation85_spill] sm:$0xff]  ;;  %v6379_v24 = vmul.f32 0.70710677, %v14168_v56 }
 0x457   : > { %v14174_v25 = vadd.f32 %v18035_v20, %v14138_v34  ;;  %v18051_v6 = vld [vmem:[#allocation309_spill] sm:$0xff]  ;;  %v6118_v20 = vmul.f32 0.5, %v5300_v51 }
 0x458   : > { %9344 = verf.f32 %v6379_v24  ;;  %v4896_v11 = vpack.c.bf16 %v18051_v6, %v18050_v47  ;;  %v6388_v24 = vmul.f32 0.70710677, %v14198_v13  ;;  %v18060_v47 = vld [vmem:[#allocation187_spill] sm:$0xff] }
 0x459   : > { %v6384_v62 = vmul.f32 0.70710677, %v14174_v25  ;;  %v14239_v6 = vadd.f32 %v18060_v47, %v14138_v34  ;;  %v18071_v47 = vld [vmem:[#allocation41_spill] sm:$0xff] }
 0x45b   : > { %8469 = vmatmul.mubr.bf16.gmra.mrb[32].mxu0 %v4809_v26  ;;  %v18037_v26 = vld [vmem:[#allocation287_spill] sm:$0xff]  ;;  %9346 = verf.f32 %v6384_v62  ;;  %v6888_v62 = vadd.f32 1.0, %v9331_v9  ;;  %v6137_v46 = vmul.f32 0.5, %v14239_v6 }
 0x45c   : > { %8472 = vmatprep.mubr.bf16.mxu0 %v4810_v36  ;;  %v4894_v35 = vpack.c.bf16 %v18037_v26, %v18036_v1  ;;  %v18039_v36 = vld [vmem:[#allocation158_spill] sm:$0xff]  ;;  %9348 = verf.f32 %v6382_v7 }
 0x45d   : > { %8633 = vmatmul.mubr.bf16.gmra.mrb[124].mxu1 %v4891_v14  ;;  %v14184_v18 = vadd.f32 %v18039_v36, %v14138_v34  ;;  %v14189_v14 = vadd.f32 %v14138_v34, %v18040_v16  ;;  %v18052_v1 = vld [vmem:[#allocation170_spill] sm:$0xff]  ;;  %v6119_v36 = vmul.f32 0.5, %v5303_v17  ;;  %v18053_v17 = vld [vmem:[#allocation183_spill] sm:$0xff] }
 0x45e   : > { %8636 = vmatprep.mubr.bf16.mxu1 %v4892_v52  ;;  %v18042_v52 = vld [vmem:[#allocation193_spill] sm:$0xff]  ;;  %v14217_v26 = vadd.f32 %v14138_v34, %v18052_v1 }
 0x45f   : > { %v4813_v32 = vpack.c.bf16 %v18042_v52, %v18041_v19  ;;  %v6385_v44 = vmul.f32 0.70710677, %v14184_v18  ;;  %v6383_v50 = vmul.f32 0.70710677, %v14189_v14  ;;  %v6124_v19 = vmul.f32 0.5, %v5324_v55 }
 0x460   : > { %v6122_v52 = vmul.f32 0.5, %v5316_v27  ;;  %v6387_v61 = vmul.f32 0.70710677, %v14217_v26 }
 0x461   : > { %9350 = verf.f32 %v6385_v44  ;;  %v14225_v44 = vadd.f32 %v18053_v17, %v14138_v34 }
 0x462   : > { %9352 = verf.f32 %v6383_v50 }
 0x463   : > { %8473 = vmatmul.mubr.bf16.gmra.mrb[36].mxu0 %v4811_v40  ;;  %v18047_v40 = vld [vmem:[#allocation210_spill] sm:$0xff]  ;;  %9354 = verf.f32 %v6388_v24  ;;  %v18062_v24 = vld [vmem:[#allocation124_spill] sm:$0xff] }
 0x464   : > { %8476 = vmatprep.mubr.bf16.mxu0 %v4812_v21  ;;  %v4895_v29 = vpack.c.bf16 %v18048_v43, %v18047_v40  ;;  %v18049_v21 = vld [vmem:[#allocation168_spill] sm:$0xff]  ;;  %v18056_v43 = vld [vmem:[#allocation185_spill] sm:$0xff]  ;;  %9356 = verf.f32 %v6386_v2 }
 0x465   : > { %8637 = vmatmul.mubr.bf16.gmra.mrb[128].mxu1 %v4893_v22  ;;  %v14211_v49 = vadd.f32 %v18049_v21, %v14138_v34  ;;  %v9333_v22 = vpop.eup %9332  ;;  %v14231_v27 = vadd.f32 %v14138_v34, %v18056_v43  ;;  %v14235_v21 = vmul.f32 %v6888_v62, %v6120_v10  ;;  %v6392_v62 = vmul.f32 0.70710677, %v14225_v44 }
 0x466   : > { %8640 = vmatprep.mubr.bf16.mxu1 %v4894_v35  ;;  %v9335_v35 = vpop.eup %9334  ;;  %v6886_v7 = vadd.f32 1.0, %v9333_v22 }
 0x467   : > { %v9337_v16 = vpop.eup %9336  ;;  %v6389_v53 = vmul.f32 0.70710677, %v14211_v49  ;;  %v6889_v33 = vadd.f32 1.0, %v9335_v35  ;;  %18059 = vst [vmem:[#allocation43_spill] sm:$0xff] %v14235_v21 }
 0x468   : > { %v9339_v51 = vpop.eup %9338  ;;  %v6887_v40 = vadd.f32 1.0, %v9337_v16  ;;  %v18063_v16 = vld [vmem:[#allocation119_spill] sm:$0xff] }
 0x469   : > { %v9341_v59 = vpop.eup %9340  ;;  %v6892_v1 = vadd.f32 1.0, %v9339_v51  ;;  %9358 = verf.f32 %v6389_v53  ;;  %v4898_v17 = vpack.c.bf16 %v18063_v16, %v18062_v24  ;;  %v6390_v51 = vmul.f32 0.70710677, %v14231_v27 }
 0x46a   : > { %v9343_v50 = vpop.eup %9342  ;;  %v6890_v35 = vadd.f32 1.0, %v9341_v59  ;;  %9360 = verf.f32 %v6387_v61  ;;  %v14250_v43 = vmul.f32 %v6887_v40, %v6119_v36  ;;  %v6128_v59 = vmul.f32 0.5, %v14174_v25  ;;  %v18067_v61 = vld [vmem:[#allocation189_spill] sm:$0xff] }
 0x46b   : > { %8477 = vmatmul.mubr.bf16.gmra.mrb[40].mxu0 %v4813_v32  ;;  %v6125_v32 = vmul.f32 0.5, %v5327_v60  ;;  %v18057_v60 = vld [vmem:[#allocation318_spill] sm:$0xff]  ;;  %v6893_v10 = vadd.f32 1.0, %v9343_v50  ;;  %v14259_v50 = vadd.f32 %v14138_v34, %v18067_v61  ;;  %v6129_v40 = vmul.f32 0.5, %v14184_v18  ;;  %v18078_v61 = vld [vmem:[#allocation204_spill] sm:$0xff] }
 0x46c   : > { %8480 = vmatprep.mubr.bf16.mxu0 %v4814_v41  ;;  %v18054_v41 = vld [vmem:[#allocation291_spill] sm:$0xff]  ;;  %18066 = vst [vmem:[#allocation45_spill] sm:$0xff] %v14250_v43  ;;  %9362 = verf.f32 %v6392_v62 }
 0x46d   : > { %8641 = vmatmul.mubr.bf16.gmra.mrb[132].mxu1 %v4895_v29  ;;  %v4815_v55 = vpack.c.bf16 %v18055_v31, %v18054_v41  ;;  %v18058_v29 = vld [vmem:[#allocation256_spill] sm:$0xff]  ;;  %v9345_v41 = vpop.eup %9344  ;;  %v14245_v31 = vmul.f32 %v6886_v7, %v6118_v20  ;;  %v6126_v20 = vmul.f32 0.5, %v14180_v30  ;;  %v6393_v7 = vmul.f32 0.70710677, %v14239_v6 }
 0x46e   : > { %8644 = vmatprep.mubr.bf16.mxu1 %v4896_v11  ;;  %v4816_v9 = vpack.c.bf16 %v18058_v29, %v18057_v60  ;;  %v18061_v11 = vld [vmem:[#allocation88_spill] sm:$0xff]  ;;  %v9347_v2 = vpop.eup %9346  ;;  %v6127_v60 = vmul.f32 0.5, %v14189_v14  ;;  %v14271_v29 = vmul.f32 %v6893_v10, %v6125_v32  ;;  %9364 = verf.f32 %v6390_v51  ;;  %v18074_v32 = vld [vmem:[#allocation217_spill] sm:$0xff]  ;;  %v18077_v51 = vld [vmem:[#allocation250_spill] sm:$0xff] }
 0x46f   : > { %v4897_v22 = vpack.c.bf16 %v17908_v63, %v18061_v11  ;;  %18064 = vst [vmem:[#allocation232_spill] sm:$0xff] %v14245_v31  ;;  %v6123_v63 = vmul.f32 0.5, %v14168_v56  ;;  %v9349_v53 = vpop.eup %9348  ;;  %v14265_v56 = vmul.f32 %v6890_v35, %v6122_v52  ;;  %v4817_v11 = vpack.c.bf16 %v17900_v3, %v18071_v47  ;;  %v18072_v52 = vld [vmem:[#allocation101_spill] sm:$0xff]  ;;  %v18076_v3 = vld [vmem:[#allocation178_spill] sm:$0xff] }
 0x470   : > { %v9351_v36 = vpop.eup %9350  ;;  %18070 = vst [vmem:[#allocation111_spill] sm:$0xff] %v14271_v29  ;;  %v18073_v35 = vld [vmem:[#allocation97_spill] sm:$0xff]  ;;  %9366 = verf.f32 %v6393_v7  ;;  %v6391_v14 = vmul.f32 0.70710677, %v14259_v50  ;;  %v14284_v16 = vadd.f32 %v18074_v32, %v14138_v34  ;;  %v6132_v32 = vmul.f32 0.5, %v14198_v13 }
 0x471   : > { %18069 = vst [vmem:[#allocation148_spill] sm:$0xff] %v14265_v56  ;;  %v9353_v30 = vpop.eup %9352  ;;  %v4818_v18 = vpack.c.bf16 %v18073_v35, %v18072_v52  ;;  %v6897_v62 = vadd.f32 1.0, %v9351_v36  ;;  %v18079_v7 = vld [vmem:[#allocation125_spill] sm:$0xff] }
 0x472   : > { %v9355_v10 = vpop.eup %9354  ;;  %v4900_v47 = vpack.c.bf16 %v18079_v7, %v18078_v61  ;;  %v18084_v61 = vld [vmem:[#allocation252_spill] sm:$0xff]  ;;  %9368 = verf.f32 %v6391_v14  ;;  %v6396_v7 = vmul.f32 0.70710677, %v14284_v16 }
 0x473   : > { %8481 = vmatmul.mubr.bf16.gmra.mrb[44].mxu0 %v4815_v55  ;;  %v14248_v55 = vmul.f32 %v6889_v33, %v6121_v5  ;;  %v14263_v33 = vmul.f32 %v6892_v1, %v6124_v19  ;;  %v6896_v19 = vadd.f32 1.0, %v9347_v2  ;;  %v6894_v1 = vadd.f32 1.0, %v9349_v53  ;;  %v9357_v52 = vpop.eup %9356 }
 0x474   : > { %8484 = vmatprep.mubr.bf16.mxu0 %v4816_v9  ;;  %v6891_v9 = vadd.f32 1.0, %v9345_v41  ;;  %v6895_v2 = vadd.f32 1.0, %v9353_v30  ;;  %v14290_v53 = vadd.f32 %v14138_v34, %v18077_v51  ;;  %v9359_v36 = vpop.eup %9358  ;;  %9370 = verf.f32 %v6396_v7 }
 0x475   : > { %8645 = vmatmul.mubr.bf16.gmra.mrb[136].mxu1 %v4897_v22  ;;  %18065 = vst [vmem:[#allocation28_spill] sm:$0xff] %v14248_v55  ;;  %v14261_v5 = vpop.f32.mrb[40].mxu1  ;;  %18068 = vst [vmem:[#allocation234_spill] sm:$0xff] %v14263_v33  ;;  %v14302_v30 = vmul.f32 %v6896_v19, %v6128_v59  ;;  %v14304_v51 = vmul.f32 %v6894_v1, %v6126_v20  ;;  %v9361_v13 = vpop.eup %9360  ;;  %v6898_v20 = vadd.f32 1.0, %v9357_v52  ;;  %v18112_v33 = vld [vmem:[#allocation156_spill] sm:$0xff] }
 0x476   : > { %8648 = vmatprep.mubr.bf16.mxu1 %v4898_v17  ;;  %v14269_v25 = vpop.f32.mrb[41].mxu1  ;;  %v18075_v17 = vld [vmem:[#allocation151_spill] sm:$0xff]  ;;  %v14294_v35 = vmul.f32 %v6891_v9, %v6123_v63  ;;  %v14309_v63 = vadd.f32 %v14138_v34, %v18084_v61  ;;  %v6900_v9 = vadd.f32 1.0, %v9355_v10  ;;  %v14315_v59 = vmul.f32 %v6895_v2, %v6127_v60  ;;  %v18089_v61 = vld [vmem:[#allocation141_spill] sm:$0xff]  ;;  %v18092_v2 = vld [vmem:[#allocation196_spill] sm:$0xff] }
 0x477   : > { %v14275_v22 = vpop.f32.mrb[42].mxu1  ;;  %v4899_v41 = vpack.c.bf16 %v18076_v3, %v18075_v17  ;;  %v18081_v17 = vld [vmem:[#allocation25_spill] sm:$0xff]  ;;  %18082 = vst [vmem:[#allocation60_spill] sm:$0xff] %v14302_v30  ;;  %18083 = vst [vmem:[#allocation55_spill] sm:$0xff] %v14304_v51  ;;  %v6394_v19 = vmul.f32 0.70710677, %v14290_v53 }
 0x478   : > { %v14279_v24 = vpop.f32.mrb[43].mxu1  ;;  %18080 = vst [vmem:[#allocation48_spill] sm:$0xff] %v14294_v35  ;;  %v14300_v3 = vadd.f32 %v18081_v17, %v14138_v34  ;;  %18086 = vst [vmem:[#allocation31_spill] sm:$0xff] %v14315_v59  ;;  %v18087_v17 = vld [vmem:[#allocation121_spill] sm:$0xff]  ;;  %v18088_v10 = vld [vmem:[#allocation67_spill] sm:$0xff]  ;;  %v6899_v14 = vadd.f32 1.0, %v9361_v13  ;;  %v14332_v59 = vmul.f32 %v6900_v9, %v6132_v32 }
 0x479   : > { %v6395_v51 = vmul.f32 0.70710677, %v14309_v63  ;;  %v18096_v13 = vld [vmem:[#allocation253_spill] sm:$0xff]  ;;  %9372 = verf.f32 %v6394_v19  ;;  %v18099_v32 = vld [vmem:[#allocation282_spill] sm:$0xff] }
 0x47a   : > { %v6397_v1 = vmul.f32 0.70710677, %v14300_v3  ;;  %18093 = vst [vmem:[#allocation81_spill] sm:$0xff] %v14332_v59  ;;  %v18100_v9 = vld [vmem:[#allocation245_spill] sm:$0xff] }
 0x47b   : > { %8485 = vmatmul.mubr.bf16.gmra.mrb[48].mxu0 %v4817_v11  ;;  %v6130_v11 = vmul.f32 0.5, %v14205_v28  ;;  %v6131_v28 = vmul.f32 0.5, %v14217_v26  ;;  %v4819_v26 = vpack.c.bf16 %v18089_v61, %v18088_v10  ;;  %v18095_v10 = vld [vmem:[#allocation230_spill] sm:$0xff]  ;;  %v4902_v7 = vpack.c.bf16 %v18100_v9, %v18099_v32  ;;  %v18104_v19 = vld [vmem:[#allocation233_spill] sm:$0xff] }
 0x47c   : > { %8488 = vmatprep.mubr.bf16.mxu0 %v4818_v18  ;;  %v6133_v18 = vmul.f32 0.5, %v14211_v49  ;;  %v6901_v49 = vadd.f32 1.0, %v9359_v36  ;;  %v9363_v36 = vpop.eup %9362  ;;  %v4901_v61 = vpack.c.bf16 %v18096_v13, %v18095_v10  ;;  %9374 = verf.f32 %v6397_v1  ;;  %v18105_v13 = vld [vmem:[#allocation311_spill] sm:$0xff] }
 0x47d   : > { %8649 = vmatmul.mubr.bf16.gmra.mrb[140].mxu1 %v4899_v41  ;;  %v14313_v41 = vmul.f32 %v6897_v62, %v6129_v40  ;;  %v18090_v40 = vld [vmem:[#allocation122_spill] sm:$0xff]  ;;  %v9365_v30 = vpop.eup %9364  ;;  %v14340_v35 = vmul.f32 %v6898_v20, %v6130_v11  ;;  %v14355_v11 = vmul.f32 %v6899_v14, %v6131_v28  ;;  %9376 = verf.f32 %v6395_v51 }
 0x47e   : > { %8652 = vmatprep.mubr.bf16.mxu1 %v4900_v47  ;;  %v14321_v47 = vadd.f32 %v18087_v17, %v14138_v34  ;;  %v14328_v60 = vadd.f32 %v14138_v34, %v18090_v40  ;;  %v18091_v62 = vld [vmem:[#allocation62_spill] sm:$0xff]  ;;  %v18098_v40 = vld [vmem:[#allocation264_spill] sm:$0xff]  ;;  %v6904_v51 = vadd.f32 1.0, %v9363_v36  ;;  %v6902_v14 = vadd.f32 1.0, %v9365_v30 }
 0x47f   : > { %18085 = vst [vmem:[#allocation279_spill] sm:$0xff] %v14313_v41  ;;  %v4820_v52 = vpack.c.bf16 %v18092_v2, %v18091_v62  ;;  %v18094_v17 = vld [vmem:[#allocation134_spill] sm:$0xff]  ;;  %18097 = vst [vmem:[#allocation306_spill] sm:$0xff] %v14340_v35  ;;  %v14344_v29 = vadd.f32 %v14138_v34, %v18098_v40  ;;  %v9367_v62 = vpop.eup %9366  ;;  %v14348_v2 = vmul.f32 %v6901_v49, %v6133_v18  ;;  %v6136_v18 = vmul.f32 0.5, %v14225_v44  ;;  %v18109_v36 = vld [vmem:[#allocation40_spill] sm:$0xff] }
 0x480   : > { %v14336_v41 = vadd.f32 %v18094_v17, %v14138_v34  ;;  %v18102_v17 = vld [vmem:[#allocation34_spill] sm:$0xff]  ;;  %18103 = vst [vmem:[#allocation33_spill] sm:$0xff] %v14355_v11  ;;  %v6398_v20 = vmul.f32 0.70710677, %v14328_v60  ;;  %v6134_v49 = vmul.f32 0.5, %v14231_v27  ;;  %v14367_v40 = vadd.f32 %v18105_v13, %v14138_v34  ;;  %v18108_v13 = vld [vmem:[#allocation197_spill] sm:$0xff] }
 0x481   : > { %18101 = vst [vmem:[#allocation316_spill] sm:$0xff] %v14348_v2  ;;  %v14353_v10 = vadd.f32 %v18102_v17, %v14138_v34  ;;  %v6399_v32 = vmul.f32 0.70710677, %v14344_v29  ;;  %v18106_v27 = vld [vmem:[#allocation146_spill] sm:$0xff] }
 0x482   : > { %v6401_v1 = vmul.f32 0.70710677, %v14336_v41  ;;  %v14377_v17 = vadd.f32 %v14138_v34, %v18106_v27  ;;  %v18110_v11 = vld [vmem:[#allocation238_spill] sm:$0xff]  ;;  %v6405_v27 = vmul.f32 0.70710677, %v14367_v40 }
 0x483   : > { %8489 = vmatmul.mubr.bf16.gmra.mrb[52].mxu0 %v4819_v26  ;;  %v6400_v26 = vmul.f32 0.70710677, %v14321_v47  ;;  %v6404_v44 = vmul.f32 0.70710677, %v14353_v10 }
 0x484   : > { %8492 = vmatprep.mubr.bf16.mxu0 %v4820_v52  ;;  %v14360_v52 = vadd.f32 %v14138_v34, %v18104_v19  ;;  %v18107_v19 = vld [vmem:[#allocation52_spill] sm:$0xff] }
 0x485   : > { %8653 = vmatmul.mubr.bf16.gmra.mrb[144].mxu1 %v4901_v61  ;;  %v6905_v61 = vadd.f32 1.0, %v9367_v62  ;;  %9378 = verf.f32 %v6400_v26  ;;  %v4821_v2 = vpack.c.bf16 %v18108_v13, %v18107_v19  ;;  %v14386_v62 = vadd.f32 %v18109_v36, %v14138_v34  ;;  %v18111_v26 = vld [vmem:[#allocation267_spill] sm:$0xff]  ;;  %v18114_v13 = vld [vmem:[#allocation76_spill] sm:$0xff] }
 0x486   : > { %8656 = vmatprep.mubr.bf16.mxu1 %v4902_v7  ;;  %v14369_v28 = vpop.f32.mrb[44].mxu1  ;;  %v9369_v7 = vpop.eup %9368  ;;  %9380 = verf.f32 %v6398_v20  ;;  %v6402_v30 = vmul.f32 0.70710677, %v14360_v52  ;;  %v4822_v35 = vpack.c.bf16 %v18111_v26, %v18110_v11  ;;  %v14395_v19 = vadd.f32 %v14138_v34, %v18112_v33  ;;  %v18113_v20 = vld [vmem:[#allocation263_spill] sm:$0xff]  ;;  %v18115_v36 = vld [vmem:[#allocation172_spill] sm:$0xff]  ;;  %v18116_v11 = vld [vmem:[#allocation305_spill] sm:$0xff] }
 0x487   : > { %v14372_v9 = vpop.f32.mrb[45].mxu1  ;;  %9382 = verf.f32 %v6401_v1  ;;  %v4903_v43 = vpack.c.bf16 %v18114_v13, %v18113_v20  ;;  %v6903_v55 = vadd.f32 1.0, %v9369_v7  ;;  %v14401_v31 = vadd.f32 %v18115_v36, %v14138_v34  ;;  %v18117_v26 = vld [vmem:[#allocation321_spill] sm:$0xff]  ;;  %v9371_v21 = vpop.eup %9370 }
 0x488   : > { %v14381_v59 = vpop.f32.mrb[46].mxu1  ;;  %9384 = verf.f32 %v6399_v32  ;;  %v4904_v1 = vpack.c.bf16 %v18117_v26, %v18116_v11  ;;  %v6403_v33 = vmul.f32 0.70710677, %v14377_v17  ;;  %v9373_v32 = vpop.eup %9372  ;;  %v14411_v7 = vmul.f32 %v6904_v51, %v6136_v18 }
 0x489   : > { %v14390_v56 = vpop.f32.mrb[47].mxu1  ;;  %9386 = verf.f32 %v6404_v44  ;;  %v6135_v20 = vmul.f32 0.5, %v14259_v50  ;;  %v9375_v13 = vpop.eup %9374  ;;  %v14415_v36 = vmul.f32 %v6902_v14, %v6134_v49  ;;  %v14417_v6 = vmul.f32 %v6905_v61, %v6137_v46  ;;  %v18123_v14 = vld [vmem:[#allocation247_spill] sm:$0xff] }
 0x48a   : > { %18119 = vst [vmem:[#allocation162_spill] sm:$0xff] %v14411_v7  ;;  %9388 = verf.f32 %v6402_v30  ;;  %v6406_v44 = vmul.f32 0.70710677, %v14395_v19  ;;  %v6140_v18 = vmul.f32 0.5, %v14284_v16  ;;  %v6138_v50 = vmul.f32 0.5, %v14290_v53  ;;  %v18124_v61 = vld [vmem:[#allocation307_spill] sm:$0xff] }
 0x48b   : > { %8493 = vmatmul.mubr.bf16.gmra.mrb[56].mxu0 %v4821_v2  ;;  %v18118_v2 = vld [vmem:[#allocation180_spill] sm:$0xff]  ;;  %18120 = vst [vmem:[#allocation198_spill] sm:$0xff] %v14415_v36  ;;  %18121 = vst [vmem:[#allocation190_spill] sm:$0xff] %v14417_v6  ;;  %9390 = verf.f32 %v6405_v27  ;;  %v14422_v26 = vmul.f32 %v6903_v55, %v6135_v20  ;;  %v6409_v51 = vmul.f32 0.70710677, %v14401_v31  ;;  %v6908_v49 = vadd.f32 1.0, %v9371_v21 }
 0x48c   : > { %8496 = vmatprep.mubr.bf16.mxu0 %v4822_v35  ;;  %v14409_v39 = vadd.f32 %v14138_v34, %v18118_v2  ;;  %v6408_v35 = vmul.f32 0.70710677, %v14386_v62  ;;  %9392 = verf.f32 %v6403_v33  ;;  %v4823_v27 = vpack.c.bf16 %v18124_v61, %v18123_v14  ;;  %v18125_v20 = vld [vmem:[#allocation322_spill] sm:$0xff] }
 0x48d   : > { %8657 = vmatmul.mubr.bf16.gmra.mrb[148].mxu1 %v4903_v43  ;;  %v9377_v43 = vpop.eup %9376  ;;  %18122 = vst [vmem:[#allocation30_spill] sm:$0xff] %v14422_v26  ;;  %v6906_v2 = vadd.f32 1.0, %v9373_v32  ;;  %v6909_v55 = vadd.f32 1.0, %v9375_v13  ;;  %v18126_v16 = vld [vmem:[#allocation286_spill] sm:$0xff]  ;;  %v14440_v21 = vadd.f32 %v14032_v23, %v14138_v34  ;;  %v4905_v33 = vpack.c.bf16 %v17910_v12, %v17886_v15  ;;  %v18127_v13 = vld [vmem:[#allocation131_spill] sm:$0xff] }
 0x48e   : > { %8660 = vmatprep.mubr.bf16.mxu1 %v4904_v1  ;;  %v6407_v46 = vmul.f32 0.70710677, %v14409_v39  ;;  %9394 = verf.f32 %v6408_v35  ;;  %v4824_v6 = vpack.c.bf16 %v18126_v16, %v18125_v20  ;;  %v6907_v26 = vadd.f32 1.0, %v9377_v43  ;;  %v18128_v43 = vld [vmem:[#allocation72_spill] sm:$0xff]  ;;  %v18138_v36 = vld [vmem:[#allocation194_spill] sm:$0xff] }
 0x48f   : > { %v14420_v11 = vpop.f32.mrb[48].mxu1  ;;  %v9379_v7 = vpop.eup %9378  ;;  %9396 = verf.f32 %v6406_v44  ;;  %v6141_v32 = vmul.f32 0.5, %v14300_v3  ;;  %v14447_v35 = vadd.f32 %v14138_v34, %v14037_v45  ;;  %v4906_v44 = vpack.c.bf16 %v18128_v43, %v18127_v13 }
 0x490   : > { %v14427_v30 = vpop.f32.mrb[49].mxu1  ;;  %v9381_v14 = vpop.eup %9380  ;;  %9398 = verf.f32 %v6409_v51  ;;  %v14451_v20 = vmul.f32 %v6908_v49, %v6140_v18  ;;  %v6139_v23 = vmul.f32 0.5, %v14309_v63  ;;  %v14456_v15 = vadd.f32 %v14042_v58, %v14138_v34 }
 0x491   : > { %v14432_v1 = vpop.f32.mrb[50].mxu1  ;;  %v9383_v61 = vpop.eup %9382  ;;  %9400 = verf.f32 %v6407_v46  ;;  %v14458_v3 = vmul.f32 %v6906_v2, %v6138_v50  ;;  %v14460_v45 = vmul.f32 %v6909_v55, %v6141_v32  ;;  %v14464_v51 = vadd.f32 %v14138_v34, %v14044_v48  ;;  %v18133_v32 = vld [vmem:[#allocation135_spill] sm:$0xff] }
 0x492   : > { %v14436_v53 = vpop.f32.mrb[51].mxu1  ;;  %18129 = vst [vmem:[#allocation161_spill] sm:$0xff] %v14451_v20  ;;  %v9385_v12 = vpop.eup %9384  ;;  %v14466_v49 = vmul.f32 %v6907_v26, %v6139_v23  ;;  %v6144_v63 = vmul.f32 0.5, %v14321_v47  ;;  %v6142_v58 = vmul.f32 0.5, %v14328_v60  ;;  %v6412_v46 = vmul.f32 0.70710677, %v14440_v21 }
 0x493   : > { %8497 = vmatmul.mubr.bf16.gmra.mrb[60].mxu0 %v4823_v27  ;;  %18130 = vst [vmem:[#allocation137_spill] sm:$0xff] %v14458_v3  ;;  %18131 = vst [vmem:[#allocation142_spill] sm:$0xff] %v14460_v45  ;;  %v9387_v18 = vpop.eup %9386  ;;  %v6145_v2 = vmul.f32 0.5, %v14336_v41  ;;  %v6148_v48 = vmul.f32 0.5, %v14353_v10  ;;  %v6410_v55 = vmul.f32 0.70710677, %v14447_v35  ;;  %v4825_v13 = vpack.c.bf16 %v17902_v0, %v18133_v32 }
 0x494   : > { %8500 = vmatprep.mubr.bf16.mxu0 %v4824_v6  ;;  %v6912_v6 = vadd.f32 1.0, %v9379_v7  ;;  %18132 = vst [vmem:[#allocation91_spill] sm:$0xff] %v14466_v49  ;;  %v9389_v50 = vpop.eup %9388  ;;  %v6143_v7 = vmul.f32 0.5, %v14344_v29  ;;  %v6146_v47 = vmul.f32 0.5, %v14360_v52  ;;  %v6413_v60 = vmul.f32 0.70710677, %v14456_v15 }
 0x495   : > { %8661 = vmatmul.mubr.bf16.gmra.mrb[152].mxu1 %v4905_v33  ;;  %v9391_v26 = vpop.eup %9390  ;;  %v6910_v33 = vadd.f32 1.0, %v9381_v14  ;;  %v6913_v29 = vadd.f32 1.0, %v9383_v61  ;;  %v6411_v10 = vmul.f32 0.70710677, %v14464_v51  ;;  %v18136_v23 = vld [vmem:[#allocation112_spill] sm:$0xff]  ;;  %v6911_v49 = vadd.f32 1.0, %v9385_v12 }
 0x496   : > { %8664 = vmatprep.mubr.bf16.mxu1 %v4906_v44  ;;  %v14485_v41 = vmul.f32 %v6912_v6, %v6144_v63  ;;  %v18135_v44 = vld [vmem:[#allocation108_spill] sm:$0xff]  ;;  %v9393_v14 = vpop.eup %9392  ;;  %v6916_v52 = vadd.f32 1.0, %v9387_v18  ;;  %9402 = verf.f32 %v6412_v46  ;;  %v18137_v3 = vld [vmem:[#allocation171_spill] sm:$0xff]  ;;  %v6914_v42 = vadd.f32 1.0, %v9389_v50  ;;  %v18139_v61 = vld [vmem:[#allocation214_spill] sm:$0xff] }
 0x497   : > { %v14471_v27 = vpop.f32.mrb[52].mxu1  ;;  %v4826_v45 = vpack.c.bf16 %v18136_v23, %v18135_v44  ;;  %v4907_v0 = vpack.c.bf16 %v18138_v36, %v18137_v3  ;;  %v6917_v6 = vadd.f32 1.0, %v9391_v26  ;;  %9404 = verf.f32 %v6410_v55  ;;  %v18140_v63 = vld [vmem:[#allocation249_spill] sm:$0xff] }
 0x498   : > { %v14477_v16 = vpop.f32.mrb[53].mxu1  ;;  %18134 = vst [vmem:[#allocation236_spill] sm:$0xff] %v14485_v41  ;;  %v9395_v32 = vpop.eup %9394  ;;  %v4908_v41 = vpack.c.bf16 %v18140_v63, %v18139_v61  ;;  %v14496_v44 = vmul.f32 %v6910_v33, %v6142_v58  ;;  %v6149_v23 = vmul.f32 0.5, %v14367_v40  ;;  %9406 = verf.f32 %v6413_v60  ;;  %v18148_v60 = vld [vmem:[#allocation164_spill] sm:$0xff] }
 0x499   : > { %v14483_v43 = vpop.f32.mrb[54].mxu1  ;;  %v9397_v37 = vpop.eup %9396  ;;  %v14501_v12 = vadd.f32 %v14261_v5, %v14138_v34  ;;  %v14503_v3 = vmul.f32 %v6913_v29, %v6145_v2  ;;  %v6915_v18 = vadd.f32 1.0, %v9393_v14  ;;  %9408 = verf.f32 %v6411_v10 }
 0x49a   : > { %v14490_v20 = vpop.f32.mrb[55].mxu1  ;;  %18141 = vst [vmem:[#allocation159_spill] sm:$0xff] %v14496_v44  ;;  %v9399_v36 = vpop.eup %9398  ;;  %v14509_v46 = vmul.f32 %v6911_v49, %v6143_v7  ;;  %v14511_v40 = vmul.f32 %v6916_v52, %v6148_v48  ;;  %v6147_v50 = vmul.f32 0.5, %v14377_v17  ;;  %v14516_v5 = vadd.f32 %v14275_v22, %v14138_v34  ;;  %v18147_v17 = vld [vmem:[#allocation132_spill] sm:$0xff] }
 0x49b   : > { %8501 = vmatmul.mubr.bf16.gmra.mrb[64].mxu0 %v4825_v13  ;;  %18142 = vst [vmem:[#allocation237_spill] sm:$0xff] %v14503_v3  ;;  %v9401_v58 = vpop.eup %9400  ;;  %v14520_v55 = vmul.f32 %v6914_v42, %v6146_v47  ;;  %v14522_v26 = vmul.f32 %v6917_v6, %v6149_v23  ;;  %v14526_v33 = vadd.f32 %v14138_v34, %v14279_v24  ;;  %v6918_v7 = vadd.f32 1.0, %v9397_v37  ;;  %v18153_v23 = vld [vmem:[#allocation303_spill] sm:$0xff] }
 0x49c   : > { %8504 = vmatprep.mubr.bf16.mxu0 %v4826_v45  ;;  %v14507_v45 = vadd.f32 %v14138_v34, %v14269_v25  ;;  %18143 = vst [vmem:[#allocation244_spill] sm:$0xff] %v14509_v46  ;;  %18144 = vst [vmem:[#allocation294_spill] sm:$0xff] %v14511_v40  ;;  %v6920_v25 = vadd.f32 1.0, %v9395_v32  ;;  %v6921_v48 = vadd.f32 1.0, %v9399_v36  ;;  %v4827_v13 = vpack.c.bf16 %v18148_v60, %v18147_v17  ;;  %v18151_v32 = vld [vmem:[#allocation224_spill] sm:$0xff]  ;;  %v18154_v36 = vld [vmem:[#allocation251_spill] sm:$0xff] }
 0x49d   : > { %8665 = vmatmul.mubr.bf16.gmra.mrb[156].mxu1 %v4907_v0  ;;  %18145 = vst [vmem:[#allocation240_spill] sm:$0xff] %v14520_v55  ;;  %18146 = vst [vmem:[#allocation274_spill] sm:$0xff] %v14522_v26  ;;  %v6416_v22 = vmul.f32 0.70710677, %v14501_v12  ;;  %v14535_v42 = vmul.f32 %v6915_v18, %v6147_v50  ;;  %v6152_v47 = vmul.f32 0.5, %v14386_v62  ;;  %v6919_v29 = vadd.f32 1.0, %v9401_v58 }
 0x49e   : > { %8668 = vmatprep.mubr.bf16.mxu1 %v4908_v41  ;;  %v6414_v10 = vmul.f32 0.70710677, %v14507_v45  ;;  %v6150_v14 = vmul.f32 0.5, %v14395_v19  ;;  %v6153_v37 = vmul.f32 0.5, %v14401_v31  ;;  %v6417_v52 = vmul.f32 0.70710677, %v14516_v5 }
 0x49f   : > { %v14518_v2 = vpop.f32.mrb[56].mxu1  ;;  %18149 = vst [vmem:[#allocation300_spill] sm:$0xff] %v14535_v42  ;;  %v18150_v0 = vld [vmem:[#allocation262_spill] sm:$0xff]  ;;  %v14546_v61 = vmul.f32 %v6920_v25, %v6152_v47  ;;  %v6151_v63 = vmul.f32 0.5, %v14409_v39  ;;  %v6415_v62 = vmul.f32 0.70710677, %v14526_v33  ;;  %v4910_v18 = vpack.c.bf16 %v18154_v36, %v18153_v23 }
 0x4a0   : > { %v14528_v49 = vpop.f32.mrb[57].mxu1  ;;  %v4909_v6 = vpack.c.bf16 %v18151_v32, %v18150_v0  ;;  %v9403_v58 = vpop.eup %9402  ;;  %v14552_v50 = vmul.f32 %v6918_v7, %v6150_v14  ;;  %v14554_v19 = vmul.f32 %v6921_v48, %v6153_v37  ;;  %9410 = verf.f32 %v6416_v22  ;;  %v18158_v60 = vld [vmem:[#allocation152_spill] sm:$0xff]  ;;  %v18159_v7 = vld [vmem:[#allocation155_spill] sm:$0xff]  ;;  %v18162_v23 = vld [vmem:[#allocation289_spill] sm:$0xff] }
 0x4a1   : > { %v14533_v41 = vpop.f32.mrb[58].mxu1  ;;  %18152 = vst [vmem:[#allocation276_spill] sm:$0xff] %v14546_v61  ;;  %v14558_v31 = vadd.f32 %v14369_v28, %v14138_v34  ;;  %v9405_v25 = vpop.eup %9404  ;;  %v14560_v17 = vmul.f32 %v6919_v29, %v6151_v63  ;;  %9412 = verf.f32 %v6414_v10  ;;  %v14564_v39 = vadd.f32 %v14138_v34, %v14372_v9  ;;  %v18160_v32 = vld [vmem:[#allocation191_spill] sm:$0xff] }
 0x4a2   : > { %v14539_v24 = vpop.f32.mrb[59].mxu1  ;;  %18155 = vst [vmem:[#allocation313_spill] sm:$0xff] %v14552_v50  ;;  %18156 = vst [vmem:[#allocation298_spill] sm:$0xff] %v14554_v19  ;;  %v9407_v48 = vpop.eup %9406  ;;  %v6156_v22 = vmul.f32 0.5, %v14440_v21  ;;  %v6154_v47 = vmul.f32 0.5, %v14447_v35  ;;  %9414 = verf.f32 %v6417_v52  ;;  %v14572_v28 = vadd.f32 %v14381_v59, %v14138_v34 }
 0x4a3   : > { %8505 = vmatmul.mubr.bf16.gmra.mrb[68].mxu0 %v4827_v13  ;;  %18157 = vst [vmem:[#allocation295_spill] sm:$0xff] %v14560_v17  ;;  %v9409_v29 = vpop.eup %9408  ;;  %v6924_v10 = vadd.f32 1.0, %v9403_v58  ;;  %v6157_v14 = vmul.f32 0.5, %v14456_v15  ;;  %9416 = verf.f32 %v6415_v62  ;;  %v14577_v9 = vadd.f32 %v14138_v34, %v14390_v56 }
 0x4a4   : > { %v6922_v37 = vadd.f32 1.0, %v9405_v25  ;;  %v6155_v0 = vmul.f32 0.5, %v14464_v51  ;;  %v6420_v21 = vmul.f32 0.70710677, %v14558_v31  ;;  %v14583_v35 = vadd.f32 %v14420_v11, %v14138_v34  ;;  %v18163_v11 = vld [vmem:[#allocation290_spill] sm:$0xff] }
 0x4a5   : > { %8669 = vmatmul.mubr.bf16.gmra.mrb[160].mxu1 %v4909_v6  ;;  %v6925_v59 = vadd.f32 1.0, %v9407_v48  ;;  %v6418_v52 = vmul.f32 0.70710677, %v14564_v39  ;;  %v14588_v15 = vadd.f32 %v14138_v34, %v14427_v30  ;;  %v18161_v6 = vld [vmem:[#allocation203_spill] sm:$0xff]  ;;  %v6923_v63 = vadd.f32 1.0, %v9409_v29  ;;  %v18165_v25 = vld [vmem:[#allocation38_spill] sm:$0xff] }
 0x4a6   : > { %8672 = vmatprep.mubr.bf16.mxu1 %v4910_v18  ;;  %v6421_v62 = vmul.f32 0.70710677, %v14572_v28  ;;  %v14595_v51 = vadd.f32 %v14432_v1, %v14138_v34  ;;  %v4911_v36 = vpack.c.bf16 %v18163_v11, %v18162_v23  ;;  %v14599_v18 = vmul.f32 %v6924_v10, %v6156_v22  ;;  %v18166_v48 = vld [vmem:[#allocation87_spill] sm:$0xff] }
 0x4a7   : > { %v6419_v58 = vmul.f32 0.70710677, %v14577_v9  ;;  %v14604_v30 = vadd.f32 %v14138_v34, %v14436_v53  ;;  %v4912_v29 = vpack.c.bf16 %v18166_v48, %v18165_v25  ;;  %v14608_v56 = vmul.f32 %v6922_v37, %v6154_v47 }
 0x4a8   : > { %18164 = vst [vmem:[#allocation314_spill] sm:$0xff] %v14599_v18  ;;  %9418 = verf.f32 %v6420_v21  ;;  %v6424_v1 = vmul.f32 0.70710677, %v14583_v35  ;;  %v14613_v13 = vadd.f32 %v14471_v27, %v14138_v34  ;;  %v14615_v22 = vmul.f32 %v6925_v59, %v6157_v14 }
 0x4a9   : > { %18167 = vst [vmem:[#allocation32_spill] sm:$0xff] %v14608_v56  ;;  %9420 = verf.f32 %v6418_v52  ;;  %v6422_v10 = vmul.f32 0.70710677, %v14588_v15  ;;  %v14620_v53 = vadd.f32 %v14138_v34, %v14477_v16  ;;  %v14622_v37 = vmul.f32 %v6923_v63, %v6155_v0  ;;  %v18170_v0 = vld [vmem:[#allocation26_spill] sm:$0xff]  ;;  %v18171_v63 = vld [vmem:[#allocation317_spill] sm:$0xff] }
 0x4aa   : > { %18168 = vst [vmem:[#allocation105_spill] sm:$0xff] %v14615_v22  ;;  %v9411_v47 = vpop.eup %9410  ;;  %9422 = verf.f32 %v6421_v62  ;;  %v6425_v21 = vmul.f32 0.70710677, %v14595_v51  ;;  %v14627_v27 = vadd.f32 %v14483_v43, %v14138_v34  ;;  %v6423_v52 = vmul.f32 0.70710677, %v14604_v30  ;;  %v18172_v62 = vld [vmem:[#allocation211_spill] sm:$0xff] }
 0x4ab   : > { %18169 = vst [vmem:[#allocation324_spill] sm:$0xff] %v14622_v37  ;;  %v9413_v59 = vpop.eup %9412  ;;  %9424 = verf.f32 %v6419_v58  ;;  %v14634_v16 = vadd.f32 %v14138_v34, %v14490_v20  ;;  %v6428_v43 = vmul.f32 0.70710677, %v14613_v13  ;;  %v4913_v25 = vpack.c.bf16 %v13851_v4, %v13834_v57 }
 0x4ac   : > { %v9415_v11 = vpop.eup %9414  ;;  %9426 = verf.f32 %v6424_v1  ;;  %v6426_v48 = vmul.f32 0.70710677, %v14620_v53  ;;  %v6429_v46 = vmul.f32 0.70710677, %v14627_v27  ;;  %v6926_v4 = vadd.f32 1.0, %v9413_v59 }
 0x4ad   : > { %8673 = vmatmul.mubr.bf16.gmra.mrb[164].mxu1 %v4911_v36  ;;  %v14643_v36 = vadd.f32 %v14518_v2, %v14138_v34  ;;  %v9417_v20 = vpop.eup %9416  ;;  %9428 = verf.f32 %v6422_v10  ;;  %v6928_v2 = vadd.f32 1.0, %v9411_v47  ;;  %v6929_v10 = vadd.f32 1.0, %v9415_v11 }
 0x4ae   : > { %8676 = vmatprep.mubr.bf16.mxu1 %v4912_v29  ;;  %v14652_v29 = vadd.f32 %v14138_v34, %v14528_v49  ;;  %9430 = verf.f32 %v6425_v21  ;;  %v6427_v44 = vmul.f32 0.70710677, %v14634_v16  ;;  %v6160_v49 = vmul.f32 0.5, %v14501_v12 }
 0x4af   : > { %v14629_v14 = vpop.f32.mrb[60].mxu1  ;;  %9432 = verf.f32 %v6423_v52  ;;  %v6927_v37 = vadd.f32 1.0, %v9417_v20  ;;  %v6432_v22 = vmul.f32 0.70710677, %v14643_v36  ;;  %v6158_v47 = vmul.f32 0.5, %v14507_v45 }
 0x4b0   : > { %v14636_v23 = vpop.f32.mrb[61].mxu1  ;;  %9434 = verf.f32 %v6428_v43  ;;  %v6161_v21 = vmul.f32 0.5, %v14516_v5  ;;  %v6430_v3 = vmul.f32 0.70710677, %v14652_v29  ;;  %v18173_v59 = vpack.c.bf16 %v18159_v7, %v18158_v60 }
 0x4b1   : > { %v14645_v58 = vpop.f32.mrb[62].mxu1  ;;  %9436 = verf.f32 %v6426_v48  ;;  %v14670_v11 = vmul.f32 %v6928_v2, %v6160_v49  ;;  %v6159_v12 = vmul.f32 0.5, %v14526_v33  ;;  %v14675_v43 = vadd.f32 %v14533_v41, %v14138_v34 }
 0x4b2   : > { %v14654_v1 = vpop.f32.mrb[63].mxu1  ;;  %v9419_v52 = vpop.eup %9418  ;;  %9438 = verf.f32 %v6429_v46  ;;  %v14681_v20 = vmul.f32 %v6929_v10, %v6161_v21  ;;  %v6164_v60 = vmul.f32 0.5, %v14558_v31  ;;  %v6162_v46 = vmul.f32 0.5, %v14564_v39  ;;  %v18179_v31 = vld [vmem:[#allocation68_spill] sm:$0xff] }
 0x4b3   : > { %18174 = vst [vmem:[#allocation277_spill] sm:$0xff] %v14670_v11  ;;  %v9421_v5 = vpop.eup %9420  ;;  %9440 = verf.f32 %v6427_v44  ;;  %v14686_v2 = vmul.f32 %v6927_v37, %v6159_v12  ;;  %v14691_v33 = vadd.f32 %v14138_v34, %v14539_v24  ;;  %v6932_v10 = vadd.f32 1.0, %v9419_v52  ;;  %v18182_v12 = vld [vmem:[#allocation255_spill] sm:$0xff] }
 0x4b4   : > { %18176 = vst [vmem:[#allocation24_spill] sm:$0xff] %v14681_v20  ;;  %v9423_v48 = vpop.eup %9422  ;;  %9442 = verf.f32 %v6432_v22  ;;  %v6165_v49 = vmul.f32 0.5, %v14572_v28  ;;  %v6163_v39 = vmul.f32 0.5, %v14577_v9  ;;  %v6168_v22 = vmul.f32 0.5, %v14583_v35 }
 0x4b5   : > { %8677 = vmatmul.mubr.bf16.gmra.mrb[168].mxu1 %v4913_v25  ;;  %v14679_v25 = vmul.f32 %v6926_v4, %v6158_v47  ;;  %18177 = vst [vmem:[#allocation71_spill] sm:$0xff] %v14686_v2  ;;  %18178 = vst [vmem:[#allocation70_spill] sm:$0xff] %v14691_v33  ;;  %v9425_v4 = vpop.eup %9424  ;;  %9444 = verf.f32 %v6430_v3  ;;  %v18180_v47 = vld [vmem:[#allocation195_spill] sm:$0xff]  ;;  %v6433_v24 = vmul.f32 0.70710677, %v14675_v43  ;;  %v6930_v52 = vadd.f32 1.0, %v9421_v5 }
 0x4b6   : > { %8680 = vmatprep.mubr.bf16.mxu1 %v18173_v59  ;;  %v9427_v21 = vpop.eup %9426  ;;  %v18181_v59 = vld [vmem:[#allocation199_spill] sm:$0xff]  ;;  %v6166_v28 = vmul.f32 0.5, %v14588_v15  ;;  %v6169_v3 = vmul.f32 0.5, %v14595_v51  ;;  %v14709_v20 = vadd.f32 %v14629_v14, %v14138_v34  ;;  %v6167_v9 = vmul.f32 0.5, %v14604_v30 }
 0x4b7   : > { %v14677_v45 = vpop.f32.mrb[64].mxu1  ;;  %18175 = vst [vmem:[#allocation200_spill] sm:$0xff] %v14679_v25  ;;  %v9429_v2 = vpop.eup %9428  ;;  %v6933_v25 = vadd.f32 1.0, %v9423_v48  ;;  %v6431_v35 = vmul.f32 0.70710677, %v14691_v33  ;;  %v14715_v11 = vadd.f32 %v14138_v34, %v14636_v23  ;;  %v18183_v5 = vpack.c.bf16 %v18161_v6, %v18160_v32  ;;  %v18186_v48 = vld [vmem:[#allocation83_spill] sm:$0xff] }
 0x4b8   : > { %v14684_v7 = vpop.f32.mrb[65].mxu1  ;;  %v9431_v37 = vpop.eup %9430  ;;  %v14720_v51 = vmul.f32 %v6932_v10, %v6164_v60  ;;  %v6931_v57 = vadd.f32 1.0, %v9425_v4  ;;  %v14724_v14 = vadd.f32 %v14645_v58, %v14138_v34  ;;  %v18185_v30 = vpack.c.bf16 %v18171_v63, %v18170_v0  ;;  %v18187_v33 = vld [vmem:[#allocation75_spill] sm:$0xff] }
 0x4b9   : > { %v14693_v41 = vpop.f32.mrb[66].mxu1  ;;  %v9433_v15 = vpop.eup %9432  ;;  %v6936_v18 = vadd.f32 1.0, %v9427_v21  ;;  %v6934_v17 = vadd.f32 1.0, %v9429_v2  ;;  %9446 = verf.f32 %v6433_v24  ;;  %v14733_v32 = vadd.f32 %v14138_v34, %v14654_v1 }
 0x4ba   : > { %v14696_v44 = vpop.f32.mrb[67].mxu1  ;;  %18184 = vst [vmem:[#allocation74_spill] sm:$0xff] %v14720_v51  ;;  %v9435_v56 = vpop.eup %9434  ;;  %v14735_v4 = vmul.f32 %v6930_v52, %v6162_v46  ;;  %v6937_v58 = vadd.f32 1.0, %v9431_v37  ;;  %v6172_v10 = vmul.f32 0.5, %v14613_v13  ;;  %v6436_v0 = vmul.f32 0.70710677, %v14709_v20 }
 0x4bb   : > { %v9437_v60 = vpop.eup %9436  ;;  %v6170_v2 = vmul.f32 0.5, %v14620_v53  ;;  %9448 = verf.f32 %v6431_v35  ;;  %v6434_v21 = vmul.f32 0.70710677, %v14715_v11  ;;  %v14743_v24 = vmul.f32 %v6931_v57, %v6163_v39 }
 0x4bc   : > { %18188 = vst [vmem:[#allocation73_spill] sm:$0xff] %v14735_v4  ;;  %v6173_v46 = vmul.f32 0.5, %v14627_v27  ;;  %v6171_v37 = vmul.f32 0.5, %v14634_v16  ;;  %v6437_v13 = vmul.f32 0.70710677, %v14724_v14  ;;  %v14748_v51 = vmul.f32 %v6936_v18, %v6168_v22 }
 0x4bd   : > { %8681 = vmatmul.mubr.bf16.gmra.mrb[172].mxu1 %v18183_v5  ;;  %v9439_v5 = vpop.eup %9438  ;;  %18190 = vst [vmem:[#allocation102_spill] sm:$0xff] %v14743_v24  ;;  %v6935_v53 = vadd.f32 1.0, %v9433_v15  ;;  %v6176_v57 = vmul.f32 0.5, %v14643_v36  ;;  %9450 = verf.f32 %v6436_v0  ;;  %v14759_v27 = vld [vmem:[%s16778_s17] ss:$0 sm:$0xff]  ;;  %v6938_v16 = vadd.f32 1.0, %v9437_v60 }
 0x4be   : > { %8684 = vmatprep.mubr.bf16.mxu1 %v18185_v30  ;;  %v14739_v30 = vmul.f32 %v6933_v25, %v6165_v49  ;;  %v9441_v1 = vpop.eup %9440  ;;  %18191 = vst [vmem:[#allocation92_spill] sm:$0xff] %v14748_v51  ;;  %v14750_v25 = vmul.f32 %v6934_v17, %v6166_v28  ;;  %v6435_v49 = vmul.f32 0.70710677, %v14733_v32  ;;  %v14763_v18 = vadd.f32 %v14759_v27, %v14677_v45 }
 0x4bf   : > { %v8578_v6 = vpop.f32.mrb[68].mxu1  ;;  %v9443_v23 = vpop.eup %9442  ;;  %v6940_v17 = vadd.f32 1.0, %v9435_v56  ;;  %9452 = verf.f32 %v6434_v21  ;;  %v14767_v39 = vadd.f32 %v14759_v27, %v14684_v7  ;;  %v18194_v36 = vpack.c.bf16 %v13774_v8, %v18172_v62 }
 0x4c0   : > { %v5571_v63 = vpop.f32.mrb[69].mxu1  ;;  %18189 = vst [vmem:[#allocation96_spill] sm:$0xff] %v14739_v30  ;;  %18192 = vst [vmem:[#allocation269_spill] sm:$0xff] %v14750_v25  ;;  %v9445_v35 = vpop.eup %9444  ;;  %v14753_v30 = vmul.f32 %v6937_v58, %v6169_v3  ;;  %v6941_v22 = vadd.f32 1.0, %v9439_v5  ;;  %v6939_v28 = vadd.f32 1.0, %v9441_v1  ;;  %9454 = verf.f32 %v6437_v13 }
 0x4c1   : > { %v8579_v34 = vpop.f32.mrb[70].mxu1  ;;  %v14774_v3 = vadd.f32 %v14759_v27, %v14693_v41  ;;  %v18195_v56 = vpack.c.bf16 %v13790_v54, %v13781_v38  ;;  %v6944_v45 = vadd.f32 1.0, %v9443_v23  ;;  %v6942_v15 = vadd.f32 1.0, %v9445_v35 }
 0x4c2   : > { %v5574_v52 = vpop.f32.mrb[71].mxu1  ;;  %18193 = vst [vmem:[#allocation283_spill] sm:$0xff] %v14753_v30  ;;  %9456 = verf.f32 %v6435_v49  ;;  %v14781_v7 = vadd.f32 %v14759_v27, %v14696_v44  ;;  %v14783_v62 = vmul.f32 %v6935_v53, %v6167_v9  ;;  %v6174_v60 = vmul.f32 0.5, %v14652_v29 }
 0x4c3   : > { %v6440_v58 = vmul.f32 0.70710677, %v14763_v18  ;;  %v14788_v41 = vadd.f32 %v14759_v27, %v8578_v6  ;;  %v9447_v38 = vpop.eup %9446  ;;  %v14790_v54 = vmul.f32 %v6940_v17, %v6172_v10  ;;  %v14793_v23 = vmul.f32 0.5, %v14675_v43 }
 0x4c4   : > { %18196 = vst [vmem:[#allocation66_spill] sm:$0xff] %v14783_v62  ;;  %v6438_v44 = vmul.f32 0.70710677, %v14767_v39  ;;  %v14797_v5 = vadd.f32 %v14759_v27, %v5571_v63  ;;  %v14799_v21 = vmul.f32 %v6938_v16, %v6170_v2  ;;  %v14801_v29 = vmul.f32 %v6941_v22, %v6173_v46 }
 0x4c5   : > { %8685 = vmatmul.mubr.bf16.gmra.mrb[176].mxu1 %v18194_v36  ;;  %18197 = vst [vmem:[#allocation42_spill] sm:$0xff] %v14790_v54  ;;  %18198 = vst [vmem:[#allocation308_spill] sm:$0xff] %v14793_v23  ;;  %v6441_v6 = vmul.f32 0.70710677, %v14774_v3  ;;  %v14805_v1 = vadd.f32 %v14759_v27, %v8579_v34  ;;  %v9449_v13 = vpop.eup %9448  ;;  %v14807_v53 = vmul.f32 %v6939_v28, %v6171_v37  ;;  %v6439_v63 = vmul.f32 0.70710677, %v14781_v7 }
 0x4c6   : > { %8688 = vmatprep.mubr.bf16.mxu1 %v18195_v56  ;;  %18199 = vst [vmem:[#allocation120_spill] sm:$0xff] %v14799_v21  ;;  %18200 = vst [vmem:[#allocation53_spill] sm:$0xff] %v14801_v29  ;;  %v14809_v43 = vmul.f32 %v6944_v45, %v6176_v57  ;;  %v14811_v49 = vmul.f32 %v6942_v15, %v6174_v60  ;;  %v14814_v35 = vadd.f32 1.0, %v9447_v38  ;;  %9458 = verf.f32 %v6440_v58 }
 0x4c7   : > { %v8582_v8 = vpop.f32.mrb[72].mxu1  ;;  %18201 = vst [vmem:[#allocation225_spill] sm:$0xff] %v14807_v53  ;;  %v6444_v2 = vmul.f32 0.70710677, %v14788_v41  ;;  %v14818_v46 = vadd.f32 %v14759_v27, %v5574_v52  ;;  %v6180_v34 = vmul.f32 0.5, %v14709_v20  ;;  %9460 = verf.f32 %v6438_v44  ;;  %v9451_v16 = vpop.eup %9450 }
 0x4c8   : > { %v5587_v0 = vpop.f32.mrb[73].mxu1  ;;  %18202 = vst [vmem:[#allocation61_spill] sm:$0xff] %v14809_v43  ;;  %18203 = vst [vmem:[#allocation285_spill] sm:$0xff] %v14811_v49  ;;  %v6442_v37 = vmul.f32 0.70710677, %v14797_v5  ;;  %v14823_v57 = vadd.f32 %v14759_v27, %v8582_v8  ;;  %v18205_v17 = vpack.c.bf16 %v18180_v47, %v18179_v31  ;;  %v14828_v36 = vadd.f32 1.0, %v9449_v13 }
 0x4c9   : > { %v8583_v9 = vpop.f32.mrb[74].mxu1  ;;  %18204 = vst [vmem:[#allocation179_spill] sm:$0xff] %v14814_v35  ;;  %9462 = verf.f32 %v6441_v6  ;;  %v6445_v22 = vmul.f32 0.70710677, %v14805_v1  ;;  %v14832_v52 = vadd.f32 %v14759_v27, %v5587_v0  ;;  %v18207_v20 = vpack.c.bf16 %v18182_v12, %v18181_v59  ;;  %v9453_v28 = vpop.eup %9452 }
 0x4ca   : > { %v5590_v10 = vpop.f32.mrb[75].mxu1  ;;  %18206 = vst [vmem:[#allocation106_spill] sm:$0xff] %v14828_v36  ;;  %v6178_v56 = vmul.f32 0.5, %v14715_v11  ;;  %v6181_v45 = vmul.f32 0.5, %v14724_v14  ;;  %9464 = verf.f32 %v6439_v63  ;;  %v14840_v31 = vadd.f32 %v14759_v27, %v8583_v9  ;;  %v9455_v15 = vpop.eup %9454 }
 0x4cb   : > { %v6179_v8 = vmul.f32 0.5, %v14733_v32  ;;  %9466 = verf.f32 %v6444_v2  ;;  %v6443_v60 = vmul.f32 0.70710677, %v14818_v46  ;;  %v14845_v58 = vadd.f32 %v14759_v27, %v5590_v10 }
 0x4cc   : > { %v9457_v12 = vpop.eup %9456  ;;  %v14848_v11 = vmul.f32 0.5, %v14763_v18  ;;  %9468 = verf.f32 %v6442_v37  ;;  %v6448_v14 = vmul.f32 0.70710677, %v14823_v57  ;;  %v6948_v44 = vadd.f32 1.0, %v9451_v16 }
 0x4cd   : > { %8689 = vmatmul.mubr.bf16.gmra.mrb[180].mxu1 %v18205_v17  ;;  %9470 = verf.f32 %v6445_v22  ;;  %v6446_v32 = vmul.f32 0.70710677, %v14832_v52  ;;  %v6946_v10 = vadd.f32 1.0, %v9453_v28  ;;  %v6949_v13 = vadd.f32 1.0, %v9455_v15 }
 0x4ce   : > { %8692 = vmatprep.mubr.bf16.mxu1 %v18207_v20  ;;  %v6182_v18 = vmul.f32 0.5, %v14767_v39  ;;  %v6449_v63 = vmul.f32 0.70710677, %v14840_v31  ;;  %v6947_v2 = vadd.f32 1.0, %v9457_v12  ;;  %9472 = verf.f32 %v6443_v60 }
 0x4cf   : > { %v8586_v47 = vpop.f32.mrb[76].mxu1  ;;  %v6447_v37 = vmul.f32 0.70710677, %v14845_v58  ;;  %v6185_v16 = vmul.f32 0.5, %v14774_v3  ;;  %9474 = verf.f32 %v6448_v14  ;;  %v18208_v39 = vpack.c.bf16 %v18187_v33, %v18186_v48 }
 0x4d0   : > { %v5603_v59 = vpop.f32.mrb[77].mxu1  ;;  %v14852_v0 = vadd.f32 %v14759_v27, %v8586_v47  ;;  %v9459_v28 = vpop.eup %9458  ;;  %v14874_v15 = vmul.f32 %v6948_v44, %v6180_v34  ;;  %v6183_v60 = vmul.f32 0.5, %v14781_v7  ;;  %9476 = verf.f32 %v6446_v32 }
 0x4d1   : > { %v8587_v38 = vpop.f32.mrb[78].mxu1  ;;  %v14856_v9 = vadd.f32 %v14759_v27, %v5603_v59  ;;  %v9461_v59 = vpop.eup %9460  ;;  %v14878_v14 = vmul.f32 %v6946_v10, %v6178_v56  ;;  %9478 = verf.f32 %v6449_v63  ;;  %v14884_v34 = vmul.f32 %v6947_v2, %v6179_v8 }
 0x4d2   : > { %v5606_v6 = vpop.f32.mrb[79].mxu1  ;;  %v14862_v17 = vadd.f32 %v14759_v27, %v8587_v38  ;;  %v6452_v22 = vmul.f32 0.70710677, %v14852_v0  ;;  %v6188_v38 = vmul.f32 0.5, %v14788_v41  ;;  %9480 = verf.f32 %v6447_v37 }
 0x4d3   : > { %v14867_v20 = vadd.f32 %v14759_v27, %v5606_v6  ;;  %v6450_v3 = vmul.f32 0.70710677, %v14856_v9  ;;  %v6186_v6 = vmul.f32 0.5, %v14797_v5  ;;  %v9463_v33 = vpop.eup %9462  ;;  %v6950_v63 = vadd.f32 1.0, %v9461_v59 }
 0x4d4   : > { %v6453_v7 = vmul.f32 0.70710677, %v14862_v17  ;;  %v9465_v32 = vpop.eup %9464  ;;  %9482 = verf.f32 %v6452_v22  ;;  %v6953_v37 = vadd.f32 1.0, %v9463_v33 }
 0x4d5   : > { %8693 = vmatmul.mubr.bf16.gmra.mrb[184].mxu1 %v18208_v39  ;;  %v14882_v39 = vmul.f32 %v6949_v13, %v6181_v45  ;;  %v6451_v56 = vmul.f32 0.70710677, %v14867_v20  ;;  %v9467_v10 = vpop.eup %9466  ;;  %v6189_v45 = vmul.f32 0.5, %v14805_v1  ;;  %9484 = verf.f32 %v6450_v3 }
 0x4d6   : > { %v14872_v47 = vpop.f32.mrb[0].mxu0  ;;  %v9469_v2 = vpop.eup %9468  ;;  %v6951_v36 = vadd.f32 1.0, %v9465_v32  ;;  %9486 = verf.f32 %v6453_v7  ;;  %v6956_v33 = vadd.f32 1.0, %v9467_v10  ;;  %v14908_v49 = vmul.f32 %v6950_v63, %v6182_v18 }
 0x4d7   : > { %18209 = vst [vmem:[#allocation218_spill] sm:$0xff] %v14872_v47  ;;  %v8422_v12 = vpop.f32.mrb[1].mxu0  ;;  %9488 = verf.f32 %v6451_v56  ;;  %v14911_v43 = vmul.f32 %v6953_v37, %v6185_v16  ;;  %v6190_v56 = vmul.f32 0.5, %v14832_v52  ;;  %v6193_v10 = vmul.f32 0.5, %v14840_v31 }
 0x4d8   : > { %v4789_v48 = vpop.f32.mrb[2].mxu0  ;;  %v8590_v44 = vpop.f32.mrb[80].mxu1  ;;  %v6952_v12 = vadd.f32 1.0, %v9459_v28  ;;  %v6187_v28 = vmul.f32 0.5, %v14818_v46  ;;  %v6191_v18 = vmul.f32 0.5, %v14845_v58 }
 0x4d9   : > { %v8423_v47 = vpop.f32.mrb[3].mxu0  ;;  %v14889_v41 = vadd.f32 %v14759_v27, %v8590_v44  ;;  %v5619_v5 = vpop.f32.mrb[81].mxu1 }
 0x4da   : > { %v14893_v8 = vadd.f32 %v14759_v27, %v5619_v5  ;;  %v8591_v13 = vpop.f32.mrb[82].mxu1  ;;  %v9471_v44 = vpop.eup %9470  ;;  %v14905_v59 = vmul.f32 %v6952_v12, %v14848_v11  ;;  %v14914_v12 = vmul.f32 %v6951_v36, %v6183_v60  ;;  %v6196_v36 = vmul.f32 0.5, %v14852_v0 }
 0x4db   : > { %v6456_v22 = vmul.f32 0.70710677, %v14889_v41  ;;  %v14898_v47 = vadd.f32 %v14759_v27, %v8591_v13  ;;  %v5622_v48 = vpop.f32.mrb[83].mxu1  ;;  %v9473_v5 = vpop.eup %9472  ;;  %v6954_v13 = vadd.f32 1.0, %v9469_v2  ;;  %v6957_v35 = vadd.f32 1.0, %v9471_v44 }
 0x4dc   : > { %v6454_v1 = vmul.f32 0.70710677, %v14893_v8  ;;  %v14902_v3 = vadd.f32 %v14759_v27, %v5622_v48  ;;  %v9475_v7 = vpop.eup %9474  ;;  %v6192_v48 = vmul.f32 0.5, %v14823_v57  ;;  %v6955_v23 = vadd.f32 1.0, %v9473_v5 }
 0x4dd   : > { %v6457_v46 = vmul.f32 0.70710677, %v14898_v47  ;;  %9490 = verf.f32 %v6456_v22  ;;  %v9477_v11 = vpop.eup %9476  ;;  %v14919_v22 = vmul.f32 %v6956_v33, %v6188_v38  ;;  %v14922_v44 = vmul.f32 %v6954_v13, %v6186_v6 }
 0x4de   : > { %v6455_v32 = vmul.f32 0.70710677, %v14902_v3  ;;  %9492 = verf.f32 %v6454_v1  ;;  %v9479_v2 = vpop.eup %9478  ;;  %v14926_v58 = vmul.f32 %v6957_v35, %v6189_v45  ;;  %v6194_v38 = vmul.f32 0.5, %v14856_v9 }
 0x4df   : > { %9494 = verf.f32 %v6457_v46  ;;  %v9481_v57 = vpop.eup %9480  ;;  %v6958_v53 = vadd.f32 1.0, %v9477_v11  ;;  %v14931_v0 = vmul.f32 %v6955_v23, %v6187_v28  ;;  %v6197_v45 = vmul.f32 0.5, %v14862_v17 }
 0x4e0   : > { %v8594_v63 = vpop.f32.mrb[84].mxu1  ;;  %9496 = verf.f32 %v6455_v32  ;;  %v9483_v60 = vpop.eup %9482  ;;  %v6961_v32 = vadd.f32 1.0, %v9479_v2  ;;  %v6959_v35 = vadd.f32 1.0, %v9481_v57  ;;  %v6200_v28 = vmul.f32 0.5, %v14889_v41 }
 0x4e1   : > { %v5644_v16 = vadd.f32 %v14759_v27, %v8594_v63  ;;  %v5635_v37 = vpop.f32.mrb[85].mxu1  ;;  %v9485_v5 = vpop.eup %9484  ;;  %v6960_v63 = vadd.f32 1.0, %v9475_v7  ;;  %v6195_v7 = vmul.f32 0.5, %v14867_v20  ;;  %v14937_v23 = vmul.f32 %v6958_v53, %v6190_v56 }
 0x4e2   : > { %v5636_v52 = vadd.f32 %v14759_v27, %v5635_v37  ;;  %v8595_v31 = vpop.f32.mrb[86].mxu1  ;;  %v9487_v29 = vpop.eup %9486  ;;  %v6962_v21 = vadd.f32 1.0, %v9485_v5  ;;  %v14944_v20 = vmul.f32 %v6959_v35, %v6191_v18  ;;  %v6199_v53 = vmul.f32 0.5, %v14902_v3 }
 0x4e3   : > { %v6460_v1 = vmul.f32 0.70710677, %v5644_v16  ;;  %v5647_v33 = vadd.f32 %v14759_v27, %v8595_v31  ;;  %v5638_v46 = vpop.f32.mrb[87].mxu1  ;;  %v9489_v54 = vpop.eup %9488  ;;  %v6964_v31 = vadd.f32 1.0, %v9483_v60  ;;  %v14935_v30 = vmul.f32 %v6960_v63, %v6192_v48 }
 0x4e4   : > { %v6458_v6 = vmul.f32 0.70710677, %v5636_v52  ;;  %v5639_v13 = vadd.f32 %v14759_v27, %v5638_v46  ;;  %v6965_v17 = vadd.f32 1.0, %v9487_v29  ;;  %v6198_v46 = vmul.f32 0.5, %v14893_v8 }
 0x4e5   : > { %9498 = verf.f32 %v6460_v1  ;;  %v6461_v37 = vmul.f32 0.70710677, %v5647_v33  ;;  %v14940_v1 = vmul.f32 %v6961_v32, %v6193_v10  ;;  %v6201_v48 = vmul.f32 0.5, %v14898_v47 }
 0x4e6   : > { %9500 = verf.f32 %v6458_v6  ;;  %v6459_v9 = vmul.f32 0.70710677, %v5639_v13  ;;  %v14949_v6 = vmul.f32 %v6964_v31, %v6196_v36  ;;  %v14951_v10 = vmul.f32 %v6962_v21, %v6194_v38 }
 0x4e7   : > { %9502 = verf.f32 %v6461_v37  ;;  %v9491_v11 = vpop.eup %9490  ;;  %v6963_v29 = vadd.f32 1.0, %v9489_v54  ;;  %v14954_v47 = vmul.f32 %v6965_v17, %v6197_v45  ;;  %v6204_v3 = vmul.f32 0.5, %v5644_v16 }
 0x4e8   : > { %9504 = verf.f32 %v6459_v9  ;;  %v8598_v2 = vpop.f32.mrb[88].mxu1  ;;  %v9493_v57 = vpop.eup %9492  ;;  %v6968_v9 = vadd.f32 1.0, %v9491_v11  ;;  %v6202_v36 = vmul.f32 0.5, %v5636_v52  ;;  %v6205_v62 = vmul.f32 0.5, %v5647_v33 }
 0x4e9   : > { %v5660_v60 = vadd.f32 %v14759_v27, %v8598_v2  ;;  %v5651_v5 = vpop.f32.mrb[89].mxu1  ;;  %v9495_v63 = vpop.eup %9494  ;;  %v6966_v2 = vadd.f32 1.0, %v9493_v57  ;;  %v14957_v54 = vmul.f32 %v6963_v29, %v6195_v7  ;;  %v6203_v45 = vmul.f32 0.5, %v5639_v13 }
 0x4ea   : > { %v5652_v56 = vadd.f32 %v14759_v27, %v5651_v5  ;;  %v8599_v41 = vpop.f32.mrb[90].mxu1  ;;  %v9497_v37 = vpop.eup %9496  ;;  %v6969_v51 = vadd.f32 1.0, %v9495_v63  ;;  %v14959_v25 = vmul.f32 %v6968_v9, %v6200_v28 }
 0x4eb   : > { %v6464_v32 = vmul.f32 0.70710677, %v5660_v60  ;;  %v5654_v8 = vpop.f32.mrb[91].mxu1  ;;  %v5663_v35 = vadd.f32 %v14759_v27, %v8599_v41  ;;  %v6967_v31 = vadd.f32 1.0, %v9497_v37  ;;  %v14961_v41 = vmul.f32 %v6966_v2, %v6198_v46 }
 0x4ec   : > { %v6462_v18 = vmul.f32 0.70710677, %v5652_v56  ;;  %v5655_v5 = vadd.f32 %v14759_v27, %v5654_v8  ;;  %18210 = vst [vmem:[#allocation201_spill] sm:$0xff] %v14959_v25  ;;  %v14964_v29 = vmul.f32 %v6969_v51, %v6201_v48  ;;  %v6208_v37 = vmul.f32 0.5, %v5660_v60 }
 0x4ed   : > { %9506 = verf.f32 %v6464_v32  ;;  %v6465_v21 = vmul.f32 0.70710677, %v5663_v35  ;;  %v14967_v46 = vmul.f32 %v6967_v31, %v6199_v53  ;;  %v6206_v2 = vmul.f32 0.5, %v5652_v56 }
 0x4ee   : > { %9508 = verf.f32 %v6462_v18  ;;  %v6463_v11 = vmul.f32 0.70710677, %v5655_v5  ;;  %18211 = vst [vmem:[#allocation149_spill] sm:$0xff] %v14964_v29 }
 0x4ef   : > { %v9499_v38 = vpop.eup %9498  ;;  %9510 = verf.f32 %v6465_v21 }
 0x4f0   : > { %v9501_v57 = vpop.eup %9500  ;;  %v8602_v16 = vpop.f32.mrb[92].mxu1  ;;  %v6972_v32 = vadd.f32 1.0, %v9499_v38  ;;  %9512 = verf.f32 %v6463_v11  ;;  %v6209_v38 = vmul.f32 0.5, %v5663_v35 }
 0x4f1   : > { %v9503_v17 = vpop.eup %9502  ;;  %v6970_v63 = vadd.f32 1.0, %v9501_v57  ;;  %v5676_v52 = vadd.f32 %v14759_v27, %v8602_v16  ;;  %v5667_v8 = vpop.f32.mrb[93].mxu1  ;;  %v6207_v57 = vmul.f32 0.5, %v5655_v5 }
 0x4f2   : > { %v9505_v7 = vpop.eup %9504  ;;  %v6973_v33 = vadd.f32 1.0, %v9503_v17  ;;  %v5668_v28 = vadd.f32 %v14759_v27, %v5667_v8  ;;  %v8603_v9 = vpop.f32.mrb[94].mxu1  ;;  %v14970_v24 = vmul.f32 %v6972_v32, %v6204_v3 }
 0x4f3   : > { %v6971_v13 = vadd.f32 1.0, %v9505_v7  ;;  %v6468_v18 = vmul.f32 0.70710677, %v5676_v52  ;;  %v5670_v21 = vpop.f32.mrb[95].mxu1  ;;  %v5679_v16 = vadd.f32 %v14759_v27, %v8603_v9  ;;  %v14972_v51 = vmul.f32 %v6970_v63, %v6202_v36 }
 0x4f4   : > { %v6466_v11 = vmul.f32 0.70710677, %v5668_v28  ;;  %18212 = vst [vmem:[#allocation265_spill] sm:$0xff] %v14970_v24  ;;  %v5671_v60 = vadd.f32 %v14759_v27, %v5670_v21  ;;  %v14975_v17 = vmul.f32 %v6973_v33, %v6205_v62  ;;  %v14977_v53 = vmul.f32 0.5, %v5676_v52 }
 0x4f5   : > { %18213 = vst [vmem:[#allocation205_spill] sm:$0xff] %v14972_v51  ;;  %9514 = verf.f32 %v6468_v18  ;;  %v6469_v56 = vmul.f32 0.70710677, %v5679_v16  ;;  %v14980_v8 = vmul.f32 %v6971_v13, %v6203_v45  ;;  %v14982_v3 = vmul.f32 0.5, %v5668_v28 }
 0x4f6   : > { %v8442_v48 = vpop.f32.mrb[4].mxu0  ;;  %18214 = vst [vmem:[#allocation138_spill] sm:$0xff] %v14975_v17  ;;  %9516 = verf.f32 %v6466_v11  ;;  %v14984_v36 = vmul.f32 0.5, %v5679_v16  ;;  %v6467_v52 = vmul.f32 0.70710677, %v5671_v60 }
 0x4f7   : > { %v9507_v31 = vpop.eup %9506  ;;  %v5036_v35 = vadd.f32 %v14759_v27, %v8442_v48  ;;  %v5027_v5 = vpop.f32.mrb[5].mxu0  ;;  %18215 = vst [vmem:[#allocation223_spill] sm:$0xff] %v14980_v8  ;;  %9518 = verf.f32 %v6469_v56  ;;  %v14988_v48 = vmul.f32 0.5, %v5671_v60 }
 0x4f8   : > { %v9509_v32 = vpop.eup %9508  ;;  %v5028_v63 = vadd.f32 %v14759_v27, %v5027_v5  ;;  %v8443_v7 = vpop.f32.mrb[6].mxu0  ;;  %v6976_v62 = vadd.f32 1.0, %v9507_v31 }
 0x4f9   : > { %v8606_v33 = vpop.f32.mrb[96].mxu1  ;;  %v6308_v9 = vmul.f32 0.70710677, %v5036_v35  ;;  %v5039_v18 = vadd.f32 %v14759_v27, %v8443_v7  ;;  %v5030_v21 = vpop.f32.mrb[7].mxu0  ;;  %v6974_v11 = vadd.f32 1.0, %v9509_v32  ;;  %v14990_v13 = vmul.f32 0.5, %v5036_v35 }
 0x4fa   : > { %v5683_v45 = vpop.f32.mrb[97].mxu1  ;;  %v9511_v28 = vpop.eup %9510  ;;  %v14992_v16 = vmul.f32 0.5, %v5028_v63  ;;  %v6306_v4 = vmul.f32 0.70710677, %v5028_v63  ;;  %v5031_v5 = vadd.f32 %v14759_v27, %v5030_v21  ;;  %v14997_v7 = vmul.f32 %v6976_v62, %v6208_v37 }
 0x4fb   : > { %v8607_v31 = vpop.f32.mrb[98].mxu1  ;;  %v9513_v56 = vpop.eup %9512  ;;  %9520 = verf.f32 %v6308_v9  ;;  %v14995_v19 = vmul.f32 0.5, %v5039_v18  ;;  %v6309_v50 = vmul.f32 0.70710677, %v5039_v18  ;;  %v14999_v61 = vmul.f32 %v6974_v11, %v6206_v2 }
 0x4fc   : > { %18216 = vst [vmem:[#allocation167_spill] sm:$0xff] %v14997_v7  ;;  %v5686_v32 = vpop.f32.mrb[99].mxu1  ;;  %9522 = verf.f32 %v6306_v4  ;;  %v6307_v60 = vmul.f32 0.70710677, %v5031_v5  ;;  %v6977_v35 = vadd.f32 1.0, %v9511_v28  ;;  %v6975_v42 = vadd.f32 1.0, %v9513_v56 }
 0x4fd   : > { %18217 = vst [vmem:[#allocation220_spill] sm:$0xff] %v14999_v61  ;;  %9524 = verf.f32 %v6309_v50  ;;  %v5692_v63 = vadd.f32 %v14759_v27, %v8606_v33  ;;  %v5684_v21 = vadd.f32 %v14759_v27, %v5683_v45  ;;  %v15003_v26 = vmul.f32 0.5, %v5031_v5 }
 0x4fe   : > { %9526 = verf.f32 %v6307_v60  ;;  %v8446_v9 = vpop.f32.mrb[8].mxu0  ;;  %v15005_v55 = vmul.f32 %v6977_v35, %v6209_v38  ;;  %v5695_v37 = vadd.f32 %v14759_v27, %v8607_v31  ;;  %v15009_v18 = vmul.f32 %v6975_v42, %v6207_v57 }
 0x4ff   : > { %v9515_v62 = vpop.eup %9514  ;;  %v5052_v4 = vadd.f32 %v14759_v27, %v8446_v9  ;;  %v5043_v2 = vpop.f32.mrb[9].mxu0  ;;  %9528 = verf.f32 %v6467_v52  ;;  %v5687_v50 = vadd.f32 %v14759_v27, %v5686_v32  ;;  %v15013_v5 = vmul.f32 0.5, %v5692_v63 }
 0x500   : > { %18218 = vst [vmem:[#allocation273_spill] sm:$0xff] %v15005_v55  ;;  %18219 = vst [vmem:[#allocation301_spill] sm:$0xff] %v15009_v18  ;;  %v9517_v33 = vpop.eup %9516  ;;  %v5044_v11 = vadd.f32 %v14759_v27, %v5043_v2  ;;  %v8447_v45 = vpop.f32.mrb[10].mxu0  ;;  %v6980_v28 = vadd.f32 1.0, %v9515_v62  ;;  %v6472_v38 = vmul.f32 0.70710677, %v5692_v63 }
 0x501   : > { %v15015_v56 = vpop.f32.mrb[100].mxu1  ;;  %v6312_v31 = vmul.f32 0.70710677, %v5052_v4  ;;  %v5055_v60 = vadd.f32 %v14759_v27, %v8447_v45  ;;  %v5046_v35 = vpop.f32.mrb[11].mxu0  ;;  %v6978_v9 = vadd.f32 1.0, %v9517_v33  ;;  %v15018_v42 = vmul.f32 0.5, %v5684_v21 }
 0x502   : > { %v15020_v57 = vpop.f32.mrb[101].mxu1  ;;  %v9519_v52 = vpop.eup %9518  ;;  %v15022_v32 = vmul.f32 0.5, %v5052_v4  ;;  %v15024_v2 = vmul.f32 0.5, %v5044_v11  ;;  %v6310_v62 = vmul.f32 0.70710677, %v5044_v11  ;;  %v5047_v40 = vadd.f32 %v14759_v27, %v5046_v35 }
 0x503   : > { %v15027_v63 = vpop.f32.mrb[102].mxu1  ;;  %9530 = verf.f32 %v6312_v31  ;;  %v15029_v55 = vmul.f32 0.5, %v5055_v60  ;;  %v6313_v45 = vmul.f32 0.70710677, %v5055_v60  ;;  %v15032_v33 = vmul.f32 %v6980_v28, %v14977_v53 }
 0x504   : > { %v15034_v7 = vpop.f32.mrb[103].mxu1  ;;  %9532 = verf.f32 %v6310_v62  ;;  %v6311_v18 = vmul.f32 0.70710677, %v5047_v40  ;;  %v15037_v4 = vmul.f32 %v6978_v9, %v14982_v3  ;;  %v6981_v61 = vadd.f32 1.0, %v9519_v52 }
 0x505   : > { %18220 = vst [vmem:[#allocation103_spill] sm:$0xff] %v15032_v33  ;;  %v9521_v11 = vpop.eup %9520  ;;  %9534 = verf.f32 %v6313_v45  ;;  %v15039_v35 = vmul.f32 0.5, %v5047_v40  ;;  %v6470_v17 = vmul.f32 0.70710677, %v5684_v21  ;;  %v15041_v31 = vmul.f32 0.5, %v5695_v37 }
 0x506   : > { %18221 = vst [vmem:[#allocation144_spill] sm:$0xff] %v15037_v4  ;;  %v9523_v24 = vpop.eup %9522  ;;  %v6820_v60 = vadd.f32 1.0, %v9521_v11  ;;  %9536 = verf.f32 %v6311_v18  ;;  %v8450_v53 = vpop.f32.mrb[12].mxu0  ;;  %v15044_v28 = vmul.f32 %v6981_v61, %v14984_v36  ;;  %v6473_v62 = vmul.f32 0.70710677, %v5695_v37 }
 0x507   : > { %v9525_v8 = vpop.eup %9524  ;;  %v6818_v51 = vadd.f32 1.0, %v9523_v24  ;;  %v5068_v3 = vadd.f32 %v14759_v27, %v8450_v53  ;;  %v5059_v9 = vpop.f32.mrb[13].mxu0  ;;  %9538 = verf.f32 %v6472_v38  ;;  %v15047_v52 = vmul.f32 0.70710677, %v5687_v50 }
 0x508   : > { %18222 = vst [vmem:[#allocation27_spill] sm:$0xff] %v15044_v28  ;;  %v9527_v40 = vpop.eup %9526  ;;  %v7076_v21 = vmul.f32 %v6820_v60, %v14990_v13  ;;  %v6821_v45 = vadd.f32 1.0, %v9525_v8  ;;  %v5060_v11 = vadd.f32 %v14759_v27, %v5059_v9  ;;  %v8451_v18 = vpop.f32.mrb[14].mxu0  ;;  %9540 = verf.f32 %v6470_v17 }
 0x509   : > { %v15051_v29 = vpop.f32.mrb[104].mxu1  ;;  %v9529_v61 = vpop.eup %9528  ;;  %v7074_v36 = vmul.f32 %v6818_v51, %v14992_v16  ;;  %v6819_v24 = vadd.f32 1.0, %v9527_v40  ;;  %v6316_v37 = vmul.f32 0.70710677, %v5068_v3  ;;  %v15054_v28 = vmul.f32 0.5, %v5687_v50 }
 0x50a   : > { %v5062_v53 = vpop.f32.mrb[15].mxu0  ;;  %v15056_v38 = vpop.f32.mrb[105].mxu1  ;;  %v15059_v25 = vadd.f32 %v14874_v15, %v7076_v21  ;;  %v7077_v8 = vmul.f32 %v6821_v45, %v14995_v19  ;;  %v15062_v13 = vmul.f32 0.5, %v5068_v3  ;;  %v6314_v17 = vmul.f32 0.70710677, %v5060_v11 }
 0x50b   : > { %v15064_v60 = vpop.f32.mrb[106].mxu1  ;;  %v15067_v9 = vadd.f32 %v14878_v14, %v7074_v36  ;;  %v7075_v51 = vmul.f32 %v6819_v24, %v15003_v26  ;;  %9542 = verf.f32 %v6316_v37  ;;  %v5071_v16 = vadd.f32 %v14759_v27, %v8451_v18 }
 0x50c   : > { %v15071_v50 = vpop.f32.mrb[107].mxu1  ;;  %v15074_v15 = vadd.f32 %v14882_v39, %v7077_v8  ;;  %9544 = verf.f32 %v6314_v17  ;;  %v5063_v19 = vadd.f32 %v14759_v27, %v5062_v53  ;;  %v6979_v3 = vadd.f32 1.0, %v9529_v61 }
 0x50d   : > { %v9531_v40 = vpop.eup %9530  ;;  %v15078_v21 = vadd.f32 %v14884_v34, %v7075_v51  ;;  %v15080_v14 = vmul.f32 0.5, %v5060_v11  ;;  %v6317_v45 = vmul.f32 0.70710677, %v5071_v16  ;;  %9546 = verf.f32 %v6473_v62 }
 0x50e   : > { %v9533_v26 = vpop.eup %9532  ;;  %v6824_v36 = vadd.f32 1.0, %v9531_v40  ;;  %v15082_v18 = vmul.f32 0.5, %v5071_v16  ;;  %v15084_v24 = vmul.f32 0.5, %v5063_v19  ;;  %v6315_v39 = vmul.f32 0.70710677, %v5063_v19  ;;  %v8454_v37 = vpop.f32.mrb[16].mxu0 }
 0x50f   : > { %v9535_v8 = vpop.eup %9534  ;;  %v6822_v17 = vadd.f32 1.0, %v9533_v26  ;;  %9548 = verf.f32 %v6317_v45  ;;  %v5084_v61 = vadd.f32 %v14759_v27, %v8454_v37  ;;  %v5075_v53 = vpop.f32.mrb[17].mxu0  ;;  %v15088_v34 = vmul.f32 %v6979_v3, %v14988_v48 }
 0x510   : > { %v9537_v11 = vpop.eup %9536  ;;  %v7080_v62 = vmul.f32 %v6824_v36, %v15022_v32  ;;  %v6825_v51 = vadd.f32 1.0, %v9535_v8  ;;  %9550 = verf.f32 %v6315_v39  ;;  %v5076_v16 = vadd.f32 %v14759_v27, %v5075_v53  ;;  %v8455_v40 = vpop.f32.mrb[18].mxu0 }
 0x511   : > { %18223 = vst [vmem:[#allocation229_spill] sm:$0xff] %v15088_v34  ;;  %v15092_v4 = vpop.f32.mrb[108].mxu1  ;;  %v9539_v19 = vpop.eup %9538  ;;  %v7078_v26 = vmul.f32 %v6822_v17, %v15024_v2  ;;  %v6823_v45 = vadd.f32 1.0, %v9537_v11  ;;  %v6320_v33 = vmul.f32 0.70710677, %v5084_v61  ;;  %v15097_v48 = vadd.f32 %v14759_v27, %v15015_v56 }
 0x512   : > { %v5078_v37 = vpop.f32.mrb[19].mxu0  ;;  %v15099_v3 = vpop.f32.mrb[109].mxu1  ;;  %v15102_v36 = vadd.f32 %v14905_v59, %v7080_v62  ;;  %v7081_v39 = vmul.f32 %v6825_v51, %v15029_v55  ;;  %v15105_v8 = vmul.f32 0.5, %v5084_v61  ;;  %v6318_v53 = vmul.f32 0.70710677, %v5076_v16 }
 0x513   : > { %v9541_v32 = vpop.eup %9540  ;;  %v15107_v34 = vpop.f32.mrb[110].mxu1  ;;  %v15110_v2 = vadd.f32 %v14908_v49, %v7078_v26  ;;  %v7079_v17 = vmul.f32 %v6823_v45, %v15039_v35  ;;  %9552 = verf.f32 %v6320_v33  ;;  %v5087_v56 = vadd.f32 %v14759_v27, %v8455_v40 }
 0x514   : > { %18224 = vst [vmem:[#allocation37_spill] sm:$0xff] %v15102_v36  ;;  %v15114_v11 = vpop.f32.mrb[111].mxu1  ;;  %v15117_v59 = vadd.f32 %v14911_v43, %v7081_v39  ;;  %9554 = verf.f32 %v6318_v53  ;;  %v5079_v55 = vadd.f32 %v14759_v27, %v5078_v37  ;;  %v6984_v61 = vadd.f32 1.0, %v9539_v19 }
 0x515   : > { %v9543_v62 = vpop.eup %9542  ;;  %v15121_v51 = vadd.f32 %v14914_v12, %v7079_v17  ;;  %v15123_v49 = vmul.f32 0.5, %v5076_v16  ;;  %v6321_v26 = vmul.f32 0.70710677, %v5087_v56  ;;  %v6982_v35 = vadd.f32 1.0, %v9541_v32 }
 0x516   : > { %18225 = vst [vmem:[#allocation39_spill] sm:$0xff] %v15117_v59  ;;  %v9545_v33 = vpop.eup %9544  ;;  %v6828_v45 = vadd.f32 1.0, %v9543_v62  ;;  %v15125_v40 = vmul.f32 0.5, %v5087_v56  ;;  %v15127_v36 = vmul.f32 0.5, %v5079_v55  ;;  %v6319_v43 = vmul.f32 0.70710677, %v5079_v55 }
 0x517   : > { %18226 = vst [vmem:[#allocation181_spill] sm:$0xff] %v15121_v51  ;;  %v8458_v39 = vpop.f32.mrb[20].mxu0  ;;  %v9547_v53 = vpop.eup %9546  ;;  %v6826_v59 = vadd.f32 1.0, %v9545_v33  ;;  %9556 = verf.f32 %v6321_v26  ;;  %v15131_v12 = vmul.f32 %v6984_v61, %v15013_v5  ;;  %v15136_v56 = vmul.f32 %v6982_v35, %v15018_v42 }
 0x518   : > { %v5100_v19 = vadd.f32 %v14759_v27, %v8458_v39  ;;  %v5091_v37 = vpop.f32.mrb[21].mxu0  ;;  %v7084_v16 = vmul.f32 %v6828_v45, %v15062_v13  ;;  %9558 = verf.f32 %v6319_v43  ;;  %v15138_v55 = vpop.f32.mrb[112].mxu1  ;;  %v6985_v5 = vadd.f32 1.0, %v9547_v53 }
 0x519   : > { %v5092_v32 = vadd.f32 %v14759_v27, %v5091_v37  ;;  %v8459_v17 = vpop.f32.mrb[22].mxu0  ;;  %18227 = vst [vmem:[#allocation54_spill] sm:$0xff] %v15136_v56  ;;  %v9549_v62 = vpop.eup %9548  ;;  %v7082_v26 = vmul.f32 %v6826_v59, %v15080_v14 }
 0x51a   : > { %v6324_v33 = vmul.f32 0.70710677, %v5100_v19  ;;  %v5103_v39 = vadd.f32 %v14759_v27, %v8459_v17  ;;  %v5094_v51 = vpop.f32.mrb[23].mxu0  ;;  %v15142_v61 = vpop.f32.mrb[113].mxu1  ;;  %v15145_v45 = vadd.f32 %v14919_v22, %v7084_v16  ;;  %v6829_v43 = vadd.f32 1.0, %v9549_v62 }
 0x51b   : > { %v9551_v13 = vpop.eup %9550  ;;  %v15147_v37 = vmul.f32 0.5, %v5100_v19  ;;  %v6322_v42 = vmul.f32 0.70710677, %v5092_v32  ;;  %v15149_v35 = vpop.f32.mrb[114].mxu1  ;;  %v15152_v56 = vadd.f32 %v14922_v44, %v7082_v26  ;;  %v15154_v59 = vmul.f32 0.5, %v5092_v32 }
 0x51c   : > { %18228 = vst [vmem:[#allocation107_spill] sm:$0xff] %v15145_v45  ;;  %v6827_v14 = vadd.f32 1.0, %v9551_v13  ;;  %9560 = verf.f32 %v6324_v33  ;;  %v15156_v53 = vpop.f32.mrb[115].mxu1  ;;  %v7085_v17 = vmul.f32 %v6829_v43, %v15082_v18  ;;  %v6325_v22 = vmul.f32 0.70710677, %v5103_v39 }
 0x51d   : > { %18229 = vst [vmem:[#allocation243_spill] sm:$0xff] %v15152_v56  ;;  %9562 = verf.f32 %v6322_v42  ;;  %v5095_v16 = vadd.f32 %v14759_v27, %v5094_v51  ;;  %v9553_v19 = vpop.eup %9552  ;;  %v15161_v45 = vmul.f32 0.5, %v5103_v39  ;;  %v15164_v44 = vmul.f32 %v6985_v5, %v15041_v31 }
 0x51e   : > { %v7083_v62 = vmul.f32 %v6827_v14, %v15084_v24  ;;  %9564 = verf.f32 %v15047_v52  ;;  %v9555_v32 = vpop.eup %9554  ;;  %v15168_v26 = vadd.f32 %v14926_v58, %v7085_v17  ;;  %v6832_v33 = vadd.f32 1.0, %v9553_v19  ;;  %v8462_v18 = vpop.f32.mrb[24].mxu0 }
 0x51f   : > { %9566 = verf.f32 %v6325_v22  ;;  %v15171_v13 = vmul.f32 0.5, %v15097_v48  ;;  %v6830_v24 = vadd.f32 1.0, %v9555_v32  ;;  %v6323_v39 = vmul.f32 0.70710677, %v5095_v16  ;;  %v5107_v5 = vpop.f32.mrb[25].mxu0 }
 0x520   : > { %18230 = vst [vmem:[#allocation275_spill] sm:$0xff] %v15168_v26  ;;  %v15174_v51 = vadd.f32 %v14931_v0, %v7083_v62  ;;  %v5116_v31 = vadd.f32 %v14759_v27, %v8462_v18  ;;  %v7088_v52 = vmul.f32 %v6832_v33, %v15105_v8  ;;  %v15178_v43 = vmul.f32 0.5, %v5095_v16  ;;  %v8463_v42 = vpop.f32.mrb[26].mxu0  ;;  %v15182_v17 = vpop.f32.mrb[116].mxu1 }
 0x521   : > { %v5108_v58 = vadd.f32 %v14759_v27, %v5107_v5  ;;  %v6476_v14 = vmul.f32 0.70710677, %v15097_v48  ;;  %v9557_v22 = vpop.eup %9556  ;;  %v7086_v0 = vmul.f32 %v6830_v24, %v15123_v49  ;;  %9568 = verf.f32 %v6323_v39  ;;  %v5110_v62 = vpop.f32.mrb[27].mxu0 }
 0x522   : > { %18231 = vst [vmem:[#allocation64_spill] sm:$0xff] %v15174_v51  ;;  %v6328_v19 = vmul.f32 0.70710677, %v5116_v31  ;;  %v5700_v32 = vadd.f32 %v14759_v27, %v15020_v57  ;;  %v15187_v18 = vpop.f32.mrb[117].mxu1  ;;  %v9559_v8 = vpop.eup %9558  ;;  %v15190_v16 = vadd.f32 %v14935_v30, %v7088_v52  ;;  %v6833_v33 = vadd.f32 1.0, %v9557_v22 }
 0x523   : > { %v15192_v5 = vmul.f32 0.5, %v5116_v31  ;;  %v6326_v48 = vmul.f32 0.70710677, %v5108_v58  ;;  %v15194_v26 = vpop.f32.mrb[118].mxu1  ;;  %v15197_v49 = vadd.f32 %v14937_v23, %v7086_v0  ;;  %v6831_v24 = vadd.f32 1.0, %v9559_v8 }
 0x524   : > { %18232 = vst [vmem:[#allocation77_spill] sm:$0xff] %v15190_v16  ;;  %18233 = vst [vmem:[#allocation63_spill] sm:$0xff] %v15194_v26  ;;  %9570 = verf.f32 %v6328_v19  ;;  %v15202_v27 = vld [vmem:[%s16778_s17] ss:$0 sm:$0xff]  ;;  %v15205_v30 = vpop.f32.mrb[119].mxu1  ;;  %v7089_v39 = vmul.f32 %v6833_v33, %v15125_v40  ;;  %v15208_v31 = vmul.f32 0.5, %v5108_v58 }
 0x525   : > { %18234 = vst [vmem:[#allocation268_spill] sm:$0xff] %v15197_v49  ;;  %v5119_v57 = vadd.f32 %v15202_v27, %v8463_v42  ;;  %18235 = vst [vmem:[#allocation241_spill] sm:$0xff] %v15205_v30  ;;  %9572 = verf.f32 %v6326_v48  ;;  %v5111_v52 = vadd.f32 %v15202_v27, %v5110_v62  ;;  %v7087_v22 = vmul.f32 %v6831_v24, %v15127_v36 }
 0x526   : > { %v9561_v23 = vpop.eup %9560  ;;  %9574 = verf.f32 %v6476_v14  ;;  %v15212_v19 = vmul.f32 0.5, %v5700_v32  ;;  %v15215_v16 = vadd.f32 %v14940_v1, %v7089_v39  ;;  %v8466_v58 = vpop.f32.mrb[28].mxu0 }
 0x527   : > { %v6329_v0 = vmul.f32 0.70710677, %v5119_v57  ;;  %v9563_v8 = vpop.eup %9562  ;;  %v6836_v42 = vadd.f32 1.0, %v9561_v23  ;;  %v15217_v49 = vmul.f32 0.5, %v5119_v57  ;;  %v6327_v40 = vmul.f32 0.70710677, %v5111_v52 }
 0x528   : > { %18236 = vst [vmem:[#allocation254_spill] sm:$0xff] %v15215_v16  ;;  %v9565_v33 = vpop.eup %9564  ;;  %v15220_v48 = vadd.f32 %v14944_v20, %v7087_v22  ;;  %v6834_v62 = vadd.f32 1.0, %v9563_v8  ;;  %v5132_v36 = vadd.f32 %v15202_v27, %v8466_v58  ;;  %v5123_v14 = vpop.f32.mrb[29].mxu0  ;;  %v15223_v51 = vmul.f32 0.5, %v5111_v52 }
 0x529   : > { %9576 = verf.f32 %v6329_v0  ;;  %v9567_v24 = vpop.eup %9566  ;;  %v5124_v1 = vadd.f32 %v15202_v27, %v5123_v14  ;;  %v8467_v39 = vpop.f32.mrb[30].mxu0  ;;  %v6983_v57 = vadd.f32 1.0, %v9565_v33  ;;  %v15229_v16 = vmul.f32 %v6836_v42, %v15147_v37 }
 0x52a   : > { %18237 = vst [vmem:[#allocation278_spill] sm:$0xff] %v15220_v48  ;;  %9578 = verf.f32 %v6327_v40  ;;  %v15226_v23 = vpop.f32.mrb[120].mxu1  ;;  %v15232_v20 = vmul.f32 %v6834_v62, %v15154_v59  ;;  %v6837_v22 = vadd.f32 1.0, %v9567_v24  ;;  %v6332_v0 = vmul.f32 0.70710677, %v5132_v36  ;;  %v5126_v8 = vpop.f32.mrb[31].mxu0 }
 0x52b   : > { %18238 = vst [vmem:[#allocation297_spill] sm:$0xff] %v15226_v23  ;;  %v15234_v58 = vpop.f32.mrb[121].mxu1  ;;  %v15236_v52 = vmul.f32 0.5, %v5132_v36  ;;  %v15238_v40 = vmul.f32 0.5, %v5124_v1  ;;  %v6330_v14 = vmul.f32 0.70710677, %v5124_v1  ;;  %v5135_v33 = vadd.f32 %v15202_v27, %v8467_v39  ;;  %v9569_v23 = vpop.eup %9568 }
 0x52c   : > { %18239 = vst [vmem:[#allocation319_spill] sm:$0xff] %v15234_v58  ;;  %v15241_v48 = vpop.f32.mrb[122].mxu1  ;;  %9580 = verf.f32 %v6332_v0  ;;  %v15244_v37 = vmul.f32 %v6983_v57, %v15054_v28  ;;  %v5127_v59 = vadd.f32 %v15202_v27, %v5126_v8  ;;  %v6474_v42 = vmul.f32 0.70710677, %v5700_v32 }
 0x52d   : > { %18240 = vst [vmem:[#allocation35_spill] sm:$0xff] %v15241_v48  ;;  %v15247_v62 = vpop.f32.mrb[123].mxu1  ;;  %v15250_v36 = vmul.f32 %v6837_v22, %v15161_v45  ;;  %v6835_v24 = vadd.f32 1.0, %v9569_v23  ;;  %9582 = verf.f32 %v6330_v14  ;;  %v6333_v1 = vmul.f32 0.70710677, %v5135_v33 }
 0x52e   : > { %18241 = vst [vmem:[#allocation296_spill] sm:$0xff] %v15244_v37  ;;  %18242 = vst [vmem:[#allocation315_spill] sm:$0xff] %v15247_v62  ;;  %v9571_v58 = vpop.eup %9570  ;;  %v15252_v39 = vmul.f32 0.5, %v5135_v33  ;;  %v6331_v48 = vmul.f32 0.70710677, %v5127_v59  ;;  %9584 = verf.f32 %v6474_v42  ;;  %v5711_v28 = vadd.f32 %v15202_v27, %v15027_v63  ;;  %v8470_v45 = vpop.f32.mrb[32].mxu0 }
 0x52f   : > { %v9573_v57 = vpop.eup %9572  ;;  %v7091_v0 = vmul.f32 %v6835_v24, %v15178_v43  ;;  %v6840_v32 = vadd.f32 1.0, %v9571_v58  ;;  %9586 = verf.f32 %v6333_v1  ;;  %v15257_v8 = vmul.f32 0.5, %v5127_v59  ;;  %v5139_v33 = vpop.f32.mrb[33].mxu0 }
 0x530   : > { %v9575_v22 = vpop.eup %9574  ;;  %v6838_v23 = vadd.f32 1.0, %v9573_v57  ;;  %9588 = verf.f32 %v6331_v48  ;;  %v5148_v14 = vadd.f32 %v15202_v27, %v8470_v45  ;;  %v5703_v42 = vadd.f32 %v15202_v27, %v15034_v7  ;;  %v8471_v59 = vpop.f32.mrb[34].mxu0 }
 0x531   : > { %v15263_v62 = vmul.f32 %v6840_v32, %v15192_v5  ;;  %v6988_v63 = vadd.f32 1.0, %v9575_v22  ;;  %v5140_v43 = vadd.f32 %v15202_v27, %v5139_v33  ;;  %v15266_v58 = vmul.f32 0.5, %v5711_v28  ;;  %v15268_v24 = vpop.f32.mrb[124].mxu1  ;;  %v5142_v7 = vpop.f32.mrb[35].mxu0 }
 0x532   : > { %18243 = vst [vmem:[#allocation325_spill] sm:$0xff] %v15268_v24  ;;  %v15271_v48 = vmul.f32 %v6838_v23, %v15208_v31  ;;  %v6336_v57 = vmul.f32 0.70710677, %v5148_v14  ;;  %v6477_v45 = vmul.f32 0.70710677, %v5711_v28  ;;  %v5151_v56 = vadd.f32 %v15202_v27, %v8471_v59  ;;  %v15274_v30 = vpop.f32.mrb[125].mxu1 }
 0x533   : > { %v9577_v1 = vpop.eup %9576  ;;  %18244 = vst [vmem:[#allocation130_spill] sm:$0xff] %v15274_v30  ;;  %v15277_v22 = vmul.f32 %v6988_v63, %v15171_v13  ;;  %v15279_v33 = vmul.f32 0.5, %v5148_v14  ;;  %v6334_v26 = vmul.f32 0.70710677, %v5140_v43  ;;  %v15281_v24 = vpop.f32.mrb[126].mxu1  ;;  %v15283_v31 = vmul.f32 0.5, %v5140_v43 }
 0x534   : > { %v9579_v5 = vpop.eup %9578  ;;  %v6841_v32 = vadd.f32 1.0, %v9577_v1  ;;  %18246 = vst [vmem:[#allocation126_spill] sm:$0xff] %v15281_v24  ;;  %9590 = verf.f32 %v6336_v57  ;;  %v6337_v28 = vmul.f32 0.70710677, %v5151_v56  ;;  %v15285_v23 = vpop.f32.mrb[127].mxu1  ;;  %v15290_v1 = vmul.f32 0.5, %v5151_v56 }
 0x535   : > { %18245 = vst [vmem:[#allocation213_spill] sm:$0xff] %v15277_v22  ;;  %v6839_v37 = vadd.f32 1.0, %v9579_v5  ;;  %18247 = vst [vmem:[#allocation207_spill] sm:$0xff] %v15285_v23  ;;  %9592 = verf.f32 %v6334_v26  ;;  %v6475_v13 = vmul.f32 0.70710677, %v5703_v42  ;;  %v15295_v5 = vmul.f32 0.5, %v5703_v42 }
 0x536   : > { %v15288_v59 = vmul.f32 %v6841_v32, %v15217_v49  ;;  %v7522_v14 = vld [vmem:[%s16779_s18] sm:$0xf]  ;;  %v9581_v63 = vpop.eup %9580  ;;  %9594 = verf.f32 %v6477_v45  ;;  %v5143_v43 = vadd.f32 %v15202_v27, %v5142_v7  ;;  %v7346_v57 = vadd.f32 %v14951_v10, %v15232_v20  ;;  %v8474_v23 = vpop.f32.mrb[36].mxu0 }
 0x537   : > { %8348 = vmatprep.mubr.bf16.mxu0 %v7522_v14  ;;  %v9583_v49 = vpop.eup %9582  ;;  %v6844_v32 = vadd.f32 1.0, %v9581_v63  ;;  %9596 = verf.f32 %v6337_v28  ;;  %v7347_v56 = vadd.f32 %v14957_v54, %v7091_v0  ;;  %v7458_v26 = vpack.c.bf16 %v15078_v21, %v15067_v9  ;;  %v5155_v30 = vpop.f32.mrb[37].mxu0 }
 0x538   : > { %v9585_v24 = vpop.eup %9584  ;;  %v15304_v45 = vmul.f32 %v6839_v37, %v15223_v51  ;;  %v6842_v42 = vadd.f32 1.0, %v9583_v49  ;;  %9598 = verf.f32 %v6475_v13  ;;  %v6335_v7 = vmul.f32 0.70710677, %v5143_v43  ;;  %v8475_v0 = vpop.f32.mrb[38].mxu0 }
 0x539   : > { %v9587_v22 = vpop.eup %9586  ;;  %v6986_v10 = vadd.f32 1.0, %v9585_v24  ;;  %v15306_v20 = vmul.f32 0.5, %v5143_v43  ;;  %v7466_v14 = vpack.c.bf16 %v7347_v56, %v7346_v57  ;;  %v7348_v54 = vadd.f32 %v14949_v6, %v15229_v16  ;;  %v15310_v28 = vpop.f32.mrb[128].mxu1 }
 0x53a   : > { %v9589_v9 = vpop.eup %9588  ;;  %v15313_v21 = vmul.f32 %v6844_v32, %v15236_v52  ;;  %v6845_v51 = vadd.f32 1.0, %v9587_v22  ;;  %9600 = verf.f32 %v6335_v7  ;;  %v7349_v37 = vadd.f32 %v14954_v47, %v15250_v36  ;;  %v15317_v13 = vpop.f32.mrb[39].mxu0 }
 0x53b   : > { %v15319_v24 = vpop.f32.mrb[129].mxu1  ;;  %v15322_v63 = vmul.f32 %v6842_v42, %v15238_v40  ;;  %v6843_v6 = vadd.f32 1.0, %v9589_v9  ;;  %8332 = vmatprep.subr.bf16.mxu0 %v7466_v14  ;;  %v5724_v16 = vadd.f32 %v15202_v27, %v15051_v29  ;;  %v5164_v52 = vadd.f32 %v15202_v27, %v8474_v23 }
 0x53c   : > { %v15327_v43 = vpop.f32.mrb[130].mxu1  ;;  %v15330_v22 = vmul.f32 %v6986_v10, %v15212_v19  ;;  %8333 = vmatpush3.bf16.xpose.msra.mxu0 %v7458_v26  ;;  %v7467_v47 = vpack.c.bf16 %v7349_v37, %v7348_v54  ;;  %v5716_v36 = vadd.f32 %v15202_v27, %v15056_v38  ;;  %v5156_v40 = vadd.f32 %v15202_v27, %v5155_v30 }
 0x53d   : > { %v15335_v57 = vpop.f32.mrb[131].mxu1  ;;  %v15338_v49 = vmul.f32 %v6845_v51, %v15252_v39  ;;  %v15341_v29 = vmul.f32 %v6843_v6, %v15257_v8  ;;  %v15343_v23 = vmul.f32 0.5, %v5724_v16  ;;  %v6480_v32 = vmul.f32 0.70710677, %v5724_v16 }
 0x53e   : > { %18248 = vst [vmem:[#allocation260_spill] sm:$0xff] %v15335_v57  ;;  %v9591_v19 = vpop.eup %9590  ;;  %8334 = vmatprep.subr.bf16.mxu0 %v7467_v47  ;;  %v15345_v56 = vmul.f32 0.5, %v5164_v52  ;;  %v6340_v26 = vmul.f32 0.70710677, %v5164_v52  ;;  %v15347_v42 = vmul.f32 0.5, %v5716_v36  ;;  %v5727_v39 = vadd.f32 %v15202_v27, %v15064_v60  ;;  %v8478_v8 = vpop.f32.mrb[40].mxu0 }
 0x53f   : > { %v6478_v38 = vmul.f32 0.70710677, %v5716_v36  ;;  %v9593_v30 = vpop.eup %9592  ;;  %v6848_v7 = vadd.f32 1.0, %v9591_v19  ;;  %9602 = verf.f32 %v6480_v32  ;;  %v6338_v10 = vmul.f32 0.70710677, %v5156_v40  ;;  %v5171_v37 = vpop.f32.mrb[41].mxu0 }
 0x540   : > { %v9595_v14 = vpop.eup %9594  ;;  %v6846_v54 = vadd.f32 1.0, %v9593_v30  ;;  %9604 = verf.f32 %v6340_v26  ;;  %v5167_v9 = vadd.f32 %v15202_v27, %v8475_v0  ;;  %v5719_v51 = vadd.f32 %v15202_v27, %v15071_v50  ;;  %v15359_v36 = vpop.f32.mrb[42].mxu0 }
 0x541   : > { %v9597_v6 = vpop.eup %9596  ;;  %v15355_v16 = vmul.f32 %v6848_v7, %v15279_v33  ;;  %v6989_v52 = vadd.f32 1.0, %v9595_v14  ;;  %9606 = verf.f32 %v6478_v38  ;;  %v15357_v47 = vmul.f32 0.5, %v5156_v40  ;;  %v15361_v60 = vpop.f32.mrb[132].mxu1 }
 0x542   : > { %18249 = vst [vmem:[#allocation281_spill] sm:$0xff] %v15361_v60  ;;  %v9599_v32 = vpop.eup %9598  ;;  %v6849_v19 = vadd.f32 1.0, %v9597_v6  ;;  %9608 = verf.f32 %v6338_v10  ;;  %v15363_v0 = vmul.f32 0.5, %v5727_v39  ;;  %v6481_v26 = vmul.f32 0.70710677, %v5727_v39  ;;  %v15365_v50 = vpop.f32.mrb[43].mxu0 }
 0x543   : > { %v15367_v30 = vpop.f32.mrb[133].mxu1  ;;  %v15370_v33 = vmul.f32 %v6846_v54, %v15283_v31  ;;  %v15373_v40 = vmul.f32 %v6989_v52, %v15266_v58  ;;  %v6987_v38 = vadd.f32 1.0, %v9599_v32  ;;  %v6341_v7 = vmul.f32 0.70710677, %v5167_v9 }
 0x544   : > { %18250 = vst [vmem:[#allocation129_spill] sm:$0xff] %v15367_v30  ;;  %v15375_v14 = vpop.f32.mrb[134].mxu1  ;;  %v9601_v60 = vpop.eup %9600  ;;  %v15378_v10 = vmul.f32 %v6849_v19, %v15290_v1  ;;  %9610 = verf.f32 %v6481_v26  ;;  %v15380_v39 = vmul.f32 0.5, %v5167_v9  ;;  %v6479_v6 = vmul.f32 0.70710677, %v5719_v51 }
 0x545   : > { %18251 = vst [vmem:[#allocation79_spill] sm:$0xff] %v15375_v14  ;;  %v15382_v57 = vpop.f32.mrb[135].mxu1  ;;  %v6847_v30 = vadd.f32 1.0, %v9601_v60  ;;  %9612 = verf.f32 %v6341_v7  ;;  %v15384_v31 = vmul.f32 0.5, %v5719_v51  ;;  %v5159_v58 = vadd.f32 %v15202_v27, %v15317_v13 }
 0x546   : > { %18252 = vst [vmem:[#allocation299_spill] sm:$0xff] %v15382_v57  ;;  %9614 = verf.f32 %v6479_v6  ;;  %v7459_v54 = vpack.c.bf16 %v15074_v15, %v15059_v25  ;;  %v7350_v1 = vadd.f32 %v14961_v41, %v15271_v48  ;;  %v7351_v9 = vadd.f32 %v14967_v46, %v15304_v45  ;;  %v15402_v32 = vpop.f32.mrb[44].mxu0  ;;  %v18257_v57 = vld [vmem:[#allocation103_spill] sm:$0xff] }
 0x547   : > { %v15395_v52 = vmul.f32 %v6987_v38, %v15295_v5  ;;  %v15398_v60 = vmul.f32 %v6847_v30, %v15306_v20  ;;  %v6339_v51 = vmul.f32 0.70710677, %v5159_v58  ;;  %v5740_v13 = vadd.f32 %v15202_v27, %v15092_v4  ;;  %v15408_v48 = vpop.f32.mrb[45].mxu0 }
 0x548   : > { %8335 = vmatpush3.bf16.xpose.msra.mxu0 %v7459_v54  ;;  %v7468_v25 = vpack.c.bf16 %v7351_v9, %v7350_v1  ;;  %v5180_v15 = vadd.f32 %v15202_v27, %v8478_v8  ;;  %v5732_v41 = vadd.f32 %v15202_v27, %v15099_v3  ;;  %v5172_v46 = vadd.f32 %v15202_v27, %v5171_v37  ;;  %v15414_v19 = vpop.f32.mrb[46].mxu0  ;;  %v15416_v26 = vpop.f32.mrb[136].mxu1 }
 0x549   : > { %v9603_v5 = vpop.eup %9602  ;;  %v15410_v45 = vmul.f32 0.5, %v5159_v58  ;;  %9616 = verf.f32 %v6339_v51  ;;  %v15412_v20 = vmul.f32 0.5, %v5740_v13  ;;  %v6484_v4 = vmul.f32 0.70710677, %v5740_v13  ;;  %18253 = vst [vmem:[#allocation266_spill] sm:$0xff] %v15416_v26  ;;  %v15422_v7 = vpop.f32.mrb[47].mxu0 }
 0x54a   : > { %v9605_v30 = vpop.eup %9604  ;;  %v6992_v8 = vadd.f32 1.0, %v9603_v5  ;;  %8336 = vmatprep.subr.bf16.mxu0 %v7468_v25  ;;  %v15418_v38 = vmul.f32 0.5, %v5180_v15  ;;  %v6344_v3 = vmul.f32 0.70710677, %v5180_v15  ;;  %v5743_v37 = vadd.f32 %v15202_v27, %v15107_v34  ;;  %v15426_v9 = vpop.f32.mrb[137].mxu1 }
 0x54b   : > { %v9607_v6 = vpop.eup %9606  ;;  %v6852_v58 = vadd.f32 1.0, %v9605_v30  ;;  %9618 = verf.f32 %v6484_v4  ;;  %v15424_v54 = vmul.f32 0.5, %v5732_v41  ;;  %v6482_v1 = vmul.f32 0.70710677, %v5732_v41  ;;  %18254 = vst [vmem:[#allocation36_spill] sm:$0xff] %v15426_v9  ;;  %v15430_v15 = vpop.f32.mrb[138].mxu1 }
 0x54c   : > { %v9609_v51 = vpop.eup %9608  ;;  %v6990_v13 = vadd.f32 1.0, %v9607_v6  ;;  %9620 = verf.f32 %v6344_v3  ;;  %v15428_v25 = vmul.f32 0.5, %v5172_v46  ;;  %v6342_v5 = vmul.f32 0.70710677, %v5172_v46  ;;  %18255 = vst [vmem:[#allocation22_spill] sm:$0xff] %v15430_v15  ;;  %v15436_v4 = vpop.f32.mrb[139].mxu1 }
 0x54d   : > { %v15433_v34 = vmul.f32 %v6992_v8, %v15343_v23  ;;  %v7108_v26 = vmul.f32 %v6852_v58, %v15345_v56  ;;  %v6850_v30 = vadd.f32 1.0, %v9609_v51  ;;  %9622 = verf.f32 %v6482_v1  ;;  %18256 = vst [vmem:[#allocation20_spill] sm:$0xff] %v15436_v4  ;;  %v18259_v4 = vld [vmem:[#allocation144_spill] sm:$0xff] }
 0x54e   : > { %v9611_v41 = vpop.eup %9610  ;;  %9624 = verf.f32 %v6342_v5  ;;  %v15438_v9 = vmul.f32 0.5, %v5743_v37  ;;  %v6485_v6 = vmul.f32 0.70710677, %v5743_v37  ;;  %v5183_v3 = vadd.f32 %v15202_v27, %v15359_v36  ;;  %v15448_v58 = vpop.f32.mrb[48].mxu0 }
 0x54f   : > { %v9613_v46 = vpop.eup %9612  ;;  %v15443_v15 = vadd.f32 %v18257_v57, %v7108_v26  ;;  %v7106_v23 = vmul.f32 %v6850_v30, %v15357_v47  ;;  %v6993_v8 = vadd.f32 1.0, %v9611_v41  ;;  %v5735_v56 = vadd.f32 %v15202_v27, %v15114_v11  ;;  %v15453_v36 = vpop.f32.mrb[49].mxu0 }
 0x550   : > { %v9615_v1 = vpop.eup %9614  ;;  %v15451_v51 = vmul.f32 %v6990_v13, %v15347_v42  ;;  %v6853_v37 = vadd.f32 1.0, %v9613_v46  ;;  %9626 = verf.f32 %v6485_v6  ;;  %v6345_v5 = vmul.f32 0.70710677, %v5183_v3  ;;  %v15463_v11 = vpop.f32.mrb[50].mxu0 }
 0x551   : > { %18258 = vst [vmem:[#allocation21_spill] sm:$0xff] %v15443_v15  ;;  %v15456_v57 = vadd.f32 %v18259_v4, %v7106_v23  ;;  %v15459_v47 = vmul.f32 %v6993_v8, %v15363_v0  ;;  %v6991_v26 = vadd.f32 1.0, %v9615_v1  ;;  %v15461_v30 = vmul.f32 0.5, %v5183_v3  ;;  %v15465_v41 = vpop.f32.mrb[140].mxu1  ;;  %v15470_v46 = vpop.f32.mrb[51].mxu0  ;;  %v18263_v3 = vld [vmem:[#allocation181_spill] sm:$0xff] }
 0x552   : > { %18261 = vst [vmem:[#allocation46_spill] sm:$0xff] %v15465_v41  ;;  %v7109_v42 = vmul.f32 %v6853_v37, %v15380_v39  ;;  %9628 = verf.f32 %v6345_v5  ;;  %v6483_v13 = vmul.f32 0.70710677, %v5735_v56  ;;  %v5175_v6 = vadd.f32 %v15202_v27, %v15365_v50  ;;  %v15472_v4 = vpop.f32.mrb[141].mxu1  ;;  %v18264_v1 = vld [vmem:[#allocation201_spill] sm:$0xff]  ;;  %v18267_v15 = vld [vmem:[#allocation27_spill] sm:$0xff] }
 0x553   : > { %18260 = vst [vmem:[#allocation49_spill] sm:$0xff] %v15456_v57  ;;  %18262 = vst [vmem:[#allocation94_spill] sm:$0xff] %v15472_v4  ;;  %v9617_v0 = vpop.eup %9616  ;;  %v15474_v23 = vmul.f32 0.5, %v5735_v56  ;;  %v7460_v8 = vpack.c.bf16 %v18263_v3, %v15110_v2  ;;  %v7352_v41 = vadd.f32 %v18264_v1, %v15263_v62  ;;  %v18265_v39 = vld [vmem:[#allocation149_spill] sm:$0xff]  ;;  %v15482_v5 = vpop.f32.mrb[142].mxu1  ;;  %v15488_v57 = vmul.f32 %v6991_v26, %v15384_v31 }
 0x554   : > { %v7353_v37 = vadd.f32 %v18265_v39, %v15288_v59  ;;  %18266 = vst [vmem:[#allocation118_spill] sm:$0xff] %v15482_v5  ;;  %v15485_v50 = vadd.f32 %v18267_v15, %v7109_v42  ;;  %v6851_v4 = vadd.f32 1.0, %v9617_v0  ;;  %9630 = verf.f32 %v6483_v13  ;;  %v15490_v56 = vpop.f32.mrb[143].mxu1  ;;  %v18270_v39 = vld [vmem:[#allocation229_spill] sm:$0xff] }
 0x555   : > { %18269 = vst [vmem:[#allocation177_spill] sm:$0xff] %v15490_v56  ;;  %v9619_v14 = vpop.eup %9618  ;;  %v6343_v2 = vmul.f32 0.70710677, %v5175_v6  ;;  %8337 = vmatpush3.bf16.xpose.msra.mxu0 %v7460_v8  ;;  %v5756_v62 = vadd.f32 %v15202_v27, %v15138_v55  ;;  %v5196_v59 = vadd.f32 %v15202_v27, %v15402_v32  ;;  %v15497_v31 = vmul.f32 0.5, %v5175_v6 }
 0x556   : > { %18268 = vst [vmem:[#allocation47_spill] sm:$0xff] %v15485_v50  ;;  %v7469_v3 = vpack.c.bf16 %v7353_v37, %v7352_v41  ;;  %v9621_v1 = vpop.eup %9620  ;;  %v7107_v15 = vmul.f32 %v6851_v4, %v15410_v45  ;;  %v6996_v42 = vadd.f32 1.0, %v9619_v14  ;;  %v5748_v26 = vadd.f32 %v15202_v27, %v15142_v61  ;;  %v15503_v8 = vpop.f32.mrb[52].mxu0 }
 0x557   : > { %v9623_v13 = vpop.eup %9622  ;;  %v6856_v0 = vadd.f32 1.0, %v9621_v1  ;;  %9632 = verf.f32 %v6343_v2  ;;  %v6488_v41 = vmul.f32 0.70710677, %v5756_v62  ;;  %v5188_v55 = vadd.f32 %v15202_v27, %v15408_v48  ;;  %v15513_v61 = vpop.f32.mrb[53].mxu0 }
 0x558   : > { %8338 = vmatprep.subr.bf16.mxu0 %v7469_v3  ;;  %v9625_v32 = vpop.eup %9624  ;;  %v15506_v37 = vadd.f32 %v18270_v39, %v7107_v15  ;;  %v15509_v14 = vmul.f32 %v6996_v42, %v15412_v20  ;;  %v6994_v45 = vadd.f32 1.0, %v9623_v13  ;;  %v15511_v6 = vmul.f32 0.5, %v5756_v62  ;;  %v15516_v48 = vpop.f32.mrb[54].mxu0 }
 0x559   : > { %v7112_v4 = vmul.f32 %v6856_v0, %v15418_v38  ;;  %v6854_v2 = vadd.f32 1.0, %v9625_v32  ;;  %9634 = verf.f32 %v6488_v41  ;;  %v6348_v3 = vmul.f32 0.70710677, %v5196_v59  ;;  %v15518_v1 = vpop.f32.mrb[144].mxu1  ;;  %v15527_v13 = vpop.f32.mrb[55].mxu0 }
 0x55a   : > { %18271 = vst [vmem:[#allocation202_spill] sm:$0xff] %v15518_v1  ;;  %v9627_v56 = vpop.eup %9626  ;;  %v15521_v15 = vmul.f32 %v6994_v45, %v15424_v54  ;;  %v15523_v20 = vmul.f32 0.5, %v5196_v59  ;;  %v15525_v42 = vmul.f32 0.5, %v5748_v26  ;;  %v6486_v62 = vmul.f32 0.70710677, %v5748_v26  ;;  %v15529_v39 = vpop.f32.mrb[145].mxu1 }
 0x55b   : > { %18272 = vst [vmem:[#allocation222_spill] sm:$0xff] %v15529_v39  ;;  %v15532_v38 = vadd.f32 %v15131_v12, %v7112_v4  ;;  %v7110_v0 = vmul.f32 %v6854_v2, %v15428_v25  ;;  %v6997_v41 = vadd.f32 1.0, %v9627_v56  ;;  %9636 = verf.f32 %v6348_v3  ;;  %v15535_v32 = vpop.f32.mrb[146].mxu1  ;;  %v18276_v39 = vld [vmem:[#allocation54_spill] sm:$0xff] }
 0x55c   : > { %18274 = vst [vmem:[#allocation246_spill] sm:$0xff] %v15535_v32  ;;  %v9629_v54 = vpop.eup %9628  ;;  %9638 = verf.f32 %v6486_v62  ;;  %v6346_v59 = vmul.f32 0.70710677, %v5188_v55  ;;  %v5759_v45 = vadd.f32 %v15202_v27, %v15149_v35  ;;  %v5199_v26 = vadd.f32 %v15202_v27, %v15414_v19  ;;  %v15541_v1 = vpop.f32.mrb[147].mxu1 }
 0x55d   : > { %18273 = vst [vmem:[#allocation228_spill] sm:$0xff] %v15532_v38  ;;  %18275 = vst [vmem:[#allocation51_spill] sm:$0xff] %v15541_v1  ;;  %v15544_v12 = vadd.f32 %v18276_v39, %v7110_v0  ;;  %v6857_v4 = vadd.f32 1.0, %v9629_v54  ;;  %v15546_v25 = vmul.f32 0.5, %v5188_v55  ;;  %v5751_v56 = vadd.f32 %v15202_v27, %v15156_v53  ;;  %v18278_v54 = vld [vmem:[#allocation37_spill] sm:$0xff] }
 0x55e   : > { %v9631_v2 = vpop.eup %9630  ;;  %v15551_v3 = vmul.f32 %v6997_v41, %v15438_v9  ;;  %9640 = verf.f32 %v6346_v59  ;;  %v15553_v35 = vmul.f32 0.5, %v5759_v45  ;;  %v6489_v62 = vmul.f32 0.70710677, %v5759_v45  ;;  %v15558_v0 = vpop.f32.mrb[56].mxu0  ;;  %v18279_v9 = vld [vmem:[#allocation39_spill] sm:$0xff] }
 0x55f   : > { %18277 = vst [vmem:[#allocation84_spill] sm:$0xff] %v15544_v12  ;;  %v7113_v19 = vmul.f32 %v6857_v4, %v15461_v30  ;;  %v6995_v38 = vadd.f32 1.0, %v9631_v2  ;;  %v15556_v1 = vmul.f32 0.5, %v5199_v26  ;;  %v6349_v39 = vmul.f32 0.70710677, %v5199_v26  ;;  %v15564_v59 = vpop.f32.mrb[57].mxu0 }
 0x560   : > { %9642 = verf.f32 %v6489_v62  ;;  %v6487_v55 = vmul.f32 0.70710677, %v5751_v56  ;;  %v5191_v53 = vadd.f32 %v15202_v27, %v15422_v7  ;;  %v7461_v41 = vpack.c.bf16 %v18279_v9, %v18278_v54  ;;  %v18281_v26 = vld [vmem:[#allocation205_spill] sm:$0xff]  ;;  %v15573_v2 = vpop.f32.mrb[58].mxu0  ;;  %v15575_v62 = vpop.f32.mrb[148].mxu1 }
 0x561   : > { %v9633_v32 = vpop.eup %9632  ;;  %v15567_v45 = vadd.f32 %v15164_v44, %v7113_v19  ;;  %9644 = verf.f32 %v6349_v39  ;;  %v15569_v30 = vmul.f32 0.5, %v5751_v56  ;;  %v7354_v4 = vadd.f32 %v18281_v26, %v15322_v63  ;;  %18282 = vst [vmem:[#allocation128_spill] sm:$0xff] %v15575_v62  ;;  %v15580_v12 = vpop.f32.mrb[59].mxu0  ;;  %v18284_v19 = vld [vmem:[#allocation223_spill] sm:$0xff] }
 0x562   : > { %v15578_v7 = vmul.f32 %v6995_v38, %v15474_v23  ;;  %v6855_v54 = vadd.f32 1.0, %v9633_v32  ;;  %9646 = verf.f32 %v6487_v55  ;;  %v6347_v9 = vmul.f32 0.70710677, %v5191_v53  ;;  %8339 = vmatpush3.bf16.xpose.msra.mxu0 %v7461_v41  ;;  %v15582_v44 = vpop.f32.mrb[149].mxu1 }
 0x563   : > { %18280 = vst [vmem:[#allocation110_spill] sm:$0xff] %v15567_v45  ;;  %18283 = vst [vmem:[#allocation113_spill] sm:$0xff] %v15582_v44  ;;  %v9635_v56 = vpop.eup %9634  ;;  %v7355_v39 = vadd.f32 %v18284_v19, %v15341_v29  ;;  %v5772_v63 = vadd.f32 %v15202_v27, %v15182_v17  ;;  %v5212_v26 = vadd.f32 %v15202_v27, %v15448_v58  ;;  %v15592_v38 = vpop.f32.mrb[150].mxu1  ;;  %v15599_v19 = vmul.f32 0.5, %v5191_v53 }
 0x564   : > { %v5764_v23 = vadd.f32 %v15202_v27, %v15187_v18  ;;  %18285 = vst [vmem:[#allocation184_spill] sm:$0xff] %v15592_v38  ;;  %v7111_v32 = vmul.f32 %v6855_v54, %v15497_v31  ;;  %v7000_v55 = vadd.f32 1.0, %v9635_v56  ;;  %9648 = verf.f32 %v6347_v9  ;;  %v15597_v44 = vpop.f32.mrb[151].mxu1  ;;  %v18287_v18 = vld [vmem:[#allocation296_spill] sm:$0xff] }
 0x565   : > { %v5204_v41 = vadd.f32 %v15202_v27, %v15453_v36  ;;  %18286 = vst [vmem:[#allocation116_spill] sm:$0xff] %v15597_v44  ;;  %v9637_v29 = vpop.eup %9636  ;;  %v7470_v17 = vpack.c.bf16 %v7355_v39, %v7354_v4  ;;  %v15601_v62 = vmul.f32 0.5, %v5772_v63  ;;  %v6492_v58 = vmul.f32 0.70710677, %v5772_v63  ;;  %v18292_v44 = vld [vmem:[#allocation213_spill] sm:$0xff] }
 0x566   : > { %v9639_v45 = vpop.eup %9638  ;;  %v15604_v5 = vadd.f32 %v18287_v18, %v7111_v32  ;;  %v6860_v38 = vadd.f32 1.0, %v9637_v29  ;;  %v15606_v31 = vmul.f32 0.5, %v5212_v26  ;;  %v6352_v54 = vmul.f32 0.70710677, %v5212_v26  ;;  %v15611_v56 = vpop.f32.mrb[60].mxu0 }
 0x567   : > { %v15609_v9 = vmul.f32 %v7000_v55, %v15511_v6  ;;  %v6998_v36 = vadd.f32 1.0, %v9639_v45  ;;  %8340 = vmatprep.subr.bf16.mxu0 %v7470_v17  ;;  %9650 = verf.f32 %v6492_v58  ;;  %v6490_v53 = vmul.f32 0.70710677, %v5764_v23  ;;  %v15616_v29 = vpop.f32.mrb[61].mxu0  ;;  %v18290_v6 = vld [vmem:[#allocation63_spill] sm:$0xff] }
 0x568   : > { %18288 = vst [vmem:[#allocation140_spill] sm:$0xff] %v15604_v5  ;;  %v9641_v4 = vpop.eup %9640  ;;  %v7116_v39 = vmul.f32 %v6860_v38, %v15523_v20  ;;  %9652 = verf.f32 %v6352_v54  ;;  %v15614_v63 = vmul.f32 0.5, %v5764_v23  ;;  %v6350_v32 = vmul.f32 0.70710677, %v5204_v41  ;;  %v15622_v55 = vpop.f32.mrb[62].mxu0  ;;  %v18294_v38 = vld [vmem:[#allocation241_spill] sm:$0xff] }
 0x569   : > { %18289 = vst [vmem:[#allocation173_spill] sm:$0xff] %v15609_v9  ;;  %v6858_v18 = vadd.f32 1.0, %v9641_v4  ;;  %9654 = verf.f32 %v6490_v53  ;;  %v15618_v26 = vmul.f32 0.5, %v5204_v41  ;;  %v5775_v45 = vadd.f32 %v15202_v27, %v18290_v6  ;;  %v15624_v17 = vpop.f32.mrb[152].mxu1  ;;  %v15633_v41 = vpop.f32.mrb[63].mxu0 }
 0x56a   : > { %18291 = vst [vmem:[#allocation208_spill] sm:$0xff] %v15624_v17  ;;  %v9643_v58 = vpop.eup %9642  ;;  %v15627_v20 = vadd.f32 %v18292_v44, %v7116_v39  ;;  %9656 = verf.f32 %v6350_v32  ;;  %v5215_v23 = vadd.f32 %v15202_v27, %v15463_v11  ;;  %v5767_v54 = vadd.f32 %v15202_v27, %v18294_v38  ;;  %v15635_v53 = vpop.f32.mrb[153].mxu1 }
 0x56b   : > { %18295 = vst [vmem:[#allocation123_spill] sm:$0xff] %v15635_v53  ;;  %v9645_v4 = vpop.eup %9644  ;;  %v15638_v6 = vmul.f32 %v6998_v36, %v15525_v42  ;;  %v7114_v17 = vmul.f32 %v6858_v18, %v15546_v25  ;;  %v7001_v9 = vadd.f32 1.0, %v9643_v58  ;;  %v6493_v44 = vmul.f32 0.70710677, %v5775_v45  ;;  %v15641_v39 = vpop.f32.mrb[154].mxu1 }
 0x56c   : > { %18293 = vst [vmem:[#allocation188_spill] sm:$0xff] %v15627_v20  ;;  %18296 = vst [vmem:[#allocation261_spill] sm:$0xff] %v15641_v39  ;;  %v9647_v32 = vpop.eup %9646  ;;  %v6861_v20 = vadd.f32 1.0, %v9645_v4  ;;  %v15643_v11 = vmul.f32 0.5, %v5775_v45  ;;  %v15645_v5 = vmul.f32 0.5, %v5215_v23  ;;  %v15647_v50 = vpop.f32.mrb[155].mxu1  ;;  %v5207_v45 = vadd.f32 %v15202_v27, %v15470_v46 }
 0x56d   : > { %v6353_v38 = vmul.f32 0.70710677, %v5215_v23  ;;  %18297 = vst [vmem:[#allocation192_spill] sm:$0xff] %v15647_v50  ;;  %v15650_v53 = vadd.f32 %v15330_v22, %v7114_v17  ;;  %v6999_v42 = vadd.f32 1.0, %v9647_v32  ;;  %9658 = verf.f32 %v6493_v44  ;;  %v18299_v50 = vld [vmem:[#allocation243_spill] sm:$0xff]  ;;  %v18300_v39 = vld [vmem:[#allocation64_spill] sm:$0xff] }
 0x56e   : > { %v15652_v36 = vmul.f32 0.5, %v5767_v54  ;;  %v9649_v25 = vpop.eup %9648  ;;  %v7117_v18 = vmul.f32 %v6861_v20, %v15556_v1  ;;  %v6491_v58 = vmul.f32 0.70710677, %v5767_v54  ;;  %v15658_v4 = vmul.f32 %v7001_v9, %v15553_v35  ;;  %v18301_v17 = vld [vmem:[#allocation265_spill] sm:$0xff]  ;;  %v15664_v32 = vpop.f32.mrb[64].mxu0 }
 0x56f   : > { %18298 = vst [vmem:[#allocation212_spill] sm:$0xff] %v15650_v53  ;;  %9660 = verf.f32 %v6353_v38  ;;  %v6859_v23 = vadd.f32 1.0, %v9649_v25  ;;  %v7462_v22 = vpack.c.bf16 %v18300_v39, %v18299_v50  ;;  %v7356_v44 = vadd.f32 %v18301_v17, %v15313_v21  ;;  %v15672_v20 = vpop.f32.mrb[65].mxu0  ;;  %v18303_v50 = vld [vmem:[#allocation138_spill] sm:$0xff]  ;;  %v18304_v21 = vld [vmem:[#allocation297_spill] sm:$0xff] }
 0x570   : > { %v15667_v53 = vadd.f32 %v15373_v40, %v7117_v18  ;;  %v15670_v1 = vmul.f32 %v6999_v42, %v15569_v30  ;;  %9662 = verf.f32 %v6491_v58  ;;  %v6351_v46 = vmul.f32 0.70710677, %v5207_v45  ;;  %v15681_v38 = vpop.f32.mrb[66].mxu0  ;;  %v15683_v30 = vpop.f32.mrb[156].mxu1 }
 0x571   : > { %v9651_v35 = vpop.eup %9650  ;;  %v7115_v9 = vmul.f32 %v6859_v23, %v15599_v19  ;;  %8341 = vmatpush3.bf16.xpose.msra.mxu0 %v7462_v22  ;;  %v7357_v54 = vadd.f32 %v18303_v50, %v15338_v49  ;;  %v5788_v39 = vadd.f32 %v15202_v27, %v18304_v21  ;;  %v5228_v40 = vadd.f32 %v15202_v27, %v15503_v8  ;;  %v18306_v19 = vld [vmem:[#allocation319_spill] sm:$0xff]  ;;  %v15689_v23 = vpop.f32.mrb[67].mxu0 }
 0x572   : > { %18302 = vst [vmem:[#allocation166_spill] sm:$0xff] %v15667_v53  ;;  %18305 = vst [vmem:[#allocation235_spill] sm:$0xff] %v15683_v30  ;;  %v9653_v42 = vpop.eup %9652  ;;  %v7004_v25 = vadd.f32 1.0, %v9651_v35  ;;  %v15685_v18 = vmul.f32 0.5, %v5207_v45  ;;  %9664 = verf.f32 %v6351_v46  ;;  %v5780_v58 = vadd.f32 %v15202_v27, %v18306_v19  ;;  %v15691_v49 = vpop.f32.mrb[157].mxu1 }
 0x573   : > { %18307 = vst [vmem:[#allocation292_spill] sm:$0xff] %v15691_v49  ;;  %v9655_v22 = vpop.eup %9654  ;;  %v15694_v17 = vadd.f32 %v15395_v52, %v7115_v9  ;;  %v6864_v8 = vadd.f32 1.0, %v9653_v42  ;;  %v7471_v50 = vpack.c.bf16 %v7357_v54, %v7356_v44  ;;  %v5220_v21 = vadd.f32 %v15202_v27, %v15513_v61  ;;  %v15698_v35 = vpop.f32.mrb[158].mxu1 }
 0x574   : > { %18308 = vst [vmem:[#allocation215_spill] sm:$0xff] %v15698_v35  ;;  %v9657_v45 = vpop.eup %9656  ;;  %v15701_v46 = vmul.f32 %v7004_v25, %v15601_v62  ;;  %v7002_v19 = vadd.f32 1.0, %v9655_v22  ;;  %v15703_v30 = vmul.f32 0.5, %v5788_v39  ;;  %v6496_v53 = vmul.f32 0.70710677, %v5788_v39  ;;  %v15705_v49 = vpop.f32.mrb[159].mxu1 }
 0x575   : > { %18309 = vst [vmem:[#allocation272_spill] sm:$0xff] %v15705_v49  ;;  %v7120_v52 = vmul.f32 %v6864_v8, %v15606_v31  ;;  %v6862_v9 = vadd.f32 1.0, %v9657_v45  ;;  %8342 = vmatprep.subr.bf16.mxu0 %v7471_v50  ;;  %v15708_v44 = vmul.f32 0.5, %v5228_v40  ;;  %v6356_v54 = vmul.f32 0.70710677, %v5228_v40  ;;  %v18311_v40 = vld [vmem:[#allocation35_spill] sm:$0xff] }
 0x576   : > { %v15711_v61 = vmul.f32 %v7002_v19, %v15614_v63  ;;  %9666 = verf.f32 %v6496_v53  ;;  %v15713_v42 = vmul.f32 0.5, %v5780_v58  ;;  %v6494_v62 = vmul.f32 0.70710677, %v5780_v58  ;;  %v15719_v8 = vpop.f32.mrb[68].mxu0 }
 0x577   : > { %v9659_v25 = vpop.eup %9658  ;;  %v15716_v22 = vadd.f32 %v15433_v34, %v7120_v52  ;;  %v7118_v39 = vmul.f32 %v6862_v9, %v15618_v26  ;;  %9668 = verf.f32 %v6356_v54  ;;  %v6354_v31 = vmul.f32 0.70710677, %v5220_v21  ;;  %v15725_v58 = vpop.f32.mrb[69].mxu0  ;;  %v18313_v26 = vld [vmem:[#allocation315_spill] sm:$0xff] }
 0x578   : > { %v7005_v45 = vadd.f32 1.0, %v9659_v25  ;;  %9670 = verf.f32 %v6494_v62  ;;  %v5791_v63 = vadd.f32 %v15202_v27, %v18311_v40  ;;  %v5231_v53 = vadd.f32 %v15202_v27, %v15516_v48  ;;  %v15732_v9 = vpop.f32.mrb[70].mxu0  ;;  %v15734_v54 = vpop.f32.mrb[160].mxu1 }
 0x579   : > { %18310 = vst [vmem:[#allocation288_spill] sm:$0xff] %v15716_v22  ;;  %v9661_v50 = vpop.eup %9660  ;;  %v15728_v34 = vadd.f32 %v15451_v51, %v7118_v39  ;;  %9672 = verf.f32 %v6354_v31  ;;  %v5783_v52 = vadd.f32 %v15202_v27, %v18313_v26  ;;  %18314 = vst [vmem:[#allocation293_spill] sm:$0xff] %v15734_v54  ;;  %v15739_v40 = vmul.f32 0.5, %v5220_v21  ;;  %v15743_v51 = vpop.f32.mrb[71].mxu0 }
 0x57a   : > { %v6865_v19 = vadd.f32 1.0, %v9661_v50  ;;  %v9663_v62 = vpop.eup %9662  ;;  %v15737_v25 = vmul.f32 %v7005_v45, %v15643_v11  ;;  %v15741_v48 = vmul.f32 0.5, %v5791_v63  ;;  %v6497_v22 = vmul.f32 0.70710677, %v5791_v63  ;;  %v15745_v39 = vpop.f32.mrb[161].mxu1  ;;  %v18318_v45 = vld [vmem:[#allocation107_spill] sm:$0xff] }
 0x57b   : > { %18312 = vst [vmem:[#allocation169_spill] sm:$0xff] %v15728_v34  ;;  %18316 = vst [vmem:[#allocation320_spill] sm:$0xff] %v15745_v39  ;;  %v7003_v50 = vadd.f32 1.0, %v9663_v62  ;;  %v15748_v26 = vmul.f32 0.5, %v5231_v53  ;;  %v6357_v34 = vmul.f32 0.70710677, %v5231_v53  ;;  %v5223_v21 = vadd.f32 %v15202_v27, %v15527_v13 }
 0x57c   : > { %18315 = vst [vmem:[#allocation304_spill] sm:$0xff] %v15737_v25  ;;  %v7121_v31 = vmul.f32 %v6865_v19, %v15645_v5  ;;  %v15750_v54 = vpop.f32.mrb[162].mxu1  ;;  %v9665_v49 = vpop.eup %9664  ;;  %9674 = verf.f32 %v6497_v22  ;;  %v6495_v11 = vmul.f32 0.70710677, %v5783_v52  ;;  %v18319_v63 = vld [vmem:[#allocation275_spill] sm:$0xff]  ;;  %v15761_v19 = vmul.f32 0.5, %v5783_v52 }
 0x57d   : > { %18317 = vst [vmem:[#allocation310_spill] sm:$0xff] %v15750_v54  ;;  %v7463_v35 = vpack.c.bf16 %v18319_v63, %v18318_v45  ;;  %v15756_v25 = vpop.f32.mrb[163].mxu1  ;;  %v6863_v5 = vadd.f32 1.0, %v9665_v49  ;;  %9676 = verf.f32 %v6357_v34  ;;  %v15764_v53 = vmul.f32 %v7003_v50, %v15652_v36  ;;  %v18322_v27 = vld [vmem:[#allocation220_spill] sm:$0xff]  ;;  %v18323_v45 = vld [vmem:[#allocation301_spill] sm:$0xff] }
 0x57e   : > { %18320 = vst [vmem:[#allocation98_spill] sm:$0xff] %v15756_v25  ;;  %v15759_v39 = vadd.f32 %v15459_v47, %v7121_v31  ;;  %9678 = verf.f32 %v6495_v11  ;;  %v6355_v22 = vmul.f32 0.70710677, %v5223_v21  ;;  %v7358_v13 = vadd.f32 %v18322_v27, %v15370_v33  ;;  %v15774_v47 = vld [vmem:[%s16778_s17] ss:$0 sm:$0xff]  ;;  %v18325_v33 = vld [vmem:[#allocation130_spill] sm:$0xff] }
 0x57f   : > { %8343 = vmatpush3.bf16.xpose.msra.mxu0 %v7463_v35  ;;  %v7119_v62 = vmul.f32 %v6863_v5, %v15685_v18  ;;  %v7359_v63 = vadd.f32 %v18323_v45, %v15398_v60  ;;  %v18324_v49 = vld [vmem:[#allocation325_spill] sm:$0xff]  ;;  %v5244_v34 = vadd.f32 %v15774_v47, %v15558_v0  ;;  %v15780_v52 = vmul.f32 0.5, %v5223_v21  ;;  %v18326_v27 = vld [vmem:[#allocation126_spill] sm:$0xff] }
 0x580   : > { %18321 = vst [vmem:[#allocation95_spill] sm:$0xff] %v15759_v39  ;;  %v5804_v36 = vadd.f32 %v15774_v47, %v18324_v49  ;;  %v9667_v35 = vpop.eup %9666  ;;  %9680 = verf.f32 %v6355_v22  ;;  %v5796_v18 = vadd.f32 %v15774_v47, %v18325_v33  ;;  %v5236_v60 = vadd.f32 %v15774_v47, %v15564_v59  ;;  %v15791_v0 = vpop.f32.mrb[164].mxu1 }
 0x581   : > { %v9669_v31 = vpop.eup %9668  ;;  %v15787_v50 = vadd.f32 %v15488_v57, %v7119_v62  ;;  %v7008_v11 = vadd.f32 1.0, %v9667_v35  ;;  %v7472_v5 = vpack.c.bf16 %v7359_v63, %v7358_v13  ;;  %v5807_v45 = vadd.f32 %v15774_v47, %v18326_v27  ;;  %18327 = vst [vmem:[#allocation219_spill] sm:$0xff] %v15791_v0  ;;  %v15800_v62 = vpop.f32.mrb[165].mxu1 }
 0x582   : > { %v9671_v21 = vpop.eup %9670  ;;  %v6868_v49 = vadd.f32 1.0, %v9669_v31  ;;  %v15793_v22 = vmul.f32 0.5, %v5804_v36  ;;  %v6500_v39 = vmul.f32 0.70710677, %v5804_v36  ;;  %v6360_v33 = vmul.f32 0.70710677, %v5244_v34 }
 0x583   : > { %v9673_v25 = vpop.eup %9672  ;;  %v15796_v59 = vmul.f32 %v7008_v11, %v15703_v30  ;;  %v7006_v54 = vadd.f32 1.0, %v9671_v21  ;;  %8344 = vmatprep.subr.bf16.mxu0 %v7472_v5  ;;  %v15798_v57 = vmul.f32 0.5, %v5244_v34  ;;  %v6498_v13 = vmul.f32 0.70710677, %v5796_v18  ;;  %18328 = vst [vmem:[#allocation50_spill] sm:$0xff] %v15800_v62  ;;  %v15807_v36 = vpop.f32.mrb[166].mxu1 }
 0x584   : > { %v15803_v63 = vmul.f32 %v6868_v49, %v15708_v44  ;;  %v6866_v35 = vadd.f32 1.0, %v9673_v25  ;;  %9682 = verf.f32 %v6500_v39  ;;  %v15805_v31 = vmul.f32 0.5, %v5796_v18  ;;  %18329 = vst [vmem:[#allocation80_spill] sm:$0xff] %v15807_v36  ;;  %v15814_v11 = vpop.f32.mrb[167].mxu1  ;;  %v18331_v49 = vld [vmem:[#allocation207_spill] sm:$0xff] }
 0x585   : > { %v15810_v27 = vmul.f32 %v7006_v54, %v15713_v42  ;;  %9684 = verf.f32 %v6360_v33  ;;  %v15812_v30 = vmul.f32 0.5, %v5236_v60  ;;  %v6358_v34 = vmul.f32 0.70710677, %v5236_v60  ;;  %18330 = vst [vmem:[#allocation117_spill] sm:$0xff] %v15814_v11 }
 0x586   : > { %v9675_v5 = vpop.eup %9674  ;;  %9686 = verf.f32 %v6498_v13  ;;  %v15816_v21 = vmul.f32 0.5, %v5807_v45  ;;  %v6501_v44 = vmul.f32 0.70710677, %v5807_v45  ;;  %v5247_v25 = vadd.f32 %v15774_v47, %v15573_v2 }
 0x587   : > { %v9677_v39 = vpop.eup %9676  ;;  %v7009_v18 = vadd.f32 1.0, %v9675_v5  ;;  %9688 = verf.f32 %v6358_v34  ;;  %v5799_v42 = vadd.f32 %v15774_v47, %v18331_v49  ;;  %v5239_v54 = vadd.f32 %v15774_v47, %v15580_v12 }
 0x588   : > { %v9679_v60 = vpop.eup %9678  ;;  %v15825_v33 = vmul.f32 %v6866_v35, %v15739_v40  ;;  %v6869_v13 = vadd.f32 1.0, %v9677_v39  ;;  %9690 = verf.f32 %v6501_v44  ;;  %v6361_v11 = vmul.f32 0.70710677, %v5247_v25  ;;  %v15832_v5 = vpop.f32.mrb[168].mxu1  ;;  %v18335_v39 = vld [vmem:[#allocation268_spill] sm:$0xff] }
 0x589   : > { %v15828_v45 = vmul.f32 %v7009_v18, %v15741_v48  ;;  %v7007_v2 = vadd.f32 1.0, %v9679_v60  ;;  %v15830_v36 = vmul.f32 0.5, %v5247_v25  ;;  %v6499_v34 = vmul.f32 0.70710677, %v5799_v42  ;;  %18333 = vst [vmem:[#allocation176_spill] sm:$0xff] %v15832_v5  ;;  %v15839_v35 = vpop.f32.mrb[169].mxu1 }
 0x58a   : > { %v9681_v49 = vpop.eup %9680  ;;  %v15835_v62 = vmul.f32 %v6869_v13, %v15748_v26  ;;  %9692 = verf.f32 %v6361_v11  ;;  %v15837_v12 = vmul.f32 0.5, %v5799_v42  ;;  %v6359_v40 = vmul.f32 0.70710677, %v5239_v54  ;;  %18334 = vst [vmem:[#allocation78_spill] sm:$0xff] %v15839_v35  ;;  %v18336_v25 = vld [vmem:[#allocation278_spill] sm:$0xff]  ;;  %v15845_v60 = vpop.f32.mrb[170].mxu1 }
 0x58b   : > { %18332 = vst [vmem:[#allocation143_spill] sm:$0xff] %v15828_v45  ;;  %v6867_v44 = vadd.f32 1.0, %v9681_v49  ;;  %9694 = verf.f32 %v6499_v34  ;;  %v15841_v48 = vmul.f32 0.5, %v5239_v54  ;;  %v7464_v18 = vpack.c.bf16 %v18336_v25, %v18335_v39  ;;  %18337 = vst [vmem:[#allocation93_spill] sm:$0xff] %v15845_v60  ;;  %v18338_v5 = vld [vmem:[#allocation167_spill] sm:$0xff]  ;;  %v18339_v11 = vld [vmem:[#allocation273_spill] sm:$0xff] }
 0x58c   : > { %9696 = verf.f32 %v6359_v40  ;;  %v7360_v26 = vadd.f32 %v18338_v5, %v15355_v16  ;;  %v7361_v42 = vadd.f32 %v18339_v11, %v15378_v10  ;;  %v5820_v13 = vadd.f32 %v15774_v47, %v15310_v28  ;;  %v15853_v35 = vpop.f32.mrb[171].mxu1 }
 0x58d   : > { %18340 = vst [vmem:[#allocation115_spill] sm:$0xff] %v15853_v35  ;;  %v15856_v54 = vmul.f32 %v7007_v2, %v15761_v19  ;;  %8345 = vmatpush3.bf16.xpose.msra.mxu0 %v7464_v18  ;;  %v5260_v34 = vadd.f32 %v15774_v47, %v15611_v56  ;;  %v5812_v49 = vadd.f32 %v15774_v47, %v15319_v24 }
 0x58e   : > { %v5252_v16 = vadd.f32 %v15774_v47, %v15616_v29  ;;  %v9683_v5 = vpop.eup %9682  ;;  %v15865_v10 = vmul.f32 %v6867_v44, %v15780_v52  ;;  %v7473_v28 = vpack.c.bf16 %v7361_v42, %v7360_v26  ;;  %v15867_v40 = vmul.f32 0.5, %v5820_v13 }
 0x58f   : > { %v6504_v39 = vmul.f32 0.70710677, %v5820_v13  ;;  %v9685_v19 = vpop.eup %9684  ;;  %v7012_v2 = vadd.f32 1.0, %v9683_v5  ;;  %v15869_v25 = vmul.f32 0.5, %v5260_v34  ;;  %v6364_v18 = vmul.f32 0.70710677, %v5260_v34 }
 0x590   : > { %v5823_v56 = vadd.f32 %v15774_v47, %v15327_v43  ;;  %v9687_v24 = vpop.eup %9686  ;;  %v6872_v11 = vadd.f32 1.0, %v9685_v19  ;;  %8346 = vmatprep.subr.bf16.mxu0 %v7473_v28  ;;  %v15873_v29 = vmul.f32 0.5, %v5812_v49  ;;  %v6502_v52 = vmul.f32 0.70710677, %v5812_v49  ;;  %v15877_v5 = vpop.f32.mrb[172].mxu1 }
 0x591   : > { %9698 = verf.f32 %v6504_v39  ;;  %v9689_v44 = vpop.eup %9688  ;;  %v7010_v26 = vadd.f32 1.0, %v9687_v24  ;;  %v15875_v42 = vmul.f32 0.5, %v5252_v16  ;;  %v6362_v13 = vmul.f32 0.70710677, %v5252_v16  ;;  %18341 = vst [vmem:[#allocation139_spill] sm:$0xff] %v15877_v5  ;;  %v15885_v39 = vpop.f32.mrb[173].mxu1 }
 0x592   : > { %9700 = verf.f32 %v6364_v18  ;;  %v9691_v35 = vpop.eup %9690  ;;  %v15880_v34 = vmul.f32 %v7012_v2, %v15793_v22  ;;  %v15883_v43 = vmul.f32 %v6872_v11, %v15798_v57  ;;  %v6870_v28 = vadd.f32 1.0, %v9689_v44  ;;  %18342 = vst [vmem:[#allocation175_spill] sm:$0xff] %v15885_v39  ;;  %v15889_v24 = vpop.f32.mrb[174].mxu1  ;;  %v18344_v57 = vld [vmem:[#allocation260_spill] sm:$0xff] }
 0x593   : > { %9702 = verf.f32 %v6502_v52  ;;  %v7013_v49 = vadd.f32 1.0, %v9691_v35  ;;  %v15887_v19 = vmul.f32 0.5, %v5823_v56  ;;  %v6505_v18 = vmul.f32 0.70710677, %v5823_v56  ;;  %18343 = vst [vmem:[#allocation221_spill] sm:$0xff] %v15889_v24  ;;  %v15900_v35 = vpop.f32.mrb[175].mxu1 }
 0x594   : > { %9704 = verf.f32 %v6362_v13  ;;  %v9693_v16 = vpop.eup %9692  ;;  %v15892_v5 = vmul.f32 %v7010_v26, %v15805_v31  ;;  %v5263_v22 = vadd.f32 %v15774_v47, %v15622_v55  ;;  %v5815_v2 = vadd.f32 %v15774_v47, %v18344_v57  ;;  %18345 = vst [vmem:[#allocation227_spill] sm:$0xff] %v15900_v35  ;;  %v18346_v13 = vld [vmem:[#allocation77_spill] sm:$0xff]  ;;  %v18347_v31 = vld [vmem:[#allocation254_spill] sm:$0xff] }
 0x595   : > { %v5255_v11 = vadd.f32 %v15774_v47, %v15633_v41  ;;  %v9695_v52 = vpop.eup %9694  ;;  %v15903_v56 = vmul.f32 %v6870_v28, %v15812_v30  ;;  %v6873_v44 = vadd.f32 1.0, %v9693_v16  ;;  %9706 = verf.f32 %v6505_v18  ;;  %v18348_v16 = vld [vmem:[#allocation281_spill] sm:$0xff] }
 0x596   : > { %v7465_v26 = vpack.c.bf16 %v18347_v31, %v18346_v13  ;;  %v9697_v24 = vpop.eup %9696  ;;  %v15908_v55 = vmul.f32 %v7013_v49, %v15816_v21  ;;  %v7011_v39 = vadd.f32 1.0, %v9695_v52  ;;  %v15910_v57 = vmul.f32 0.5, %v5263_v22 }
 0x597   : > { %v6365_v60 = vmul.f32 0.70710677, %v5263_v22  ;;  %v15913_v41 = vmul.f32 %v6873_v44, %v15830_v36  ;;  %v6871_v35 = vadd.f32 1.0, %v9697_v24  ;;  %v15915_v0 = vmul.f32 0.5, %v5815_v2  ;;  %v18349_v22 = vld [vmem:[#allocation129_spill] sm:$0xff] }
 0x598   : > { %v6503_v30 = vmul.f32 0.70710677, %v5815_v2  ;;  %8347 = vmatpush3.bf16.xpose.msra.mxu0 %v7465_v26  ;;  %v15917_v28 = vmul.f32 0.5, %v5255_v11  ;;  %v6363_v18 = vmul.f32 0.70710677, %v5255_v11  ;;  %v5836_v21 = vadd.f32 %v15774_v47, %v18348_v16  ;;  %v15928_v52 = vpop.f32.mrb[176].mxu1 }
 0x599   : > { %9708 = verf.f32 %v6365_v60  ;;  %v15922_v49 = vmul.f32 %v7011_v39, %v15837_v12  ;;  %v5276_v36 = vadd.f32 %v15774_v47, %v15664_v32  ;;  %v5828_v24 = vadd.f32 %v15774_v47, %v18349_v22  ;;  %18350 = vst [vmem:[#allocation242_spill] sm:$0xff] %v15928_v52  ;;  %v15935_v12 = vpop.f32.mrb[177].mxu1 }
 0x59a   : > { %9710 = verf.f32 %v6503_v30  ;;  %v15931_v60 = vmul.f32 %v6871_v35, %v15841_v48  ;;  %v6508_v11 = vmul.f32 0.70710677, %v5836_v21  ;;  %v5268_v44 = vadd.f32 %v15774_v47, %v15672_v20  ;;  %18351 = vst [vmem:[#allocation57_spill] sm:$0xff] %v15935_v12  ;;  %v15941_v30 = vpop.f32.mrb[178].mxu1 }
 0x59b   : > { %v9699_v2 = vpop.eup %9698  ;;  %9712 = verf.f32 %v6363_v18  ;;  %v15937_v31 = vmul.f32 0.5, %v5836_v21  ;;  %v15939_v32 = vmul.f32 0.5, %v5276_v36  ;;  %v6368_v26 = vmul.f32 0.70710677, %v5276_v36  ;;  %18352 = vst [vmem:[#allocation136_spill] sm:$0xff] %v15941_v30  ;;  %v15945_v18 = vpop.f32.mrb[179].mxu1 }
 0x59c   : > { %v9701_v39 = vpop.eup %9700  ;;  %v7016_v13 = vadd.f32 1.0, %v9699_v2  ;;  %9714 = verf.f32 %v6508_v11  ;;  %v15943_v48 = vmul.f32 0.5, %v5828_v24  ;;  %v6506_v35 = vmul.f32 0.70710677, %v5828_v24  ;;  %18353 = vst [vmem:[#allocation216_spill] sm:$0xff] %v15945_v18  ;;  %v18354_v36 = vld [vmem:[#allocation79_spill] sm:$0xff] }
 0x59d   : > { %v9703_v16 = vpop.eup %9702  ;;  %v6876_v22 = vadd.f32 1.0, %v9701_v39  ;;  %9716 = verf.f32 %v6368_v26  ;;  %v6366_v21 = vmul.f32 0.70710677, %v5268_v44  ;;  %v15948_v45 = vmul.f32 0.5, %v5268_v44  ;;  %v15955_v11 = vld [vmem:[%s16779_s18] sm:$0xf] }
 0x59e   : > { %v9705_v20 = vpop.eup %9704  ;;  %v7272_v12 = vmul.f32 %v7016_v13, %v15867_v40  ;;  %v7014_v52 = vadd.f32 1.0, %v9703_v16  ;;  %9718 = verf.f32 %v6506_v35  ;;  %v5839_v30 = vadd.f32 %v15774_v47, %v18354_v36  ;;  %v18355_v39 = vld [vmem:[#allocation43_spill] sm:$0xff]  ;;  %v18357_v36 = vld [vmem:[#allocation232_spill] sm:$0xff] }
 0x59f   : > { %v6874_v2 = vadd.f32 1.0, %v9705_v20  ;;  %8349 = vmatmul.mubr.bf16.vlgmr.msra.gmra.mrb[72].mxu0 %v15955_v11  ;;  %v9707_v24 = vpop.eup %9706  ;;  %9720 = verf.f32 %v6366_v21  ;;  %v5279_v44 = vadd.f32 %v15774_v47, %v15681_v38  ;;  %v15966_v26 = vmul.f32 %v6876_v22, %v15869_v25 }
 0x5a0   : > { %v15959_v40 = vadd.f32 %v7272_v12, %v18355_v39  ;;  %v7270_v13 = vmul.f32 %v7014_v52, %v15873_v29  ;;  %8366 = vmatprep.mubr.bf16.mxu0 %v15955_v11  ;;  %v7017_v35 = vadd.f32 1.0, %v9707_v24  ;;  %v6509_v20 = vmul.f32 0.70710677, %v5839_v30  ;;  %v18359_v52 = vld [vmem:[#allocation299_spill] sm:$0xff]  ;;  %v15978_v38 = vpop.f32.mrb[180].mxu1 }
 0x5a1   : > { %v15969_v16 = vmul.f32 %v6874_v2, %v15875_v42  ;;  %v15974_v12 = vmul.f32 0.5, %v5839_v30  ;;  %v6369_v29 = vmul.f32 0.70710677, %v5279_v44  ;;  %v5831_v21 = vadd.f32 %v15774_v47, %v18359_v52  ;;  %18360 = vst [vmem:[#allocation206_spill] sm:$0xff] %v15978_v38  ;;  %v15985_v2 = vpop.f32.mrb[181].mxu1 }
 0x5a2   : > { %18356 = vst [vmem:[#allocation29_spill] sm:$0xff] %v15959_v40  ;;  %v15972_v18 = vadd.f32 %v7270_v13, %v18357_v36  ;;  %v7273_v25 = vmul.f32 %v7017_v35, %v15887_v19  ;;  %9722 = verf.f32 %v6509_v20  ;;  %v5271_v42 = vadd.f32 %v15774_v47, %v15689_v23  ;;  %v15989_v52 = vpop.f32.mrb[182].mxu1  ;;  %v18362_v40 = vld [vmem:[#allocation28_spill] sm:$0xff] }
 0x5a3   : > { %v9709_v39 = vpop.eup %9708  ;;  %v7378_v22 = vadd.f32 %v15521_v15, %v15825_v33  ;;  %v15987_v13 = vmul.f32 0.5, %v5279_v44  ;;  %9724 = verf.f32 %v6369_v29  ;;  %v6507_v36 = vmul.f32 0.70710677, %v5831_v21  ;;  %18361 = vst [vmem:[#allocation258_spill] sm:$0xff] %v15989_v52  ;;  %v18364_v52 = vld [vmem:[#allocation49_spill] sm:$0xff] }
 0x5a4   : > { %18358 = vst [vmem:[#allocation239_spill] sm:$0xff] %v15972_v18  ;;  %v9711_v30 = vpop.eup %9710  ;;  %v6877_v24 = vadd.f32 1.0, %v9709_v39  ;;  %v15992_v19 = vadd.f32 %v7273_v25, %v18362_v40  ;;  %v15994_v20 = vmul.f32 0.5, %v5831_v21  ;;  %v6367_v23 = vmul.f32 0.70710677, %v5271_v42  ;;  %v15996_v18 = vpop.f32.mrb[183].mxu1 }
 0x5a5   : > { %v9713_v38 = vpop.eup %9712  ;;  %v7015_v35 = vadd.f32 1.0, %v9711_v30  ;;  %18363 = vst [vmem:[#allocation280_spill] sm:$0xff] %v15996_v18  ;;  %9726 = verf.f32 %v6507_v36  ;;  %v15998_v33 = vmul.f32 0.5, %v5271_v42  ;;  %v7379_v44 = vadd.f32 %v15578_v7, %v15865_v10  ;;  %v18365_v10 = vld [vmem:[#allocation45_spill] sm:$0xff] }
 0x5a6   : > { %v6875_v15 = vadd.f32 1.0, %v9713_v38  ;;  %v9715_v29 = vpop.eup %9714  ;;  %9728 = verf.f32 %v6367_v23  ;;  %v7474_v40 = vpack.c.bf16 %v15506_v37, %v18364_v52  ;;  %v7380_v21 = vadd.f32 %v15509_v14, %v15803_v63  ;;  %v18367_v52 = vld [vmem:[#allocation36_spill] sm:$0xff] }
 0x5a7   : > { %v7271_v39 = vmul.f32 %v7015_v35, %v15915_v0  ;;  %v9717_v25 = vpop.eup %9716  ;;  %v16008_v30 = vmul.f32 %v6877_v24, %v15910_v57  ;;  %v7020_v38 = vadd.f32 1.0, %v9715_v29  ;;  %v7482_v42 = vpack.c.bf16 %v7379_v44, %v7378_v22  ;;  %v18366_v35 = vld [vmem:[#allocation266_spill] sm:$0xff] }
 0x5a8   : > { %v7381_v36 = vadd.f32 %v15551_v3, %v15835_v62  ;;  %v9719_v7 = vpop.eup %9718  ;;  %v6880_v0 = vadd.f32 1.0, %v9717_v25  ;;  %v5852_v37 = vadd.f32 %v15774_v47, %v18366_v35  ;;  %v5292_v14 = vadd.f32 %v15774_v47, %v15719_v8  ;;  %v16022_v62 = vpop.f32.mrb[184].mxu1 }
 0x5a9   : > { %v16013_v18 = vadd.f32 %v7271_v39, %v18365_v10  ;;  %v9721_v63 = vpop.eup %9720  ;;  %v7276_v57 = vmul.f32 %v7020_v38, %v15937_v31  ;;  %v7018_v24 = vadd.f32 1.0, %v9719_v7  ;;  %8350 = vmatprep.subr.bf16.mxu0 %v7482_v42  ;;  %v5844_v3 = vadd.f32 %v15774_v47, %v18367_v52  ;;  %v16030_v39 = vpop.f32.mrb[185].mxu1  ;;  %v18368_v31 = vld [vmem:[#allocation234_spill] sm:$0xff] }
 0x5aa   : > { %v7483_v22 = vpack.c.bf16 %v7381_v36, %v7380_v21  ;;  %v16025_v23 = vmul.f32 %v6875_v15, %v15917_v28  ;;  %v16028_v44 = vmul.f32 %v6880_v0, %v15939_v32  ;;  %v6878_v29 = vadd.f32 1.0, %v9721_v63  ;;  %8351 = vmatpush3.bf16.xpose.msra.mxu0 %v7474_v40  ;;  %v16038_v36 = vpop.f32.mrb[186].mxu1  ;;  %v18371_v0 = vld [vmem:[#allocation148_spill] sm:$0xff] }
 0x5ab   : > { %v6512_v8 = vmul.f32 0.70710677, %v5852_v37  ;;  %v16033_v25 = vadd.f32 %v7276_v57, %v18368_v31  ;;  %v7274_v21 = vmul.f32 %v7018_v24, %v15943_v48  ;;  %v16036_v38 = vmul.f32 0.5, %v5852_v37  ;;  %v16045_v7 = vpop.f32.mrb[187].mxu1  ;;  %v18372_v57 = vld [vmem:[#allocation22_spill] sm:$0xff] }
 0x5ac   : > { %8352 = vmatprep.subr.bf16.mxu0 %v7483_v22  ;;  %v6372_v42 = vmul.f32 0.70710677, %v5292_v14  ;;  %v9723_v28 = vpop.eup %9722  ;;  %v16041_v32 = vmul.f32 %v6878_v29, %v15948_v45  ;;  %v16043_v15 = vmul.f32 0.5, %v5292_v14  ;;  %v6510_v40 = vmul.f32 0.70710677, %v5844_v3  ;;  %18370 = vst [vmem:[#allocation226_spill] sm:$0xff] %v16045_v7 }
 0x5ad   : > { %18369 = vst [vmem:[#allocation248_spill] sm:$0xff] %v16033_v25  ;;  %9730 = verf.f32 %v6512_v8  ;;  %v9725_v10 = vpop.eup %9724  ;;  %v16048_v35 = vadd.f32 %v7274_v21, %v18371_v0  ;;  %v7021_v48 = vadd.f32 1.0, %v9723_v28  ;;  %v5284_v37 = vadd.f32 %v15774_v47, %v15725_v58  ;;  %v18373_v8 = vld [vmem:[#allocation20_spill] sm:$0xff] }
 0x5ae   : > { %9732 = verf.f32 %v6372_v42  ;;  %v6881_v63 = vadd.f32 1.0, %v9725_v10  ;;  %v5855_v45 = vadd.f32 %v15774_v47, %v18372_v57  ;;  %v5295_v14 = vadd.f32 %v15774_v47, %v15732_v9  ;;  %v18374_v10 = vld [vmem:[#allocation111_spill] sm:$0xff]  ;;  %v18385_v25 = vld [vmem:[#allocation140_spill] sm:$0xff] }
 0x5af   : > { %9734 = verf.f32 %v6510_v40  ;;  %v9727_v24 = vpop.eup %9726  ;;  %v7277_v22 = vmul.f32 %v7021_v48, %v15974_v12  ;;  %v6254_v52 = vmul.f32 0.5, %v5844_v3  ;;  %v6370_v29 = vmul.f32 0.70710677, %v5284_v37 }
 0x5b0   : > { %v5847_v31 = vadd.f32 %v15774_v47, %v18373_v8  ;;  %v9729_v21 = vpop.eup %9728  ;;  %v16060_v42 = vmul.f32 %v6881_v63, %v15987_v13  ;;  %v7019_v58 = vadd.f32 1.0, %v9727_v24  ;;  %v16062_v28 = vmul.f32 0.5, %v5284_v37  ;;  %v18376_v63 = vld [vmem:[#allocation21_spill] sm:$0xff]  ;;  %v18377_v24 = vld [vmem:[#allocation47_spill] sm:$0xff] }
 0x5b1   : > { %v6513_v40 = vmul.f32 0.70710677, %v5855_v45  ;;  %v16065_v0 = vadd.f32 %v7277_v22, %v18374_v10  ;;  %v6879_v9 = vadd.f32 1.0, %v9729_v21  ;;  %9736 = verf.f32 %v6370_v29  ;;  %v18378_v10 = vld [vmem:[#allocation48_spill] sm:$0xff] }
 0x5b2   : > { %v16067_v57 = vmul.f32 0.5, %v5855_v45  ;;  %v7275_v12 = vmul.f32 %v7019_v58, %v15994_v20  ;;  %v16070_v3 = vmul.f32 0.5, %v5295_v14  ;;  %v6373_v48 = vmul.f32 0.70710677, %v5295_v14 }
 0x5b3   : > { %18375 = vst [vmem:[#allocation174_spill] sm:$0xff] %v16065_v0  ;;  %9738 = verf.f32 %v6513_v40  ;;  %v16072_v8 = vmul.f32 0.5, %v5847_v31  ;;  %v6511_v13 = vmul.f32 0.70710677, %v5847_v31  ;;  %v5287_v37 = vadd.f32 %v15774_v47, %v15743_v51  ;;  %v18379_v51 = vld [vmem:[#allocation46_spill] sm:$0xff]  ;;  %v18383_v0 = vld [vmem:[#allocation60_spill] sm:$0xff] }
 0x5b4   : > { %v7475_v22 = vpack.c.bf16 %v18377_v24, %v18376_v63  ;;  %v16079_v21 = vadd.f32 %v7275_v12, %v18378_v10  ;;  %9740 = verf.f32 %v6373_v48  ;;  %v7382_v20 = vadd.f32 %v15638_v6, %v15903_v56  ;;  %v18380_v12 = vld [vmem:[#allocation94_spill] sm:$0xff]  ;;  %v18382_v56 = vld [vmem:[#allocation177_spill] sm:$0xff] }
 0x5b5   : > { %v7383_v45 = vadd.f32 %v15670_v1, %v15931_v60  ;;  %v16086_v14 = vmul.f32 %v6879_v9, %v15998_v33  ;;  %9742 = verf.f32 %v6511_v13  ;;  %v6371_v29 = vmul.f32 0.70710677, %v5287_v37  ;;  %v18381_v63 = vld [vmem:[#allocation118_spill] sm:$0xff] }
 0x5b6   : > { %8353 = vmatpush3.bf16.xpose.msra.mxu0 %v7475_v22  ;;  %v5868_v31 = vadd.f32 %v15774_v47, %v18379_v51  ;;  %v5860_v48 = vadd.f32 %v15774_v47, %v18380_v12  ;;  %v5871_v6 = vadd.f32 %v15774_v47, %v18381_v63  ;;  %v5863_v1 = vadd.f32 %v15774_v47, %v18382_v56 }
 0x5b7   : > { %v9731_v58 = vpop.eup %9730  ;;  %v7484_v40 = vpack.c.bf16 %v7383_v45, %v7382_v20  ;;  %v16096_v9 = vmul.f32 0.5, %v5287_v37  ;;  %9744 = verf.f32 %v6371_v29 }
 0x5b8   : > { %v9733_v60 = vpop.eup %9732  ;;  %v7024_v33 = vadd.f32 1.0, %v9731_v58  ;;  %v6516_v13 = vmul.f32 0.70710677, %v5868_v31  ;;  %v16098_v10 = vmul.f32 0.5, %v5868_v31  ;;  %v16100_v20 = vmul.f32 0.5, %v5860_v48 }
 0x5b9   : > { %v9735_v24 = vpop.eup %9734  ;;  %v6884_v22 = vadd.f32 1.0, %v9733_v60  ;;  %8354 = vmatprep.subr.bf16.mxu0 %v7484_v40  ;;  %v6514_v45 = vmul.f32 0.70710677, %v5860_v48  ;;  %v6517_v63 = vmul.f32 0.70710677, %v5871_v6  ;;  %v16104_v37 = vmul.f32 0.5, %v5871_v6 }
 0x5ba   : > { %v7280_v51 = vmul.f32 %v7024_v33, %v16036_v38  ;;  %v7022_v12 = vadd.f32 1.0, %v9735_v24  ;;  %9746 = verf.f32 %v6516_v13  ;;  %v6515_v29 = vmul.f32 0.70710677, %v5863_v1  ;;  %v18384_v40 = vld [vmem:[#allocation84_spill] sm:$0xff]  ;;  %v18387_v13 = vld [vmem:[#allocation55_spill] sm:$0xff] }
 0x5bb   : > { %v7140_v56 = vmul.f32 %v6884_v22, %v16043_v15  ;;  %9748 = verf.f32 %v6514_v45  ;;  %v9737_v58 = vpop.eup %9736  ;;  %v7476_v48 = vpack.c.bf16 %v18385_v25, %v18384_v40  ;;  %v18386_v15 = vld [vmem:[#allocation173_spill] sm:$0xff]  ;;  %v18391_v40 = vld [vmem:[#allocation51_spill] sm:$0xff] }
 0x5bc   : > { %v16107_v60 = vadd.f32 %v7280_v51, %v18383_v0  ;;  %v7278_v31 = vmul.f32 %v7022_v12, %v6254_v52  ;;  %9750 = verf.f32 %v6517_v63  ;;  %v6882_v33 = vadd.f32 1.0, %v9737_v58  ;;  %v18388_v0 = vld [vmem:[#allocation202_spill] sm:$0xff] }
 0x5bd   : > { %v9739_v7 = vpop.eup %9738  ;;  %v16112_v38 = vadd.f32 %v15880_v34, %v7140_v56  ;;  %9752 = verf.f32 %v6515_v29  ;;  %v7384_v6 = vadd.f32 %v18386_v15, %v15883_v43  ;;  %v7385_v52 = vadd.f32 %v15658_v4, %v15913_v41  ;;  %v18389_v12 = vld [vmem:[#allocation222_spill] sm:$0xff]  ;;  %v18392_v15 = vld [vmem:[#allocation279_spill] sm:$0xff] }
 0x5be   : > { %v16117_v24 = vadd.f32 %v7278_v31, %v18387_v13  ;;  %v7025_v22 = vadd.f32 1.0, %v9739_v7  ;;  %8355 = vmatpush3.bf16.xpose.msra.mxu0 %v7476_v48  ;;  %v5884_v25 = vadd.f32 %v15774_v47, %v18388_v0  ;;  %v9741_v45 = vpop.eup %9740  ;;  %v7138_v34 = vmul.f32 %v6882_v33, %v16062_v28  ;;  %v18390_v56 = vld [vmem:[#allocation246_spill] sm:$0xff] }
 0x5bf   : > { %v6259_v51 = vmul.f32 0.5, %v5863_v1  ;;  %v5876_v63 = vadd.f32 %v15774_v47, %v18389_v12  ;;  %v5887_v43 = vadd.f32 %v15774_v47, %v18390_v56  ;;  %v9743_v29 = vpop.eup %9742  ;;  %v6885_v58 = vadd.f32 1.0, %v9741_v45 }
 0x5c0   : > { %v7281_v7 = vmul.f32 %v7025_v22, %v16067_v57  ;;  %v7485_v31 = vpack.c.bf16 %v7385_v52, %v7384_v6  ;;  %v5879_v4 = vadd.f32 %v15774_v47, %v18391_v40  ;;  %v16132_v41 = vadd.f32 %v15892_v5, %v7138_v34  ;;  %v18395_v40 = vld [vmem:[#allocation110_spill] sm:$0xff] }
 0x5c1   : > { %v7023_v48 = vadd.f32 1.0, %v9743_v29  ;;  %v16134_v28 = vmul.f32 0.5, %v5884_v25  ;;  %v6520_v1 = vmul.f32 0.70710677, %v5884_v25  ;;  %v9745_v33 = vpop.eup %9744  ;;  %v7141_v0 = vmul.f32 %v6885_v58, %v16070_v3  ;;  %v18393_v29 = vld [vmem:[#allocation31_spill] sm:$0xff] }
 0x5c2   : > { %v16137_v13 = vadd.f32 %v7281_v7, %v18392_v15  ;;  %8356 = vmatprep.subr.bf16.mxu0 %v7485_v31  ;;  %v16140_v57 = vmul.f32 0.5, %v5876_v63  ;;  %v6518_v6 = vmul.f32 0.70710677, %v5876_v63  ;;  %v6883_v52 = vadd.f32 1.0, %v9745_v33  ;;  %v18394_v31 = vld [vmem:[#allocation228_spill] sm:$0xff] }
 0x5c3   : > { %v7279_v22 = vmul.f32 %v7023_v48, %v16072_v8  ;;  %9754 = verf.f32 %v6520_v1  ;;  %v6521_v5 = vmul.f32 0.70710677, %v5887_v43  ;;  %v16144_v34 = vadd.f32 %v15908_v55, %v7141_v0 }
 0x5c4   : > { %v9747_v45 = vpop.eup %9746  ;;  %9756 = verf.f32 %v6518_v6  ;;  %v16146_v25 = vmul.f32 0.5, %v5887_v43  ;;  %v6519_v12 = vmul.f32 0.70710677, %v5879_v4  ;;  %v7139_v7 = vmul.f32 %v6883_v52, %v16096_v9 }
 0x5c5   : > { %v9749_v56 = vpop.eup %9748  ;;  %v16149_v3 = vadd.f32 %v7279_v22, %v18393_v29  ;;  %v7028_v63 = vadd.f32 1.0, %v9747_v45  ;;  %9758 = verf.f32 %v6521_v5  ;;  %v7477_v48 = vpack.c.bf16 %v18395_v40, %v18394_v31  ;;  %v18396_v22 = vld [vmem:[#allocation128_spill] sm:$0xff]  ;;  %v18397_v5 = vld [vmem:[#allocation113_spill] sm:$0xff] }
 0x5c6   : > { %v9751_v8 = vpop.eup %9750  ;;  %v7026_v58 = vadd.f32 1.0, %v9749_v56  ;;  %9760 = verf.f32 %v6519_v12  ;;  %v7386_v55 = vadd.f32 %v15711_v61, %v15969_v16  ;;  %v16157_v1 = vadd.f32 %v15922_v49, %v7139_v7  ;;  %v18399_v12 = vld [vmem:[#allocation116_spill] sm:$0xff] }
 0x5c7   : > { %v9753_v43 = vpop.eup %9752  ;;  %v7029_v33 = vadd.f32 1.0, %v9751_v8  ;;  %v16159_v15 = vmul.f32 0.5, %v5879_v4  ;;  %v7387_v9 = vadd.f32 %v15764_v53, %v16025_v23  ;;  %v16164_v0 = vmul.f32 %v7028_v63, %v16098_v10  ;;  %8357 = vmatpush3.bf16.xpose.msra.mxu0 %v7477_v48  ;;  %v18398_v4 = vld [vmem:[#allocation184_spill] sm:$0xff] }
 0x5c8   : > { %v7027_v6 = vadd.f32 1.0, %v9753_v43  ;;  %v5900_v52 = vadd.f32 %v15774_v47, %v18396_v22  ;;  %v5892_v61 = vadd.f32 %v15774_v47, %v18397_v5  ;;  %v16171_v49 = vmul.f32 %v7026_v58, %v16100_v20  ;;  %v18400_v31 = vld [vmem:[#allocation212_spill] sm:$0xff] }
 0x5c9   : > { %v7486_v16 = vpack.c.bf16 %v7387_v9, %v7386_v55  ;;  %v5903_v45 = vadd.f32 %v15774_v47, %v18398_v4  ;;  %v5895_v53 = vadd.f32 %v15774_v47, %v18399_v12  ;;  %v16178_v23 = vmul.f32 %v7029_v33, %v16104_v37  ;;  %v18401_v48 = vld [vmem:[#allocation304_spill] sm:$0xff]  ;;  %v18403_v9 = vld [vmem:[#allocation123_spill] sm:$0xff] }
 0x5ca   : > { %v16180_v10 = vmul.f32 %v7027_v6, %v6259_v51  ;;  %v16182_v56 = vmul.f32 0.5, %v5900_v52  ;;  %v6524_v29 = vmul.f32 0.70710677, %v5900_v52  ;;  %v16184_v7 = vmul.f32 0.5, %v5892_v61  ;;  %v18402_v43 = vld [vmem:[#allocation208_spill] sm:$0xff] }
 0x5cb   : > { %8358 = vmatprep.subr.bf16.mxu0 %v7486_v16  ;;  %v6522_v20 = vmul.f32 0.70710677, %v5892_v61  ;;  %v16186_v63 = vmul.f32 0.5, %v5903_v45  ;;  %v6525_v8 = vmul.f32 0.70710677, %v5903_v45  ;;  %v7478_v40 = vpack.c.bf16 %v15694_v17, %v18400_v31  ;;  %v18404_v17 = vld [vmem:[#allocation261_spill] sm:$0xff] }
 0x5cc   : > { %9762 = verf.f32 %v6524_v29  ;;  %v6523_v58 = vmul.f32 0.70710677, %v5895_v53  ;;  %v7388_v37 = vadd.f32 %v15701_v46, %v15966_v26  ;;  %v7389_v55 = vadd.f32 %v18401_v48, %v16008_v30  ;;  %v18405_v4 = vld [vmem:[#allocation192_spill] sm:$0xff] }
 0x5cd   : > { %v9755_v51 = vpop.eup %9754  ;;  %9764 = verf.f32 %v6522_v20  ;;  %v5916_v33 = vadd.f32 %v15774_v47, %v18402_v43  ;;  %v5908_v6 = vadd.f32 %v15774_v47, %v18403_v9  ;;  %v16198_v5 = vmul.f32 0.5, %v5895_v53  ;;  %v18406_v43 = vld [vmem:[#allocation188_spill] sm:$0xff] }
 0x5ce   : > { %v9757_v22 = vpop.eup %9756  ;;  %v7032_v52 = vadd.f32 1.0, %v9755_v51  ;;  %9766 = verf.f32 %v6525_v8  ;;  %v5919_v61 = vadd.f32 %v15774_v47, %v18404_v17  ;;  %v7487_v16 = vpack.c.bf16 %v7389_v55, %v7388_v37 }
 0x5cf   : > { %v9759_v46 = vpop.eup %9758  ;;  %v7030_v26 = vadd.f32 1.0, %v9757_v22  ;;  %9768 = verf.f32 %v6523_v58  ;;  %v5911_v30 = vadd.f32 %v15774_v47, %v18405_v4  ;;  %8359 = vmatpush3.bf16.xpose.msra.mxu0 %v7478_v40  ;;  %v16207_v20 = vmul.f32 0.5, %v5916_v33 }
 0x5d0   : > { %v9761_v45 = vpop.eup %9760  ;;  %v16205_v12 = vmul.f32 %v7032_v52, %v16134_v28  ;;  %v7033_v29 = vadd.f32 1.0, %v9759_v46  ;;  %v6528_v53 = vmul.f32 0.70710677, %v5916_v33  ;;  %8360 = vmatprep.subr.bf16.mxu0 %v7487_v16  ;;  %v16212_v51 = vmul.f32 0.5, %v5908_v6  ;;  %v18407_v33 = vld [vmem:[#allocation166_spill] sm:$0xff]  ;;  %v18409_v52 = vld [vmem:[#allocation292_spill] sm:$0xff] }
 0x5d1   : > { %v16210_v8 = vmul.f32 %v7030_v26, %v16140_v57  ;;  %v7031_v31 = vadd.f32 1.0, %v9761_v45  ;;  %v6526_v58 = vmul.f32 0.70710677, %v5908_v6  ;;  %v16217_v48 = vmul.f32 0.5, %v5919_v61  ;;  %v18411_v26 = vld [vmem:[#allocation272_spill] sm:$0xff] }
 0x5d2   : > { %v16215_v37 = vmul.f32 %v7033_v29, %v16146_v25  ;;  %9770 = verf.f32 %v6528_v53  ;;  %v6529_v28 = vmul.f32 0.70710677, %v5919_v61  ;;  %v16219_v40 = vmul.f32 0.5, %v5911_v30  ;;  %v18408_v25 = vld [vmem:[#allocation235_spill] sm:$0xff] }
 0x5d3   : > { %9772 = verf.f32 %v6526_v58  ;;  %v6527_v55 = vmul.f32 0.70710677, %v5911_v30  ;;  %v7479_v57 = vpack.c.bf16 %v18407_v33, %v18406_v43  ;;  %v7390_v9 = vadd.f32 %v15810_v27, %v16041_v32  ;;  %v18410_v61 = vld [vmem:[#allocation215_spill] sm:$0xff] }
 0x5d4   : > { %9774 = verf.f32 %v6529_v28  ;;  %v7391_v6 = vadd.f32 %v15856_v54, %v16086_v14  ;;  %v5932_v22 = vadd.f32 %v15774_v47, %v18408_v25  ;;  %v5924_v17 = vadd.f32 %v15774_v47, %v18409_v52  ;;  %v18412_v54 = vld [vmem:[#allocation169_spill] sm:$0xff] }
 0x5d5   : > { %9776 = verf.f32 %v6527_v55  ;;  %v5935_v46 = vadd.f32 %v15774_v47, %v18410_v61  ;;  %v5927_v16 = vadd.f32 %v15774_v47, %v18411_v26  ;;  %v16236_v30 = vmul.f32 %v7031_v31, %v16159_v15 }
 0x5d6   : > { %v9763_v4 = vpop.eup %9762  ;;  %v7488_v27 = vpack.c.bf16 %v7391_v6, %v7390_v9  ;;  %v6532_v32 = vmul.f32 0.70710677, %v5932_v22  ;;  %v7480_v14 = vpack.c.bf16 %v15787_v50, %v18412_v54  ;;  %v16240_v53 = vmul.f32 0.5, %v5932_v22 }
 0x5d7   : > { %v9765_v45 = vpop.eup %9764  ;;  %v7036_v29 = vadd.f32 1.0, %v9763_v4  ;;  %v16242_v58 = vmul.f32 0.5, %v5924_v17  ;;  %v6530_v28 = vmul.f32 0.70710677, %v5924_v17  ;;  %8361 = vmatpush3.bf16.xpose.msra.mxu0 %v7479_v57  ;;  %v16244_v33 = vmul.f32 0.5, %v5935_v46  ;;  %v18413_v17 = vld [vmem:[#allocation143_spill] sm:$0xff] }
 0x5d8   : > { %v9767_v55 = vpop.eup %9766  ;;  %v7034_v43 = vadd.f32 1.0, %v9765_v45  ;;  %9778 = verf.f32 %v6532_v32  ;;  %v6533_v15 = vmul.f32 0.70710677, %v5935_v46  ;;  %8362 = vmatprep.subr.bf16.mxu0 %v7488_v27  ;;  %v16246_v6 = vmul.f32 0.5, %v5927_v16  ;;  %v18414_v46 = vld [vmem:[#allocation293_spill] sm:$0xff]  ;;  %v18415_v27 = vld [vmem:[#allocation320_spill] sm:$0xff] }
 0x5d9   : > { %v9769_v31 = vpop.eup %9768  ;;  %v7037_v9 = vadd.f32 1.0, %v9767_v55  ;;  %9780 = verf.f32 %v6530_v28  ;;  %v6531_v50 = vmul.f32 0.70710677, %v5927_v16  ;;  %v16249_v25 = vmul.f32 %v7036_v29, %v16182_v56  ;;  %v18417_v29 = vld [vmem:[#allocation98_spill] sm:$0xff] }
 0x5da   : > { %v7035_v22 = vadd.f32 1.0, %v9769_v31  ;;  %9782 = verf.f32 %v6533_v15  ;;  %v7392_v52 = vadd.f32 %v15796_v59, %v16028_v44  ;;  %v16254_v57 = vmul.f32 %v7034_v43, %v16184_v7  ;;  %v18416_v44 = vld [vmem:[#allocation310_spill] sm:$0xff] }
 0x5db   : > { %9784 = verf.f32 %v6531_v50  ;;  %v7393_v61 = vadd.f32 %v18413_v17, %v16060_v42  ;;  %v5948_v26 = vadd.f32 %v15774_v47, %v18414_v46  ;;  %v16261_v16 = vmul.f32 %v7037_v9, %v16186_v63 }
 0x5dc   : > { %v9771_v4 = vpop.eup %9770  ;;  %v16264_v56 = vmul.f32 %v7035_v22, %v16198_v5  ;;  %v5940_v59 = vadd.f32 %v15774_v47, %v18415_v27  ;;  %v5951_v7 = vadd.f32 %v15774_v47, %v18416_v44  ;;  %v5943_v28 = vadd.f32 %v15774_v47, %v18417_v29  ;;  %v18419_v27 = vld [vmem:[#allocation95_spill] sm:$0xff] }
 0x5dd   : > { %v9773_v32 = vpop.eup %9772  ;;  %v7040_v54 = vadd.f32 1.0, %v9771_v4  ;;  %v7489_v45 = vpack.c.bf16 %v7393_v61, %v7392_v52  ;;  %v6536_v42 = vmul.f32 0.70710677, %v5948_v26  ;;  %v16272_v63 = vmul.f32 0.5, %v5948_v26  ;;  %v18418_v4 = vld [vmem:[#allocation288_spill] sm:$0xff] }
 0x5de   : > { %v9775_v55 = vpop.eup %9774  ;;  %v7038_v43 = vadd.f32 1.0, %v9773_v32  ;;  %v16274_v15 = vmul.f32 0.5, %v5940_v59  ;;  %v6534_v5 = vmul.f32 0.70710677, %v5940_v59  ;;  %v16276_v50 = vmul.f32 0.5, %v5951_v7 }
 0x5df   : > { %v9777_v31 = vpop.eup %9776  ;;  %v7041_v9 = vadd.f32 1.0, %v9775_v55  ;;  %9786 = verf.f32 %v6536_v42  ;;  %v6537_v22 = vmul.f32 0.70710677, %v5951_v7  ;;  %v16279_v17 = vmul.f32 %v7040_v54, %v16207_v20  ;;  %8363 = vmatpush3.bf16.xpose.msra.mxu0 %v7480_v14  ;;  %v18420_v20 = vld [vmem:[#allocation306_spill] sm:$0xff]  ;;  %v18422_v14 = vld [vmem:[#allocation219_spill] sm:$0xff] }
 0x5e0   : > { %v16282_v52 = vmul.f32 %v7038_v43, %v16212_v51  ;;  %v7039_v61 = vadd.f32 1.0, %v9777_v31  ;;  %9788 = verf.f32 %v6534_v5  ;;  %8364 = vmatprep.subr.bf16.mxu0 %v7489_v45  ;;  %v16284_v46 = vmul.f32 0.5, %v5943_v28  ;;  %v18421_v51 = vld [vmem:[#allocation33_spill] sm:$0xff]  ;;  %v18424_v43 = vld [vmem:[#allocation80_spill] sm:$0xff] }
 0x5e1   : > { %9790 = verf.f32 %v6537_v22  ;;  %v6535_v26 = vmul.f32 0.70710677, %v5943_v28  ;;  %v7481_v59 = vpack.c.bf16 %v18419_v27, %v18418_v4  ;;  %v16289_v7 = vmul.f32 %v7041_v9, %v16217_v48  ;;  %v18423_v28 = vld [vmem:[#allocation50_spill] sm:$0xff] }
 0x5e2   : > { %v9779_v44 = vpop.eup %9778  ;;  %v7410_v32 = vadd.f32 %v16171_v49, %v18420_v20  ;;  %v7411_v54 = vadd.f32 %v16180_v10, %v18421_v51  ;;  %v5964_v45 = vadd.f32 %v15774_v47, %v18422_v14  ;;  %v5956_v55 = vadd.f32 %v15774_v47, %v18423_v28 }
 0x5e3   : > { %v9781_v42 = vpop.eup %9780  ;;  %v7044_v29 = vadd.f32 1.0, %v9779_v44  ;;  %9792 = verf.f32 %v6535_v26  ;;  %v5967_v5 = vadd.f32 %v15774_v47, %v18424_v43  ;;  %v16302_v31 = vmul.f32 %v7039_v61, %v16219_v40  ;;  %v18425_v47 = vld [vmem:[#allocation294_spill] sm:$0xff] }
 0x5e4   : > { %v9783_v48 = vpop.eup %9782  ;;  %v7042_v49 = vadd.f32 1.0, %v9781_v42  ;;  %v7498_v9 = vpack.c.bf16 %v7411_v54, %v7410_v32  ;;  %v6540_v22 = vmul.f32 0.70710677, %v5964_v45  ;;  %v16305_v20 = vmul.f32 0.5, %v5964_v45  ;;  %v18426_v32 = vld [vmem:[#allocation240_spill] sm:$0xff]  ;;  %v18427_v45 = vld [vmem:[#allocation117_spill] sm:$0xff] }
 0x5e5   : > { %v9785_v10 = vpop.eup %9784  ;;  %v7300_v4 = vmul.f32 %v7044_v29, %v16240_v53  ;;  %v7045_v27 = vadd.f32 1.0, %v9783_v48  ;;  %v6538_v26 = vmul.f32 0.70710677, %v5956_v55  ;;  %v16308_v14 = vmul.f32 0.5, %v5956_v55  ;;  %v18428_v55 = vld [vmem:[#allocation274_spill] sm:$0xff]  ;;  %v18429_v48 = vld [vmem:[#allocation81_spill] sm:$0xff] }
 0x5e6   : > { %v7298_v44 = vmul.f32 %v7042_v49, %v16242_v58  ;;  %v7043_v51 = vadd.f32 1.0, %v9785_v10  ;;  %9794 = verf.f32 %v6540_v22  ;;  %v6541_v61 = vmul.f32 0.70710677, %v5967_v5  ;;  %v16321_v58 = vld [vmem:[%s16778_s17] ss:$0 sm:$0xff]  ;;  %v18431_v10 = vld [vmem:[#allocation300_spill] sm:$0xff] }
 0x5e7   : > { %v16311_v28 = vadd.f32 %v7300_v4, %v18425_v47  ;;  %v7301_v40 = vmul.f32 %v7045_v27, %v16244_v33  ;;  %9796 = verf.f32 %v6538_v26  ;;  %8365 = vmatpush3.bf16.xpose.msra.mxu0 %v7481_v59  ;;  %v5959_v42 = vadd.f32 %v16321_v58, %v18427_v45  ;;  %v18430_v59 = vld [vmem:[#allocation316_spill] sm:$0xff] }
 0x5e8   : > { %v16315_v54 = vadd.f32 %v7298_v44, %v18426_v32  ;;  %v7299_v53 = vmul.f32 %v7043_v51, %v16246_v6  ;;  %v7490_v29 = vpack.c.bf16 %v16157_v1, %v16132_v41  ;;  %8368 = vmatprep.subr.bf16.mxu0 %v7498_v9  ;;  %9798 = verf.f32 %v6541_v61  ;;  %v18432_v47 = vld [vmem:[#allocation176_spill] sm:$0xff] }
 0x5e9   : > { %v9787_v33 = vpop.eup %9786  ;;  %v16328_v43 = vadd.f32 %v7301_v40, %v18428_v55  ;;  %v7412_v6 = vadd.f32 %v16164_v0, %v18429_v48  ;;  %v7413_v49 = vadd.f32 %v16178_v23, %v18430_v59  ;;  %v6285_v26 = vmul.f32 0.5, %v5967_v5  ;;  %v18433_v40 = vld [vmem:[#allocation78_spill] sm:$0xff]  ;;  %v18434_v23 = vld [vmem:[#allocation93_spill] sm:$0xff] }
 0x5ea   : > { %v9789_v22 = vpop.eup %9788  ;;  %v16335_v4 = vadd.f32 %v7299_v53, %v18431_v10  ;;  %v7048_v27 = vadd.f32 1.0, %v9787_v33  ;;  %v6539_v44 = vmul.f32 0.70710677, %v5959_v42  ;;  %v5980_v9 = vadd.f32 %v16321_v58, %v18432_v47 }
 0x5eb   : > { %v9791_v41 = vpop.eup %9790  ;;  %v7046_v1 = vadd.f32 1.0, %v9789_v22  ;;  %v7499_v51 = vpack.c.bf16 %v7413_v49, %v7412_v6  ;;  %v5972_v61 = vadd.f32 %v16321_v58, %v18433_v40  ;;  %v5983_v53 = vadd.f32 %v16321_v58, %v18434_v23  ;;  %v18435_v6 = vld [vmem:[#allocation276_spill] sm:$0xff] }
 0x5ec   : > { %v7304_v0 = vmul.f32 %v7048_v27, %v16272_v63  ;;  %v7049_v32 = vadd.f32 1.0, %v9791_v41  ;;  %9800 = verf.f32 %v6539_v44  ;;  %v6283_v33 = vmul.f32 0.5, %v5959_v42  ;;  %v18436_v63 = vld [vmem:[#allocation313_spill] sm:$0xff]  ;;  %v18437_v41 = vld [vmem:[#allocation298_spill] sm:$0xff] }
 0x5ed   : > { %v9793_v45 = vpop.eup %9792  ;;  %v7302_v5 = vmul.f32 %v7046_v1, %v16274_v15  ;;  %v16345_v55 = vmul.f32 0.5, %v5980_v9  ;;  %v6544_v48 = vmul.f32 0.70710677, %v5980_v9  ;;  %v6542_v10 = vmul.f32 0.70710677, %v5972_v61 }
 0x5ee   : > { %v16348_v59 = vadd.f32 %v7304_v0, %v18435_v6  ;;  %v7305_v49 = vmul.f32 %v7049_v32, %v16276_v50  ;;  %v7047_v22 = vadd.f32 1.0, %v9793_v45  ;;  %8367 = vmatmul.mubr.bf16.vlgmr.msra.gmra.mrb[76].mxu0 %v15955_v11  ;;  %v16355_v44 = vmul.f32 0.5, %v5972_v61  ;;  %v18438_v50 = vld [vmem:[#allocation115_spill] sm:$0xff]  ;;  %v18439_v32 = vld [vmem:[#allocation198_spill] sm:$0xff] }
 0x5ef   : > { %v16352_v27 = vadd.f32 %v7302_v5, %v18436_v63  ;;  %9802 = verf.f32 %v6544_v48  ;;  %v6545_v15 = vmul.f32 0.70710677, %v5983_v53  ;;  %8369 = vmatpush3.bf16.xpose.msra.mxu0 %v7490_v29  ;;  %v5975_v9 = vadd.f32 %v16321_v58, %v18438_v50  ;;  %8384 = vmatprep.mubr.bf16.mxu0 %v15955_v11  ;;  %v18440_v45 = vld [vmem:[#allocation295_spill] sm:$0xff]  ;;  %v18441_v11 = vld [vmem:[#allocation30_spill] sm:$0xff] }
 0x5f0   : > { %v9795_v42 = vpop.eup %9794  ;;  %v16358_v1 = vadd.f32 %v7305_v49, %v18437_v41  ;;  %v7303_v47 = vmul.f32 %v7047_v22, %v16284_v46  ;;  %9804 = verf.f32 %v6542_v10  ;;  %8370 = vmatprep.subr.bf16.mxu0 %v7499_v51  ;;  %v7491_v61 = vpack.c.bf16 %v16144_v34, %v16112_v38  ;;  %v18442_v51 = vld [vmem:[#allocation139_spill] sm:$0xff] }
 0x5f1   : > { %v9797_v40 = vpop.eup %9796  ;;  %v7052_v0 = vadd.f32 1.0, %v9795_v42  ;;  %9806 = verf.f32 %v6545_v15  ;;  %v7414_v23 = vadd.f32 %v16210_v8, %v18439_v32  ;;  %v6289_v29 = vmul.f32 0.5, %v5983_v53  ;;  %v18443_v63 = vld [vmem:[#allocation175_spill] sm:$0xff]  ;;  %v18444_v15 = vld [vmem:[#allocation221_spill] sm:$0xff]  ;;  %v18445_v42 = vld [vmem:[#allocation314_spill] sm:$0xff] }
 0x5f2   : > { %v16369_v5 = vadd.f32 %v7303_v47, %v18440_v45  ;;  %v7050_v46 = vadd.f32 1.0, %v9797_v40  ;;  %v6543_v48 = vmul.f32 0.70710677, %v5975_v9  ;;  %v9799_v6 = vpop.eup %9798  ;;  %v7415_v22 = vadd.f32 %v16236_v30, %v18441_v11  ;;  %v18446_v40 = vld [vmem:[#allocation32_spill] sm:$0xff] }
 0x5f3   : > { %v7308_v49 = vmul.f32 %v7052_v0, %v16305_v20  ;;  %v5996_v10 = vadd.f32 %v16321_v58, %v18442_v51  ;;  %v5988_v38 = vadd.f32 %v16321_v58, %v18443_v63  ;;  %v7053_v8 = vadd.f32 1.0, %v9799_v6  ;;  %v18447_v6 = vld [vmem:[#allocation105_spill] sm:$0xff]  ;;  %v18450_v63 = vld [vmem:[#allocation162_spill] sm:$0xff] }
 0x5f4   : > { %v7306_v34 = vmul.f32 %v7050_v46, %v16308_v14  ;;  %9808 = verf.f32 %v6543_v48  ;;  %v5999_v53 = vadd.f32 %v16321_v58, %v18444_v15  ;;  %v6287_v20 = vmul.f32 0.5, %v5975_v9  ;;  %v18448_v9 = vld [vmem:[#allocation227_spill] sm:$0xff] }
 0x5f5   : > { %v16382_v41 = vadd.f32 %v7308_v49, %v18445_v42  ;;  %v7500_v47 = vpack.c.bf16 %v7415_v22, %v7414_v23  ;;  %v6548_v50 = vmul.f32 0.70710677, %v5996_v10  ;;  %v7309_v32 = vmul.f32 %v7053_v8, %v6285_v26  ;;  %v18449_v49 = vld [vmem:[#allocation239_spill] sm:$0xff] }
 0x5f6   : > { %v9801_v30 = vpop.eup %9800  ;;  %v16385_v0 = vadd.f32 %v7306_v34, %v18446_v40  ;;  %v16387_v45 = vmul.f32 0.5, %v5996_v10  ;;  %v6546_v11 = vmul.f32 0.70710677, %v5988_v38  ;;  %v16389_v46 = vmul.f32 0.5, %v5988_v38  ;;  %v18451_v34 = vld [vmem:[#allocation190_spill] sm:$0xff] }
 0x5f7   : > { %v7051_v14 = vadd.f32 1.0, %v9801_v30  ;;  %9810 = verf.f32 %v6548_v50  ;;  %v6549_v48 = vmul.f32 0.70710677, %v5999_v53  ;;  %v16392_v51 = vadd.f32 %v7309_v32, %v18447_v6  ;;  %8371 = vmatpush3.bf16.xpose.msra.mxu0 %v7491_v61  ;;  %v18452_v30 = vld [vmem:[#allocation242_spill] sm:$0xff] }
 0x5f8   : > { %9812 = verf.f32 %v6546_v11  ;;  %v5991_v23 = vadd.f32 %v16321_v58, %v18448_v9  ;;  %v7492_v22 = vpack.c.bf16 %v16013_v18, %v18449_v49  ;;  %8372 = vmatprep.subr.bf16.mxu0 %v7500_v47  ;;  %v7416_v38 = vadd.f32 %v16205_v12, %v18450_v63  ;;  %v18453_v18 = vld [vmem:[#allocation324_spill] sm:$0xff] }
 0x5f9   : > { %v9803_v26 = vpop.eup %9802  ;;  %v7307_v10 = vmul.f32 %v7051_v14, %v6283_v33  ;;  %9814 = verf.f32 %v6549_v48  ;;  %v7417_v8 = vadd.f32 %v16215_v37, %v18451_v34  ;;  %v16402_v61 = vmul.f32 0.5, %v5999_v53  ;;  %v18454_v14 = vld [vmem:[#allocation57_spill] sm:$0xff] }
 0x5fa   : > { %v9805_v15 = vpop.eup %9804  ;;  %v7056_v42 = vadd.f32 1.0, %v9803_v26  ;;  %v6547_v50 = vmul.f32 0.70710677, %v5991_v23  ;;  %v6012_v40 = vadd.f32 %v16321_v58, %v18452_v30  ;;  %v6004_v12 = vadd.f32 %v16321_v58, %v18454_v14  ;;  %v18457_v30 = vld [vmem:[#allocation216_spill] sm:$0xff] }
 0x5fb   : > { %v9807_v32 = vpop.eup %9806  ;;  %v16407_v11 = vadd.f32 %v7307_v10, %v18453_v18  ;;  %v7054_v33 = vadd.f32 1.0, %v9805_v15  ;;  %v7501_v47 = vpack.c.bf16 %v7417_v8, %v7416_v38  ;;  %v16412_v6 = vmul.f32 0.5, %v5991_v23  ;;  %v18455_v10 = vld [vmem:[#allocation277_spill] sm:$0xff]  ;;  %v18456_v8 = vld [vmem:[#allocation136_spill] sm:$0xff] }
 0x5fc   : > { %v7312_v48 = vmul.f32 %v7056_v42, %v16345_v55  ;;  %v7057_v37 = vadd.f32 1.0, %v9807_v32  ;;  %9816 = verf.f32 %v6547_v50  ;;  %v16415_v9 = vmul.f32 0.5, %v6012_v40  ;;  %v18458_v23 = vld [vmem:[#allocation200_spill] sm:$0xff] }
 0x5fd   : > { %v7310_v53 = vmul.f32 %v7054_v33, %v16355_v44  ;;  %v6552_v49 = vmul.f32 0.70710677, %v6012_v40  ;;  %v6550_v26 = vmul.f32 0.70710677, %v6004_v12  ;;  %v6015_v15 = vadd.f32 %v16321_v58, %v18456_v8  ;;  %v18459_v44 = vld [vmem:[#allocation29_spill] sm:$0xff]  ;;  %v18460_v32 = vld [vmem:[#allocation24_spill] sm:$0xff] }
 0x5fe   : > { %v9809_v63 = vpop.eup %9808  ;;  %v16418_v34 = vadd.f32 %v7312_v48, %v18455_v10  ;;  %v7313_v38 = vmul.f32 %v7057_v37, %v6289_v29  ;;  %v6007_v55 = vadd.f32 %v16321_v58, %v18457_v30  ;;  %v7493_v40 = vpack.c.bf16 %v15992_v19, %v18459_v44  ;;  %v18461_v10 = vld [vmem:[#allocation137_spill] sm:$0xff]  ;;  %v18462_v19 = vld [vmem:[#allocation91_spill] sm:$0xff] }
 0x5ff   : > { %v16425_v42 = vadd.f32 %v7310_v53, %v18458_v23  ;;  %v7055_v50 = vadd.f32 1.0, %v9809_v63  ;;  %9818 = verf.f32 %v6552_v49  ;;  %8373 = vmatpush3.bf16.xpose.msra.mxu0 %v7492_v22  ;;  %v16432_v33 = vmul.f32 0.5, %v6004_v12  ;;  %v18463_v22 = vld [vmem:[#allocation206_spill] sm:$0xff]  ;;  %v18464_v30 = vld [vmem:[#allocation71_spill] sm:$0xff] }
 0x600   : > { %v16430_v18 = vadd.f32 %v7313_v38, %v18460_v32  ;;  %9820 = verf.f32 %v6550_v26  ;;  %v6553_v29 = vmul.f32 0.70710677, %v6015_v15  ;;  %8374 = vmatprep.subr.bf16.mxu0 %v7501_v47  ;;  %v16434_v37 = vmul.f32 0.5, %v6015_v15 }
 0x601   : > { %v9811_v14 = vpop.eup %9810  ;;  %v7311_v48 = vmul.f32 %v7055_v50, %v6287_v20  ;;  %v6551_v53 = vmul.f32 0.70710677, %v6007_v55  ;;  %v7418_v49 = vadd.f32 %v16254_v57, %v18461_v10  ;;  %v7419_v38 = vadd.f32 %v16264_v56, %v18462_v19  ;;  %v18468_v19 = vld [vmem:[#allocation142_spill] sm:$0xff] }
 0x602   : > { %v9813_v63 = vpop.eup %9812  ;;  %v7060_v8 = vadd.f32 1.0, %v9811_v14  ;;  %9822 = verf.f32 %v6553_v29  ;;  %v6028_v12 = vadd.f32 %v16321_v58, %v18463_v22  ;;  %v6020_v47 = vadd.f32 %v16321_v58, %v15985_v2  ;;  %v18466_v2 = vld [vmem:[#allocation280_spill] sm:$0xff] }
 0x603   : > { %v9815_v26 = vpop.eup %9814  ;;  %v16443_v23 = vadd.f32 %v7311_v48, %v18464_v30  ;;  %v7058_v20 = vadd.f32 1.0, %v9813_v63  ;;  %9824 = verf.f32 %v6551_v53  ;;  %v6295_v50 = vmul.f32 0.5, %v6007_v55  ;;  %v18465_v53 = vld [vmem:[#allocation258_spill] sm:$0xff] }
 0x604   : > { %v16448_v57 = vmul.f32 %v7060_v8, %v16387_v45  ;;  %v7061_v15 = vadd.f32 1.0, %v9815_v26  ;;  %v7502_v44 = vpack.c.bf16 %v7419_v38, %v7418_v49  ;;  %v16453_v32 = vmul.f32 0.5, %v6028_v12 }
 0x605   : > { %v16451_v56 = vmul.f32 %v7058_v20, %v16389_v46  ;;  %v6556_v29 = vmul.f32 0.70710677, %v6028_v12  ;;  %v6554_v14 = vmul.f32 0.70710677, %v6020_v47  ;;  %v16455_v10 = vmul.f32 0.5, %v6020_v47  ;;  %v18467_v46 = vld [vmem:[#allocation161_spill] sm:$0xff] }
 0x606   : > { %v9817_v48 = vpop.eup %9816  ;;  %v6031_v63 = vadd.f32 %v16321_v58, %v18465_v53  ;;  %v6023_v45 = vadd.f32 %v16321_v58, %v18466_v2  ;;  %v7494_v55 = vpack.c.bf16 %v16079_v21, %v16048_v35  ;;  %v7420_v8 = vadd.f32 %v16249_v25, %v18467_v46 }
 0x607   : > { %v7059_v49 = vadd.f32 1.0, %v9817_v48  ;;  %9826 = verf.f32 %v6556_v29  ;;  %v7421_v38 = vadd.f32 %v16261_v16, %v18468_v19  ;;  %v7317_v22 = vmul.f32 %v7061_v15, %v16402_v61  ;;  %8375 = vmatpush3.bf16.xpose.msra.mxu0 %v7493_v40  ;;  %v18471_v19 = vld [vmem:[#allocation174_spill] sm:$0xff] }
 0x608   : > { %9828 = verf.f32 %v6554_v14  ;;  %v16468_v12 = vmul.f32 0.5, %v6031_v63  ;;  %v6557_v26 = vmul.f32 0.70710677, %v6031_v63  ;;  %8376 = vmatprep.subr.bf16.mxu0 %v7502_v44  ;;  %v16470_v20 = vmul.f32 0.5, %v6023_v45 }
 0x609   : > { %v9819_v30 = vpop.eup %9818  ;;  %v6555_v35 = vmul.f32 0.70710677, %v6023_v45  ;;  %v7503_v21 = vpack.c.bf16 %v7421_v38, %v7420_v8  ;;  %v6044_v47 = vadd.f32 %v16321_v58, %v16022_v62  ;;  %v6036_v16 = vadd.f32 %v16321_v58, %v16030_v39  ;;  %v18470_v8 = vld [vmem:[#allocation248_spill] sm:$0xff] }
 0x60a   : > { %v9821_v25 = vpop.eup %9820  ;;  %v7064_v29 = vadd.f32 1.0, %v9819_v30  ;;  %9830 = verf.f32 %v6557_v26  ;;  %v6047_v61 = vadd.f32 %v16321_v58, %v16038_v36  ;;  %v7315_v40 = vmul.f32 %v7059_v49, %v16412_v6  ;;  %v18469_v6 = vld [vmem:[#allocation226_spill] sm:$0xff]  ;;  %v18472_v26 = vld [vmem:[#allocation159_spill] sm:$0xff] }
 0x60b   : > { %v7062_v15 = vadd.f32 1.0, %v9821_v25  ;;  %9832 = verf.f32 %v6555_v35  ;;  %v6560_v44 = vmul.f32 0.70710677, %v6044_v47  ;;  %v16480_v53 = vmul.f32 0.5, %v6044_v47  ;;  %v18473_v35 = vld [vmem:[#allocation244_spill] sm:$0xff] }
 0x60c   : > { %v9823_v14 = vpop.eup %9822  ;;  %v7320_v48 = vmul.f32 %v7064_v29, %v16415_v9  ;;  %v16482_v62 = vmul.f32 0.5, %v6036_v16  ;;  %v6558_v63 = vmul.f32 0.70710677, %v6036_v16  ;;  %v16484_v39 = vmul.f32 0.5, %v6047_v61 }
 0x60d   : > { %v9825_v2 = vpop.eup %9824  ;;  %v7065_v45 = vadd.f32 1.0, %v9823_v14  ;;  %9834 = verf.f32 %v6560_v44  ;;  %v6561_v46 = vmul.f32 0.70710677, %v6047_v61  ;;  %v16488_v49 = vadd.f32 %v16321_v58, %v18469_v6 }
 0x60e   : > { %v7063_v36 = vadd.f32 1.0, %v9825_v2  ;;  %9836 = verf.f32 %v6558_v63  ;;  %v7495_v9 = vpack.c.bf16 %v18471_v19, %v18470_v8  ;;  %v7318_v38 = vmul.f32 %v7062_v15, %v16432_v33  ;;  %v18474_v33 = vld [vmem:[#allocation236_spill] sm:$0xff] }
 0x60f   : > { %9838 = verf.f32 %v6561_v46  ;;  %v7422_v30 = vadd.f32 %v16282_v52, %v18472_v26  ;;  %v7423_v47 = vadd.f32 %v16302_v31, %v18473_v35  ;;  %v7321_v25 = vmul.f32 %v7065_v45, %v16434_v37  ;;  %8377 = vmatpush3.bf16.xpose.msra.mxu0 %v7494_v55  ;;  %v18475_v52 = vld [vmem:[#allocation237_spill] sm:$0xff]  ;;  %v18478_v46 = vld [vmem:[#allocation74_spill] sm:$0xff] }
 0x610   : > { %v7319_v29 = vmul.f32 %v7063_v36, %v6295_v50  ;;  %v6559_v16 = vmul.f32 0.70710677, %v16488_v49  ;;  %v7496_v58 = vpack.c.bf16 %v16149_v3, %v16117_v24  ;;  %8378 = vmatprep.subr.bf16.mxu0 %v7503_v21  ;;  %v16503_v15 = vadd.f32 %v16279_v17, %v18474_v33  ;;  %v18476_v55 = vld [vmem:[#allocation73_spill] sm:$0xff]  ;;  %v18477_v21 = vld [vmem:[#allocation102_spill] sm:$0xff] }
 0x611   : > { %v9827_v61 = vpop.eup %9826  ;;  %v7504_v44 = vpack.c.bf16 %v7423_v47, %v7422_v30  ;;  %v16507_v14 = vadd.f32 %v16289_v7, %v18475_v52  ;;  %v7497_v31 = vpack.c.bf16 %v16137_v13, %v16107_v60  ;;  %v16513_v63 = vadd.f32 %v16451_v56, %v18476_v55  ;;  %v18479_v56 = vld [vmem:[#allocation96_spill] sm:$0xff]  ;;  %v16573_v60 = vpop.permute.xlu0 %7527 }
 0x612   : > { %v9829_v37 = vpop.eup %9828  ;;  %v7068_v50 = vadd.f32 1.0, %v9827_v61  ;;  %9840 = verf.f32 %v6559_v16  ;;  %v7443_v2 = vadd.f32 %v7315_v40, %v18477_v21  ;;  %v7506_v7 = vpack.c.bf16 %v16335_v4, %v16315_v54  ;;  %v18480_v16 = vld [vmem:[#allocation269_spill] sm:$0xff]  ;;  %v18481_v4 = vld [vmem:[#allocation66_spill] sm:$0xff]  ;;  %v18484_v55 = vld [vmem:[#allocation120_spill] sm:$0xff] }
 0x613   : > { %v7066_v45 = vadd.f32 1.0, %v9829_v37  ;;  %v7505_v17 = vpack.c.bf16 %v16507_v14, %v16503_v15  ;;  %v16522_v36 = vadd.f32 %v16448_v57, %v18478_v46  ;;  %v7445_v26 = vadd.f32 %v7317_v22, %v18479_v56  ;;  %v18482_v15 = vld [vmem:[#allocation92_spill] sm:$0xff]  ;;  %v18485_v21 = vld [vmem:[#allocation42_spill] sm:$0xff]  ;;  %v18487_v46 = vld [vmem:[#allocation225_spill] sm:$0xff] }
 0x614   : > { %v9831_v6 = vpop.eup %9830  ;;  %v7324_v8 = vmul.f32 %v7068_v50, %v16453_v32  ;;  %v7514_v19 = vpack.c.bf16 %v7443_v2, %v16513_v63  ;;  %v7507_v40 = vpack.c.bf16 %v16328_v43, %v16311_v28  ;;  %v7446_v54 = vadd.f32 %v7318_v38, %v18480_v16  ;;  %v18483_v43 = vld [vmem:[#allocation283_spill] sm:$0xff]  ;;  %v18491_v16 = vld [vmem:[#allocation70_spill] sm:$0xff] }
 0x615   : > { %v9833_v30 = vpop.eup %9832  ;;  %v7322_v35 = vmul.f32 %v7066_v45, %v16455_v10  ;;  %v7069_v47 = vadd.f32 1.0, %v9831_v6  ;;  %v7447_v61 = vadd.f32 %v7319_v29, %v18481_v4  ;;  %v7515_v33 = vpack.c.bf16 %v7445_v26, %v16522_v36  ;;  %v18489_v56 = vld [vmem:[#allocation179_spill] sm:$0xff] }
 0x616   : > { %v7067_v57 = vadd.f32 1.0, %v9833_v30  ;;  %v7508_v32 = vpack.c.bf16 %v16369_v5, %v16352_v27  ;;  %v7448_v52 = vadd.f32 %v7320_v48, %v18482_v15  ;;  %v7449_v37 = vadd.f32 %v7321_v25, %v18483_v43  ;;  %v18486_v25 = vld [vmem:[#allocation53_spill] sm:$0xff] }
 0x617   : > { %v9835_v22 = vpop.eup %9834  ;;  %v7325_v14 = vmul.f32 %v7069_v47, %v16468_v12  ;;  %v7516_v28 = vpack.c.bf16 %v7447_v61, %v7446_v54  ;;  %v7509_v10 = vpack.c.bf16 %v16358_v1, %v16348_v59  ;;  %8379 = vmatpush3.bf16.xpose.msra.mxu0 %v7495_v9  ;;  %v7450_v63 = vadd.f32 %v7322_v35, %v18484_v55  ;;  %v18490_v35 = vld [vmem:[#allocation61_spill] sm:$0xff] }
 0x618   : > { %v9837_v38 = vpop.eup %9836  ;;  %v7323_v29 = vmul.f32 %v7067_v57, %v16470_v20  ;;  %v7072_v50 = vadd.f32 1.0, %v9835_v22  ;;  %v7510_v27 = vpack.c.bf16 %v16407_v11, %v16385_v0  ;;  %8380 = vmatprep.subr.bf16.mxu0 %v7504_v44  ;;  %v7517_v12 = vpack.c.bf16 %v7449_v37, %v7448_v52  ;;  %v18492_v54 = vld [vmem:[#allocation285_spill] sm:$0xff] }
 0x619   : > { %v9839_v5 = vpop.eup %9838  ;;  %v7070_v48 = vadd.f32 1.0, %v9837_v38  ;;  %v7452_v2 = vadd.f32 %v7324_v8, %v18485_v21  ;;  %v7453_v45 = vadd.f32 %v7325_v14, %v18486_v25  ;;  %v7511_v9 = vpack.c.bf16 %v16392_v51, %v16382_v41  ;;  %v18488_v8 = vld [vmem:[#allocation308_spill] sm:$0xff]  ;;  %v18498_v38 = vld [vmem:[#allocation19_spill] sm:$0xff] }
 0x61a   : > { %v7328_v59 = vmul.f32 %v7072_v50, %v16480_v53  ;;  %v7073_v1 = vadd.f32 1.0, %v9839_v5  ;;  %v7451_v20 = vadd.f32 %v7323_v29, %v18487_v46  ;;  %v7512_v0 = vpack.c.bf16 %v16443_v23, %v16425_v42  ;;  %v18493_v23 = vld [vmem:[#allocation106_spill] sm:$0xff] }
 0x61b   : > { %v7326_v36 = vmul.f32 %v7070_v48, %v16482_v62  ;;  %v7519_v6 = vpack.c.bf16 %v7453_v45, %v7452_v2  ;;  %v7513_v11 = vpack.c.bf16 %v16430_v18, %v16418_v34  ;;  %v7201_v26 = vmul.f32 %v18489_v56, %v18488_v8 }
 0x61c   : > { %v9841_v44 = vpop.eup %9840  ;;  %v7329_v53 = vmul.f32 %v7073_v1, %v16484_v39  ;;  %v7518_v30 = vpack.c.bf16 %v7451_v20, %v7450_v63  ;;  %v7456_v47 = vadd.f32 %v7328_v59, %v18490_v35  ;;  %v6175_v41 = vmul.f32 0.5, %v18491_v16 }
 0x61d   : > { %v6303_v51 = vmul.f32 0.5, %v16488_v49  ;;  %v7071_v62 = vadd.f32 1.0, %v9841_v44  ;;  %v7454_v4 = vadd.f32 %v7326_v36, %v18492_v54  ;;  %v9883_v49 = vld [vmem:[%s16779_s18] sm:$0xf] }
 0x61e   : > { %v7457_v42 = vadd.f32 %v7329_v53, %v7201_v26  ;;  %v7199_v61 = vmul.f32 %v18493_v23, %v6175_v41 }
 0x61f   : > { %v7327_v34 = vmul.f32 %v7071_v62, %v6303_v51  ;;  %8381 = vmatpush3.bf16.xpose.msra.mxu0 %v7496_v58 }
 0x620   : > { %v7521_v18 = vpack.c.bf16 %v7457_v42, %v7456_v47  ;;  %8382 = vmatprep.subr.bf16.mxu0 %v7505_v17 }
 0x621   : > { %v7455_v39 = vadd.f32 %v7327_v34, %v7199_v61 }
 0x623   : > { %v7520_v57 = vpack.c.bf16 %v7455_v39, %v7454_v4 }
 0x627   : > { %8383 = vmatpush3.bf16.xpose.msra.mxu0 %v7497_v31 }
 0x628   : > { %8386 = vmatprep.subr.bf16.mxu0 %v7514_v19 }
 0x62e   : > { %8385 = vmatmul.mubr.bf16.vlgmr.msra.gmra.mrb[80].mxu0 %v9883_v49 }
 0x62f   : > { %8387 = vmatpush3.bf16.xpose.msra.mxu0 %v7506_v7  ;;  %8402 = vmatprep.mubr.bf16.mxu0 %v9883_v49 }
 0x630   : > { %8388 = vmatprep.subr.bf16.mxu0 %v7515_v33 }
 0x637   : > { %8389 = vmatpush3.bf16.xpose.msra.mxu0 %v7507_v40 }
 0x638   : > { %8390 = vmatprep.subr.bf16.mxu0 %v7516_v28 }
 0x63f   : > { %8391 = vmatpush3.bf16.xpose.msra.mxu0 %v7508_v32  ;;  %v4664_v32 = vld [vmem:[%s16782_s21] sm:$0x1] }
 0x640   : > { %8392 = vmatprep.subr.bf16.mxu0 %v7517_v12  ;;  %v4665_v37 = vmul.f32 2.0, %v4664_v32 }
 0x642   : > { %v4670_v29 = vrot.slane %v4665_v37, %v18498_v38 }
 0x647   : > { %8393 = vmatpush3.bf16.xpose.msra.mxu0 %v7509_v10 }
 0x648   : > { %8394 = vmatprep.subr.bf16.mxu0 %v7518_v30 }
 0x64f   : > { %8395 = vmatpush3.bf16.xpose.msra.mxu0 %v7510_v27 }
 0x650   : > { %8396 = vmatprep.subr.bf16.mxu0 %v7519_v6 }
 0x657   : > { %8397 = vmatpush3.bf16.xpose.msra.mxu0 %v7511_v9 }
 0x658   : > { %8398 = vmatprep.subr.bf16.mxu0 %v7520_v57 }
 0x65f   : > { %8399 = vmatpush3.bf16.xpose.msra.mxu0 %v7512_v0 }
 0x660   : > { %8400 = vmatprep.subr.bf16.mxu0 %v7521_v18 }
 0x667   : > { %8401 = vmatpush3.bf16.xpose.msra.mxu0 %v7513_v11 }
 0x66e   : > { %8403 = vmatmul.mubr.bf16.vlgmr.msra.gmra.mrb[84].mxu0 %v9883_v49 }
 0x672   : > { %v7564_v24 = vpop.f32.mrb[72].mxu0 }
 0x673   : > { %v7565_v13 = vadd.f32 %v7564_v24, %v16573_v60  ;;  %v7566_v3 = vpop.f32.mrb[73].mxu0 }
 0x674   : > { %v7567_v58 = vadd.f32 %v7566_v3, %v16573_v60  ;;  %v7568_v31 = vpop.f32.mrb[74].mxu0 }
 0x675   : > { %v7694_v7 = vsel %vm10329_vm2, -inf, %v7565_v13  ;;  %v7569_v19 = vpop.f32.mrb[75].mxu0 }
 0x676   : > { %7702 = vst [vmem:[%s16579_s4] sm:$0xff] %v7694_v7  ;;  %v7695_v40 = vsel %vm10329_vm2, -inf, %v7567_v58 }
 0x677   : > { %7703 = vst [vmem:[%s16579_s4 + $0x8] sm:$0xff] %v7695_v40 }
 0x6c1   : > { %v7605_v33 = vpop.f32.mrb[76].mxu0 }
 0x6c2   : > { %v7606_v15 = vadd.f32 %v7605_v33, %v16573_v60  ;;  %v7607_v52 = vpop.f32.mrb[77].mxu0 }
 0x6c3   : > { %v7608_v22 = vadd.f32 %v7607_v52, %v16573_v60  ;;  %v7609_v14 = vpop.f32.mrb[78].mxu0 }
 0x6c4   : > { %v7696_v28 = vsel %vm10329_vm2, -inf, %v7606_v15  ;;  %v7610_v43 = vpop.f32.mrb[79].mxu0 }
 0x6c5   : > { %7704 = vst [vmem:[%s16579_s4 + $0x10] sm:$0xff] %v7696_v28  ;;  %v7697_v10 = vsel %vm10329_vm2, -inf, %v7608_v22 }
 0x6c6   : > { %7705 = vst [vmem:[%s16579_s4 + $0x18] sm:$0xff] %v7697_v10 }
 0x6c7   : > { %9897 = shalt.err (!%p9894_p5)
}
 0x6c8   : > { %s9898_s9 = scalar_lea.hbm %s16605_s25, 384  ;;  %s9902_s1 = scalar_lea.hbm %s18497_s28, 768 }
 0x6c9   : > { %p9899_p6 = scmp.ne.s32.totalorder %s16605_s25, %s9898_s9  ;;  %p9903_p10 = scmp.lt.u32.totalorder %s16605_s25, %s18497_s28 }
 0x6ca   : > { %p9904_p11 = scmp.lt.u32.totalorder %s9902_s1, %s9898_s9  ;;  %p9906_p13 = scmp.lt.u32.totalorder %s9898_s9, %s16605_s25 }
 0x6cb   : > { %p9900_p7 = pnand %p9899_p6, %p10239_p4 }
 0x6cc   : > { %p9905_p12 = por %p9904_p11, %p9903_p10 }
 0x6cd   : > { %p9901_p9 = pneg %p9900_p7 }
 0x6ce   : > { %p9907_p0 = por %p9906_p13, %p9905_p12 }
 0x6d0   : > { %p9908_p1 = pnand %p9907_p0, %p9901_p9 }
 0x6d2   : > { %9911 = shalt.err (!%p9908_p1)
}
 0x6d3   : > { %s10062_s8 = smov 128   ;;  %s10063_s27 = smov 8   ;;  %v18501_v50 = vld [vmem:[#allocation218_spill] sm:$0xff] }
 0x6d4   : > { %s18499_s6 = scalar_lea.sflag [#allocation5], %s16598_s23  ;;  %s8179_s29 = sshll.u32 %s10046_s30, 7  ;;  %v4787_v55 = vadd.f32 %v18501_v50, %v4670_v29 }
 0x6d5   : > { %8715 = dma.vmem_to_hbm [thread:$0]  (%p10239_p4), %s16607_s24, 384, %s16605_s25, %s18499_s6, %s10062_s8, %s10062_s8, %s10063_s27  }
 0x6d6   : > { %s18500_s1 = sld [smem:[#allocation341_spill]]  ;;  %s7740_s10 = sshll.u32 %s13200_s5, 4  ;;  %s7741_s10 = int_to_ptr.vmem [resolvable:$true] %s7740_s10 }
 0x6d7   : > { %s7711_s11 = scalar_lea.sflag [#allocation3], %s13164_s7  ;;  %s9912_s12 = scalar_lea.vmem %s7741_s10, 128 }
 0x6d8   : > { %p9913_p2 = scmp.ne.s32.totalorder %s7741_s10, %s9912_s12  ;;  %s10064_s13 = smov [#allocation2]  }
 0x6d9   : > { %s9916_s14 = sshll.u32 %s10064_s13, 4  ;;  %s9917_s14 = int_to_ptr.vmem [resolvable:$false] %s9916_s14 }
 0x6da   : > { %p9914_p3 = pnand %p9913_p2, %p10239_p4  ;;  %s9918_s24 = scalar_lea.vmem %s9917_s14, 256 }
 0x6db   : > { %p9919_p6 = scmp.lt.s32.totalorder %s7741_s10, %s9917_s14  ;;  %p9920_p7 = scmp.lt.s32.totalorder %s9918_s24, %s9912_s12 }
 0x6dc   : > { %s16640_s22 = scalar_lea.hbm %s18500_s1, %s8179_s29  ;;  %p9915_p5 = pneg %p9914_p3 }
 0x6dd   : > { %p9921_p9 = por %p9920_p7, %p9919_p6 }
 0x6df   : > { %p9922_p10 = pnand %p9921_p9, %p9915_p5 }
 0x6e1   : > { %9925 = shalt.err (!%p9922_p10)
}
 0x6e2   : > { %s9926_s5 = scalar_lea.hbm %s16640_s22, 128  ;;  %s9930_s13 = scalar_lea.hbm %s18500_s1, 256 }
 0x6e3   : > { %p9927_p11 = scmp.ne.s32.totalorder %s16640_s22, %s9926_s5  ;;  %p9931_p0 = scmp.lt.u32.totalorder %s16640_s22, %s18500_s1 }
 0x6e4   : > { %p9932_p1 = scmp.lt.u32.totalorder %s9930_s13, %s9926_s5  ;;  %p9934_p3 = scmp.lt.u32.totalorder %s9926_s5, %s16640_s22 }
 0x6e5   : > { %p9928_p12 = pnand %p9927_p11, %p10239_p4 }
 0x6e6   : > { %p9933_p2 = por %p9932_p1, %p9931_p0 }
 0x6e7   : > { %p9929_p13 = pneg %p9928_p12 }
 0x6e8   : > { %p9935_p5 = por %p9934_p3, %p9933_p2 }
 0x6ea   : > { %p9936_p6 = pnand %p9935_p5, %p9929_p13 }
 0x6ec   : > { %9939 = shalt.err (!%p9936_p6)
}
 0x6ed   : > { %8714 = dma.vmem_to_hbm [thread:$0]  (%p10239_p4), %s7741_s10, 128, %s16640_s22, %s7711_s11   ;;  %vm4792_vm1 = vcmask 523264  }
 0x6ee   : > { %s18502_s12 = sshll.u32 %s13164_s7, 3  ;;  %s18503_s24 = sld [smem:[#allocation344_spill]] }
 0x6ef   : > { %s1040_s6 = scalar_lea.vmem [#allocation7], %s18502_s12  ;;  %s7726_s8 = scalar_lea.sflag [#allocation8], %s13164_s7 }
 0x6f0   : > { %4793 = vst.msk [vmem:[%s1040_s6] sm:$0xff] %vm4792_vm1, %v4787_v55  ;;  %s7787_s25 = sshll.u32 %s1040_s6, 4  ;;  %s10065_s27 = smov [#allocation7]   ;;  %s7788_s25 = int_to_ptr.vmem [resolvable:$true] %s7787_s25 }
 0x6f1   : > { %s9940_s13 = scalar_lea.vmem %s7788_s25, 128  ;;  %s9944_s10 = sshll.u32 %s10065_s27, 4  ;;  %s9945_s10 = int_to_ptr.vmem [resolvable:$false] %s9944_s10 }
 0x6f2   : > { %p9941_p7 = scmp.ne.s32.totalorder %s7788_s25, %s9940_s13  ;;  %s9946_s11 = scalar_lea.vmem %s9945_s10, 256 }
 0x6f3   : > { %p9947_p11 = scmp.lt.s32.totalorder %s7788_s25, %s9945_s10  ;;  %p9948_p12 = scmp.lt.s32.totalorder %s9946_s11, %s9940_s13 }
 0x6f4   : > { %s16669_s5 = scalar_lea.hbm %s18503_s24, %s8179_s29  ;;  %p9942_p9 = pnand %p9941_p7, %p10239_p4 }
 0x6f5   : > { %p9949_p13 = por %p9948_p12, %p9947_p11 }
 0x6f6   : > { %p9943_p10 = pneg %p9942_p9 }
 0x6f8   : > { %p9950_p0 = pnand %p9949_p13, %p9943_p10 }
 0x6fa   : > { %9953 = shalt.err (!%p9950_p0)
}
 0x6fb   : > { %s9954_s7 = scalar_lea.hbm %s16669_s5, 128  ;;  %s9958_s14 = scalar_lea.hbm %s18503_s24, 256 }
 0x6fc   : > { %p9955_p1 = scmp.ne.s32.totalorder %s16669_s5, %s9954_s7  ;;  %p9959_p5 = scmp.lt.u32.totalorder %s16669_s5, %s18503_s24 }
 0x6fd   : > { %p9960_p6 = scmp.lt.u32.totalorder %s9958_s14, %s9954_s7  ;;  %p9962_p9 = scmp.lt.u32.totalorder %s9954_s7, %s16669_s5 }
 0x6fe   : > { %p9956_p2 = pnand %p9955_p1, %p10239_p4 }
 0x6ff   : > { %p9961_p7 = por %p9960_p6, %p9959_p5 }
 0x700   : > { %p9957_p3 = pneg %p9956_p2 }
 0x701   : > { %p9963_p10 = por %p9962_p9, %p9961_p7 }
 0x703   : > { %p9964_p11 = pnand %p9963_p10, %p9957_p3 }
 0x705   : > { %9967 = shalt.err (!%p9964_p11)
}
 0x706   : > { %8717 = dma.vmem_to_hbm [thread:$0]  (%p10239_p4), %s7788_s25, 128, %s16669_s5, %s7726_s8   ;;  %v7646_v63 = vpop.f32.mrb[80].mxu0 }
 0x707   : > { %v7647_v27 = vadd.f32 %v7646_v63, %v16573_v60  ;;  %v7648_v5 = vpop.f32.mrb[81].mxu0  ;;  %s8186_s9 = sshll.u32 %s10046_s30, 10  ;;  %s7773_s0 = sshll.u32 %s16579_s4, 4  ;;  %s16708_s0 = int_to_ptr.vmem [resolvable:$true] %s7773_s0 }
 0x708   : > { %v7649_v48 = vadd.f32 %v7648_v5, %v16573_v60  ;;  %v7650_v12 = vpop.f32.mrb[82].mxu0  ;;  %s18504_s8 = sld [smem:[#allocation343_spill]]  ;;  %s9968_s30 = scalar_lea.vmem %s16708_s0, 1024 }
 0x709   : > { %v7698_v21 = vsel %vm10329_vm2, -inf, %v7647_v27  ;;  %v7651_v2 = vpop.f32.mrb[83].mxu0  ;;  %p9969_p12 = scmp.ne.s32.totalorder %s16708_s0, %s9968_s30  ;;  %s10066_s27 = smov [#allocation6]  }
 0x70a   : > { %7706 = vst [vmem:[%s16579_s4 + $0x20] sm:$0xff] %v7698_v21  ;;  %v7699_v25 = vsel %vm10329_vm2, -inf, %v7649_v48  ;;  %s9972_s10 = sshll.u32 %s10066_s27, 4  ;;  %s9973_s10 = int_to_ptr.vmem [resolvable:$false] %s9972_s10 }
 0x70b   : > { %7707 = vst [vmem:[%s16579_s4 + $0x28] sm:$0xff] %v7699_v25  ;;  %p9970_p13 = pnand %p9969_p12, %p10239_p4  ;;  %s9974_s11 = scalar_lea.vmem %s9973_s10, 2048 }
 0x70c   : > { %p9975_p1 = scmp.lt.s32.totalorder %s16708_s0, %s9973_s10  ;;  %p9976_p2 = scmp.lt.s32.totalorder %s9974_s11, %s9968_s30 }
 0x70d   : > { %p9971_p0 = pneg %p9970_p13 }
 0x70e   : > { %s16706_s13 = scalar_lea.hbm %s18504_s8, %s8186_s9  ;;  %p9977_p3 = por %p9976_p2, %p9975_p1 }
 0x710   : > { %p9978_p5 = pnand %p9977_p3, %p9971_p0 }
 0x741   : > { %v7687_v45 = vpop.f32.mrb[84].mxu0 }
 0x742   : > { %v7688_v59 = vadd.f32 %v7687_v45, %v16573_v60  ;;  %v7689_v1 = vpop.f32.mrb[85].mxu0 }
 0x743   : > { %v7690_v46 = vadd.f32 %v7689_v1, %v16573_v60  ;;  %v7691_v20 = vpop.f32.mrb[86].mxu0 }
 0x744   : > { %v7700_v9 = vsel %vm10329_vm2, -inf, %v7688_v59  ;;  %v7692_v36 = vpop.f32.mrb[87].mxu0 }
 0x745   : > { %7708 = vst [vmem:[%s16579_s4 + $0x30] sm:$0xff] %v7700_v9  ;;  %v7701_v6 = vsel %vm10329_vm2, -inf, %v7690_v46 }
 0x746   : > { %7709 = vst [vmem:[%s16579_s4 + $0x38] sm:$0xff] %v7701_v6 }
 0x747   : > { %9981 = shalt.err (!%p9978_p5)
}
 0x748   : > { %s9982_s4 = scalar_lea.hbm %s16706_s13, 1024  ;;  %s9986_s22 = scalar_lea.hbm %s18504_s8, 2048 }
 0x749   : > { %p9983_p6 = scmp.ne.s32.totalorder %s16706_s13, %s9982_s4  ;;  %p9987_p10 = scmp.lt.u32.totalorder %s16706_s13, %s18504_s8 }
 0x74a   : > { %p9988_p11 = scmp.lt.u32.totalorder %s9986_s22, %s9982_s4  ;;  %p9990_p13 = scmp.lt.u32.totalorder %s9982_s4, %s16706_s13 }
 0x74b   : > { %p9984_p7 = pnand %p9983_p6, %p10239_p4 }
 0x74c   : > { %p9989_p12 = por %p9988_p11, %p9987_p10 }
 0x74d   : > { %p9985_p9 = pneg %p9984_p7 }
 0x74e   : > { %p9991_p0 = por %p9990_p13, %p9989_p12 }
 0x750   : > { %p9992_p1 = pnand %p9991_p0, %p9985_p9 }
 0x752   : > { %9995 = shalt.err (!%p9992_p1)
}
 0x753   : > { %s18505_s6 = scalar_lea.sflag [#allocation5], %s16598_s23 }
 0x754   : > { %8716 = dma.vmem_to_hbm [thread:$0]  (%p10239_p4), %s16708_s0, 1024, %s16706_s13, %s18505_s6  }
 0x755 PF: > { %s18506_s9 = sld [smem:[#allocation12_spill]]  ;;  %p8735_p2 = scmp.ge.s32.totalorder %s10054_s3, 2 }
 0x757   : > { %p8723_p3 = pnand %p8735_p2, %p10248_p8 }
 0x75b   : > { %s7799_s25 = sand.u32 1, %s18506_s9  }
 0x75c   : > { %s7800_s30 = scalar_lea.sflag [#allocation3], %s7799_s25 }
 0x75d   : > { %10021 = dma.done.wait (!%p8723_p3), %s7800_s30, 128  }
 0x75e   : > { %10023 = vsyncadd (!%p8723_p3), %s7800_s30, 4294967168  ;;  %s18508_s27 = sadd.s32 4294967294, %s10054_s3  }
 0x75f   : > { %s7808_s10 = sand.u32 1, %s18508_s27  }
 0x760   : > { %s7809_s26 = scalar_lea.sflag [#allocation5], %s7808_s10 }
 0x761   : > { %10025 = dma.done.wait (!%p8723_p3), %s7809_s26, 1408  }
 0x762   : > { %10027 = vsyncadd (!%p8723_p3), %s7809_s26, 4294965888  ;;  %s7827_s23 = scalar_lea.sflag [#allocation8], %s7799_s25 }
 0x763   : > { %10029 = dma.done.wait (!%p8723_p3), %s7827_s23, 128  }
 0x764   : > { %10031 = vsyncadd (!%p8723_p3), %s7827_s23, 4294967168  ;;  %s45_s3 = sadd.s32 1, %s10054_s3   ;;  %s18509_s0 = sld [smem:[#allocation13_spill]] }
 0x765   : > { %p42_p4 = scmp.ge.s32.totalorder %s45_s3, 4   ;;  %s18510_s6 = sld [smem:[#allocation18_spill]] }
 0x766   : > { %s18511_s30 = sld [smem:[#allocation14_spill]]  ;;  %s18512_s7 = sld [smem:[#allocation15_spill]] }
 0x767   : > { %s18513_s29 = smov %s10038_s2  ;;  %44 = sbr.rel (!%p42_p4) target bundleno = 28 (0x1c), region = 239 }
 0x76a   : > { %s18514_s2 = smov %s18509_s0 }
 0x76e   :  { %7832 = vsyncpa [#allocation3], 1 }
 0x76f   :  { %7834 = vsyncpa [#allocation3 + $0x1], 1 }
 0x770   :  { %7835 = vsyncpa [#allocation5], 1 }
 0x771   :  { %7837 = vsyncpa [#allocation5 + $0x1], 1 }
 0x772   :  { %7838 = vsyncpa [#allocation8], 1 }
 0x773   :  { %7840 = vsyncpa [#allocation8 + $0x1], 1 }

</bundles_post_ra>
